<compile_context>
chip_gen: v5e
topology: v5e:2x2
jax: 0.10.0
libtpu: 0.0.40
codegen_flags: <defaults>
</compile_context>

<pallas_src>
import math

import jax
import jax.numpy as jnp
from jax.experimental import pallas as pl
from jax.experimental.pallas import tpu as pltpu


# ------------------------------ fused MLP kernel ----------------------------- #
def _mlp_kernel(x_ref, w1_ref, b1_ref, w2_ref, b2_ref, o_ref):
    # Layer 1: Linear(2R -> 4R) + bias + ReLU.  bf16 operands, f32 MXU accumulate.
    x = x_ref[...].astype(jnp.bfloat16)
    h = jnp.dot(x, w1_ref[...], preferred_element_type=jnp.float32) + b1_ref[...]
    h = jnp.maximum(h, 0.0)
    # nn.Dropout(p=0.3): identity in inference/eval mode.
    # TODO(synk): training-mode dropout (pltpu.prng_seed + stateful_bernoulli, scale 1/(1-p)).
    h = h.astype(jnp.bfloat16)          # keep the 2nd matmul on the fast bf16 MXU path
    # Layer 2: Linear(4R -> R) + bias.
    o = jnp.dot(h, w2_ref[...], preferred_element_type=jnp.float32) + b2_ref[...]
    o_ref[...] = o.astype(o_ref.dtype)


def _tpu_info():
    """(VMEM capacity bytes, has-two-TensorCores) with safe fallbacks."""
    try:
        vmem_cap = int(pltpu.get_tpu_info().vmem_capacity_bytes)
    except Exception:
        vmem_cap = 64 << 20                      # conservative (v7x-sized) fallback
    try:
        kind = jax.devices()[0].device_kind.lower()
    except Exception:
        kind = ""
    two_cores = "7" in kind                      # v7x: 2 TensorCores per chip
    return vmem_cap, two_cores


def current_state_encoder(x, params):
    """x: (batch, 2*repr_dim) -> (batch, repr_dim). Single fused pallas_call."""
    w1 = params["w1"].astype(jnp.bfloat16)       # no-op if params already stored bf16
    w2 = params["w2"].astype(jnp.bfloat16)
    b1 = params["b1"].astype(jnp.float32)
    b2 = params["b2"].astype(jnp.float32)

    M, Din = x.shape
    Dh = w1.shape[1]
    Dout = w2.shape[1]

    vmem_cap, two_cores = _tpu_info()

    # Row-tile selection (generation aware).
    if M <= 256:
        tm = M                                   # one block: tiny-batch regime is weight-DMA bound
    elif two_cores:
        tm = 128 if M < 512 else 256             # >= 2 "parallel" steps so both v7x TCs get work
    else:
        tm = 512                                 # v5e/v6e: single TC, fewer/larger tiles win
    grid = (pl.cdiv(M, tm),)                     # partial last block is padded by Pallas

    # Scoped-VMEM budget: double-buffered weights/biases + double-buffered x/out
    # row tiles + the in-kernel hidden intermediate (f32 accumulate + bf16 copy).
    w_bytes = (w1.size + w2.size) * 2 + (b1.size + b2.size) * 4
    act_bytes = 2 * tm * (Din + Dout) * x.dtype.itemsize
    hid_bytes = tm * Dh * (4 + 2)
    needed = 2 * w_bytes + act_bytes + hid_bytes
    vmem_bytes = int(min(max(needed + (8 << 20), 32 << 20), vmem_cap - (12 << 20)))

    flops = 2 * M * (Din * Dh + Dh * Dout)
    bytes_accessed = int(w_bytes + x.size * x.dtype.itemsize + M * Dout * x.dtype.itemsize)

    return pl.pallas_call(
        _mlp_kernel,
        out_shape=jax.ShapeDtypeStruct((M, Dout), x.dtype),
        grid=grid,
        in_specs=[
            pl.BlockSpec((tm, Din), lambda i: (i, 0)),    # x row tile
            pl.BlockSpec((Din, Dh), lambda i: (0, 0)),    # w1 (bf16, VMEM resident)
            pl.BlockSpec((1, Dh), lambda i: (0, 0)),      # b1 (f32)
            pl.BlockSpec((Dh, Dout), lambda i: (0, 0)),   # w2 (bf16, VMEM resident)
            pl.BlockSpec((1, Dout), lambda i: (0, 0)),    # b2 (f32)
        ],
        out_specs=pl.BlockSpec((tm, Dout), lambda i: (i, 0)),
        compiler_params=pltpu.CompilerParams(
            dimension_semantics=("parallel",),
            vmem_limit_bytes=vmem_bytes,
        ),
        cost_estimate=pl.CostEstimate(
            flops=flops, transcendentals=0, bytes_accessed=bytes_accessed),
    )(x, w1, b1, w2, b2)


# ---------------------------- deterministic init ----------------------------- #
def init_params(key, repr_dim=512):
    """nn.Linear-style init U(-1/sqrt(fan_in), 1/sqrt(fan_in)); weights stored bf16."""
    din, dh, dout = repr_dim * 2, repr_dim * 4, repr_dim
    k1, k2, k3, k4 = jax.random.split(key, 4)

    def linear(kw, kb, fan_in, fan_out):
        bound = 1.0 / math.sqrt(fan_in)
        w = jax.random.uniform(kw, (fan_in, fan_out), jnp.float32, -bound, bound)
        b = jax.random.uniform(kb, (1, fan_out), jnp.float32, -bound, bound)
        return w.astype(jnp.bfloat16), b          # stream weights bf16; biases stay f32

    w1, b1 = linear(k1, k2, din, dh)
    w2, b2 = linear(k3, k4, dh, dout)
    return {"w1": w1, "b1": b1, "w2": w2, "b2": b2}


if __name__ == "__main__":
    key = jax.random.PRNGKey(0)
    k_x, k_p = jax.random.split(key)

    repr_dim = 512                       # module default
    batch = 2                            # small test batch
    x = jax.random.normal(k_x, (batch, repr_dim * 2), dtype=jnp.float32)
    params = init_params(k_p, repr_dim)

    fwd = jax.jit(current_state_encoder)
    out = fwd(x, params)
    jax.block_until_ready(out)
    assert out.shape == (batch, repr_dim), out.shape

    # Pure-JAX reference (inference-mode dropout == identity); weights upcast to f32.
    w1f = params["w1"].astype(jnp.float32)
    w2f = params["w2"].astype(jnp.float32)
    ref = jnp.maximum(x @ w1f + params["b1"], 0.0) @ w2f + params["b2"]
    err = float(jnp.max(jnp.abs(out - ref)))
    assert jnp.allclose(out, ref, atol=5e-2, rtol=5e-2), err

    print("KERNEL_OK")
</pallas_src>

<mosaic_0001>
module attributes {stable_mosaic.version = 11 : i64} {
  func.func @_mlp_kernel(%arg0: i32, %arg1: memref<2x1024xf32, #tpu.memory_space<vmem>>, %arg2: memref<1024x2048xbf16, #tpu.memory_space<vmem>>, %arg3: memref<1x2048xf32, #tpu.memory_space<vmem>>, %arg4: memref<2048x512xbf16, #tpu.memory_space<vmem>>, %arg5: memref<1x512xf32, #tpu.memory_space<vmem>>, %arg6: memref<2x512xf32, #tpu.memory_space<vmem>>) attributes {dimension_semantics = [#tpu.dimension_semantics<parallel>], iteration_bounds = array<i64: 1>, scalar_prefetch = 0 : i64, scratch_operands = 0 : i64, tpu.core_type = #tpu.core_type<tc>, window_params = [{transform_indices = @transform_0, window_bounds = array<i64: 2, 1024>}, {pipeline_mode = #tpu.pipeline_mode<synchronous>, transform_indices = @transform_1, window_bounds = array<i64: 1024, 2048>}, {pipeline_mode = #tpu.pipeline_mode<synchronous>, transform_indices = @transform_2, window_bounds = array<i64: 1, 2048>}, {pipeline_mode = #tpu.pipeline_mode<synchronous>, transform_indices = @transform_3, window_bounds = array<i64: 2048, 512>}, {pipeline_mode = #tpu.pipeline_mode<synchronous>, transform_indices = @transform_4, window_bounds = array<i64: 1, 512>}, {transform_indices = @transform_5, window_bounds = array<i64: 2, 512>}]} {
    %c0 = arith.constant 0 : index
    %c0_0 = arith.constant 0 : index
    %0 = vector.load %arg1[%c0, %c0_0] : memref<2x1024xf32, #tpu.memory_space<vmem>>, vector<2x1024xf32>
    %1 = arith.truncf %0 : vector<2x1024xf32> to vector<2x1024xbf16>
    %c0_1 = arith.constant 0 : index
    %c0_2 = arith.constant 0 : index
    %2 = vector.load %arg2[%c0_1, %c0_2] : memref<1024x2048xbf16, #tpu.memory_space<vmem>>, vector<1024x2048xbf16>
    %cst = arith.constant dense<0.000000e+00> : vector<2x2048xf32>
    %3 = tpu.matmul %1, %2, %cst {dimension_numbers = #tpu.dot_dimension_numbers<[1], [0], [0], [1], [0, 0, 1, 1], [], []>} : vector<2x1024xbf16>, vector<1024x2048xbf16>, vector<2x2048xf32> -> vector<2x2048xf32>
    %c0_3 = arith.constant 0 : index
    %c0_4 = arith.constant 0 : index
    %4 = vector.load %arg3[%c0_3, %c0_4] : memref<1x2048xf32, #tpu.memory_space<vmem>>, vector<1x2048xf32>
    %5 = vector.broadcast %4 : vector<1x2048xf32> to vector<2x2048xf32>
    %6 = arith.addf %3, %5 : vector<2x2048xf32>
    %cst_5 = arith.constant 0.000000e+00 : f32
    %7 = vector.broadcast %cst_5 : f32 to vector<2x2048xf32>
    %8 = arith.maximumf %6, %7 : vector<2x2048xf32>
    %9 = arith.truncf %8 : vector<2x2048xf32> to vector<2x2048xbf16>
    %c0_6 = arith.constant 0 : index
    %c0_7 = arith.constant 0 : index
    %10 = vector.load %arg4[%c0_6, %c0_7] : memref<2048x512xbf16, #tpu.memory_space<vmem>>, vector<2048x512xbf16>
    %cst_8 = arith.constant dense<0.000000e+00> : vector<2x512xf32>
    %11 = tpu.matmul %9, %10, %cst_8 {dimension_numbers = #tpu.dot_dimension_numbers<[1], [0], [0], [1], [0, 0, 1, 1], [], []>} : vector<2x2048xbf16>, vector<2048x512xbf16>, vector<2x512xf32> -> vector<2x512xf32>
    %c0_9 = arith.constant 0 : index
    %c0_10 = arith.constant 0 : index
    %12 = vector.load %arg5[%c0_9, %c0_10] : memref<1x512xf32, #tpu.memory_space<vmem>>, vector<1x512xf32>
    %13 = vector.broadcast %12 : vector<1x512xf32> to vector<2x512xf32>
    %14 = arith.addf %11, %13 : vector<2x512xf32>
    %c0_11 = arith.constant 0 : index
    %c0_12 = arith.constant 0 : index
    %15 = vector.load %arg6[%c0_11, %c0_12] : memref<2x512xf32, #tpu.memory_space<vmem>>, vector<2x512xf32>
    tpu.vector_store %arg6[%c0_11, %c0_12], %14 {strides = array<i32>} : memref<2x512xf32, #tpu.memory_space<vmem>>, vector<2x512xf32>,
    return
  }
  func.func @transform_0(%arg0: i32) -> (i32, i32) {
    %c0_i32 = arith.constant 0 : i32
    %c0_i32_0 = arith.constant 0 : i32
    return %arg0, %c0_i32 : i32, i32
  }
  func.func @transform_1(%arg0: i32) -> (i32, i32) {
    %c0_i32 = arith.constant 0 : i32
    %c0_i32_0 = arith.constant 0 : i32
    %c0_i32_1 = arith.constant 0 : i32
    return %c0_i32, %c0_i32_0 : i32, i32
  }
  func.func @transform_2(%arg0: i32) -> (i32, i32) {
    %c0_i32 = arith.constant 0 : i32
    %c0_i32_0 = arith.constant 0 : i32
    %c0_i32_1 = arith.constant 0 : i32
    return %c0_i32, %c0_i32_0 : i32, i32
  }
  func.func @transform_3(%arg0: i32) -> (i32, i32) {
    %c0_i32 = arith.constant 0 : i32
    %c0_i32_0 = arith.constant 0 : i32
    %c0_i32_1 = arith.constant 0 : i32
    return %c0_i32, %c0_i32_0 : i32, i32
  }
  func.func @transform_4(%arg0: i32) -> (i32, i32) {
    %c0_i32 = arith.constant 0 : i32
    %c0_i32_0 = arith.constant 0 : i32
    %c0_i32_1 = arith.constant 0 : i32
    return %c0_i32, %c0_i32_0 : i32, i32
  }
  func.func @transform_5(%arg0: i32) -> (i32, i32) {
    %c0_i32 = arith.constant 0 : i32
    %c0_i32_0 = arith.constant 0 : i32
    return %arg0, %c0_i32 : i32, i32
  }
}

</mosaic_0001>

<bundles_post_ra>
// kernel: current_state_encoder.1
= control target key start
LH: loop header
LB: loop body
LE: loop exit
PB: predicated region body
PF: predicated region fallthrough
CT: control target
= control target key end

     0   :  { %10 = vsyncpa [#allocation3], 0  ;;  %s20274_s0 = inlined_call_operand.hbm [shape: f32[2,1024], index: 0, kind: input, shape index: {}]   ;;  %s20275_s1 = inlined_call_operand.hbm [shape: bf16[1024,2048], index: 1, kind: input, shape index: {}]   ;;  %s20276_s2 = inlined_call_operand.hbm [shape: f32[1,2048], index: 2, kind: input, shape index: {}]   ;;  %s20277_s3 = inlined_call_operand.hbm [shape: bf16[2048,512], index: 3, kind: input, shape index: {}]   ;;  %s20278_s4 = inlined_call_operand.hbm [shape: f32[1,512], index: 4, kind: input, shape index: {}]   ;;  %s20279_s5 = inlined_call_operand.hbm [shape: f32[2,512], index: 5, kind: output, shape index: {}]  }
   0x1   :  { %11 = vsyncpa [#allocation6], 0 }
   0x2   :  { %12 = vsyncpa [#allocation9], 0  ;;  %s29_s20 = sshll.u32 %s20275_s1, 4  ;;  %s30_s20 = int_to_ptr.hbm [resolvable:$true] %s29_s20 }
   0x3   :  { %13 = vsyncpa [#allocation4], 0  ;;  %s19798_s21 = smov [#allocation5]   ;;  %s53_s25 = sshll.u32 %s20277_s3, 4  ;;  %s54_s25 = int_to_ptr.hbm [resolvable:$true] %s53_s25 }
   0x4   :  { %s31_s22 = sshll.u32 %s19798_s21, 4  ;;  %s19799_s26 = smov 1024   ;;  %s32_s22 = int_to_ptr.vmem [resolvable:$true] %s31_s22 }
   0x5   :  { %s19800_s27 = smov 64   ;;  %s19801_s28 = smov [#allocation8]  }
   0x6   :  { %37 = dma.hbm_to_vmem [thread:$0]  %s30_s20, 131072, %s32_s22, [#allocation6], %s19799_s26, %s19799_s26, %s19800_s27  }
   0x7   :  { %s55_s29 = sshll.u32 %s19801_s28, 4  ;;  %s19802_s30 = smov 256   ;;  %s56_s29 = int_to_ptr.vmem [resolvable:$true] %s55_s29 }
   0x8   :  { %s19803_s6 = smov 16   ;;  %s19_s8 = sshll.u32 %s20274_s0, 4  ;;  %s20_s8 = int_to_ptr.hbm [resolvable:$true] %s19_s8 }
   0x9   :  { %61 = dma.hbm_to_vmem [thread:$0]  %s54_s25, 65536, %s56_s29, [#allocation9], %s19802_s30, %s19802_s30, %s19803_s6  }
   0xa   :  { %s19804_s9 = smov [#allocation2]   ;;  %s43_s12 = sshll.u32 %s20276_s2, 4  ;;  %s44_s12 = int_to_ptr.hbm [resolvable:$true] %s43_s12 }
   0xb   :  { %s21_s10 = sshll.u32 %s19804_s9, 4  ;;  %s19805_s13 = smov [#allocation7]   ;;  %s22_s10 = int_to_ptr.vmem [resolvable:$true] %s21_s10 }
   0xc   :  { %24 = dma.hbm_to_vmem [thread:$0]  %s20_s8, 256, %s22_s10, [#allocation3]  }
   0xd   :  { %s45_s14 = sshll.u32 %s19805_s13, 4  ;;  %s67_s17 = sshll.u32 %s20278_s4, 4  ;;  %s46_s14 = int_to_ptr.vmem [resolvable:$true] %s45_s14  ;;  %s68_s17 = int_to_ptr.hbm [resolvable:$true] %s67_s17 }
   0xe   :  { %48 = dma.hbm_to_vmem [thread:$0]  %s44_s12, 256, %s46_s14, [#allocation6]  }
   0xf   :  { %s19806_s0 = smov [#allocation10]  }
  0x10   :  { %s69_s18 = sshll.u32 %s19806_s0, 4  ;;  %s70_s18 = int_to_ptr.vmem [resolvable:$true] %s69_s18 }
  0x11   :  { %72 = dma.hbm_to_vmem [thread:$0]  %s68_s17, 64, %s70_s18, [#allocation9]  }
  0x12   :  { %19790 = dma.done.wait [#allocation3], 256  }
  0x13   :  { %19791 = vsyncadd [#allocation3], 4294967040 }
  0x14   :  { %19792 = dma.done.wait [#allocation6], 131328  }
  0x15   :  { %19793 = vsyncadd [#allocation6], 4294835968 }
  0x16   :  { %19794 = dma.done.wait [#allocation9], 65600  }
  0x17   :  { %19795 = vsyncadd [#allocation9], 4294901696  ;;  %v12398_v0 = vld [vmem:[#allocation5 + $0x380] sm:$0xf]  ;;  %vm11921_vm0 = vcmask 1041408   ;;  %vm11923_vm1 = vcmask 1045508  }
  0x18   :  { %v18212_v1 = vld [vmem:[#allocation5 + $0x3bc] sm:$0xf0]  ;;  %s19807_s2 = smov [#allocation11]   ;;  %s11936_s21 = sshll.u32 %s20279_s5, 4  ;;  %vm11925_vm2 = vcmask 1043456   ;;  %s11937_s21 = int_to_ptr.hbm [resolvable:$true] %s11936_s21 }
  0x19   :  { %v12910_v2 = vld [vmem:[#allocation5 + $0x780] sm:$0xf]  ;;  %v12399_v3 = vor.u32 %v18212_v1, %v12398_v0  ;;  %s11934_s4 = sshll.u32 %s19807_s2, 4  ;;  %s11935_s4 = int_to_ptr.vmem [resolvable:$true] %s11934_s4 }
  0x1a   :  { %v18340_v4 = vld [vmem:[#allocation5 + $0x7bc] sm:$0xf0] }
  0x1b   :  { %v13422_v5 = vld [vmem:[#allocation5 + $0xb80] sm:$0xf]  ;;  %v12911_v7 = vor.u32 %v18340_v4, %v12910_v2  ;;  %6304 = vmatpush.bf16.msra.mxu0 %v12399_v3 }
  0x1c   :  { %v18468_v6 = vld [vmem:[#allocation5 + $0xbbc] sm:$0xf0] }
  0x1d   :  { %v13423_v8 = vor.u32 %v18468_v6, %v13422_v5  ;;  %v13934_v9 = vld [vmem:[#allocation5 + $0xf80] sm:$0xf]  ;;  %6317 = vmatpush.bf16.msra.mxu1 %v12911_v7 }
  0x1e   :  { %v18596_v10 = vld [vmem:[#allocation5 + $0xfbc] sm:$0xf0] }
  0x1f   :  { %v12334_v11 = vld [vmem:[#allocation5 + $0x300] sm:$0xf]  ;;  %v13935_v12 = vor.u32 %v18596_v10, %v13934_v9  ;;  %6330 = vmatpush.bf16.msra.mxu2 %v13423_v8 }
  0x20   :  { %v18196_v13 = vld [vmem:[#allocation5 + $0x33c] sm:$0xf0] }
  0x21   :  { %v12846_v14 = vld [vmem:[#allocation5 + $0x700] sm:$0xf]  ;;  %v12335_v16 = vor.u32 %v18196_v13, %v12334_v11  ;;  %6343 = vmatpush.bf16.msra.mxu3 %v13935_v12 }
  0x22   :  { %v18324_v15 = vld [vmem:[#allocation5 + $0x73c] sm:$0xf0] }
  0x23   :  { %v12847_v17 = vor.u32 %v18324_v15, %v12846_v14  ;;  %v13358_v18 = vld [vmem:[#allocation5 + $0xb00] sm:$0xf]  ;;  %6305 = vmatpush.bf16.msra.mxu0 %v12335_v16 }
  0x24   :  { %v18452_v19 = vld [vmem:[#allocation5 + $0xb3c] sm:$0xf0] }
  0x25   :  { %v13870_v20 = vld [vmem:[#allocation5 + $0xf00] sm:$0xf]  ;;  %v13359_v21 = vor.u32 %v18452_v19, %v13358_v18  ;;  %6318 = vmatpush.bf16.msra.mxu1 %v12847_v17 }
  0x26   :  { %v18580_v22 = vld [vmem:[#allocation5 + $0xf3c] sm:$0xf0] }
  0x27   :  { %v12270_v23 = vld [vmem:[#allocation5 + $0x280] sm:$0xf]  ;;  %v13871_v25 = vor.u32 %v18580_v22, %v13870_v20  ;;  %6331 = vmatpush.bf16.msra.mxu2 %v13359_v21 }
  0x28   :  { %v18180_v24 = vld [vmem:[#allocation5 + $0x2bc] sm:$0xf0] }
  0x29   :  { %v12782_v26 = vld [vmem:[#allocation5 + $0x680] sm:$0xf]  ;;  %v12271_v29 = vor.u32 %v18180_v24, %v12270_v23  ;;  %6344 = vmatpush.bf16.msra.mxu3 %v13871_v25 }
  0x2a   :  { %v18308_v27 = vld [vmem:[#allocation5 + $0x6bc] sm:$0xf0] }
  0x2b   :  { %v13294_v28 = vld [vmem:[#allocation5 + $0xa80] sm:$0xf]  ;;  %v12783_v33 = vor.u32 %v18308_v27, %v12782_v26  ;;  %6306 = vmatpush.bf16.msra.mxu0 %v12271_v29 }
  0x2c   :  { %v18436_v30 = vld [vmem:[#allocation5 + $0xabc] sm:$0xf0] }
  0x2d   :  { %v13806_v31 = vld [vmem:[#allocation5 + $0xe80] sm:$0xf]  ;;  %v13295_v34 = vor.u32 %v18436_v30, %v13294_v28  ;;  %6319 = vmatpush.bf16.msra.mxu1 %v12783_v33 }
  0x2e   :  { %v18564_v32 = vld [vmem:[#allocation5 + $0xebc] sm:$0xf0] }
  0x2f   :  { %v12206_v35 = vld [vmem:[#allocation5 + $0x200] sm:$0xf]  ;;  %v13807_v38 = vor.u32 %v18564_v32, %v13806_v31  ;;  %6332 = vmatpush.bf16.msra.mxu2 %v13295_v34 }
  0x30   :  { %v18164_v36 = vld [vmem:[#allocation5 + $0x23c] sm:$0xf0] }
  0x31   :  { %v12718_v37 = vld [vmem:[#allocation5 + $0x600] sm:$0xf]  ;;  %v12207_v44 = vor.u32 %v18164_v36, %v12206_v35  ;;  %6345 = vmatpush.bf16.msra.mxu3 %v13807_v38 }
  0x32   :  { %v18292_v39 = vld [vmem:[#allocation5 + $0x63c] sm:$0xf0] }
  0x33   :  { %v13230_v40 = vld [vmem:[#allocation5 + $0xa00] sm:$0xf]  ;;  %v12719_v45 = vor.u32 %v18292_v39, %v12718_v37  ;;  %6307 = vmatpush.bf16.msra.mxu0 %v12207_v44 }
  0x34   :  { %v18420_v41 = vld [vmem:[#allocation5 + $0xa3c] sm:$0xf0] }
  0x35   :  { %v13742_v42 = vld [vmem:[#allocation5 + $0xe00] sm:$0xf]  ;;  %v13231_v46 = vor.u32 %v18420_v41, %v13230_v40  ;;  %6320 = vmatpush.bf16.msra.mxu1 %v12719_v45 }
  0x36   :  { %v18548_v43 = vld [vmem:[#allocation5 + $0xe3c] sm:$0xf0] }
  0x37   :  { %v12142_v47 = vld [vmem:[#allocation5 + $0x180] sm:$0xf]  ;;  %v13743_v50 = vor.u32 %v18548_v43, %v13742_v42  ;;  %6333 = vmatpush.bf16.msra.mxu2 %v13231_v46 }
  0x38   :  { %v18148_v48 = vld [vmem:[#allocation5 + $0x1bc] sm:$0xf0] }
  0x39   :  { %v12654_v49 = vld [vmem:[#allocation5 + $0x580] sm:$0xf]  ;;  %v12143_v56 = vor.u32 %v18148_v48, %v12142_v47  ;;  %6346 = vmatpush.bf16.msra.mxu3 %v13743_v50 }
  0x3a   :  { %v18276_v51 = vld [vmem:[#allocation5 + $0x5bc] sm:$0xf0] }
  0x3b   :  { %v13166_v52 = vld [vmem:[#allocation5 + $0x980] sm:$0xf]  ;;  %v12655_v57 = vor.u32 %v18276_v51, %v12654_v49  ;;  %6308 = vmatpush.bf16.msra.mxu0 %v12143_v56 }
  0x3c   :  { %v18404_v53 = vld [vmem:[#allocation5 + $0x9bc] sm:$0xf0] }
  0x3d   :  { %v13678_v54 = vld [vmem:[#allocation5 + $0xd80] sm:$0xf]  ;;  %v13167_v58 = vor.u32 %v18404_v53, %v13166_v52  ;;  %6321 = vmatpush.bf16.msra.mxu1 %v12655_v57 }
  0x3e   :  { %v18532_v55 = vld [vmem:[#allocation5 + $0xdbc] sm:$0xf0] }
  0x3f   :  { %v12078_v59 = vld [vmem:[#allocation5 + $0x100] sm:$0xf]  ;;  %v13679_v62 = vor.u32 %v18532_v55, %v13678_v54  ;;  %6334 = vmatpush.bf16.msra.mxu2 %v13167_v58 }
  0x40   :  { %v18132_v60 = vld [vmem:[#allocation5 + $0x13c] sm:$0xf0] }
  0x41   :  { %v12590_v61 = vld [vmem:[#allocation5 + $0x500] sm:$0xf]  ;;  %v12079_v4 = vor.u32 %v18132_v60, %v12078_v59  ;;  %6347 = vmatpush.bf16.msra.mxu3 %v13679_v62 }
  0x42   :  { %v18260_v63 = vld [vmem:[#allocation5 + $0x53c] sm:$0xf0] }
  0x43   :  { %v13102_v0 = vld [vmem:[#allocation5 + $0x900] sm:$0xf]  ;;  %v12591_v5 = vor.u32 %v18260_v63, %v12590_v61  ;;  %6309 = vmatpush.bf16.msra.mxu0 %v12079_v4 }
  0x44   :  { %v18388_v1 = vld [vmem:[#allocation5 + $0x93c] sm:$0xf0] }
  0x45   :  { %v13614_v2 = vld [vmem:[#allocation5 + $0xd00] sm:$0xf]  ;;  %v13103_v6 = vor.u32 %v18388_v1, %v13102_v0  ;;  %6322 = vmatpush.bf16.msra.mxu1 %v12591_v5 }
  0x46   :  { %v18516_v3 = vld [vmem:[#allocation5 + $0xd3c] sm:$0xf0] }
  0x47   :  { %v12014_v7 = vld [vmem:[#allocation5 + $0x80] sm:$0xf]  ;;  %v13615_v10 = vor.u32 %v18516_v3, %v13614_v2  ;;  %6335 = vmatpush.bf16.msra.mxu2 %v13103_v6  ;;  %v93_v2 = vld [vmem:[#allocation2] sm:$0xff] }
  0x48   :  { %v18116_v8 = vld [vmem:[#allocation5 + $0xbc] sm:$0xf0]  ;;  %97 = vst [vmem:[#allocation1] ss:$4 sm:$0xff] %v93_v2 }
  0x49   :  { %v12526_v9 = vld [vmem:[#allocation5 + $0x480] sm:$0xf]  ;;  %v12015_v16 = vor.u32 %v18116_v8, %v12014_v7  ;;  %6348 = vmatpush.bf16.msra.mxu3 %v13615_v10 }
  0x4a   :  { %v18244_v11 = vld [vmem:[#allocation5 + $0x4bc] sm:$0xf0] }
  0x4b   :  { %v13038_v12 = vld [vmem:[#allocation5 + $0x880] sm:$0xf]  ;;  %v12527_v19 = vor.u32 %v18244_v11, %v12526_v9  ;;  %6310 = vmatpush.bf16.msra.mxu0 %v12015_v16 }
  0x4c   :  { %v18372_v13 = vld [vmem:[#allocation5 + $0x8bc] sm:$0xf0] }
  0x4d   :  { %v13550_v14 = vld [vmem:[#allocation5 + $0xc80] sm:$0xf]  ;;  %v13039_v20 = vor.u32 %v18372_v13, %v13038_v12  ;;  %6323 = vmatpush.bf16.msra.mxu1 %v12527_v19 }
  0x4e   :  { %v18500_v15 = vld [vmem:[#allocation5 + $0xcbc] sm:$0xf0] }
  0x4f   :  { %v11950_v17 = vld [vmem:[#allocation5] sm:$0xf]  ;;  %v13551_v24 = vor.u32 %v18500_v15, %v13550_v14  ;;  %6336 = vmatpush.bf16.msra.mxu2 %v13039_v20 }
  0x50   :  { %v18100_v18 = vld [vmem:[#allocation5 + $0x3c] sm:$0xf0] }
  0x51   :  { %v12462_v21 = vld [vmem:[#allocation5 + $0x400] sm:$0xf]  ;;  %v11951_v31 = vor.u32 %v18100_v18, %v11950_v17  ;;  %6349 = vmatpush.bf16.msra.mxu3 %v13551_v24 }
  0x52   :  { %v18228_v22 = vld [vmem:[#allocation5 + $0x43c] sm:$0xf0] }
  0x53   :  { %v12974_v23 = vld [vmem:[#allocation5 + $0x800] sm:$0xf]  ;;  %v12463_v35 = vor.u32 %v18228_v22, %v12462_v21  ;;  %6311 = vmatpush.bf16.msra.mxu0 %v11951_v31  ;;  %v100_v31 = vld.sshfl [vmem:[#allocation1] sm:$0xff pattern:$0x73625140] }
  0x54   :  { %v18356_v25 = vld [vmem:[#allocation5 + $0x83c] sm:$0xf0] }
  0x55   :  { %v13486_v26 = vld [vmem:[#allocation5 + $0xc00] sm:$0xf]  ;;  %v12975_v36 = vor.u32 %v18356_v25, %v12974_v23  ;;  %6324 = vmatpush.bf16.msra.mxu1 %v12463_v35 }
  0x56   :  { %v18484_v27 = vld [vmem:[#allocation5 + $0xc3c] sm:$0xf0] }
  0x57   :  { %v14446_v28 = vld [vmem:[#allocation5 + $0x1380] sm:$0xf]  ;;  %v13487_v39 = vor.u32 %v18484_v27, %v13486_v26  ;;  %6337 = vmatpush.bf16.msra.mxu2 %v12975_v36  ;;  %v101_v36 = vld.sshfl [vmem:[#allocation1 + $0x8] sm:$0xff pattern:$0x73625140] }
  0x58   :  { %v18724_v29 = vld [vmem:[#allocation5 + $0x13bc] sm:$0xf0] }
  0x59   :  { %v14958_v30 = vld [vmem:[#allocation5 + $0x1780] sm:$0xf]  ;;  %v14447_v40 = vor.u32 %v18724_v29, %v14446_v28  ;;  %6350 = vmatpush.bf16.msra.mxu3 %v13487_v39 }
  0x5a   :  { %v18852_v32 = vld [vmem:[#allocation5 + $0x17bc] sm:$0xf0] }
  0x5b   :  { %v15470_v33 = vld [vmem:[#allocation5 + $0x1b80] sm:$0xf]  ;;  %v14959_v41 = vor.u32 %v18852_v32, %v14958_v30  ;;  %6356 = vmatpush.bf16.msrb.mxu0 %v14447_v40  ;;  %v102_v30 = vld.sshfl [vmem:[#allocation1 + $0x10] sm:$0xff pattern:$0x73625140] }
  0x5c   :  { %v18980_v34 = vld [vmem:[#allocation5 + $0x1bbc] sm:$0xf0] }
  0x5d   :  { %v15982_v37 = vld [vmem:[#allocation5 + $0x1f80] sm:$0xf]  ;;  %v15471_v42 = vor.u32 %v18980_v34, %v15470_v33  ;;  %6369 = vmatpush.bf16.msrb.mxu1 %v14959_v41  ;;  %v19853_v33 = vpack.c.bf16 %v102_v30, %v102_v30  ;;  %v19855_v34 = vpack.c.bf16 %v100_v31, %v100_v31  ;;  %v18444_v30 = vld [vmem:[#allocation5 + $0xb04] sm:$0xf] }
  0x5e   :  { %v19108_v38 = vld [vmem:[#allocation5 + $0x1fbc] sm:$0xf0]  ;;  %v13360_v31 = vld [vmem:[#allocation5 + $0xb40] sm:$0xf0] }
  0x5f   :  { %v14382_v43 = vld [vmem:[#allocation5 + $0x1300] sm:$0xf]  ;;  %v15983_v46 = vor.u32 %v19108_v38, %v15982_v37  ;;  %6382 = vmatpush.bf16.msrb.mxu2 %v15471_v42  ;;  %v19859_v42 = vpack.c.bf16 %v101_v36, %v101_v36  ;;  %6312 = vmatmul.bf16.vlgmr.msra.gmra.mxu0 %v19855_v34  ;;  %v13872_v36 = vld [vmem:[#allocation5 + $0xf40] sm:$0xf0] }
  0x60   :  { %v18708_v44 = vld [vmem:[#allocation5 + $0x133c] sm:$0xf0]  ;;  %6338 = vmatmul.bf16.vlgmr.msra.gmra.mxu2 %v19853_v33 }
  0x61   :  { %v14894_v45 = vld [vmem:[#allocation5 + $0x1700] sm:$0xf]  ;;  %v14383_v52 = vor.u32 %v18708_v44, %v14382_v43  ;;  %6395 = vmatpush.bf16.msrb.mxu3 %v15983_v46  ;;  %6325 = vmatmul.bf16.vlgmr.msra.gmra.mxu1 %v19859_v42 }
  0x62   :  { %v18836_v47 = vld [vmem:[#allocation5 + $0x173c] sm:$0xf0] }
  0x63   :  { %v15406_v48 = vld [vmem:[#allocation5 + $0x1b00] sm:$0xf]  ;;  %v14895_v53 = vor.u32 %v18836_v47, %v14894_v45  ;;  %6357 = vmatpush.bf16.msrb.mxu0 %v14383_v52  ;;  %v94_v52 = vld [vmem:[#allocation2 + $0x8] sm:$0xff] }
  0x64   :  { %v18964_v49 = vld [vmem:[#allocation5 + $0x1b3c] sm:$0xf0]  ;;  %99 = vst [vmem:[#allocation1 + $0x20] ss:$4 sm:$0xff] %v94_v52  ;;  %v18556_v52 = vld [vmem:[#allocation5 + $0xe84] sm:$0xf] }
  0x65   :  { %v15918_v50 = vld [vmem:[#allocation5 + $0x1f00] sm:$0xf]  ;;  %v15407_v54 = vor.u32 %v18964_v49, %v15406_v48  ;;  %6370 = vmatpush.bf16.msrb.mxu1 %v14895_v53 }
  0x66   :  { %v19092_v51 = vld [vmem:[#allocation5 + $0x1f3c] sm:$0xf0] }
  0x67   :  { %v14318_v55 = vld [vmem:[#allocation5 + $0x1280] sm:$0xf]  ;;  %v15919_v58 = vor.u32 %v19092_v51, %v15918_v50  ;;  %6383 = vmatpush.bf16.msrb.mxu2 %v15407_v54 }
  0x68   :  { %v18692_v56 = vld [vmem:[#allocation5 + $0x12bc] sm:$0xf0] }
  0x69   :  { %v14830_v57 = vld [vmem:[#allocation5 + $0x1680] sm:$0xf]  ;;  %v14319_v0 = vor.u32 %v18692_v56, %v14318_v55  ;;  %6396 = vmatpush.bf16.msrb.mxu3 %v15919_v58 }
  0x6a   :  { %v18820_v59 = vld [vmem:[#allocation5 + $0x16bc] sm:$0xf0] }
  0x6b   :  { %v15342_v60 = vld [vmem:[#allocation5 + $0x1a80] sm:$0xf]  ;;  %v14831_v3 = vor.u32 %v18820_v59, %v14830_v57  ;;  %6358 = vmatpush.bf16.msrb.mxu0 %v14319_v0 }
  0x6c   :  { %v18948_v61 = vld [vmem:[#allocation5 + $0x1abc] sm:$0xf0] }
  0x6d   :  { %v15854_v62 = vld [vmem:[#allocation5 + $0x1e80] sm:$0xf]  ;;  %v15343_v4 = vor.u32 %v18948_v61, %v15342_v60  ;;  %6371 = vmatpush.bf16.msrb.mxu1 %v14831_v3 }
  0x6e   :  { %v19076_v63 = vld [vmem:[#allocation5 + $0x1ebc] sm:$0xf0] }
  0x6f   :  { %v14254_v1 = vld [vmem:[#allocation5 + $0x1200] sm:$0xf]  ;;  %v15855_v7 = vor.u32 %v19076_v63, %v15854_v62  ;;  %6384 = vmatpush.bf16.msrb.mxu2 %v15343_v4 }
  0x70   :  { %v18676_v5 = vld [vmem:[#allocation5 + $0x123c] sm:$0xf0] }
  0x71   :  { %v14766_v6 = vld [vmem:[#allocation5 + $0x1600] sm:$0xf]  ;;  %v14255_v13 = vor.u32 %v18676_v5, %v14254_v1  ;;  %6397 = vmatpush.bf16.msrb.mxu3 %v15855_v7  ;;  %v12400_v7 = vld [vmem:[#allocation5 + $0x3c0] sm:$0xf0] }
  0x72   :  { %v18804_v8 = vld [vmem:[#allocation5 + $0x163c] sm:$0xf0] }
  0x73   :  { %v15278_v9 = vld [vmem:[#allocation5 + $0x1a00] sm:$0xf]  ;;  %v14767_v15 = vor.u32 %v18804_v8, %v14766_v6  ;;  %6359 = vmatpush.bf16.msrb.mxu0 %v14255_v13  ;;  %v18204_v6 = vld [vmem:[#allocation5 + $0x384] sm:$0xf] }
  0x74   :  { %v18932_v10 = vld [vmem:[#allocation5 + $0x1a3c] sm:$0xf0]  ;;  %v18332_v8 = vld [vmem:[#allocation5 + $0x784] sm:$0xf] }
  0x75   :  { %v15790_v11 = vld [vmem:[#allocation5 + $0x1e00] sm:$0xf]  ;;  %v15279_v16 = vor.u32 %v18932_v10, %v15278_v9  ;;  %6372 = vmatpush.bf16.msrb.mxu1 %v14767_v15  ;;  %v12912_v9 = vld [vmem:[#allocation5 + $0x7c0] sm:$0xf0] }
  0x76   :  { %v19060_v12 = vld [vmem:[#allocation5 + $0x1e3c] sm:$0xf0]  ;;  %v18460_v10 = vld [vmem:[#allocation5 + $0xb84] sm:$0xf] }
  0x77   :  { %v14190_v14 = vld [vmem:[#allocation5 + $0x1180] sm:$0xf]  ;;  %v15791_v20 = vor.u32 %v19060_v12, %v15790_v11  ;;  %6385 = vmatpush.bf16.msrb.mxu2 %v15279_v16  ;;  %v13424_v12 = vld [vmem:[#allocation5 + $0xbc0] sm:$0xf0] }
  0x78   :  { %v18660_v17 = vld [vmem:[#allocation5 + $0x11bc] sm:$0xf0]  ;;  %v18588_v13 = vld [vmem:[#allocation5 + $0xf84] sm:$0xf] }
  0x79   :  { %v14702_v18 = vld [vmem:[#allocation5 + $0x1580] sm:$0xf]  ;;  %v14191_v27 = vor.u32 %v18660_v17, %v14190_v14  ;;  %6398 = vmatpush.bf16.msrb.mxu3 %v15791_v20  ;;  %v13936_v14 = vld [vmem:[#allocation5 + $0xfc0] sm:$0xf0] }
  0x7a   :  { %v18788_v19 = vld [vmem:[#allocation5 + $0x15bc] sm:$0xf0]  ;;  %v18188_v17 = vld [vmem:[#allocation5 + $0x304] sm:$0xf] }
  0x7b   :  { %v15214_v21 = vld [vmem:[#allocation5 + $0x1980] sm:$0xf]  ;;  %v14703_v28 = vor.u32 %v18788_v19, %v14702_v18  ;;  %6360 = vmatpush.bf16.msrb.mxu0 %v14191_v27  ;;  %v12336_v18 = vld [vmem:[#allocation5 + $0x340] sm:$0xf0] }
  0x7c   :  { %v18916_v22 = vld [vmem:[#allocation5 + $0x19bc] sm:$0xf0]  ;;  %v106_v19 = vld.sshfl [vmem:[#allocation1 + $0x30] sm:$0xff pattern:$0x73625140] }
  0x7d   :  { %v15726_v23 = vld [vmem:[#allocation5 + $0x1d80] sm:$0xf]  ;;  %v15215_v32 = vor.u32 %v18916_v22, %v15214_v21  ;;  %6373 = vmatpush.bf16.msrb.mxu1 %v14703_v28  ;;  %v12403_v21 = vor.u32 %v18204_v6, %v12400_v7  ;;  %v104_v22 = vld.sshfl [vmem:[#allocation1 + $0x20] sm:$0xff pattern:$0x73625140]  ;;  %v13939_v28 = vor.u32 %v18588_v13, %v13936_v14 }
  0x7e   :  { %v19044_v24 = vld [vmem:[#allocation5 + $0x1dbc] sm:$0xf0]  ;;  %v105_v27 = vld.sshfl [vmem:[#allocation1 + $0x28] sm:$0xff pattern:$0x73625140] }
  0x7f   :  { %v14126_v25 = vld [vmem:[#allocation5 + $0x1100] sm:$0xf]  ;;  %v15727_v37 = vor.u32 %v19044_v24, %v15726_v23  ;;  %6386 = vmatpush.bf16.msrb.mxu2 %v15215_v32  ;;  %v12915_v24 = vor.u32 %v18332_v8, %v12912_v9  ;;  %v19865_v32 = vpack.c.bf16 %v106_v19, %v106_v19  ;;  %v12144_v6 = vld [vmem:[#allocation5 + $0x1c0] sm:$0xf0] }
  0x80   :  { %v18644_v26 = vld [vmem:[#allocation5 + $0x113c] sm:$0xf0]  ;;  %v18268_v7 = vld [vmem:[#allocation5 + $0x584] sm:$0xf] }
  0x81   :  { %v14638_v29 = vld [vmem:[#allocation5 + $0x1500] sm:$0xf]  ;;  %v14127_v45 = vor.u32 %v18644_v26, %v14126_v25  ;;  %6399 = vmatpush.bf16.msrb.mxu3 %v15727_v37  ;;  %v13427_v25 = vor.u32 %v18460_v10, %v13424_v12  ;;  %v18316_v26 = vld [vmem:[#allocation5 + $0x704] sm:$0xf]  ;;  %v19867_v37 = vpack.c.bf16 %v104_v22, %v104_v22 }
  0x82   :  { %v103_v35 = vld.sshfl [vmem:[#allocation1 + $0x18] sm:$0xff pattern:$0x73625140] }
  0x83   :  { %v18772_v38 = vld [vmem:[#allocation5 + $0x153c] sm:$0xf0]  ;;  %v19857_v41 = vpack.c.bf16 %v103_v35, %v103_v35  ;;  %6361 = vmatpush.bf16.msrb.mxu0 %v14127_v45  ;;  %v18572_v35 = vld [vmem:[#allocation5 + $0xf04] sm:$0xf] }
  0x84   :  { %v15150_v39 = vld [vmem:[#allocation5 + $0x1900] sm:$0xf]  ;;  %v14639_v48 = vor.u32 %v18772_v38, %v14638_v29  ;;  %v12848_v29 = vld [vmem:[#allocation5 + $0x740] sm:$0xf0] }
  0x85   :  { %v18900_v40 = vld [vmem:[#allocation5 + $0x193c] sm:$0xf0]  ;;  %6351 = vmatmul.bf16.vlgmr.msra.gmra.mxu3 %v19857_v41  ;;  %v18172_v45 = vld [vmem:[#allocation5 + $0x284] sm:$0xf] }
  0x86   :  { %v15662_v43 = vld [vmem:[#allocation5 + $0x1d00] sm:$0xf]  ;;  %v15151_v49 = vor.u32 %v18900_v40, %v15150_v39  ;;  %6374 = vmatpush.bf16.msrb.mxu1 %v14639_v48  ;;  %v12339_v39 = vor.u32 %v18188_v17, %v12336_v18  ;;  %v19871_v40 = vpack.c.bf16 %v105_v27, %v105_v27  ;;  %v13875_v48 = vor.u32 %v18572_v35, %v13872_v36  ;;  %v12656_v9 = vld [vmem:[#allocation5 + $0x5c0] sm:$0xf0] }
  0x87   :  { %v19028_v44 = vld [vmem:[#allocation5 + $0x1d3c] sm:$0xf0]  ;;  %v18396_v10 = vld [vmem:[#allocation5 + $0x984] sm:$0xf] }
  0x88   :  { %v14062_v46 = vld [vmem:[#allocation5 + $0x1080] sm:$0xf]  ;;  %v15663_v53 = vor.u32 %v19028_v44, %v15662_v43  ;;  %6387 = vmatpush.bf16.msrb.mxu2 %v15151_v49  ;;  %v12851_v43 = vor.u32 %v18316_v26, %v12848_v29  ;;  %v13363_v44 = vor.u32 %v18444_v30, %v13360_v31  ;;  %v12784_v49 = vld [vmem:[#allocation5 + $0x6c0] sm:$0xf0] }
  0x89   :  { %v18628_v47 = vld [vmem:[#allocation5 + $0x10bc] sm:$0xf0]  ;;  %v18524_v12 = vld [vmem:[#allocation5 + $0xd84] sm:$0xf] }
  0x8a   :  { %v14574_v50 = vld [vmem:[#allocation5 + $0x1480] sm:$0xf]  ;;  %v14063_v59 = vor.u32 %v18628_v47, %v14062_v46  ;;  %6400 = vmatpush.bf16.msrb.mxu3 %v15663_v53  ;;  %v12272_v46 = vld [vmem:[#allocation5 + $0x2c0] sm:$0xf0] }
  0x8b   :  { %v18756_v51 = vld [vmem:[#allocation5 + $0x14bc] sm:$0xf0]  ;;  %v18300_v47 = vld [vmem:[#allocation5 + $0x684] sm:$0xf] }
  0x8c   :  { %v15086_v54 = vld [vmem:[#allocation5 + $0x1880] sm:$0xf]  ;;  %v14575_v63 = vor.u32 %v18756_v51, %v14574_v50  ;;  %6362 = vmatpush.bf16.msrb.mxu0 %v14063_v59  ;;  %v18428_v50 = vld [vmem:[#allocation5 + $0xa84] sm:$0xf] }
  0x8d   :  { %v18884_v55 = vld [vmem:[#allocation5 + $0x18bc] sm:$0xf0]  ;;  %v13296_v51 = vld [vmem:[#allocation5 + $0xac0] sm:$0xf0] }
  0x8e   :  { %v15598_v56 = vld [vmem:[#allocation5 + $0x1c80] sm:$0xf]  ;;  %v15087_v0 = vor.u32 %v18884_v55, %v15086_v54  ;;  %6375 = vmatpush.bf16.msrb.mxu1 %v14575_v63  ;;  %v13808_v53 = vld [vmem:[#allocation5 + $0xec0] sm:$0xf0]  ;;  %v12275_v54 = vor.u32 %v18172_v45, %v12272_v46  ;;  %v12787_v55 = vor.u32 %v18300_v47, %v12784_v49 }
  0x8f   :  { %v19012_v57 = vld [vmem:[#allocation5 + $0x1cbc] sm:$0xf0]  ;;  %v18284_v59 = vld [vmem:[#allocation5 + $0x604] sm:$0xf] }
  0x90   :  { %v13998_v58 = vld [vmem:[#allocation5 + $0x1000] sm:$0xf]  ;;  %v15599_v4 = vor.u32 %v19012_v57, %v15598_v56  ;;  %6388 = vmatpush.bf16.msrb.mxu2 %v15087_v0  ;;  %v13299_v56 = vor.u32 %v18428_v50, %v13296_v51  ;;  %v18156_v57 = vld [vmem:[#allocation5 + $0x204] sm:$0xf] }
  0x91   :  { %v18612_v60 = vld [vmem:[#allocation5 + $0x103c] sm:$0xf0]  ;;  %v13232_v63 = vld [vmem:[#allocation5 + $0xa40] sm:$0xf0] }
  0x92   :  { %v14510_v61 = vld [vmem:[#allocation5 + $0x1400] sm:$0xf]  ;;  %v13999_v11 = vor.u32 %v18612_v60, %v13998_v58  ;;  %6401 = vmatpush.bf16.msrb.mxu3 %v15599_v4  ;;  %v12208_v58 = vld [vmem:[#allocation5 + $0x240] sm:$0xf0]  ;;  %v13811_v60 = vor.u32 %v18556_v52, %v13808_v53 }
  0x93   :  { %v18740_v62 = vld [vmem:[#allocation5 + $0x143c] sm:$0xf0]  ;;  %v18540_v0 = vld [vmem:[#allocation5 + $0xe04] sm:$0xf] }
  0x94   :  { %v15022_v1 = vld [vmem:[#allocation5 + $0x1800] sm:$0xf]  ;;  %v14511_v15 = vor.u32 %v18740_v62, %v14510_v61  ;;  %6363 = vmatpush.bf16.msrb.mxu0 %v13999_v11  ;;  %v12720_v61 = vld [vmem:[#allocation5 + $0x640] sm:$0xf0] }
  0x95   :  { %v18868_v2 = vld [vmem:[#allocation5 + $0x183c] sm:$0xf0]  ;;  %v18412_v62 = vld [vmem:[#allocation5 + $0xa04] sm:$0xf] }
  0x96   :  { %v15534_v3 = vld [vmem:[#allocation5 + $0x1c00] sm:$0xf]  ;;  %v15023_v16 = vor.u32 %v18868_v2, %v15022_v1  ;;  %6376 = vmatpush.bf16.msrb.mxu1 %v14511_v15  ;;  %v13744_v1 = vld [vmem:[#allocation5 + $0xe40] sm:$0xf0]  ;;  %v12211_v2 = vor.u32 %v18156_v57, %v12208_v58  ;;  %v13235_v4 = vor.u32 %v18412_v62, %v13232_v63  ;;  %v12659_v15 = vor.u32 %v18268_v7, %v12656_v9 }
  0x97   :  { %v18996_v5 = vld [vmem:[#allocation5 + $0x1c3c] sm:$0xf0]  ;;  %6364 = vmatmul.bf16.vlgmr.msrb.gmra.mxu0 %v19867_v37  ;;  %v13747_v8 = vor.u32 %v18540_v0, %v13744_v1  ;;  %v13168_v11 = vld [vmem:[#allocation5 + $0x9c0] sm:$0xf0] }
  0x98   :  { %v15535_v20 = vor.u32 %v18996_v5, %v15534_v3  ;;  %v107_v23 = vld.sshfl [vmem:[#allocation1 + $0x38] sm:$0xff pattern:$0x73625140]  ;;  %6389 = vmatpush.bf16.msrb.mxu2 %v15023_v16  ;;  %6408 = vmatpush.bf16.msra.mxu0 %v12403_v21  ;;  %v12723_v3 = vor.u32 %v18284_v59, %v12720_v61  ;;  %v13171_v16 = vor.u32 %v18396_v10, %v13168_v11 }
  0x99   :  { %v19869_v38 = vpack.c.bf16 %v107_v23, %v107_v23  ;;  %6377 = vmatmul.bf16.vlgmr.msrb.gmra.mxu1 %v19871_v40  ;;  %v18140_v5 = vld [vmem:[#allocation5 + $0x184] sm:$0xf] }
  0x9a   :  { %6402 = vmatpush.bf16.msrb.mxu3 %v15535_v20  ;;  %6421 = vmatpush.bf16.msra.mxu1 %v12915_v24  ;;  %v13680_v13 = vld [vmem:[#allocation5 + $0xdc0] sm:$0xf0]  ;;  %v12147_v14 = vor.u32 %v18140_v5, %v12144_v6 }
  0x9b   :  { %6390 = vmatmul.bf16.vlgmr.msrb.gmra.mxu2 %v19865_v32  ;;  %v18124_v17 = vld [vmem:[#allocation5 + $0x104] sm:$0xf]  ;;  %v13683_v20 = vor.u32 %v18524_v12, %v13680_v13 }
  0x9c   :  { %6434 = vmatpush.bf16.msra.mxu2 %v13427_v25  ;;  %6409 = vmatpush.bf16.msra.mxu0 %v12339_v39  ;;  %v12080_v18 = vld [vmem:[#allocation5 + $0x140] sm:$0xf0] }
  0x9d   :  { %6403 = vmatmul.bf16.vlgmr.msrb.gmra.mxu3 %v19869_v38  ;;  %v18252_v19 = vld [vmem:[#allocation5 + $0x504] sm:$0xf]  ;;  %v12083_v26 = vor.u32 %v18124_v17, %v12080_v18 }
  0x9e   :  { %6447 = vmatpush.bf16.msra.mxu3 %v13939_v28  ;;  %6422 = vmatpush.bf16.msra.mxu1 %v12851_v43  ;;  %v12592_v21 = vld [vmem:[#allocation5 + $0x540] sm:$0xf0] }
  0x9f   :  { %v18380_v22 = vld [vmem:[#allocation5 + $0x904] sm:$0xf]  ;;  %v12595_v27 = vor.u32 %v18252_v19, %v12592_v21 }
  0xa0   :  { %6435 = vmatpush.bf16.msra.mxu2 %v13363_v44  ;;  %6410 = vmatpush.bf16.msra.mxu0 %v12275_v54  ;;  %v13104_v23 = vld [vmem:[#allocation5 + $0x940] sm:$0xf0] }
  0xa1   :  { %v18508_v24 = vld [vmem:[#allocation5 + $0xd04] sm:$0xf]  ;;  %v13107_v28 = vor.u32 %v18380_v22, %v13104_v23 }
  0xa2   :  { %6448 = vmatpush.bf16.msra.mxu3 %v13875_v48  ;;  %6423 = vmatpush.bf16.msra.mxu1 %v12787_v55  ;;  %v13616_v25 = vld [vmem:[#allocation5 + $0xd40] sm:$0xf0] }
  0xa3   :  { %v18108_v29 = vld [vmem:[#allocation5 + $0x84] sm:$0xf]  ;;  %v13619_v35 = vor.u32 %v18508_v24, %v13616_v25 }
  0xa4   :  { %6436 = vmatpush.bf16.msra.mxu2 %v13299_v56  ;;  %6411 = vmatpush.bf16.msra.mxu0 %v12211_v2  ;;  %v12016_v30 = vld [vmem:[#allocation5 + $0xc0] sm:$0xf0] }
  0xa5   :  { %v18236_v31 = vld [vmem:[#allocation5 + $0x484] sm:$0xf]  ;;  %v12019_v46 = vor.u32 %v18108_v29, %v12016_v30 }
  0xa6   :  { %6449 = vmatpush.bf16.msra.mxu3 %v13811_v60  ;;  %6424 = vmatpush.bf16.msra.mxu1 %v12723_v3  ;;  %v12528_v36 = vld [vmem:[#allocation5 + $0x4c0] sm:$0xf0] }
  0xa7   :  { %v18364_v39 = vld [vmem:[#allocation5 + $0x884] sm:$0xf]  ;;  %v12531_v49 = vor.u32 %v18236_v31, %v12528_v36 }
  0xa8   :  { %6437 = vmatpush.bf16.msra.mxu2 %v13235_v4  ;;  %6412 = vmatpush.bf16.msra.mxu0 %v12147_v14  ;;  %v13040_v43 = vld [vmem:[#allocation5 + $0x8c0] sm:$0xf0] }
  0xa9   :  { %v18492_v44 = vld [vmem:[#allocation5 + $0xc84] sm:$0xf]  ;;  %v13043_v50 = vor.u32 %v18364_v39, %v13040_v43 }
  0xaa   :  { %6450 = vmatpush.bf16.msra.mxu3 %v13747_v8  ;;  %6425 = vmatpush.bf16.msra.mxu1 %v12659_v15  ;;  %v13552_v45 = vld [vmem:[#allocation5 + $0xcc0] sm:$0xf0] }
  0xab   :  { %v18092_v47 = vld [vmem:[#allocation5 + $0x4] sm:$0xf]  ;;  %v13555_v54 = vor.u32 %v18492_v44, %v13552_v45 }
  0xac   :  { %6438 = vmatpush.bf16.msra.mxu2 %v13171_v16  ;;  %6413 = vmatpush.bf16.msra.mxu0 %v12083_v26  ;;  %v11952_v48 = vld [vmem:[#allocation5 + $0x40] sm:$0xf0] }
  0xad   :  { %v18220_v51 = vld [vmem:[#allocation5 + $0x404] sm:$0xf]  ;;  %v11955_v61 = vor.u32 %v18092_v47, %v11952_v48 }
  0xae   :  { %6451 = vmatpush.bf16.msra.mxu3 %v13683_v20  ;;  %6426 = vmatpush.bf16.msra.mxu1 %v12595_v27  ;;  %v12464_v52 = vld [vmem:[#allocation5 + $0x440] sm:$0xf0] }
  0xaf   :  { %v18348_v53 = vld [vmem:[#allocation5 + $0x804] sm:$0xf]  ;;  %v12467_v1 = vor.u32 %v18220_v51, %v12464_v52 }
  0xb0   :  { %6439 = vmatpush.bf16.msra.mxu2 %v13107_v28  ;;  %v12976_v55 = vld [vmem:[#allocation5 + $0x840] sm:$0xf0]  ;;  %6414 = vmatpush.bf16.msra.mxu0 %v12019_v46 }
  0xb1   :  { %v18476_v56 = vld [vmem:[#allocation5 + $0xc04] sm:$0xf]  ;;  %v12979_v2 = vor.u32 %v18348_v53, %v12976_v55 }
  0xb2   :  { %6452 = vmatpush.bf16.msra.mxu3 %v13619_v35  ;;  %v13488_v57 = vld [vmem:[#allocation5 + $0xc40] sm:$0xf0]  ;;  %6427 = vmatpush.bf16.msra.mxu1 %v12531_v49 }
  0xb3   :  { %v18716_v58 = vld [vmem:[#allocation5 + $0x1384] sm:$0xf]  ;;  %v13491_v5 = vor.u32 %v18476_v56, %v13488_v57 }
  0xb4   :  { %v14448_v59 = vld [vmem:[#allocation5 + $0x13c0] sm:$0xf0]  ;;  %6440 = vmatpush.bf16.msra.mxu2 %v13043_v50  ;;  %6415 = vmatpush.bf16.msra.mxu0 %v11955_v61 }
  0xb5   :  { %v18844_v60 = vld [vmem:[#allocation5 + $0x1784] sm:$0xf]  ;;  %v14451_v6 = vor.u32 %v18716_v58, %v14448_v59 }
  0xb6   :  { %v14960_v62 = vld [vmem:[#allocation5 + $0x17c0] sm:$0xf0]  ;;  %6453 = vmatpush.bf16.msra.mxu3 %v13555_v54  ;;  %6428 = vmatpush.bf16.msra.mxu1 %v12467_v1 }
  0xb7   :  { %v18972_v63 = vld [vmem:[#allocation5 + $0x1b84] sm:$0xf]  ;;  %v14963_v7 = vor.u32 %v18844_v60, %v14960_v62  ;;  %6416 = vmatmul.bf16.vlgmr.msra.gmra.mxu0 %v19855_v34 }
  0xb8   :  { %v15472_v0 = vld [vmem:[#allocation5 + $0x1bc0] sm:$0xf0]  ;;  %6441 = vmatpush.bf16.msra.mxu2 %v12979_v2  ;;  %6460 = vmatpush.bf16.msrb.mxu0 %v14451_v6 }
  0xb9   :  { %v19100_v3 = vld [vmem:[#allocation5 + $0x1f84] sm:$0xf]  ;;  %v15475_v8 = vor.u32 %v18972_v63, %v15472_v0  ;;  %6429 = vmatmul.bf16.vlgmr.msra.gmra.mxu1 %v19859_v42 }
  0xba   :  { %v15984_v4 = vld [vmem:[#allocation5 + $0x1fc0] sm:$0xf0]  ;;  %6454 = vmatpush.bf16.msra.mxu3 %v13491_v5  ;;  %6473 = vmatpush.bf16.msrb.mxu1 %v14963_v7 }
  0xbb   :  { %v18700_v9 = vld [vmem:[#allocation5 + $0x1304] sm:$0xf]  ;;  %v15987_v12 = vor.u32 %v19100_v3, %v15984_v4  ;;  %6442 = vmatmul.bf16.vlgmr.msra.gmra.mxu2 %v19853_v33 }
  0xbc   :  { %v14384_v10 = vld [vmem:[#allocation5 + $0x1340] sm:$0xf0]  ;;  %6486 = vmatpush.bf16.msrb.mxu2 %v15475_v8 }
  0xbd   :  { %v18828_v11 = vld [vmem:[#allocation5 + $0x1704] sm:$0xf]  ;;  %v14387_v18 = vor.u32 %v18700_v9, %v14384_v10  ;;  %6455 = vmatmul.bf16.vlgmr.msra.gmra.mxu3 %v19857_v41 }
  0xbe   :  { %v14896_v13 = vld [vmem:[#allocation5 + $0x1740] sm:$0xf0]  ;;  %6499 = vmatpush.bf16.msrb.mxu3 %v15987_v12 }
  0xbf   :  { %v18956_v14 = vld [vmem:[#allocation5 + $0x1b04] sm:$0xf]  ;;  %v14899_v19 = vor.u32 %v18828_v11, %v14896_v13  ;;  %6461 = vmatpush.bf16.msrb.mxu0 %v14387_v18 }
  0xc0   :  { %v15408_v15 = vld [vmem:[#allocation5 + $0x1b40] sm:$0xf0] }
  0xc1   :  { %v19084_v16 = vld [vmem:[#allocation5 + $0x1f04] sm:$0xf]  ;;  %v15411_v20 = vor.u32 %v18956_v14, %v15408_v15  ;;  %6474 = vmatpush.bf16.msrb.mxu1 %v14899_v19 }
  0xc2   :  { %v15920_v17 = vld [vmem:[#allocation5 + $0x1f40] sm:$0xf0] }
  0xc3   :  { %v18684_v21 = vld [vmem:[#allocation5 + $0x1284] sm:$0xf]  ;;  %v15923_v24 = vor.u32 %v19084_v16, %v15920_v17  ;;  %6487 = vmatpush.bf16.msrb.mxu2 %v15411_v20 }
  0xc4   :  { %v14320_v22 = vld [vmem:[#allocation5 + $0x12c0] sm:$0xf0] }
  0xc5   :  { %v18812_v23 = vld [vmem:[#allocation5 + $0x1684] sm:$0xf]  ;;  %v14323_v30 = vor.u32 %v18684_v21, %v14320_v22  ;;  %6500 = vmatpush.bf16.msrb.mxu3 %v15923_v24 }
  0xc6   :  { %v14832_v25 = vld [vmem:[#allocation5 + $0x16c0] sm:$0xf0] }
  0xc7   :  { %v18940_v26 = vld [vmem:[#allocation5 + $0x1a84] sm:$0xf]  ;;  %v14835_v31 = vor.u32 %v18812_v23, %v14832_v25  ;;  %6462 = vmatpush.bf16.msrb.mxu0 %v14323_v30 }
  0xc8   :  { %v15344_v27 = vld [vmem:[#allocation5 + $0x1ac0] sm:$0xf0] }
  0xc9   :  { %v19068_v28 = vld [vmem:[#allocation5 + $0x1e84] sm:$0xf]  ;;  %v15347_v35 = vor.u32 %v18940_v26, %v15344_v27  ;;  %6475 = vmatpush.bf16.msrb.mxu1 %v14835_v31 }
  0xca   :  { %v15856_v29 = vld [vmem:[#allocation5 + $0x1ec0] sm:$0xf0] }
  0xcb   :  { %v18668_v36 = vld [vmem:[#allocation5 + $0x1204] sm:$0xf]  ;;  %v15859_v44 = vor.u32 %v19068_v28, %v15856_v29  ;;  %6488 = vmatpush.bf16.msrb.mxu2 %v15347_v35 }
  0xcc   :  { %v14256_v39 = vld [vmem:[#allocation5 + $0x1240] sm:$0xf0] }
  0xcd   :  { %v18796_v43 = vld [vmem:[#allocation5 + $0x1604] sm:$0xf]  ;;  %v14259_v50 = vor.u32 %v18668_v36, %v14256_v39  ;;  %6501 = vmatpush.bf16.msrb.mxu3 %v15859_v44  ;;  %v12406_v39 = vld [vmem:[#allocation5 + $0x388] sm:$0xf] }
  0xce   :  { %v14768_v45 = vld [vmem:[#allocation5 + $0x1640] sm:$0xf0]  ;;  %v12918_v44 = vld [vmem:[#allocation5 + $0x788] sm:$0xf] }
  0xcf   :  { %v18924_v46 = vld [vmem:[#allocation5 + $0x1a04] sm:$0xf]  ;;  %v14771_v51 = vor.u32 %v18796_v43, %v14768_v45  ;;  %6463 = vmatpush.bf16.msrb.mxu0 %v14259_v50  ;;  %v18213_v43 = vld [vmem:[#allocation5 + $0x3c4] sm:$0xf0] }
  0xd0   :  { %v15280_v47 = vld [vmem:[#allocation5 + $0x1a40] sm:$0xf0] }
  0xd1   :  { %v19052_v48 = vld [vmem:[#allocation5 + $0x1e04] sm:$0xf]  ;;  %v15283_v52 = vor.u32 %v18924_v46, %v15280_v47  ;;  %6476 = vmatpush.bf16.msrb.mxu1 %v14771_v51  ;;  %v18341_v46 = vld [vmem:[#allocation5 + $0x7c4] sm:$0xf0] }
  0xd2   :  { %v15792_v49 = vld [vmem:[#allocation5 + $0x1e40] sm:$0xf0]  ;;  %v13430_v47 = vld [vmem:[#allocation5 + $0xb88] sm:$0xf] }
  0xd3   :  { %v18652_v53 = vld [vmem:[#allocation5 + $0x1184] sm:$0xf]  ;;  %v15795_v56 = vor.u32 %v19052_v48, %v15792_v49  ;;  %6489 = vmatpush.bf16.msrb.mxu2 %v15283_v52  ;;  %v18469_v48 = vld [vmem:[#allocation5 + $0xbc4] sm:$0xf0] }
  0xd4   :  { %v14192_v54 = vld [vmem:[#allocation5 + $0x11c0] sm:$0xf0]  ;;  %v13942_v51 = vld [vmem:[#allocation5 + $0xf88] sm:$0xf] }
  0xd5   :  { %v18780_v55 = vld [vmem:[#allocation5 + $0x1584] sm:$0xf]  ;;  %v14195_v62 = vor.u32 %v18652_v53, %v14192_v54  ;;  %6502 = vmatpush.bf16.msrb.mxu3 %v15795_v56  ;;  %v18597_v52 = vld [vmem:[#allocation5 + $0xfc4] sm:$0xf0]  ;;  %v12407_v54 = vor.u32 %v18213_v43, %v12406_v39  ;;  %v13431_v56 = vor.u32 %v18469_v48, %v13430_v47 }
  0xd6   :  { %v14704_v57 = vld [vmem:[#allocation5 + $0x15c0] sm:$0xf0]  ;;  %v13174_v39 = vld [vmem:[#allocation5 + $0x988] sm:$0xf] }
  0xd7   :  { %v18908_v58 = vld [vmem:[#allocation5 + $0x1984] sm:$0xf]  ;;  %v14707_v63 = vor.u32 %v18780_v55, %v14704_v57  ;;  %6464 = vmatpush.bf16.msrb.mxu0 %v14195_v62  ;;  %v12919_v55 = vor.u32 %v18341_v46, %v12918_v44  ;;  %v12342_v57 = vld [vmem:[#allocation5 + $0x308] sm:$0xf] }
  0xd8   :  { %v15216_v59 = vld [vmem:[#allocation5 + $0x19c0] sm:$0xf0]  ;;  %v13366_v62 = vld [vmem:[#allocation5 + $0xb08] sm:$0xf] }
  0xd9   :  { %v19036_v60 = vld [vmem:[#allocation5 + $0x1d84] sm:$0xf]  ;;  %v15219_v0 = vor.u32 %v18908_v58, %v15216_v59  ;;  %6477 = vmatpush.bf16.msrb.mxu1 %v14707_v63  ;;  %v18197_v58 = vld [vmem:[#allocation5 + $0x344] sm:$0xf0] }
  0xda   :  { %v15728_v61 = vld [vmem:[#allocation5 + $0x1dc0] sm:$0xf0]  ;;  %v12854_v59 = vld [vmem:[#allocation5 + $0x708] sm:$0xf] }
  0xdb   :  { %v18636_v1 = vld [vmem:[#allocation5 + $0x1104] sm:$0xf]  ;;  %v15731_v4 = vor.u32 %v19036_v60, %v15728_v61  ;;  %6490 = vmatpush.bf16.msrb.mxu2 %v15219_v0  ;;  %v13943_v60 = vor.u32 %v18597_v52, %v13942_v51  ;;  %v18325_v61 = vld [vmem:[#allocation5 + $0x744] sm:$0xf0] }
  0xdc   :  { %v14128_v2 = vld [vmem:[#allocation5 + $0x1140] sm:$0xf0]  ;;  %v18453_v63 = vld [vmem:[#allocation5 + $0xb44] sm:$0xf0] }
  0xdd   :  { %v18764_v3 = vld [vmem:[#allocation5 + $0x1504] sm:$0xf]  ;;  %v14131_v10 = vor.u32 %v18636_v1, %v14128_v2  ;;  %6503 = vmatpush.bf16.msrb.mxu3 %v15731_v4  ;;  %v13878_v0 = vld [vmem:[#allocation5 + $0xf08] sm:$0xf]  ;;  %v12343_v2 = vor.u32 %v18197_v58, %v12342_v57  ;;  %v13367_v4 = vor.u32 %v18453_v63, %v13366_v62 }
  0xde   :  { %v14640_v5 = vld [vmem:[#allocation5 + $0x1540] sm:$0xf0]  ;;  %v18581_v1 = vld [vmem:[#allocation5 + $0xf44] sm:$0xf0] }
  0xdf   :  { %v18892_v6 = vld [vmem:[#allocation5 + $0x1904] sm:$0xf]  ;;  %v14643_v11 = vor.u32 %v18764_v3, %v14640_v5  ;;  %6465 = vmatpush.bf16.msrb.mxu0 %v14131_v10  ;;  %v12855_v3 = vor.u32 %v18325_v61, %v12854_v59  ;;  %v12278_v5 = vld [vmem:[#allocation5 + $0x288] sm:$0xf] }
  0xe0   :  { %v15152_v7 = vld [vmem:[#allocation5 + $0x1940] sm:$0xf0]  ;;  %v13302_v10 = vld [vmem:[#allocation5 + $0xa88] sm:$0xf] }
  0xe1   :  { %v19020_v8 = vld [vmem:[#allocation5 + $0x1d04] sm:$0xf]  ;;  %v15155_v12 = vor.u32 %v18892_v6, %v15152_v7  ;;  %6478 = vmatpush.bf16.msrb.mxu1 %v14643_v11  ;;  %v18181_v6 = vld [vmem:[#allocation5 + $0x2c4] sm:$0xf0] }
  0xe2   :  { %v15664_v9 = vld [vmem:[#allocation5 + $0x1d40] sm:$0xf0]  ;;  %v12790_v7 = vld [vmem:[#allocation5 + $0x688] sm:$0xf] }
  0xe3   :  { %v18620_v13 = vld [vmem:[#allocation5 + $0x1084] sm:$0xf]  ;;  %v15667_v16 = vor.u32 %v19020_v8, %v15664_v9  ;;  %6491 = vmatpush.bf16.msrb.mxu2 %v15155_v12  ;;  %v13879_v8 = vor.u32 %v18581_v1, %v13878_v0  ;;  %v18309_v9 = vld [vmem:[#allocation5 + $0x6c4] sm:$0xf0] }
  0xe4   :  { %v14064_v14 = vld [vmem:[#allocation5 + $0x10c0] sm:$0xf0]  ;;  %v18437_v11 = vld [vmem:[#allocation5 + $0xac4] sm:$0xf0] }
  0xe5   :  { %v18748_v15 = vld [vmem:[#allocation5 + $0x1484] sm:$0xf]  ;;  %v14067_v22 = vor.u32 %v18620_v13, %v14064_v14  ;;  %6504 = vmatpush.bf16.msrb.mxu3 %v15667_v16  ;;  %v13814_v12 = vld [vmem:[#allocation5 + $0xe88] sm:$0xf]  ;;  %v12279_v14 = vor.u32 %v18181_v6, %v12278_v5  ;;  %v13303_v16 = vor.u32 %v18437_v11, %v13302_v10 }
  0xe6   :  { %v14576_v17 = vld [vmem:[#allocation5 + $0x14c0] sm:$0xf0]  ;;  %v18565_v13 = vld [vmem:[#allocation5 + $0xec4] sm:$0xf0] }
  0xe7   :  { %v18876_v18 = vld [vmem:[#allocation5 + $0x1884] sm:$0xf]  ;;  %v14579_v25 = vor.u32 %v18748_v15, %v14576_v17  ;;  %6466 = vmatpush.bf16.msrb.mxu0 %v14067_v22  ;;  %v12791_v15 = vor.u32 %v18309_v9, %v12790_v7  ;;  %v12214_v17 = vld [vmem:[#allocation5 + $0x208] sm:$0xf] }
  0xe8   :  { %v15088_v19 = vld [vmem:[#allocation5 + $0x18c0] sm:$0xf0]  ;;  %v13238_v22 = vld [vmem:[#allocation5 + $0xa08] sm:$0xf] }
  0xe9   :  { %v19004_v20 = vld [vmem:[#allocation5 + $0x1c84] sm:$0xf]  ;;  %v15091_v26 = vor.u32 %v18876_v18, %v15088_v19  ;;  %6479 = vmatpush.bf16.msrb.mxu1 %v14579_v25  ;;  %v18165_v18 = vld [vmem:[#allocation5 + $0x244] sm:$0xf0] }
  0xea   :  { %v15600_v21 = vld [vmem:[#allocation5 + $0x1cc0] sm:$0xf0]  ;;  %v12726_v19 = vld [vmem:[#allocation5 + $0x608] sm:$0xf] }
  0xeb   :  { %v18604_v23 = vld [vmem:[#allocation5 + $0x1004] sm:$0xf]  ;;  %v15603_v30 = vor.u32 %v19004_v20, %v15600_v21  ;;  %6492 = vmatpush.bf16.msrb.mxu2 %v15091_v26  ;;  %v13815_v20 = vor.u32 %v18565_v13, %v13814_v12  ;;  %v18293_v21 = vld [vmem:[#allocation5 + $0x644] sm:$0xf0]  ;;  %v12215_v26 = vor.u32 %v18165_v18, %v12214_v17 }
  0xec   :  { %v14000_v24 = vld [vmem:[#allocation5 + $0x1040] sm:$0xf0]  ;;  %v18549_v25 = vld [vmem:[#allocation5 + $0xe44] sm:$0xf0] }
  0xed   :  { %v18732_v27 = vld [vmem:[#allocation5 + $0x1404] sm:$0xf]  ;;  %v14003_v45 = vor.u32 %v18604_v23, %v14000_v24  ;;  %6505 = vmatpush.bf16.msrb.mxu3 %v15603_v30  ;;  %v18421_v23 = vld [vmem:[#allocation5 + $0xa44] sm:$0xf0] }
  0xee   :  { %v14512_v28 = vld [vmem:[#allocation5 + $0x1440] sm:$0xf0]  ;;  %v13750_v24 = vld [vmem:[#allocation5 + $0xe08] sm:$0xf] }
  0xef   :  { %v18860_v29 = vld [vmem:[#allocation5 + $0x1804] sm:$0xf]  ;;  %v14515_v49 = vor.u32 %v18732_v27, %v14512_v28  ;;  %6467 = vmatpush.bf16.msrb.mxu0 %v14003_v45  ;;  %v12727_v27 = vor.u32 %v18293_v21, %v12726_v19  ;;  %v13239_v28 = vor.u32 %v18421_v23, %v13238_v22  ;;  %v18149_v30 = vld [vmem:[#allocation5 + $0x1c4] sm:$0xf0] }
  0xf0   :  { %v15024_v31 = vld [vmem:[#allocation5 + $0x1840] sm:$0xf0]  ;;  %v18405_v43 = vld [vmem:[#allocation5 + $0x9c4] sm:$0xf0] }
  0xf1   :  { %v18988_v35 = vld [vmem:[#allocation5 + $0x1c04] sm:$0xf]  ;;  %v15027_v50 = vor.u32 %v18860_v29, %v15024_v31  ;;  %6480 = vmatpush.bf16.msrb.mxu1 %v14515_v49  ;;  %v12150_v29 = vld [vmem:[#allocation5 + $0x188] sm:$0xf]  ;;  %v13175_v48 = vor.u32 %v18405_v43, %v13174_v39 }
  0xf2   :  { %v15536_v36 = vld [vmem:[#allocation5 + $0x1c40] sm:$0xf0]  ;;  %6468 = vmatmul.bf16.vlgmr.msrb.gmra.mxu0 %v19867_v37  ;;  %v12662_v31 = vld [vmem:[#allocation5 + $0x588] sm:$0xf]  ;;  %v12151_v46 = vor.u32 %v18149_v30, %v12150_v29 }
  0xf3   :  { %v15539_v53 = vor.u32 %v18988_v35, %v15536_v36  ;;  %6493 = vmatpush.bf16.msrb.mxu2 %v15027_v50  ;;  %6512 = vmatpush.bf16.msra.mxu0 %v12407_v54  ;;  %v13751_v35 = vor.u32 %v18549_v25, %v13750_v24  ;;  %v18277_v36 = vld [vmem:[#allocation5 + $0x5c4] sm:$0xf0] }
  0xf4   :  { %6481 = vmatmul.bf16.vlgmr.msrb.gmra.mxu1 %v19871_v40  ;;  %v13686_v44 = vld [vmem:[#allocation5 + $0xd88] sm:$0xf]  ;;  %v12663_v47 = vor.u32 %v18277_v36, %v12662_v31 }
  0xf5   :  { %6506 = vmatpush.bf16.msrb.mxu3 %v15539_v53  ;;  %6525 = vmatpush.bf16.msra.mxu1 %v12919_v55  ;;  %v18533_v45 = vld [vmem:[#allocation5 + $0xdc4] sm:$0xf0] }
  0xf6   :  { %6494 = vmatmul.bf16.vlgmr.msrb.gmra.mxu2 %v19865_v32  ;;  %v12086_v49 = vld [vmem:[#allocation5 + $0x108] sm:$0xf]  ;;  %v13687_v52 = vor.u32 %v18533_v45, %v13686_v44 }
  0xf7   :  { %6538 = vmatpush.bf16.msra.mxu2 %v13431_v56  ;;  %6513 = vmatpush.bf16.msra.mxu0 %v12343_v2  ;;  %v18133_v50 = vld [vmem:[#allocation5 + $0x144] sm:$0xf0] }
  0xf8   :  { %6507 = vmatmul.bf16.vlgmr.msrb.gmra.mxu3 %v19869_v38  ;;  %v12598_v51 = vld [vmem:[#allocation5 + $0x508] sm:$0xf]  ;;  %v12087_v58 = vor.u32 %v18133_v50, %v12086_v49 }
  0xf9   :  { %6551 = vmatpush.bf16.msra.mxu3 %v13943_v60  ;;  %6526 = vmatpush.bf16.msra.mxu1 %v12855_v3  ;;  %v18261_v53 = vld [vmem:[#allocation5 + $0x544] sm:$0xf0] }
  0xfa   :  { %v13110_v54 = vld [vmem:[#allocation5 + $0x908] sm:$0xf]  ;;  %v12599_v59 = vor.u32 %v18261_v53, %v12598_v51 }
  0xfb   :  { %6539 = vmatpush.bf16.msra.mxu2 %v13367_v4  ;;  %6514 = vmatpush.bf16.msra.mxu0 %v12279_v14  ;;  %v18389_v55 = vld [vmem:[#allocation5 + $0x944] sm:$0xf0] }
  0xfc   :  { %v13622_v56 = vld [vmem:[#allocation5 + $0xd08] sm:$0xf]  ;;  %v13111_v60 = vor.u32 %v18389_v55, %v13110_v54 }
  0xfd   :  { %6552 = vmatpush.bf16.msra.mxu3 %v13879_v8  ;;  %6527 = vmatpush.bf16.msra.mxu1 %v12791_v15  ;;  %v18517_v57 = vld [vmem:[#allocation5 + $0xd44] sm:$0xf0] }
  0xfe   :  { %v12022_v61 = vld [vmem:[#allocation5 + $0x88] sm:$0xf]  ;;  %v13623_v0 = vor.u32 %v18517_v57, %v13622_v56 }
  0xff   :  { %6540 = vmatpush.bf16.msra.mxu2 %v13303_v16  ;;  %6515 = vmatpush.bf16.msra.mxu0 %v12215_v26  ;;  %v18117_v62 = vld [vmem:[#allocation5 + $0xc4] sm:$0xf0] }
 0x100   :  { %v12534_v63 = vld [vmem:[#allocation5 + $0x488] sm:$0xf]  ;;  %v12023_v6 = vor.u32 %v18117_v62, %v12022_v61 }
 0x101   :  { %6553 = vmatpush.bf16.msra.mxu3 %v13815_v20  ;;  %6528 = vmatpush.bf16.msra.mxu1 %v12727_v27  ;;  %v18245_v1 = vld [vmem:[#allocation5 + $0x4c4] sm:$0xf0] }
 0x102   :  { %v13046_v2 = vld [vmem:[#allocation5 + $0x888] sm:$0xf]  ;;  %v12535_v9 = vor.u32 %v18245_v1, %v12534_v63 }
 0x103   :  { %6541 = vmatpush.bf16.msra.mxu2 %v13239_v28  ;;  %6516 = vmatpush.bf16.msra.mxu0 %v12151_v46  ;;  %v18373_v3 = vld [vmem:[#allocation5 + $0x8c4] sm:$0xf0] }
 0x104   :  { %v13558_v4 = vld [vmem:[#allocation5 + $0xc88] sm:$0xf]  ;;  %v13047_v10 = vor.u32 %v18373_v3, %v13046_v2 }
 0x105   :  { %6554 = vmatpush.bf16.msra.mxu3 %v13751_v35  ;;  %6529 = vmatpush.bf16.msra.mxu1 %v12663_v47  ;;  %v18501_v5 = vld [vmem:[#allocation5 + $0xcc4] sm:$0xf0] }
 0x106   :  { %v11958_v7 = vld [vmem:[#allocation5 + $0x8] sm:$0xf]  ;;  %v13559_v14 = vor.u32 %v18501_v5, %v13558_v4 }
 0x107   :  { %6542 = vmatpush.bf16.msra.mxu2 %v13175_v48  ;;  %6517 = vmatpush.bf16.msra.mxu0 %v12087_v58  ;;  %v18101_v8 = vld [vmem:[#allocation5 + $0x44] sm:$0xf0] }
 0x108   :  { %v12470_v11 = vld [vmem:[#allocation5 + $0x408] sm:$0xf]  ;;  %v11959_v21 = vor.u32 %v18101_v8, %v11958_v7 }
 0x109   :  { %6555 = vmatpush.bf16.msra.mxu3 %v13687_v52  ;;  %6530 = vmatpush.bf16.msra.mxu1 %v12599_v59  ;;  %v18229_v12 = vld [vmem:[#allocation5 + $0x444] sm:$0xf0] }
 0x10a   :  { %v12982_v13 = vld [vmem:[#allocation5 + $0x808] sm:$0xf]  ;;  %v12471_v25 = vor.u32 %v18229_v12, %v12470_v11 }
 0x10b   :  { %6543 = vmatpush.bf16.msra.mxu2 %v13111_v60  ;;  %v18357_v15 = vld [vmem:[#allocation5 + $0x844] sm:$0xf0]  ;;  %6518 = vmatpush.bf16.msra.mxu0 %v12023_v6 }
 0x10c   :  { %v13494_v16 = vld [vmem:[#allocation5 + $0xc08] sm:$0xf]  ;;  %v12983_v26 = vor.u32 %v18357_v15, %v12982_v13 }
 0x10d   :  { %6556 = vmatpush.bf16.msra.mxu3 %v13623_v0  ;;  %v18485_v17 = vld [vmem:[#allocation5 + $0xc44] sm:$0xf0]  ;;  %6531 = vmatpush.bf16.msra.mxu1 %v12535_v9 }
 0x10e   :  { %v14454_v18 = vld [vmem:[#allocation5 + $0x1388] sm:$0xf]  ;;  %v13495_v29 = vor.u32 %v18485_v17, %v13494_v16 }
 0x10f   :  { %v18725_v19 = vld [vmem:[#allocation5 + $0x13c4] sm:$0xf0]  ;;  %6544 = vmatpush.bf16.msra.mxu2 %v13047_v10  ;;  %6519 = vmatpush.bf16.msra.mxu0 %v11959_v21 }
 0x110   :  { %v14966_v20 = vld [vmem:[#allocation5 + $0x1788] sm:$0xf]  ;;  %v14455_v30 = vor.u32 %v18725_v19, %v14454_v18 }
 0x111   :  { %v18853_v22 = vld [vmem:[#allocation5 + $0x17c4] sm:$0xf0]  ;;  %6557 = vmatpush.bf16.msra.mxu3 %v13559_v14  ;;  %6532 = vmatpush.bf16.msra.mxu1 %v12471_v25 }
 0x112   :  { %v15478_v23 = vld [vmem:[#allocation5 + $0x1b88] sm:$0xf]  ;;  %v14967_v31 = vor.u32 %v18853_v22, %v14966_v20  ;;  %6520 = vmatmul.bf16.vlgmr.msra.gmra.mxu0 %v19855_v34 }
 0x113   :  { %v18981_v24 = vld [vmem:[#allocation5 + $0x1bc4] sm:$0xf0]  ;;  %6545 = vmatpush.bf16.msra.mxu2 %v12983_v26  ;;  %6564 = vmatpush.bf16.msrb.mxu0 %v14455_v30 }
 0x114   :  { %v15990_v27 = vld [vmem:[#allocation5 + $0x1f88] sm:$0xf]  ;;  %v15479_v35 = vor.u32 %v18981_v24, %v15478_v23  ;;  %6533 = vmatmul.bf16.vlgmr.msra.gmra.mxu1 %v19859_v42 }
 0x115   :  { %v19109_v28 = vld [vmem:[#allocation5 + $0x1fc4] sm:$0xf0]  ;;  %6558 = vmatpush.bf16.msra.mxu3 %v13495_v29  ;;  %6577 = vmatpush.bf16.msrb.mxu1 %v14967_v31 }
 0x116   :  { %v14390_v36 = vld [vmem:[#allocation5 + $0x1308] sm:$0xf]  ;;  %v15991_v44 = vor.u32 %v19109_v28, %v15990_v27  ;;  %6546 = vmatmul.bf16.vlgmr.msra.gmra.mxu2 %v19853_v33 }
 0x117   :  { %v18709_v39 = vld [vmem:[#allocation5 + $0x1344] sm:$0xf0]  ;;  %6590 = vmatpush.bf16.msrb.mxu2 %v15479_v35  ;;  %v19889_v35 = vld [vmem:[#allocation7] sm:$0xff] }
 0x118   :  { %v14902_v43 = vld [vmem:[#allocation5 + $0x1708] sm:$0xf]  ;;  %v14391_v50 = vor.u32 %v18709_v39, %v14390_v36  ;;  %6559 = vmatmul.bf16.vlgmr.msra.gmra.mxu3 %v19857_v41 }
 0x119   :  { %v18837_v45 = vld [vmem:[#allocation5 + $0x1744] sm:$0xf0]  ;;  %6603 = vmatpush.bf16.msrb.mxu3 %v15991_v44 }
 0x11a   :  { %v15414_v46 = vld [vmem:[#allocation5 + $0x1b08] sm:$0xf]  ;;  %v14903_v51 = vor.u32 %v18837_v45, %v14902_v43  ;;  %6565 = vmatpush.bf16.msrb.mxu0 %v14391_v50 }
 0x11b   :  { %v18965_v47 = vld [vmem:[#allocation5 + $0x1b44] sm:$0xf0] }
 0x11c   :  { %v15926_v48 = vld [vmem:[#allocation5 + $0x1f08] sm:$0xf]  ;;  %v15415_v52 = vor.u32 %v18965_v47, %v15414_v46  ;;  %6578 = vmatpush.bf16.msrb.mxu1 %v14903_v51 }
 0x11d   :  { %v19093_v49 = vld [vmem:[#allocation5 + $0x1f44] sm:$0xf0] }
 0x11e   :  { %v14326_v53 = vld [vmem:[#allocation5 + $0x1288] sm:$0xf]  ;;  %v15927_v56 = vor.u32 %v19093_v49, %v15926_v48  ;;  %6591 = vmatpush.bf16.msrb.mxu2 %v15415_v52  ;;  %v1152_v49 = vperm.slane %v19889_v35, 0 }
 0x11f   :  { %v18693_v54 = vld [vmem:[#allocation5 + $0x12c4] sm:$0xf0] }
 0x120   :  { %v14838_v55 = vld [vmem:[#allocation5 + $0x1688] sm:$0xf]  ;;  %v14327_v62 = vor.u32 %v18693_v54, %v14326_v53  ;;  %6604 = vmatpush.bf16.msrb.mxu3 %v15927_v56 }
 0x121   :  { %v18821_v57 = vld [vmem:[#allocation5 + $0x16c4] sm:$0xf0] }
 0x122   :  { %v15350_v58 = vld [vmem:[#allocation5 + $0x1a88] sm:$0xf]  ;;  %v14839_v63 = vor.u32 %v18821_v57, %v14838_v55  ;;  %6566 = vmatpush.bf16.msrb.mxu0 %v14327_v62 }
 0x123   :  { %v18949_v59 = vld [vmem:[#allocation5 + $0x1ac4] sm:$0xf0] }
 0x124   :  { %v15862_v60 = vld [vmem:[#allocation5 + $0x1e88] sm:$0xf]  ;;  %v15351_v0 = vor.u32 %v18949_v59, %v15350_v58  ;;  %6579 = vmatpush.bf16.msrb.mxu1 %v14839_v63  ;;  %v6313_v59 = vpop.f32.mrf.mxu0 }
 0x125   :  { %v19077_v61 = vld [vmem:[#allocation5 + $0x1ec4] sm:$0xf0] }
 0x126   :  { %v14262_v1 = vld [vmem:[#allocation5 + $0x1208] sm:$0xf]  ;;  %v15863_v4 = vor.u32 %v19077_v61, %v15862_v60  ;;  %6592 = vmatpush.bf16.msrb.mxu2 %v15351_v0 }
 0x127   :  { %v18677_v2 = vld [vmem:[#allocation5 + $0x1244] sm:$0xf0] }
 0x128   :  { %v14774_v3 = vld [vmem:[#allocation5 + $0x1608] sm:$0xf]  ;;  %v14263_v10 = vor.u32 %v18677_v2, %v14262_v1  ;;  %6605 = vmatpush.bf16.msrb.mxu3 %v15863_v4  ;;  %v6314_v1 = vadd.f32 %v6313_v59, %v1152_v49  ;;  %v18173_v49 = vld [vmem:[#allocation5 + $0x28c] sm:$0xf] }
 0x129   :  { %v18805_v5 = vld [vmem:[#allocation5 + $0x1644] sm:$0xf0] }
 0x12a   :  { %v15286_v6 = vld [vmem:[#allocation5 + $0x1a08] sm:$0xf]  ;;  %v14775_v11 = vor.u32 %v18805_v5, %v14774_v3  ;;  %6567 = vmatpush.bf16.msrb.mxu0 %v14263_v10 }
 0x12b   :  { %v18933_v7 = vld [vmem:[#allocation5 + $0x1a44] sm:$0xf0] }
 0x12c   :  { %v15798_v8 = vld [vmem:[#allocation5 + $0x1e08] sm:$0xf]  ;;  %v15287_v12 = vor.u32 %v18933_v7, %v15286_v6  ;;  %6580 = vmatpush.bf16.msrb.mxu1 %v14775_v11  ;;  %v18205_v6 = vld [vmem:[#allocation5 + $0x38c] sm:$0xf] }
 0x12d   :  { %v19061_v9 = vld [vmem:[#allocation5 + $0x1e44] sm:$0xf0]  ;;  %v12408_v7 = vld [vmem:[#allocation5 + $0x3c8] sm:$0xf0] }
 0x12e   :  { %v14198_v13 = vld [vmem:[#allocation5 + $0x1188] sm:$0xf]  ;;  %v15799_v16 = vor.u32 %v19061_v9, %v15798_v8  ;;  %6593 = vmatpush.bf16.msrb.mxu2 %v15287_v12  ;;  %v18333_v8 = vld [vmem:[#allocation5 + $0x78c] sm:$0xf]  ;;  %v6326_v9 = vpop.f32.mrf.mxu1 }
 0x12f   :  { %v18661_v14 = vld [vmem:[#allocation5 + $0x11c4] sm:$0xf0]  ;;  %v12920_v11 = vld [vmem:[#allocation5 + $0x7c8] sm:$0xf0] }
 0x130   :  { %v14710_v15 = vld [vmem:[#allocation5 + $0x1588] sm:$0xf]  ;;  %v14199_v22 = vor.u32 %v18661_v14, %v14198_v13  ;;  %6606 = vmatpush.bf16.msrb.mxu3 %v15799_v16  ;;  %v18461_v12 = vld [vmem:[#allocation5 + $0xb8c] sm:$0xf]  ;;  %v6327_v14 = vadd.f32 %v6326_v9, %v6314_v1 }
 0x131   :  { %v18789_v17 = vld [vmem:[#allocation5 + $0x15c4] sm:$0xf0]  ;;  %v13432_v13 = vld [vmem:[#allocation5 + $0xbc8] sm:$0xf0] }
 0x132   :  { %v15222_v18 = vld [vmem:[#allocation5 + $0x1988] sm:$0xf]  ;;  %v14711_v24 = vor.u32 %v18789_v17, %v14710_v15  ;;  %6568 = vmatpush.bf16.msrb.mxu0 %v14199_v22  ;;  %v18589_v17 = vld [vmem:[#allocation5 + $0xf8c] sm:$0xf]  ;;  %v12923_v22 = vor.u32 %v18333_v8, %v12920_v11 }
 0x133   :  { %v18917_v19 = vld [vmem:[#allocation5 + $0x19c4] sm:$0xf0]  ;;  %v18285_v1 = vld [vmem:[#allocation5 + $0x60c] sm:$0xf] }
 0x134   :  { %v15734_v20 = vld [vmem:[#allocation5 + $0x1d88] sm:$0xf]  ;;  %v15223_v25 = vor.u32 %v18917_v19, %v15222_v18  ;;  %6581 = vmatpush.bf16.msrb.mxu1 %v14711_v24  ;;  %v13944_v18 = vld [vmem:[#allocation5 + $0xfc8] sm:$0xf0] }
 0x135   :  { %v19045_v21 = vld [vmem:[#allocation5 + $0x1dc4] sm:$0xf0]  ;;  %v18189_v24 = vld [vmem:[#allocation5 + $0x30c] sm:$0xf] }
 0x136   :  { %v14134_v23 = vld [vmem:[#allocation5 + $0x1108] sm:$0xf]  ;;  %v15735_v29 = vor.u32 %v19045_v21, %v15734_v20  ;;  %6594 = vmatpush.bf16.msrb.mxu2 %v15223_v25  ;;  %v12411_v20 = vor.u32 %v18205_v6, %v12408_v7  ;;  %v6339_v21 = vpop.f32.mrf.mxu2  ;;  %v12344_v25 = vld [vmem:[#allocation5 + $0x348] sm:$0xf0] }
 0x137   :  { %v18645_v26 = vld [vmem:[#allocation5 + $0x1144] sm:$0xf0]  ;;  %v13240_v6 = vld [vmem:[#allocation5 + $0xa48] sm:$0xf0] }
 0x138   :  { %v14646_v27 = vld [vmem:[#allocation5 + $0x1508] sm:$0xf]  ;;  %v14135_v43 = vor.u32 %v18645_v26, %v14134_v23  ;;  %6607 = vmatpush.bf16.msrb.mxu3 %v15735_v29  ;;  %v13435_v23 = vor.u32 %v18461_v12, %v13432_v13  ;;  %v18317_v26 = vld [vmem:[#allocation5 + $0x70c] sm:$0xf]  ;;  %v13947_v29 = vor.u32 %v18589_v17, %v13944_v18 }
 0x139   :  { %v18773_v28 = vld [vmem:[#allocation5 + $0x1544] sm:$0xf0]  ;;  %v18541_v7 = vld [vmem:[#allocation5 + $0xe0c] sm:$0xf] }
 0x13a   :  { %v15158_v30 = vld [vmem:[#allocation5 + $0x1908] sm:$0xf]  ;;  %v14647_v45 = vor.u32 %v18773_v28, %v14646_v27  ;;  %6569 = vmatpush.bf16.msrb.mxu0 %v14135_v43  ;;  %v6340_v27 = vadd.f32 %v6339_v21, %v6327_v14  ;;  %v6352_v28 = vpop.f32.mrf.mxu3  ;;  %v18573_v43 = vld [vmem:[#allocation5 + $0xf0c] sm:$0xf] }
 0x13b   :  { %v18901_v31 = vld [vmem:[#allocation5 + $0x1944] sm:$0xf0]  ;;  %v13752_v8 = vld [vmem:[#allocation5 + $0xe48] sm:$0xf0] }
 0x13c   :  { %v15670_v36 = vld [vmem:[#allocation5 + $0x1d08] sm:$0xf]  ;;  %v15159_v46 = vor.u32 %v18901_v31, %v15158_v30  ;;  %6582 = vmatpush.bf16.msrb.mxu1 %v14647_v45  ;;  %v12856_v30 = vld [vmem:[#allocation5 + $0x748] sm:$0xf0]  ;;  %v6353_v45 = vadd.f32 %v6352_v28, %v6340_v27  ;;  %v13755_v18 = vor.u32 %v18541_v7, %v13752_v8 }
 0x13d   :  { %v19029_v39 = vld [vmem:[#allocation5 + $0x1d44] sm:$0xf0]  ;;  %v18445_v31 = vld [vmem:[#allocation5 + $0xb0c] sm:$0xf] }
 0x13e   :  { %v14070_v44 = vld [vmem:[#allocation5 + $0x1088] sm:$0xf]  ;;  %v15671_v50 = vor.u32 %v19029_v39, %v15670_v36  ;;  %6595 = vmatpush.bf16.msrb.mxu2 %v15159_v46  ;;  %v13368_v36 = vld [vmem:[#allocation5 + $0xb48] sm:$0xf0]  ;;  %v6315_v39 = vpop.f32.mrf.mxu0  ;;  %v12347_v46 = vor.u32 %v18189_v24, %v12344_v25 }
 0x13f   :  { %v18629_v47 = vld [vmem:[#allocation5 + $0x10c4] sm:$0xf0]  ;;  %v18141_v13 = vld [vmem:[#allocation5 + $0x18c] sm:$0xf] }
 0x140   :  { %v14582_v48 = vld [vmem:[#allocation5 + $0x1488] sm:$0xf]  ;;  %v14071_v56 = vor.u32 %v18629_v47, %v14070_v44  ;;  %6608 = vmatpush.bf16.msrb.mxu3 %v15671_v50  ;;  %v13880_v44 = vld [vmem:[#allocation5 + $0xf48] sm:$0xf0]  ;;  %v12859_v47 = vor.u32 %v18317_v26, %v12856_v30 }
 0x141   :  { %v18757_v51 = vld [vmem:[#allocation5 + $0x14c4] sm:$0xf0]  ;;  %v12280_v50 = vld [vmem:[#allocation5 + $0x2c8] sm:$0xf0] }
 0x142   :  { %v15094_v52 = vld [vmem:[#allocation5 + $0x1888] sm:$0xf]  ;;  %v14583_v60 = vor.u32 %v18757_v51, %v14582_v48  ;;  %6570 = vmatpush.bf16.msrb.mxu0 %v14071_v56  ;;  %v13371_v48 = vor.u32 %v18445_v31, %v13368_v36  ;;  %v18301_v51 = vld [vmem:[#allocation5 + $0x68c] sm:$0xf]  ;;  %v12283_v59 = vor.u32 %v18173_v49, %v12280_v50 }
 0x143   :  { %v18885_v53 = vld [vmem:[#allocation5 + $0x18c4] sm:$0xf0]  ;;  %v13304_v56 = vld [vmem:[#allocation5 + $0xac8] sm:$0xf0] }
 0x144   :  { %v15606_v54 = vld [vmem:[#allocation5 + $0x1c88] sm:$0xf]  ;;  %v15095_v61 = vor.u32 %v18885_v53, %v15094_v52  ;;  %6583 = vmatpush.bf16.msrb.mxu1 %v14583_v60  ;;  %v6328_v52 = vpop.f32.mrf.mxu1  ;;  %v13883_v53 = vor.u32 %v18573_v43, %v13880_v44  ;;  %v6341_v60 = vpop.f32.mrf.mxu2  ;;  %v12152_v14 = vld [vmem:[#allocation5 + $0x1c8] sm:$0xf0] }
 0x145   :  { %v19013_v55 = vld [vmem:[#allocation5 + $0x1cc4] sm:$0xf0]  ;;  %v13176_v21 = vld [vmem:[#allocation5 + $0x9c8] sm:$0xf0]  ;;  %v12155_v25 = vor.u32 %v18141_v13, %v12152_v14 }
 0x146   :  { %v14006_v57 = vld [vmem:[#allocation5 + $0x1008] sm:$0xf]  ;;  %v15607_v2 = vor.u32 %v19013_v55, %v15606_v54  ;;  %6596 = vmatpush.bf16.msrb.mxu2 %v15095_v61  ;;  %v12792_v54 = vld [vmem:[#allocation5 + $0x6c8] sm:$0xf0] }
 0x147   :  { %v18613_v58 = vld [vmem:[#allocation5 + $0x1044] sm:$0xf0]  ;;  %v18429_v55 = vld [vmem:[#allocation5 + $0xa8c] sm:$0xf]  ;;  %v12795_v61 = vor.u32 %v18301_v51, %v12792_v54 }
 0x148   :  { %v14518_v62 = vld [vmem:[#allocation5 + $0x1408] sm:$0xf]  ;;  %v14007_v10 = vor.u32 %v18613_v58, %v14006_v57  ;;  %6609 = vmatpush.bf16.msrb.mxu3 %v15607_v2  ;;  %v18557_v57 = vld [vmem:[#allocation5 + $0xe8c] sm:$0xf]  ;;  %v6354_v2 = vpop.f32.mrf.mxu3 }
 0x149   :  { %v18741_v63 = vld [vmem:[#allocation5 + $0x1444] sm:$0xf0]  ;;  %v13816_v58 = vld [vmem:[#allocation5 + $0xec8] sm:$0xf0] }
 0x14a   :  { %v15030_v0 = vld [vmem:[#allocation5 + $0x1808] sm:$0xf]  ;;  %v14519_v15 = vor.u32 %v18741_v63, %v14518_v62  ;;  %6571 = vmatpush.bf16.msrb.mxu0 %v14007_v10  ;;  %v13307_v62 = vor.u32 %v18429_v55, %v13304_v56  ;;  %v18157_v63 = vld [vmem:[#allocation5 + $0x20c] sm:$0xf]  ;;  %v6365_v10 = vpop.f32.mrf.mxu0 }
 0x14b   :  { %v18869_v3 = vld [vmem:[#allocation5 + $0x1844] sm:$0xf0]  ;;  %v18125_v28 = vld [vmem:[#allocation5 + $0x10c] sm:$0xf] }
 0x14c   :  { %v15542_v4 = vld [vmem:[#allocation5 + $0x1c08] sm:$0xf]  ;;  %v15031_v16 = vor.u32 %v18869_v3, %v15030_v0  ;;  %6584 = vmatpush.bf16.msrb.mxu1 %v14519_v15  ;;  %v12216_v0 = vld [vmem:[#allocation5 + $0x248] sm:$0xf0]  ;;  %v13819_v3 = vor.u32 %v18557_v57, %v13816_v58  ;;  %v6378_v17 = vpop.f32.mrf.mxu1  ;;  %v6391_v31 = vpop.f32.mrf.mxu2 }
 0x14d   :  { %v18997_v5 = vld [vmem:[#allocation5 + $0x1c44] sm:$0xf0]  ;;  %6572 = vmatmul.bf16.vlgmr.msrb.gmra.mxu0 %v19867_v37  ;;  %v12219_v9 = vor.u32 %v18157_v63, %v12216_v0  ;;  %v18269_v15 = vld [vmem:[#allocation5 + $0x58c] sm:$0xf] }
 0x14e   :  { %v15543_v19 = vor.u32 %v18997_v5, %v15542_v4  ;;  %6597 = vmatpush.bf16.msrb.mxu2 %v15031_v16  ;;  %6616 = vmatpush.bf16.msra.mxu0 %v12411_v20  ;;  %v12728_v4 = vld [vmem:[#allocation5 + $0x648] sm:$0xf0]  ;;  %v6366_v16 = vadd.f32 %v6365_v10, %v6353_v45 }
 0x14f   :  { %6585 = vmatmul.bf16.vlgmr.msrb.gmra.mxu1 %v19871_v40  ;;  %v18413_v5 = vld [vmem:[#allocation5 + $0xa0c] sm:$0xf]  ;;  %v12731_v11 = vor.u32 %v18285_v1, %v12728_v4 }
 0x150   :  { %6610 = vmatpush.bf16.msrb.mxu3 %v15543_v19  ;;  %6629 = vmatpush.bf16.msra.mxu1 %v12923_v22  ;;  %v13243_v12 = vor.u32 %v18413_v5, %v13240_v6  ;;  %v12664_v19 = vld [vmem:[#allocation5 + $0x5c8] sm:$0xf0]  ;;  %v6379_v24 = vadd.f32 %v6378_v17, %v6366_v16 }
 0x151   :  { %6598 = vmatmul.bf16.vlgmr.msrb.gmra.mxu2 %v19865_v32  ;;  %v18397_v20 = vld [vmem:[#allocation5 + $0x98c] sm:$0xf]  ;;  %v12667_v26 = vor.u32 %v18269_v15, %v12664_v19 }
 0x152   :  { %6642 = vmatpush.bf16.msra.mxu2 %v13435_v23  ;;  %6617 = vmatpush.bf16.msra.mxu0 %v12347_v46  ;;  %v18525_v22 = vld [vmem:[#allocation5 + $0xd8c] sm:$0xf]  ;;  %v13179_v27 = vor.u32 %v18397_v20, %v13176_v21  ;;  %v6392_v45 = vadd.f32 %v6391_v31, %v6379_v24  ;;  %v6404_v46 = vpop.f32.mrf.mxu3  ;;  %v6367_v51 = vpop.f32.mrf.mxu0 }
 0x153   :  { %6611 = vmatmul.bf16.vlgmr.msrb.gmra.mxu3 %v19869_v38  ;;  %v13688_v23 = vld [vmem:[#allocation5 + $0xdc8] sm:$0xf0] }
 0x154   :  { %6655 = vmatpush.bf16.msra.mxu3 %v13947_v29  ;;  %6630 = vmatpush.bf16.msra.mxu1 %v12859_v47  ;;  %v12088_v29 = vld [vmem:[#allocation5 + $0x148] sm:$0xf0]  ;;  %v13691_v36 = vor.u32 %v18525_v22, %v13688_v23  ;;  %v19896_v50 = vadd.f32 %v6404_v46, %v6392_v45  ;;  %v6380_v57 = vpop.f32.mrf.mxu1  ;;  %v6393_v8 = vpop.f32.mrf.mxu2 }
 0x155   :  { %v18253_v30 = vld [vmem:[#allocation5 + $0x50c] sm:$0xf]  ;;  %v12091_v49 = vor.u32 %v18125_v28, %v12088_v29 }
 0x156   :  { %6643 = vmatpush.bf16.msra.mxu2 %v13371_v48  ;;  %6618 = vmatpush.bf16.msra.mxu0 %v12283_v59  ;;  %v12600_v39 = vld [vmem:[#allocation5 + $0x548] sm:$0xf0] }
 0x157   :  { %v18381_v43 = vld [vmem:[#allocation5 + $0x90c] sm:$0xf]  ;;  %v12603_v52 = vor.u32 %v18253_v30, %v12600_v39 }
 0x158   :  { %6656 = vmatpush.bf16.msra.mxu3 %v13883_v53  ;;  %6631 = vmatpush.bf16.msra.mxu1 %v12795_v61  ;;  %v13112_v44 = vld [vmem:[#allocation5 + $0x948] sm:$0xf0] }
 0x159   :  { %v18509_v47 = vld [vmem:[#allocation5 + $0xd0c] sm:$0xf]  ;;  %v13115_v53 = vor.u32 %v18381_v43, %v13112_v44 }
 0x15a   :  { %6644 = vmatpush.bf16.msra.mxu2 %v13307_v62  ;;  %6619 = vmatpush.bf16.msra.mxu0 %v12219_v9  ;;  %v13624_v48 = vld [vmem:[#allocation5 + $0xd48] sm:$0xf0]  ;;  %v6406_v13 = vpop.f32.mrf.mxu3 }
 0x15b   :  { %v18109_v54 = vld [vmem:[#allocation5 + $0x8c] sm:$0xf]  ;;  %v13627_v58 = vor.u32 %v18509_v47, %v13624_v48 }
 0x15c   :  { %6657 = vmatpush.bf16.msra.mxu3 %v13819_v3  ;;  %6632 = vmatpush.bf16.msra.mxu1 %v12731_v11  ;;  %v12024_v55 = vld [vmem:[#allocation5 + $0xc8] sm:$0xf0] }
 0x15d   :  { %v18237_v56 = vld [vmem:[#allocation5 + $0x48c] sm:$0xf]  ;;  %v12027_v0 = vor.u32 %v18109_v54, %v12024_v55 }
 0x15e   :  { %6645 = vmatpush.bf16.msra.mxu2 %v13243_v12  ;;  %6620 = vmatpush.bf16.msra.mxu0 %v12155_v25  ;;  %v12536_v59 = vld [vmem:[#allocation5 + $0x4c8] sm:$0xf0] }
 0x15f   :  { %v18365_v60 = vld [vmem:[#allocation5 + $0x88c] sm:$0xf]  ;;  %v12539_v3 = vor.u32 %v18237_v56, %v12536_v59 }
 0x160   :  { %6658 = vmatpush.bf16.msra.mxu3 %v13755_v18  ;;  %6633 = vmatpush.bf16.msra.mxu1 %v12667_v26  ;;  %v13048_v61 = vld [vmem:[#allocation5 + $0x8c8] sm:$0xf0] }
 0x161   :  { %v18493_v62 = vld [vmem:[#allocation5 + $0xc8c] sm:$0xf]  ;;  %v13051_v4 = vor.u32 %v18365_v60, %v13048_v61 }
 0x162   :  { %6646 = vmatpush.bf16.msra.mxu2 %v13179_v27  ;;  %v13560_v63 = vld [vmem:[#allocation5 + $0xcc8] sm:$0xf0]  ;;  %6621 = vmatpush.bf16.msra.mxu0 %v12091_v49 }
 0x163   :  { %v18093_v1 = vld [vmem:[#allocation5 + $0xc] sm:$0xf]  ;;  %v13563_v9 = vor.u32 %v18493_v62, %v13560_v63 }
 0x164   :  { %6659 = vmatpush.bf16.msra.mxu3 %v13691_v36  ;;  %v11960_v2 = vld [vmem:[#allocation5 + $0x48] sm:$0xf0]  ;;  %6634 = vmatpush.bf16.msra.mxu1 %v12603_v52 }
 0x165   :  { %v18221_v5 = vld [vmem:[#allocation5 + $0x40c] sm:$0xf]  ;;  %v11963_v17 = vor.u32 %v18093_v1, %v11960_v2  ;;  %v1153_v2 = vperm.slane %v19889_v35, 1 }
 0x166   :  { %6647 = vmatpush.bf16.msra.mxu2 %v13115_v53  ;;  %v12472_v6 = vld [vmem:[#allocation5 + $0x448] sm:$0xf0]  ;;  %6622 = vmatpush.bf16.msra.mxu0 %v12027_v0 }
 0x167   :  { %v18349_v7 = vld [vmem:[#allocation5 + $0x80c] sm:$0xf]  ;;  %v12475_v21 = vor.u32 %v18221_v5, %v12472_v6 }
 0x168   :  { %6660 = vmatpush.bf16.msra.mxu3 %v13627_v58  ;;  %v12984_v10 = vld [vmem:[#allocation5 + $0x848] sm:$0xf0]  ;;  %6635 = vmatpush.bf16.msra.mxu1 %v12539_v3 }
 0x169   :  { %v18477_v11 = vld [vmem:[#allocation5 + $0xc0c] sm:$0xf]  ;;  %v12987_v22 = vor.u32 %v18349_v7, %v12984_v10  ;;  %v6417_v10 = vpop.f32.mrf.mxu0 }
 0x16a   :  { %v13496_v12 = vld [vmem:[#allocation5 + $0xc48] sm:$0xf0]  ;;  %6648 = vmatpush.bf16.msra.mxu2 %v13051_v4  ;;  %6623 = vmatpush.bf16.msra.mxu0 %v11963_v17  ;;  %v6430_v17 = vpop.f32.mrf.mxu1 }
 0x16b   :  { %v18717_v14 = vld [vmem:[#allocation5 + $0x138c] sm:$0xf]  ;;  %v13499_v25 = vor.u32 %v18477_v11, %v13496_v12 }
 0x16c   :  { %v14456_v15 = vld [vmem:[#allocation5 + $0x13c8] sm:$0xf0]  ;;  %6661 = vmatpush.bf16.msra.mxu3 %v13563_v9  ;;  %6636 = vmatpush.bf16.msra.mxu1 %v12475_v21 }
 0x16d   :  { %v18845_v16 = vld [vmem:[#allocation5 + $0x178c] sm:$0xf]  ;;  %v14459_v26 = vor.u32 %v18717_v14, %v14456_v15  ;;  %6624 = vmatmul.bf16.vlgmr.msra.gmra.mxu0 %v19855_v34 }
 0x16e   :  { %v14968_v18 = vld [vmem:[#allocation5 + $0x17c8] sm:$0xf0]  ;;  %6649 = vmatpush.bf16.msra.mxu2 %v12987_v22 }
 0x16f   :  { %v18973_v19 = vld [vmem:[#allocation5 + $0x1b8c] sm:$0xf]  ;;  %v14971_v27 = vor.u32 %v18845_v16, %v14968_v18  ;;  %6668 = vmatpush.bf16.msrb.mxu0 %v14459_v26  ;;  %6637 = vmatmul.bf16.vlgmr.msra.gmra.mxu1 %v19859_v42  ;;  %v6418_v16 = vadd.f32 %v6417_v10, %v1153_v2 }
 0x170   :  { %v15480_v20 = vld [vmem:[#allocation5 + $0x1bc8] sm:$0xf0]  ;;  %6662 = vmatpush.bf16.msra.mxu3 %v13499_v25 }
 0x171   :  { %v19101_v23 = vld [vmem:[#allocation5 + $0x1f8c] sm:$0xf]  ;;  %v15483_v28 = vor.u32 %v18973_v19, %v15480_v20  ;;  %6681 = vmatpush.bf16.msrb.mxu1 %v14971_v27  ;;  %6650 = vmatmul.bf16.vlgmr.msra.gmra.mxu2 %v19853_v33 }
 0x172   :  { %v15992_v24 = vld [vmem:[#allocation5 + $0x1fc8] sm:$0xf0] }
 0x173   :  { %v18701_v29 = vld [vmem:[#allocation5 + $0x130c] sm:$0xf]  ;;  %v15995_v36 = vor.u32 %v19101_v23, %v15992_v24  ;;  %6694 = vmatpush.bf16.msrb.mxu2 %v15483_v28  ;;  %6663 = vmatmul.bf16.vlgmr.msra.gmra.mxu3 %v19857_v41  ;;  %v6431_v23 = vadd.f32 %v6430_v17, %v6418_v16  ;;  %v12926_v16 = vld [vmem:[#allocation5 + $0x790] sm:$0xf] }
 0x174   :  { %v14392_v30 = vld [vmem:[#allocation5 + $0x1348] sm:$0xf0] }
 0x175   :  { %v18829_v31 = vld [vmem:[#allocation5 + $0x170c] sm:$0xf]  ;;  %v14395_v47 = vor.u32 %v18701_v29, %v14392_v30  ;;  %6707 = vmatpush.bf16.msrb.mxu3 %v15995_v36  ;;  %v6443_v30 = vpop.f32.mrf.mxu2 }
 0x176   :  { %v14904_v39 = vld [vmem:[#allocation5 + $0x1748] sm:$0xf0] }
 0x177   :  { %v18957_v43 = vld [vmem:[#allocation5 + $0x1b0c] sm:$0xf]  ;;  %v14907_v48 = vor.u32 %v18829_v31, %v14904_v39  ;;  %6669 = vmatpush.bf16.msrb.mxu0 %v14395_v47 }
 0x178   :  { %v15416_v44 = vld [vmem:[#allocation5 + $0x1b48] sm:$0xf0] }
 0x179   :  { %v19085_v45 = vld [vmem:[#allocation5 + $0x1f0c] sm:$0xf]  ;;  %v15419_v49 = vor.u32 %v18957_v43, %v15416_v44  ;;  %6682 = vmatpush.bf16.msrb.mxu1 %v14907_v48  ;;  %v6444_v44 = vadd.f32 %v6443_v30, %v6431_v23  ;;  %v18598_v23 = vld [vmem:[#allocation5 + $0xfcc] sm:$0xf0] }
 0x17a   :  { %v15928_v46 = vld [vmem:[#allocation5 + $0x1f48] sm:$0xf0]  ;;  %v12862_v30 = vld [vmem:[#allocation5 + $0x710] sm:$0xf] }
 0x17b   :  { %v18685_v51 = vld [vmem:[#allocation5 + $0x128c] sm:$0xf]  ;;  %v15931_v54 = vor.u32 %v19085_v45, %v15928_v46  ;;  %6695 = vmatpush.bf16.msrb.mxu2 %v15419_v49  ;;  %v6456_v45 = vpop.f32.mrf.mxu3 }
 0x17c   :  { %v14328_v52 = vld [vmem:[#allocation5 + $0x12c8] sm:$0xf0]  ;;  %v19903_v49 = vadd.f32 %v6456_v45, %v6444_v44  ;;  %v13886_v44 = vld [vmem:[#allocation5 + $0xf10] sm:$0xf] }
 0x17d   :  { %v18813_v53 = vld [vmem:[#allocation5 + $0x168c] sm:$0xf]  ;;  %v14331_v60 = vor.u32 %v18685_v51, %v14328_v52  ;;  %6708 = vmatpush.bf16.msrb.mxu3 %v15931_v54  ;;  %v6419_v51 = vpop.f32.mrf.mxu0  ;;  %v18582_v45 = vld [vmem:[#allocation5 + $0xf4c] sm:$0xf0] }
 0x17e   :  { %v14840_v55 = vld [vmem:[#allocation5 + $0x16c8] sm:$0xf0]  ;;  %v12286_v51 = vld [vmem:[#allocation5 + $0x290] sm:$0xf] }
 0x17f   :  { %v18941_v56 = vld [vmem:[#allocation5 + $0x1a8c] sm:$0xf]  ;;  %v14843_v62 = vor.u32 %v18813_v53, %v14840_v55  ;;  %6670 = vmatpush.bf16.msrb.mxu0 %v14331_v60 }
 0x180   :  { %v15352_v57 = vld [vmem:[#allocation5 + $0x1ac8] sm:$0xf0] }
 0x181   :  { %v19069_v58 = vld [vmem:[#allocation5 + $0x1e8c] sm:$0xf]  ;;  %v15355_v63 = vor.u32 %v18941_v56, %v15352_v57  ;;  %6683 = vmatpush.bf16.msrb.mxu1 %v14843_v62  ;;  %v6432_v57 = vpop.f32.mrf.mxu1 }
 0x182   :  { %v15864_v59 = vld [vmem:[#allocation5 + $0x1ec8] sm:$0xf0]  ;;  %v18438_v57 = vld [vmem:[#allocation5 + $0xacc] sm:$0xf0] }
 0x183   :  { %v18669_v61 = vld [vmem:[#allocation5 + $0x120c] sm:$0xf]  ;;  %v15867_v3 = vor.u32 %v19069_v58, %v15864_v59  ;;  %6696 = vmatpush.bf16.msrb.mxu2 %v15355_v63 }
 0x184   :  { %v14264_v0 = vld [vmem:[#allocation5 + $0x1248] sm:$0xf0] }
 0x185   :  { %v18797_v1 = vld [vmem:[#allocation5 + $0x160c] sm:$0xf]  ;;  %v14267_v9 = vor.u32 %v18669_v61, %v14264_v0  ;;  %6709 = vmatpush.bf16.msrb.mxu3 %v15867_v3 }
 0x186   :  { %v14776_v4 = vld [vmem:[#allocation5 + $0x1648] sm:$0xf0] }
 0x187   :  { %v18925_v5 = vld [vmem:[#allocation5 + $0x1a0c] sm:$0xf]  ;;  %v14779_v11 = vor.u32 %v18797_v1, %v14776_v4  ;;  %6671 = vmatpush.bf16.msrb.mxu0 %v14267_v9 }
 0x188   :  { %v15288_v6 = vld [vmem:[#allocation5 + $0x1a48] sm:$0xf0] }
 0x189   :  { %v19053_v7 = vld [vmem:[#allocation5 + $0x1e0c] sm:$0xf]  ;;  %v15291_v12 = vor.u32 %v18925_v5, %v15288_v6  ;;  %6684 = vmatpush.bf16.msrb.mxu1 %v14779_v11 }
 0x18a   :  { %v15800_v8 = vld [vmem:[#allocation5 + $0x1e48] sm:$0xf0] }
 0x18b   :  { %v18653_v13 = vld [vmem:[#allocation5 + $0x118c] sm:$0xf]  ;;  %v15803_v35 = vor.u32 %v19053_v7, %v15800_v8  ;;  %6697 = vmatpush.bf16.msrb.mxu2 %v15291_v12  ;;  %v6445_v8 = vpop.f32.mrf.mxu2 }
 0x18c   :  { %v14200_v14 = vld [vmem:[#allocation5 + $0x11c8] sm:$0xf0] }
 0x18d   :  { %v18781_v15 = vld [vmem:[#allocation5 + $0x158c] sm:$0xf]  ;;  %v14203_v24 = vor.u32 %v18653_v13, %v14200_v14  ;;  %6710 = vmatpush.bf16.msrb.mxu3 %v15803_v35  ;;  %v6458_v13 = vpop.f32.mrf.mxu3  ;;  %v12414_v14 = vld [vmem:[#allocation5 + $0x390] sm:$0xf] }
 0x18e   :  { %v14712_v18 = vld [vmem:[#allocation5 + $0x15c8] sm:$0xf0]  ;;  %v18342_v35 = vld [vmem:[#allocation5 + $0x7cc] sm:$0xf0] }
 0x18f   :  { %v18909_v19 = vld [vmem:[#allocation5 + $0x198c] sm:$0xf]  ;;  %v14715_v25 = vor.u32 %v18781_v15, %v14712_v18  ;;  %6672 = vmatpush.bf16.msrb.mxu0 %v14203_v24  ;;  %v18214_v15 = vld [vmem:[#allocation5 + $0x3cc] sm:$0xf0] }
 0x190   :  { %v15224_v20 = vld [vmem:[#allocation5 + $0x19c8] sm:$0xf0]  ;;  %v13438_v18 = vld [vmem:[#allocation5 + $0xb90] sm:$0xf] }
 0x191   :  { %v19037_v21 = vld [vmem:[#allocation5 + $0x1d8c] sm:$0xf]  ;;  %v15227_v26 = vor.u32 %v18909_v19, %v15224_v20  ;;  %6685 = vmatpush.bf16.msrb.mxu1 %v14715_v25  ;;  %v18470_v19 = vld [vmem:[#allocation5 + $0xbcc] sm:$0xf0]  ;;  %v12415_v25 = vor.u32 %v18214_v15, %v12414_v14 }
 0x192   :  { %v15736_v22 = vld [vmem:[#allocation5 + $0x1dc8] sm:$0xf0]  ;;  %v18150_v13 = vld [vmem:[#allocation5 + $0x1cc] sm:$0xf0] }
 0x193   :  { %v18637_v27 = vld [vmem:[#allocation5 + $0x110c] sm:$0xf]  ;;  %v15739_v31 = vor.u32 %v19037_v21, %v15736_v22  ;;  %6698 = vmatpush.bf16.msrb.mxu2 %v15227_v26  ;;  %v13950_v22 = vld [vmem:[#allocation5 + $0xf90] sm:$0xf]  ;;  %v12927_v26 = vor.u32 %v18342_v35, %v12926_v16  ;;  %v6482_v16 = vpop.f32.mrf.mxu1 }
 0x194   :  { %v14136_v28 = vld [vmem:[#allocation5 + $0x1148] sm:$0xf0]  ;;  %v12670_v14 = vld [vmem:[#allocation5 + $0x590] sm:$0xf] }
 0x195   :  { %v18765_v29 = vld [vmem:[#allocation5 + $0x150c] sm:$0xf]  ;;  %v14139_v48 = vor.u32 %v18637_v27, %v14136_v28  ;;  %6711 = vmatpush.bf16.msrb.mxu3 %v15739_v31  ;;  %v13439_v27 = vor.u32 %v18470_v19, %v13438_v18  ;;  %v12350_v28 = vld [vmem:[#allocation5 + $0x310] sm:$0xf]  ;;  %v13951_v31 = vor.u32 %v18598_v23, %v13950_v22 }
 0x196   :  { %v14648_v36 = vld [vmem:[#allocation5 + $0x1548] sm:$0xf0]  ;;  %v18278_v35 = vld [vmem:[#allocation5 + $0x5cc] sm:$0xf0] }
 0x197   :  { %v18893_v39 = vld [vmem:[#allocation5 + $0x190c] sm:$0xf]  ;;  %v14651_v52 = vor.u32 %v18765_v29, %v14648_v36  ;;  %6673 = vmatpush.bf16.msrb.mxu0 %v14139_v48  ;;  %v18198_v29 = vld [vmem:[#allocation5 + $0x34c] sm:$0xf0] }
 0x198   :  { %v15160_v43 = vld [vmem:[#allocation5 + $0x1948] sm:$0xf0]  ;;  %v18326_v36 = vld [vmem:[#allocation5 + $0x74c] sm:$0xf0] }
 0x199   :  { %v19021_v46 = vld [vmem:[#allocation5 + $0x1d0c] sm:$0xf]  ;;  %v15163_v53 = vor.u32 %v18893_v39, %v15160_v43  ;;  %6686 = vmatpush.bf16.msrb.mxu1 %v14651_v52  ;;  %v13374_v39 = vld [vmem:[#allocation5 + $0xb10] sm:$0xf] }
 0x19a   :  { %v15672_v47 = vld [vmem:[#allocation5 + $0x1d48] sm:$0xf0]  ;;  %v18454_v43 = vld [vmem:[#allocation5 + $0xb4c] sm:$0xf0] }
 0x19b   :  { %v18621_v54 = vld [vmem:[#allocation5 + $0x108c] sm:$0xf]  ;;  %v15675_v58 = vor.u32 %v19021_v46, %v15672_v47  ;;  %6699 = vmatpush.bf16.msrb.mxu2 %v15163_v53  ;;  %v12351_v46 = vor.u32 %v18198_v29, %v12350_v28  ;;  %v12863_v47 = vor.u32 %v18326_v36, %v12862_v30  ;;  %v13375_v48 = vor.u32 %v18454_v43, %v13374_v39  ;;  %v18182_v52 = vld [vmem:[#allocation5 + $0x2cc] sm:$0xf0]  ;;  %v6495_v29 = vpop.f32.mrf.mxu2  ;;  %v6508_v43 = vpop.f32.mrf.mxu3 }
 0x19c   :  { %v14072_v55 = vld [vmem:[#allocation5 + $0x10c8] sm:$0xf0]  ;;  %v12798_v53 = vld [vmem:[#allocation5 + $0x690] sm:$0xf] }
 0x19d   :  { %v18749_v56 = vld [vmem:[#allocation5 + $0x148c] sm:$0xf]  ;;  %v14075_v0 = vor.u32 %v18621_v54, %v14072_v55  ;;  %6712 = vmatpush.bf16.msrb.mxu3 %v15675_v58  ;;  %v13887_v54 = vor.u32 %v18582_v45, %v13886_v44  ;;  %v18310_v55 = vld [vmem:[#allocation5 + $0x6cc] sm:$0xf0] }
 0x19e   :  { %v14584_v59 = vld [vmem:[#allocation5 + $0x14c8] sm:$0xf0]  ;;  %v13822_v58 = vld [vmem:[#allocation5 + $0xe90] sm:$0xf] }
 0x19f   :  { %v18877_v60 = vld [vmem:[#allocation5 + $0x188c] sm:$0xf]  ;;  %v14587_v3 = vor.u32 %v18749_v56, %v14584_v59  ;;  %6674 = vmatpush.bf16.msrb.mxu0 %v14075_v0  ;;  %v13310_v56 = vld [vmem:[#allocation5 + $0xa90] sm:$0xf] }
 0x1a0   :  { %v15096_v61 = vld [vmem:[#allocation5 + $0x18c8] sm:$0xf0]  ;;  %v18566_v59 = vld [vmem:[#allocation5 + $0xecc] sm:$0xf0] }
 0x1a1   :  { %v19005_v62 = vld [vmem:[#allocation5 + $0x1c8c] sm:$0xf]  ;;  %v15099_v4 = vor.u32 %v18877_v60, %v15096_v61  ;;  %6687 = vmatpush.bf16.msrb.mxu1 %v14587_v3  ;;  %v12287_v60 = vor.u32 %v18182_v52, %v12286_v51  ;;  %v12799_v61 = vor.u32 %v18310_v55, %v12798_v53  ;;  %v18166_v0 = vld [vmem:[#allocation5 + $0x24c] sm:$0xf0] }
 0x1a2   :  { %v15608_v63 = vld [vmem:[#allocation5 + $0x1cc8] sm:$0xf0]  ;;  %v18294_v3 = vld [vmem:[#allocation5 + $0x64c] sm:$0xf0] }
 0x1a3   :  { %v18605_v1 = vld [vmem:[#allocation5 + $0x100c] sm:$0xf]  ;;  %v15611_v9 = vor.u32 %v19005_v62, %v15608_v63  ;;  %6700 = vmatpush.bf16.msrb.mxu2 %v15099_v4  ;;  %v13311_v62 = vor.u32 %v18438_v57, %v13310_v56  ;;  %v12222_v63 = vld [vmem:[#allocation5 + $0x210] sm:$0xf]  ;;  %v6484_v56 = vpop.f32.mrf.mxu1 }
 0x1a4   :  { %v14008_v2 = vld [vmem:[#allocation5 + $0x1048] sm:$0xf0]  ;;  %v13246_v4 = vld [vmem:[#allocation5 + $0xa10] sm:$0xf]  ;;  %v12223_v8 = vor.u32 %v18166_v0, %v12222_v63 }
 0x1a5   :  { %v18733_v5 = vld [vmem:[#allocation5 + $0x140c] sm:$0xf]  ;;  %v14011_v17 = vor.u32 %v18605_v1, %v14008_v2  ;;  %6713 = vmatpush.bf16.msrb.mxu3 %v15611_v9  ;;  %v12734_v1 = vld [vmem:[#allocation5 + $0x610] sm:$0xf]  ;;  %v13823_v2 = vor.u32 %v18566_v59, %v13822_v58  ;;  %v6469_v9 = vpop.f32.mrf.mxu0 }
 0x1a6   :  { %v14520_v6 = vld [vmem:[#allocation5 + $0x1448] sm:$0xf0]  ;;  %v6470_v15 = vadd.f32 %v6469_v9, %v19903_v49  ;;  %v13182_v18 = vld [vmem:[#allocation5 + $0x990] sm:$0xf] }
 0x1a7   :  { %v18861_v7 = vld [vmem:[#allocation5 + $0x180c] sm:$0xf]  ;;  %v14523_v20 = vor.u32 %v18733_v5, %v14520_v6  ;;  %6675 = vmatpush.bf16.msrb.mxu0 %v14011_v17  ;;  %v18422_v5 = vld [vmem:[#allocation5 + $0xa4c] sm:$0xf0] }
 0x1a8   :  { %v15032_v10 = vld [vmem:[#allocation5 + $0x1848] sm:$0xf0]  ;;  %v13758_v6 = vld [vmem:[#allocation5 + $0xe10] sm:$0xf]  ;;  %v6483_v22 = vadd.f32 %v6482_v16, %v6470_v15 }
 0x1a9   :  { %v18989_v11 = vld [vmem:[#allocation5 + $0x1c0c] sm:$0xf]  ;;  %v15035_v21 = vor.u32 %v18861_v7, %v15032_v10  ;;  %6688 = vmatpush.bf16.msrb.mxu1 %v14523_v20  ;;  %v18550_v7 = vld [vmem:[#allocation5 + $0xe4c] sm:$0xf0]  ;;  %v12735_v10 = vor.u32 %v18294_v3, %v12734_v1 }
 0x1aa   :  { %v15544_v12 = vld [vmem:[#allocation5 + $0x1c48] sm:$0xf0]  ;;  %6676 = vmatmul.bf16.vlgmr.msrb.gmra.mxu0 %v19867_v37  ;;  %v13759_v17 = vor.u32 %v18550_v7, %v13758_v6  ;;  %v18406_v19 = vld [vmem:[#allocation5 + $0x9cc] sm:$0xf0]  ;;  %v6496_v39 = vadd.f32 %v6495_v29, %v6483_v22  ;;  %v6497_v7 = vpop.f32.mrf.mxu2 }
 0x1ab   :  { %v15547_v24 = vor.u32 %v18989_v11, %v15544_v12  ;;  %6701 = vmatpush.bf16.msrb.mxu2 %v15035_v21  ;;  %6720 = vmatpush.bf16.msra.mxu0 %v12415_v25  ;;  %v13247_v11 = vor.u32 %v18422_v5, %v13246_v4  ;;  %v12158_v12 = vld [vmem:[#allocation5 + $0x190] sm:$0xf]  ;;  %v13183_v25 = vor.u32 %v18406_v19, %v13182_v18 }
 0x1ac   :  { %6689 = vmatmul.bf16.vlgmr.msrb.gmra.mxu1 %v19871_v40  ;;  %v13694_v20 = vld [vmem:[#allocation5 + $0xd90] sm:$0xf]  ;;  %v12159_v23 = vor.u32 %v18150_v13, %v12158_v12  ;;  %v6510_v12 = vpop.f32.mrf.mxu3 }
 0x1ad   :  { %6714 = vmatpush.bf16.msrb.mxu3 %v15547_v24  ;;  %6733 = vmatpush.bf16.msra.mxu1 %v12927_v26  ;;  %v18534_v21 = vld [vmem:[#allocation5 + $0xdcc] sm:$0xf0]  ;;  %v12671_v24 = vor.u32 %v18278_v35, %v12670_v14 }
 0x1ae   :  { %6702 = vmatmul.bf16.vlgmr.msrb.gmra.mxu2 %v19865_v32  ;;  %v12094_v26 = vld [vmem:[#allocation5 + $0x110] sm:$0xf]  ;;  %v13695_v49 = vor.u32 %v18534_v21, %v13694_v20 }
 0x1af   :  { %6746 = vmatpush.bf16.msra.mxu2 %v13439_v27  ;;  %6721 = vmatpush.bf16.msra.mxu0 %v12351_v46  ;;  %v18134_v27 = vld [vmem:[#allocation5 + $0x14c] sm:$0xf0] }
 0x1b0   :  { %6715 = vmatmul.bf16.vlgmr.msrb.gmra.mxu3 %v19869_v38  ;;  %v12606_v28 = vld [vmem:[#allocation5 + $0x510] sm:$0xf]  ;;  %v12095_v46 = vor.u32 %v18134_v27, %v12094_v26 }
 0x1b1   :  { %6759 = vmatpush.bf16.msra.mxu3 %v13951_v31  ;;  %6734 = vmatpush.bf16.msra.mxu1 %v12863_v47  ;;  %v18262_v30 = vld [vmem:[#allocation5 + $0x54c] sm:$0xf0]  ;;  %v19910_v47 = vadd.f32 %v6508_v43, %v6496_v39 }
 0x1b2   :  { %v13118_v31 = vld [vmem:[#allocation5 + $0x910] sm:$0xf]  ;;  %v12607_v51 = vor.u32 %v18262_v30, %v12606_v28 }
 0x1b3   :  { %6747 = vmatpush.bf16.msra.mxu2 %v13375_v48  ;;  %6722 = vmatpush.bf16.msra.mxu0 %v12287_v60  ;;  %v18390_v36 = vld [vmem:[#allocation5 + $0x94c] sm:$0xf0]  ;;  %v6471_v48 = vpop.f32.mrf.mxu0 }
 0x1b4   :  { %v13630_v44 = vld [vmem:[#allocation5 + $0xd10] sm:$0xf]  ;;  %v13119_v52 = vor.u32 %v18390_v36, %v13118_v31 }
 0x1b5   :  { %6760 = vmatpush.bf16.msra.mxu3 %v13887_v54  ;;  %6735 = vmatpush.bf16.msra.mxu1 %v12799_v61  ;;  %v18518_v45 = vld [vmem:[#allocation5 + $0xd4c] sm:$0xf0] }
 0x1b6   :  { %v12030_v53 = vld [vmem:[#allocation5 + $0x90] sm:$0xf]  ;;  %v13631_v57 = vor.u32 %v18518_v45, %v13630_v44 }
 0x1b7   :  { %6748 = vmatpush.bf16.msra.mxu2 %v13311_v62  ;;  %6723 = vmatpush.bf16.msra.mxu0 %v12223_v8  ;;  %v18118_v54 = vld [vmem:[#allocation5 + $0xcc] sm:$0xf0] }
 0x1b8   :  { %v12542_v55 = vld [vmem:[#allocation5 + $0x490] sm:$0xf]  ;;  %v12031_v63 = vor.u32 %v18118_v54, %v12030_v53 }
 0x1b9   :  { %6761 = vmatpush.bf16.msra.mxu3 %v13823_v2  ;;  %6736 = vmatpush.bf16.msra.mxu1 %v12735_v10  ;;  %v18246_v58 = vld [vmem:[#allocation5 + $0x4cc] sm:$0xf0] }
 0x1ba   :  { %v13054_v59 = vld [vmem:[#allocation5 + $0x890] sm:$0xf]  ;;  %v12543_v2 = vor.u32 %v18246_v58, %v12542_v55 }
 0x1bb   :  { %6749 = vmatpush.bf16.msra.mxu2 %v13247_v11  ;;  %6724 = vmatpush.bf16.msra.mxu0 %v12159_v23  ;;  %v18374_v60 = vld [vmem:[#allocation5 + $0x8cc] sm:$0xf0] }
 0x1bc   :  { %v13566_v61 = vld [vmem:[#allocation5 + $0xc90] sm:$0xf]  ;;  %v13055_v3 = vor.u32 %v18374_v60, %v13054_v59 }
 0x1bd   :  { %6762 = vmatpush.bf16.msra.mxu3 %v13759_v17  ;;  %6737 = vmatpush.bf16.msra.mxu1 %v12671_v24  ;;  %v18502_v62 = vld [vmem:[#allocation5 + $0xccc] sm:$0xf0] }
 0x1be   :  { %v11966_v0 = vld [vmem:[#allocation5 + $0x10] sm:$0xf]  ;;  %v13567_v8 = vor.u32 %v18502_v62, %v13566_v61 }
 0x1bf   :  { %6750 = vmatpush.bf16.msra.mxu2 %v13183_v25  ;;  %6725 = vmatpush.bf16.msra.mxu0 %v12095_v46  ;;  %v18102_v1 = vld [vmem:[#allocation5 + $0x4c] sm:$0xf0] }
 0x1c0   :  { %v12478_v4 = vld [vmem:[#allocation5 + $0x410] sm:$0xf]  ;;  %v11967_v16 = vor.u32 %v18102_v1, %v11966_v0  ;;  %v19916_v1 = vld [vmem:[#allocation7] sm:$0xff] }
 0x1c1   :  { %6763 = vmatpush.bf16.msra.mxu3 %v13695_v49  ;;  %6738 = vmatpush.bf16.msra.mxu1 %v12607_v51  ;;  %v18230_v5 = vld [vmem:[#allocation5 + $0x44c] sm:$0xf0] }
 0x1c2   :  { %v12990_v6 = vld [vmem:[#allocation5 + $0x810] sm:$0xf]  ;;  %v12479_v19 = vor.u32 %v18230_v5, %v12478_v4 }
 0x1c3   :  { %6751 = vmatpush.bf16.msra.mxu2 %v13119_v52  ;;  %v18358_v9 = vld [vmem:[#allocation5 + $0x84c] sm:$0xf0]  ;;  %6726 = vmatpush.bf16.msra.mxu0 %v12031_v63 }
 0x1c4   :  { %v13502_v10 = vld [vmem:[#allocation5 + $0xc10] sm:$0xf]  ;;  %v12991_v20 = vor.u32 %v18358_v9, %v12990_v6 }
 0x1c5   :  { %6764 = vmatpush.bf16.msra.mxu3 %v13631_v57  ;;  %v18486_v11 = vld [vmem:[#allocation5 + $0xc4c] sm:$0xf0]  ;;  %6739 = vmatpush.bf16.msra.mxu1 %v12543_v2  ;;  %v1154_v2 = vperm.slane %v19916_v1, 2 }
 0x1c6   :  { %v14462_v13 = vld [vmem:[#allocation5 + $0x1390] sm:$0xf]  ;;  %v13503_v23 = vor.u32 %v18486_v11, %v13502_v10  ;;  %v6521_v10 = vpop.f32.mrf.mxu0 }
 0x1c7   :  { %v18726_v14 = vld [vmem:[#allocation5 + $0x13cc] sm:$0xf0]  ;;  %6752 = vmatpush.bf16.msra.mxu2 %v13055_v3  ;;  %6727 = vmatpush.bf16.msra.mxu0 %v11967_v16  ;;  %v6522_v16 = vadd.f32 %v6521_v10, %v1154_v2 }
 0x1c8   :  { %v14974_v15 = vld [vmem:[#allocation5 + $0x1790] sm:$0xf]  ;;  %v14463_v24 = vor.u32 %v18726_v14, %v14462_v13 }
 0x1c9   :  { %v18854_v17 = vld [vmem:[#allocation5 + $0x17cc] sm:$0xf0]  ;;  %6765 = vmatpush.bf16.msra.mxu3 %v13567_v8  ;;  %6740 = vmatpush.bf16.msra.mxu1 %v12479_v19 }
 0x1ca   :  { %v15486_v35 = vld [vmem:[#allocation5 + $0x1b90] sm:$0xf]  ;;  %v14975_v25 = vor.u32 %v18854_v17, %v14974_v15  ;;  %6728 = vmatmul.bf16.vlgmr.msra.gmra.mxu0 %v19855_v34  ;;  %v6534_v17 = vpop.f32.mrf.mxu1 }
 0x1cb   :  { %v18982_v18 = vld [vmem:[#allocation5 + $0x1bcc] sm:$0xf0]  ;;  %6753 = vmatpush.bf16.msra.mxu2 %v12991_v20  ;;  %6772 = vmatpush.bf16.msrb.mxu0 %v14463_v24 }
 0x1cc   :  { %v15998_v21 = vld [vmem:[#allocation5 + $0x1f90] sm:$0xf]  ;;  %v15487_v26 = vor.u32 %v18982_v18, %v15486_v35  ;;  %6741 = vmatmul.bf16.vlgmr.msra.gmra.mxu1 %v19859_v42 }
 0x1cd   :  { %v19110_v22 = vld [vmem:[#allocation5 + $0x1fcc] sm:$0xf0]  ;;  %6766 = vmatpush.bf16.msra.mxu3 %v13503_v23  ;;  %6785 = vmatpush.bf16.msrb.mxu1 %v14975_v25  ;;  %v6535_v23 = vadd.f32 %v6534_v17, %v6522_v16  ;;  %v18206_v16 = vld [vmem:[#allocation5 + $0x394] sm:$0xf] }
 0x1ce   :  { %v14398_v27 = vld [vmem:[#allocation5 + $0x1310] sm:$0xf]  ;;  %v15999_v49 = vor.u32 %v19110_v22, %v15998_v21  ;;  %6754 = vmatmul.bf16.vlgmr.msra.gmra.mxu2 %v19853_v33  ;;  %v12416_v17 = vld [vmem:[#allocation5 + $0x3d0] sm:$0xf0] }
 0x1cf   :  { %v18710_v28 = vld [vmem:[#allocation5 + $0x134c] sm:$0xf0]  ;;  %6798 = vmatpush.bf16.msrb.mxu2 %v15487_v26 }
 0x1d0   :  { %v14910_v29 = vld [vmem:[#allocation5 + $0x1710] sm:$0xf]  ;;  %v14399_v44 = vor.u32 %v18710_v28, %v14398_v27  ;;  %6767 = vmatmul.bf16.vlgmr.msra.gmra.mxu3 %v19857_v41 }
 0x1d1   :  { %v18838_v30 = vld [vmem:[#allocation5 + $0x174c] sm:$0xf0]  ;;  %6811 = vmatpush.bf16.msrb.mxu3 %v15999_v49  ;;  %v6547_v49 = vpop.f32.mrf.mxu2 }
 0x1d2   :  { %v15422_v31 = vld [vmem:[#allocation5 + $0x1b10] sm:$0xf]  ;;  %v14911_v45 = vor.u32 %v18838_v30, %v14910_v29  ;;  %6773 = vmatpush.bf16.msrb.mxu0 %v14399_v44  ;;  %v6560_v44 = vpop.f32.mrf.mxu3 }
 0x1d3   :  { %v18966_v36 = vld [vmem:[#allocation5 + $0x1b4c] sm:$0xf0] }
 0x1d4   :  { %v15934_v39 = vld [vmem:[#allocation5 + $0x1f10] sm:$0xf]  ;;  %v15423_v46 = vor.u32 %v18966_v36, %v15422_v31  ;;  %6786 = vmatpush.bf16.msrb.mxu1 %v14911_v45 }
 0x1d5   :  { %v19094_v43 = vld [vmem:[#allocation5 + $0x1f4c] sm:$0xf0] }
 0x1d6   :  { %v14334_v48 = vld [vmem:[#allocation5 + $0x1290] sm:$0xf]  ;;  %v15935_v53 = vor.u32 %v19094_v43, %v15934_v39  ;;  %6799 = vmatpush.bf16.msrb.mxu2 %v15423_v46  ;;  %v6548_v43 = vadd.f32 %v6547_v49, %v6535_v23  ;;  %v18190_v49 = vld [vmem:[#allocation5 + $0x314] sm:$0xf] }
 0x1d7   :  { %v18694_v51 = vld [vmem:[#allocation5 + $0x12cc] sm:$0xf0] }
 0x1d8   :  { %v14846_v52 = vld [vmem:[#allocation5 + $0x1690] sm:$0xf]  ;;  %v14335_v59 = vor.u32 %v18694_v51, %v14334_v48  ;;  %6812 = vmatpush.bf16.msrb.mxu3 %v15935_v53  ;;  %v19919_v51 = vadd.f32 %v6560_v44, %v6548_v43  ;;  %v18446_v43 = vld [vmem:[#allocation5 + $0xb14] sm:$0xf] }
 0x1d9   :  { %v18822_v54 = vld [vmem:[#allocation5 + $0x16cc] sm:$0xf0]  ;;  %v6549_v10 = vpop.f32.mrf.mxu2  ;;  %v13376_v44 = vld [vmem:[#allocation5 + $0xb50] sm:$0xf0] }
 0x1da   :  { %v15358_v55 = vld [vmem:[#allocation5 + $0x1a90] sm:$0xf]  ;;  %v14847_v61 = vor.u32 %v18822_v54, %v14846_v52  ;;  %6774 = vmatpush.bf16.msrb.mxu0 %v14335_v59  ;;  %v6523_v52 = vpop.f32.mrf.mxu0  ;;  %v18542_v10 = vld [vmem:[#allocation5 + $0xe14] sm:$0xf] }
 0x1db   :  { %v18950_v56 = vld [vmem:[#allocation5 + $0x1acc] sm:$0xf0] }
 0x1dc   :  { %v15870_v57 = vld [vmem:[#allocation5 + $0x1e90] sm:$0xf]  ;;  %v15359_v62 = vor.u32 %v18950_v56, %v15358_v55  ;;  %6787 = vmatpush.bf16.msrb.mxu1 %v14847_v61 }
 0x1dd   :  { %v19078_v58 = vld [vmem:[#allocation5 + $0x1ecc] sm:$0xf0] }
 0x1de   :  { %v14270_v60 = vld [vmem:[#allocation5 + $0x1210] sm:$0xf]  ;;  %v15871_v3 = vor.u32 %v19078_v58, %v15870_v57  ;;  %6800 = vmatpush.bf16.msrb.mxu2 %v15359_v62  ;;  %v6536_v58 = vpop.f32.mrf.mxu1 }
 0x1df   :  { %v18678_v63 = vld [vmem:[#allocation5 + $0x124c] sm:$0xf0]  ;;  %v12800_v58 = vld [vmem:[#allocation5 + $0x6d0] sm:$0xf0] }
 0x1e0   :  { %v14782_v0 = vld [vmem:[#allocation5 + $0x1610] sm:$0xf]  ;;  %v14271_v9 = vor.u32 %v18678_v63, %v14270_v60  ;;  %6813 = vmatpush.bf16.msrb.mxu3 %v15871_v3 }
 0x1e1   :  { %v18806_v4 = vld [vmem:[#allocation5 + $0x164c] sm:$0xf0] }
 0x1e2   :  { %v15294_v5 = vld [vmem:[#allocation5 + $0x1a10] sm:$0xf]  ;;  %v14783_v11 = vor.u32 %v18806_v4, %v14782_v0  ;;  %6775 = vmatpush.bf16.msrb.mxu0 %v14271_v9 }
 0x1e3   :  { %v18934_v6 = vld [vmem:[#allocation5 + $0x1a4c] sm:$0xf0] }
 0x1e4   :  { %v15806_v7 = vld [vmem:[#allocation5 + $0x1e10] sm:$0xf]  ;;  %v15295_v12 = vor.u32 %v18934_v6, %v15294_v5  ;;  %6788 = vmatpush.bf16.msrb.mxu1 %v14783_v11 }
 0x1e5   :  { %v19062_v8 = vld [vmem:[#allocation5 + $0x1e4c] sm:$0xf0] }
 0x1e6   :  { %v14206_v13 = vld [vmem:[#allocation5 + $0x1190] sm:$0xf]  ;;  %v15807_v35 = vor.u32 %v19062_v8, %v15806_v7  ;;  %6801 = vmatpush.bf16.msrb.mxu2 %v15295_v12 }
 0x1e7   :  { %v18662_v14 = vld [vmem:[#allocation5 + $0x11cc] sm:$0xf0] }
 0x1e8   :  { %v14718_v15 = vld [vmem:[#allocation5 + $0x1590] sm:$0xf]  ;;  %v14207_v24 = vor.u32 %v18662_v14, %v14206_v13  ;;  %6814 = vmatpush.bf16.msrb.mxu3 %v15807_v35  ;;  %v18334_v35 = vld [vmem:[#allocation5 + $0x794] sm:$0xf] }
 0x1e9   :  { %v18790_v18 = vld [vmem:[#allocation5 + $0x15cc] sm:$0xf0] }
 0x1ea   :  { %v15230_v19 = vld [vmem:[#allocation5 + $0x1990] sm:$0xf]  ;;  %v14719_v25 = vor.u32 %v18790_v18, %v14718_v15  ;;  %6776 = vmatpush.bf16.msrb.mxu0 %v14207_v24  ;;  %v6562_v15 = vpop.f32.mrf.mxu3  ;;  %v18590_v24 = vld [vmem:[#allocation5 + $0xf94] sm:$0xf] }
 0x1eb   :  { %v18918_v20 = vld [vmem:[#allocation5 + $0x19cc] sm:$0xf0] }
 0x1ec   :  { %v15742_v21 = vld [vmem:[#allocation5 + $0x1d90] sm:$0xf]  ;;  %v15231_v26 = vor.u32 %v18918_v20, %v15230_v19  ;;  %6789 = vmatpush.bf16.msrb.mxu1 %v14719_v25  ;;  %v12928_v19 = vld [vmem:[#allocation5 + $0x7d0] sm:$0xf0] }
 0x1ed   :  { %v19046_v22 = vld [vmem:[#allocation5 + $0x1dcc] sm:$0xf0]  ;;  %v18462_v20 = vld [vmem:[#allocation5 + $0xb94] sm:$0xf] }
 0x1ee   :  { %v14142_v27 = vld [vmem:[#allocation5 + $0x1110] sm:$0xf]  ;;  %v15743_v30 = vor.u32 %v19046_v22, %v15742_v21  ;;  %6802 = vmatpush.bf16.msrb.mxu2 %v15231_v26  ;;  %v13440_v21 = vld [vmem:[#allocation5 + $0xbd0] sm:$0xf0] }
 0x1ef   :  { %v18646_v28 = vld [vmem:[#allocation5 + $0x114c] sm:$0xf0]  ;;  %v13952_v25 = vld [vmem:[#allocation5 + $0xfd0] sm:$0xf0] }
 0x1f0   :  { %v14654_v29 = vld [vmem:[#allocation5 + $0x1510] sm:$0xf]  ;;  %v14143_v48 = vor.u32 %v18646_v28, %v14142_v27  ;;  %6815 = vmatpush.bf16.msrb.mxu3 %v15743_v30  ;;  %v12419_v27 = vor.u32 %v18206_v16, %v12416_v17  ;;  %v12931_v28 = vor.u32 %v18334_v35, %v12928_v19  ;;  %v12352_v30 = vld [vmem:[#allocation5 + $0x350] sm:$0xf0]  ;;  %v6586_v19 = vpop.f32.mrf.mxu1 }
 0x1f1   :  { %v18774_v31 = vld [vmem:[#allocation5 + $0x154c] sm:$0xf0]  ;;  %v18142_v16 = vld [vmem:[#allocation5 + $0x194] sm:$0xf] }
 0x1f2   :  { %v15166_v36 = vld [vmem:[#allocation5 + $0x1910] sm:$0xf]  ;;  %v14655_v53 = vor.u32 %v18774_v31, %v14654_v29  ;;  %6777 = vmatpush.bf16.msrb.mxu0 %v14143_v48  ;;  %v13443_v29 = vor.u32 %v18462_v20, %v13440_v21  ;;  %v18318_v31 = vld [vmem:[#allocation5 + $0x714] sm:$0xf]  ;;  %v12355_v48 = vor.u32 %v18190_v49, %v12352_v30 }
 0x1f3   :  { %v18902_v39 = vld [vmem:[#allocation5 + $0x194c] sm:$0xf0]  ;;  %v12160_v17 = vld [vmem:[#allocation5 + $0x1d0] sm:$0xf0] }
 0x1f4   :  { %v15678_v45 = vld [vmem:[#allocation5 + $0x1d10] sm:$0xf]  ;;  %v15167_v54 = vor.u32 %v18902_v39, %v15166_v36  ;;  %6790 = vmatpush.bf16.msrb.mxu1 %v14655_v53  ;;  %v13955_v36 = vor.u32 %v18590_v24, %v13952_v25  ;;  %v12864_v39 = vld [vmem:[#allocation5 + $0x750] sm:$0xf0]  ;;  %v13379_v53 = vor.u32 %v18446_v43, %v13376_v44 }
 0x1f5   :  { %v19030_v46 = vld [vmem:[#allocation5 + $0x1d4c] sm:$0xf0]  ;;  %v12867_v52 = vor.u32 %v18318_v31, %v12864_v39  ;;  %v18270_v35 = vld [vmem:[#allocation5 + $0x594] sm:$0xf] }
 0x1f6   :  { %v14078_v55 = vld [vmem:[#allocation5 + $0x1090] sm:$0xf]  ;;  %v15679_v59 = vor.u32 %v19030_v46, %v15678_v45  ;;  %6803 = vmatpush.bf16.msrb.mxu2 %v15167_v54  ;;  %v18574_v45 = vld [vmem:[#allocation5 + $0xf14] sm:$0xf] }
 0x1f7   :  { %v18630_v56 = vld [vmem:[#allocation5 + $0x10cc] sm:$0xf0]  ;;  %v13888_v46 = vld [vmem:[#allocation5 + $0xf50] sm:$0xf0] }
 0x1f8   :  { %v14590_v57 = vld [vmem:[#allocation5 + $0x1490] sm:$0xf]  ;;  %v14079_v2 = vor.u32 %v18630_v56, %v14078_v55  ;;  %6816 = vmatpush.bf16.msrb.mxu3 %v15679_v59  ;;  %v18174_v54 = vld [vmem:[#allocation5 + $0x294] sm:$0xf] }
 0x1f9   :  { %v18758_v60 = vld [vmem:[#allocation5 + $0x14cc] sm:$0xf0]  ;;  %v12288_v55 = vld [vmem:[#allocation5 + $0x2d0] sm:$0xf0] }
 0x1fa   :  { %v15102_v61 = vld [vmem:[#allocation5 + $0x1890] sm:$0xf]  ;;  %v14591_v5 = vor.u32 %v18758_v60, %v14590_v57  ;;  %6778 = vmatpush.bf16.msrb.mxu0 %v14079_v2  ;;  %v18302_v56 = vld [vmem:[#allocation5 + $0x694] sm:$0xf]  ;;  %v13891_v57 = vor.u32 %v18574_v45, %v13888_v46  ;;  %v6612_v46 = vpop.f32.mrf.mxu3 }
 0x1fb   :  { %v18886_v62 = vld [vmem:[#allocation5 + $0x18cc] sm:$0xf0]  ;;  %v18430_v59 = vld [vmem:[#allocation5 + $0xa94] sm:$0xf] }
 0x1fc   :  { %v15614_v63 = vld [vmem:[#allocation5 + $0x1c90] sm:$0xf]  ;;  %v15103_v6 = vor.u32 %v18886_v62, %v15102_v61  ;;  %6791 = vmatpush.bf16.msrb.mxu1 %v14591_v5  ;;  %v13312_v60 = vld [vmem:[#allocation5 + $0xad0] sm:$0xf0] }
 0x1fd   :  { %v19014_v0 = vld [vmem:[#allocation5 + $0x1ccc] sm:$0xf0]  ;;  %v18558_v61 = vld [vmem:[#allocation5 + $0xe94] sm:$0xf]  ;;  %v13315_v2 = vor.u32 %v18430_v59, %v13312_v60 }
 0x1fe   :  { %v14014_v3 = vld [vmem:[#allocation5 + $0x1010] sm:$0xf]  ;;  %v15615_v11 = vor.u32 %v19014_v0, %v15614_v63  ;;  %6804 = vmatpush.bf16.msrb.mxu2 %v15103_v6  ;;  %v13824_v62 = vld [vmem:[#allocation5 + $0xed0] sm:$0xf0]  ;;  %v12291_v63 = vor.u32 %v18174_v54, %v12288_v55  ;;  %v12803_v0 = vor.u32 %v18302_v56, %v12800_v58 }
 0x1ff   :  { %v18614_v4 = vld [vmem:[#allocation5 + $0x104c] sm:$0xf0]  ;;  %v18286_v5 = vld [vmem:[#allocation5 + $0x614] sm:$0xf]  ;;  %v13827_v6 = vor.u32 %v18558_v61, %v13824_v62  ;;  %v6588_v61 = vpop.f32.mrf.mxu1 }
 0x200   :  { %v14526_v7 = vld [vmem:[#allocation5 + $0x1410] sm:$0xf]  ;;  %v14015_v18 = vor.u32 %v18614_v4, %v14014_v3  ;;  %6817 = vmatpush.bf16.msrb.mxu3 %v15615_v11  ;;  %v18158_v3 = vld [vmem:[#allocation5 + $0x214] sm:$0xf] }
 0x201   :  { %v18742_v8 = vld [vmem:[#allocation5 + $0x144c] sm:$0xf0]  ;;  %v12224_v4 = vld [vmem:[#allocation5 + $0x250] sm:$0xf0] }
 0x202   :  { %v15038_v9 = vld [vmem:[#allocation5 + $0x1810] sm:$0xf]  ;;  %v14527_v22 = vor.u32 %v18742_v8, %v14526_v7  ;;  %6779 = vmatpush.bf16.msrb.mxu0 %v14015_v18  ;;  %v12736_v7 = vld [vmem:[#allocation5 + $0x650] sm:$0xf0] }
 0x203   :  { %v18870_v12 = vld [vmem:[#allocation5 + $0x184c] sm:$0xf0]  ;;  %v18414_v8 = vld [vmem:[#allocation5 + $0xa14] sm:$0xf] }
 0x204   :  { %v15550_v13 = vld [vmem:[#allocation5 + $0x1c10] sm:$0xf]  ;;  %v15039_v23 = vor.u32 %v18870_v12, %v15038_v9  ;;  %6792 = vmatpush.bf16.msrb.mxu1 %v14527_v22  ;;  %v13248_v9 = vld [vmem:[#allocation5 + $0xa50] sm:$0xf0]  ;;  %v12227_v12 = vor.u32 %v18158_v3, %v12224_v4 }
 0x205   :  { %v18998_v14 = vld [vmem:[#allocation5 + $0x1c4c] sm:$0xf0]  ;;  %6780 = vmatmul.bf16.vlgmr.msrb.gmra.mxu0 %v19867_v37  ;;  %v13760_v11 = vld [vmem:[#allocation5 + $0xe50] sm:$0xf0]  ;;  %v13251_v15 = vor.u32 %v18414_v8, %v13248_v9 }
 0x206   :  { %v15551_v26 = vor.u32 %v18998_v14, %v15550_v13  ;;  %6805 = vmatpush.bf16.msrb.mxu2 %v15039_v23  ;;  %6824 = vmatpush.bf16.msra.mxu0 %v12419_v27  ;;  %v6573_v13 = vpop.f32.mrf.mxu0  ;;  %v12739_v14 = vor.u32 %v18286_v5, %v12736_v7  ;;  %v13763_v20 = vor.u32 %v18542_v10, %v13760_v11  ;;  %v12672_v21 = vld [vmem:[#allocation5 + $0x5d0] sm:$0xf0] }
 0x207   :  { %6793 = vmatmul.bf16.vlgmr.msrb.gmra.mxu1 %v19871_v40  ;;  %v6574_v18 = vadd.f32 %v6573_v13, %v19919_v51  ;;  %v18398_v22 = vld [vmem:[#allocation5 + $0x994] sm:$0xf]  ;;  %v12163_v27 = vor.u32 %v18142_v16, %v12160_v17 }
 0x208   :  { %6818 = vmatpush.bf16.msrb.mxu3 %v15551_v26  ;;  %6837 = vmatpush.bf16.msra.mxu1 %v12931_v28  ;;  %v13184_v23 = vld [vmem:[#allocation5 + $0x9d0] sm:$0xf0]  ;;  %v12675_v28 = vor.u32 %v18270_v35, %v12672_v21  ;;  %v6614_v35 = vpop.f32.mrf.mxu3 }
 0x209   :  { %6806 = vmatmul.bf16.vlgmr.msrb.gmra.mxu2 %v19865_v32  ;;  %v18526_v24 = vld [vmem:[#allocation5 + $0xd94] sm:$0xf]  ;;  %v6587_v26 = vadd.f32 %v6586_v19, %v6574_v18 }
 0x20a   :  { %6850 = vmatpush.bf16.msra.mxu2 %v13443_v29  ;;  %6825 = vmatpush.bf16.msra.mxu0 %v12355_v48  ;;  %v13696_v25 = vld [vmem:[#allocation5 + $0xdd0] sm:$0xf0]  ;;  %v13187_v29 = vor.u32 %v18398_v22, %v13184_v23 }
 0x20b   :  { %6819 = vmatmul.bf16.vlgmr.msrb.gmra.mxu3 %v19869_v38  ;;  %v18126_v49 = vld [vmem:[#allocation5 + $0x114] sm:$0xf]  ;;  %v13699_v51 = vor.u32 %v18526_v24, %v13696_v25 }
 0x20c   :  { %6863 = vmatpush.bf16.msra.mxu3 %v13955_v36  ;;  %6838 = vmatpush.bf16.msra.mxu1 %v12867_v52  ;;  %v12096_v30 = vld [vmem:[#allocation5 + $0x150] sm:$0xf0]  ;;  %v6599_v36 = vpop.f32.mrf.mxu2 }
 0x20d   :  { %v18254_v31 = vld [vmem:[#allocation5 + $0x514] sm:$0xf]  ;;  %v6600_v45 = vadd.f32 %v6599_v36, %v6587_v26 }
 0x20e   :  { %6851 = vmatpush.bf16.msra.mxu2 %v13379_v53  ;;  %6826 = vmatpush.bf16.msra.mxu0 %v12291_v63  ;;  %v12608_v39 = vld [vmem:[#allocation5 + $0x550] sm:$0xf0]  ;;  %v12099_v53 = vor.u32 %v18126_v49, %v12096_v30  ;;  %v6575_v55 = vpop.f32.mrf.mxu0 }
 0x20f   :  { %v18382_v43 = vld [vmem:[#allocation5 + $0x914] sm:$0xf]  ;;  %v19926_v54 = vadd.f32 %v6612_v46, %v6600_v45  ;;  %v12611_v56 = vor.u32 %v18254_v31, %v12608_v39 }
 0x210   :  { %6864 = vmatpush.bf16.msra.mxu3 %v13891_v57  ;;  %6839 = vmatpush.bf16.msra.mxu1 %v12803_v0  ;;  %v13120_v44 = vld [vmem:[#allocation5 + $0x950] sm:$0xf0] }
 0x211   :  { %v18510_v48 = vld [vmem:[#allocation5 + $0xd14] sm:$0xf]  ;;  %v13123_v57 = vor.u32 %v18382_v43, %v13120_v44 }
 0x212   :  { %6852 = vmatpush.bf16.msra.mxu2 %v13315_v2  ;;  %6827 = vmatpush.bf16.msra.mxu0 %v12227_v12  ;;  %v13632_v52 = vld [vmem:[#allocation5 + $0xd50] sm:$0xf0] }
 0x213   :  { %v18110_v58 = vld [vmem:[#allocation5 + $0x94] sm:$0xf]  ;;  %v13635_v62 = vor.u32 %v18510_v48, %v13632_v52 }
 0x214   :  { %6865 = vmatpush.bf16.msra.mxu3 %v13827_v6  ;;  %6840 = vmatpush.bf16.msra.mxu1 %v12739_v14  ;;  %v12032_v59 = vld [vmem:[#allocation5 + $0xd0] sm:$0xf0]  ;;  %v6601_v13 = vpop.f32.mrf.mxu2 }
 0x215   :  { %v18238_v60 = vld [vmem:[#allocation5 + $0x494] sm:$0xf]  ;;  %v12035_v5 = vor.u32 %v18110_v58, %v12032_v59 }
 0x216   :  { %6853 = vmatpush.bf16.msra.mxu2 %v13251_v15  ;;  %6828 = vmatpush.bf16.msra.mxu0 %v12163_v27  ;;  %v12544_v63 = vld [vmem:[#allocation5 + $0x4d0] sm:$0xf0] }
 0x217   :  { %v18366_v0 = vld [vmem:[#allocation5 + $0x894] sm:$0xf]  ;;  %v12547_v8 = vor.u32 %v18238_v60, %v12544_v63 }
 0x218   :  { %6866 = vmatpush.bf16.msra.mxu3 %v13763_v20  ;;  %6841 = vmatpush.bf16.msra.mxu1 %v12675_v28  ;;  %v13056_v2 = vld [vmem:[#allocation5 + $0x8d0] sm:$0xf0] }
 0x219   :  { %v18494_v3 = vld [vmem:[#allocation5 + $0xc94] sm:$0xf]  ;;  %v13059_v9 = vor.u32 %v18366_v0, %v13056_v2 }
 0x21a   :  { %6854 = vmatpush.bf16.msra.mxu2 %v13187_v29  ;;  %v13568_v4 = vld [vmem:[#allocation5 + $0xcd0] sm:$0xf0]  ;;  %6829 = vmatpush.bf16.msra.mxu0 %v12099_v53 }
 0x21b   :  { %v18094_v6 = vld [vmem:[#allocation5 + $0x14] sm:$0xf]  ;;  %v13571_v14 = vor.u32 %v18494_v3, %v13568_v4 }
 0x21c   :  { %6867 = vmatpush.bf16.msra.mxu3 %v13699_v51  ;;  %v11968_v7 = vld [vmem:[#allocation5 + $0x50] sm:$0xf0]  ;;  %6842 = vmatpush.bf16.msra.mxu1 %v12611_v56 }
 0x21d   :  { %v18222_v10 = vld [vmem:[#allocation5 + $0x414] sm:$0xf]  ;;  %v11971_v21 = vor.u32 %v18094_v6, %v11968_v7 }
 0x21e   :  { %6855 = vmatpush.bf16.msra.mxu2 %v13123_v57  ;;  %v12480_v11 = vld [vmem:[#allocation5 + $0x450] sm:$0xf0]  ;;  %6830 = vmatpush.bf16.msra.mxu0 %v12035_v5 }
 0x21f   :  { %v18350_v12 = vld [vmem:[#allocation5 + $0x814] sm:$0xf]  ;;  %v12483_v25 = vor.u32 %v18222_v10, %v12480_v11 }
 0x220   :  { %6868 = vmatpush.bf16.msra.mxu3 %v13635_v62  ;;  %v12992_v15 = vld [vmem:[#allocation5 + $0x850] sm:$0xf0]  ;;  %6843 = vmatpush.bf16.msra.mxu1 %v12547_v8 }
 0x221   :  { %v18478_v16 = vld [vmem:[#allocation5 + $0xc14] sm:$0xf]  ;;  %v12995_v26 = vor.u32 %v18350_v12, %v12992_v15 }
 0x222   :  { %v13504_v17 = vld [vmem:[#allocation5 + $0xc50] sm:$0xf0]  ;;  %6856 = vmatpush.bf16.msra.mxu2 %v13059_v9  ;;  %6831 = vmatpush.bf16.msra.mxu0 %v11971_v21  ;;  %v1155_v9 = vperm.slane %v19916_v1, 3 }
 0x223   :  { %v18718_v18 = vld [vmem:[#allocation5 + $0x1394] sm:$0xf]  ;;  %v13507_v29 = vor.u32 %v18478_v16, %v13504_v17  ;;  %v6625_v17 = vpop.f32.mrf.mxu0 }
 0x224   :  { %v14464_v19 = vld [vmem:[#allocation5 + $0x13d0] sm:$0xf0]  ;;  %6869 = vmatpush.bf16.msra.mxu3 %v13571_v14  ;;  %6844 = vmatpush.bf16.msra.mxu1 %v12483_v25 }
 0x225   :  { %v18846_v20 = vld [vmem:[#allocation5 + $0x1794] sm:$0xf]  ;;  %v14467_v49 = vor.u32 %v18718_v18, %v14464_v19  ;;  %6832 = vmatmul.bf16.vlgmr.msra.gmra.mxu0 %v19855_v34 }
 0x226   :  { %v14976_v22 = vld [vmem:[#allocation5 + $0x17d0] sm:$0xf0]  ;;  %6857 = vmatpush.bf16.msra.mxu2 %v12995_v26 }
 0x227   :  { %v18974_v23 = vld [vmem:[#allocation5 + $0x1b94] sm:$0xf]  ;;  %v14979_v30 = vor.u32 %v18846_v20, %v14976_v22  ;;  %6876 = vmatpush.bf16.msrb.mxu0 %v14467_v49  ;;  %6845 = vmatmul.bf16.vlgmr.msra.gmra.mxu1 %v19859_v42  ;;  %v6626_v22 = vadd.f32 %v6625_v17, %v1155_v9 }
 0x228   :  { %v15488_v24 = vld [vmem:[#allocation5 + $0x1bd0] sm:$0xf0]  ;;  %6870 = vmatpush.bf16.msra.mxu3 %v13507_v29 }
 0x229   :  { %v19102_v27 = vld [vmem:[#allocation5 + $0x1f94] sm:$0xf]  ;;  %v15491_v31 = vor.u32 %v18974_v23, %v15488_v24  ;;  %6889 = vmatpush.bf16.msrb.mxu1 %v14979_v30  ;;  %6858 = vmatmul.bf16.vlgmr.msra.gmra.mxu2 %v19853_v33  ;;  %v6638_v23 = vpop.f32.mrf.mxu1 }
 0x22a   :  { %v16000_v28 = vld [vmem:[#allocation5 + $0x1fd0] sm:$0xf0]  ;;  %v6639_v29 = vadd.f32 %v6638_v23, %v6626_v22  ;;  %v12422_v22 = vld [vmem:[#allocation5 + $0x398] sm:$0xf] }
 0x22b   :  { %v18702_v36 = vld [vmem:[#allocation5 + $0x1314] sm:$0xf]  ;;  %v16003_v43 = vor.u32 %v19102_v27, %v16000_v28  ;;  %6902 = vmatpush.bf16.msrb.mxu2 %v15491_v31  ;;  %6871 = vmatmul.bf16.vlgmr.msra.gmra.mxu3 %v19857_v41  ;;  %v18215_v23 = vld [vmem:[#allocation5 + $0x3d4] sm:$0xf0] }
 0x22c   :  { %v14400_v51 = vld [vmem:[#allocation5 + $0x1350] sm:$0xf0] }
 0x22d   :  { %v18830_v39 = vld [vmem:[#allocation5 + $0x1714] sm:$0xf]  ;;  %v14403_v53 = vor.u32 %v18702_v36, %v14400_v51  ;;  %6915 = vmatpush.bf16.msrb.mxu3 %v16003_v43  ;;  %v6651_v43 = vpop.f32.mrf.mxu2 }
 0x22e   :  { %v14912_v44 = vld [vmem:[#allocation5 + $0x1750] sm:$0xf0] }
 0x22f   :  { %v18958_v45 = vld [vmem:[#allocation5 + $0x1b14] sm:$0xf]  ;;  %v14915_v55 = vor.u32 %v18830_v39, %v14912_v44  ;;  %6877 = vmatpush.bf16.msrb.mxu0 %v14403_v53  ;;  %v6664_v53 = vpop.f32.mrf.mxu3 }
 0x230   :  { %v15424_v46 = vld [vmem:[#allocation5 + $0x1b50] sm:$0xf0] }
 0x231   :  { %v19086_v48 = vld [vmem:[#allocation5 + $0x1f14] sm:$0xf]  ;;  %v15427_v56 = vor.u32 %v18958_v45, %v15424_v46  ;;  %6890 = vmatpush.bf16.msrb.mxu1 %v14915_v55 }
 0x232   :  { %v15936_v52 = vld [vmem:[#allocation5 + $0x1f50] sm:$0xf0] }
 0x233   :  { %v18686_v57 = vld [vmem:[#allocation5 + $0x1294] sm:$0xf]  ;;  %v15939_v60 = vor.u32 %v19086_v48, %v15936_v52  ;;  %6903 = vmatpush.bf16.msrb.mxu2 %v15427_v56  ;;  %v6652_v52 = vadd.f32 %v6651_v43, %v6639_v29  ;;  %v12358_v43 = vld [vmem:[#allocation5 + $0x318] sm:$0xf] }
 0x234   :  { %v14336_v58 = vld [vmem:[#allocation5 + $0x12d0] sm:$0xf0] }
 0x235   :  { %v18814_v59 = vld [vmem:[#allocation5 + $0x1694] sm:$0xf]  ;;  %v14339_v3 = vor.u32 %v18686_v57, %v14336_v58  ;;  %6916 = vmatpush.bf16.msrb.mxu3 %v15939_v60  ;;  %v19933_v58 = vadd.f32 %v6664_v53, %v6652_v52  ;;  %v6653_v17 = vpop.f32.mrf.mxu2  ;;  %v13382_v52 = vld [vmem:[#allocation5 + $0xb18] sm:$0xf] }
 0x236   :  { %v14848_v61 = vld [vmem:[#allocation5 + $0x16d0] sm:$0xf0]  ;;  %v18455_v53 = vld [vmem:[#allocation5 + $0xb54] sm:$0xf0] }
 0x237   :  { %v18942_v62 = vld [vmem:[#allocation5 + $0x1a94] sm:$0xf]  ;;  %v14851_v5 = vor.u32 %v18814_v59, %v14848_v61  ;;  %6878 = vmatpush.bf16.msrb.mxu0 %v14339_v3  ;;  %v6627_v59 = vpop.f32.mrf.mxu0  ;;  %v13766_v17 = vld [vmem:[#allocation5 + $0xe18] sm:$0xf] }
 0x238   :  { %v15360_v63 = vld [vmem:[#allocation5 + $0x1ad0] sm:$0xf0] }
 0x239   :  { %v19070_v0 = vld [vmem:[#allocation5 + $0x1e94] sm:$0xf]  ;;  %v15363_v6 = vor.u32 %v18942_v62, %v15360_v63  ;;  %6891 = vmatpush.bf16.msrb.mxu1 %v14851_v5 }
 0x23a   :  { %v15872_v2 = vld [vmem:[#allocation5 + $0x1ed0] sm:$0xf0] }
 0x23b   :  { %v18670_v4 = vld [vmem:[#allocation5 + $0x1214] sm:$0xf]  ;;  %v15875_v10 = vor.u32 %v19070_v0, %v15872_v2  ;;  %6904 = vmatpush.bf16.msrb.mxu2 %v15363_v6  ;;  %v6640_v2 = vpop.f32.mrf.mxu1 }
 0x23c   :  { %v14272_v7 = vld [vmem:[#allocation5 + $0x1250] sm:$0xf0]  ;;  %v18311_v2 = vld [vmem:[#allocation5 + $0x6d4] sm:$0xf0] }
 0x23d   :  { %v18798_v8 = vld [vmem:[#allocation5 + $0x1614] sm:$0xf]  ;;  %v14275_v16 = vor.u32 %v18670_v4, %v14272_v7  ;;  %6917 = vmatpush.bf16.msrb.mxu3 %v15875_v10 }
 0x23e   :  { %v14784_v11 = vld [vmem:[#allocation5 + $0x1650] sm:$0xf0] }
 0x23f   :  { %v18926_v12 = vld [vmem:[#allocation5 + $0x1a14] sm:$0xf]  ;;  %v14787_v35 = vor.u32 %v18798_v8, %v14784_v11  ;;  %6879 = vmatpush.bf16.msrb.mxu0 %v14275_v16 }
 0x240   :  { %v15296_v13 = vld [vmem:[#allocation5 + $0x1a50] sm:$0xf0] }
 0x241   :  { %v19054_v14 = vld [vmem:[#allocation5 + $0x1e14] sm:$0xf]  ;;  %v15299_v18 = vor.u32 %v18926_v12, %v15296_v13  ;;  %6892 = vmatpush.bf16.msrb.mxu1 %v14787_v35 }
 0x242   :  { %v15808_v15 = vld [vmem:[#allocation5 + $0x1e50] sm:$0xf0] }
 0x243   :  { %v18654_v19 = vld [vmem:[#allocation5 + $0x1194] sm:$0xf]  ;;  %v15811_v1 = vor.u32 %v19054_v14, %v15808_v15  ;;  %6905 = vmatpush.bf16.msrb.mxu2 %v15299_v18 }
 0x244   :  { %v14208_v20 = vld [vmem:[#allocation5 + $0x11d0] sm:$0xf0] }
 0x245   :  { %v18782_v21 = vld [vmem:[#allocation5 + $0x1594] sm:$0xf]  ;;  %v14211_v49 = vor.u32 %v18654_v19, %v14208_v20  ;;  %6918 = vmatpush.bf16.msrb.mxu3 %v15811_v1  ;;  %v12934_v1 = vld [vmem:[#allocation5 + $0x798] sm:$0xf] }
 0x246   :  { %v14720_v24 = vld [vmem:[#allocation5 + $0x15d0] sm:$0xf0] }
 0x247   :  { %v18910_v25 = vld [vmem:[#allocation5 + $0x1994] sm:$0xf]  ;;  %v14723_v30 = vor.u32 %v18782_v21, %v14720_v24  ;;  %6880 = vmatpush.bf16.msrb.mxu0 %v14211_v49  ;;  %v6666_v21 = vpop.f32.mrf.mxu3  ;;  %v13958_v49 = vld [vmem:[#allocation5 + $0xf98] sm:$0xf] }
 0x248   :  { %v15232_v26 = vld [vmem:[#allocation5 + $0x19d0] sm:$0xf0] }
 0x249   :  { %v19038_v27 = vld [vmem:[#allocation5 + $0x1d94] sm:$0xf]  ;;  %v15235_v31 = vor.u32 %v18910_v25, %v15232_v26  ;;  %6893 = vmatpush.bf16.msrb.mxu1 %v14723_v30  ;;  %v18343_v25 = vld [vmem:[#allocation5 + $0x7d4] sm:$0xf0] }
 0x24a   :  { %v15744_v28 = vld [vmem:[#allocation5 + $0x1dd0] sm:$0xf0]  ;;  %v13446_v26 = vld [vmem:[#allocation5 + $0xb98] sm:$0xf] }
 0x24b   :  { %v18638_v36 = vld [vmem:[#allocation5 + $0x1114] sm:$0xf]  ;;  %v15747_v44 = vor.u32 %v19038_v27, %v15744_v28  ;;  %6906 = vmatpush.bf16.msrb.mxu2 %v15235_v31  ;;  %v18471_v27 = vld [vmem:[#allocation5 + $0xbd4] sm:$0xf0] }
 0x24c   :  { %v14144_v51 = vld [vmem:[#allocation5 + $0x1150] sm:$0xf0]  ;;  %v18599_v30 = vld [vmem:[#allocation5 + $0xfd4] sm:$0xf0] }
 0x24d   :  { %v18766_v39 = vld [vmem:[#allocation5 + $0x1514] sm:$0xf]  ;;  %v14147_v57 = vor.u32 %v18638_v36, %v14144_v51  ;;  %6919 = vmatpush.bf16.msrb.mxu3 %v15747_v44  ;;  %v12423_v36 = vor.u32 %v18215_v23, %v12422_v22  ;;  %v12935_v51 = vor.u32 %v18343_v25, %v12934_v1  ;;  %v18199_v44 = vld [vmem:[#allocation5 + $0x354] sm:$0xf0]  ;;  %v6690_v25 = vpop.f32.mrf.mxu1 }
 0x24e   :  { %v14656_v45 = vld [vmem:[#allocation5 + $0x1550] sm:$0xf0]  ;;  %v12166_v22 = vld [vmem:[#allocation5 + $0x198] sm:$0xf] }
 0x24f   :  { %v18894_v46 = vld [vmem:[#allocation5 + $0x1914] sm:$0xf]  ;;  %v14659_v60 = vor.u32 %v18766_v39, %v14656_v45  ;;  %6881 = vmatpush.bf16.msrb.mxu0 %v14147_v57  ;;  %v13447_v39 = vor.u32 %v18471_v27, %v13446_v26  ;;  %v12870_v45 = vld [vmem:[#allocation5 + $0x718] sm:$0xf]  ;;  %v12359_v57 = vor.u32 %v18199_v44, %v12358_v43 }
 0x250   :  { %v15168_v48 = vld [vmem:[#allocation5 + $0x1950] sm:$0xf0]  ;;  %v18151_v23 = vld [vmem:[#allocation5 + $0x1d4] sm:$0xf0] }
 0x251   :  { %v19022_v55 = vld [vmem:[#allocation5 + $0x1d14] sm:$0xf]  ;;  %v15171_v61 = vor.u32 %v18894_v46, %v15168_v48  ;;  %6894 = vmatpush.bf16.msrb.mxu1 %v14659_v60  ;;  %v13959_v46 = vor.u32 %v18599_v30, %v13958_v49  ;;  %v18327_v48 = vld [vmem:[#allocation5 + $0x754] sm:$0xf0]  ;;  %v13383_v60 = vor.u32 %v18455_v53, %v13382_v52 }
 0x252   :  { %v15680_v56 = vld [vmem:[#allocation5 + $0x1d50] sm:$0xf0]  ;;  %v12871_v59 = vor.u32 %v18327_v48, %v12870_v45  ;;  %v12678_v1 = vld [vmem:[#allocation5 + $0x598] sm:$0xf] }
 0x253   :  { %v18622_v62 = vld [vmem:[#allocation5 + $0x1094] sm:$0xf]  ;;  %v15683_v3 = vor.u32 %v19022_v55, %v15680_v56  ;;  %6907 = vmatpush.bf16.msrb.mxu2 %v15171_v61  ;;  %v13894_v55 = vld [vmem:[#allocation5 + $0xf18] sm:$0xf] }
 0x254   :  { %v14080_v63 = vld [vmem:[#allocation5 + $0x10d0] sm:$0xf0]  ;;  %v18583_v56 = vld [vmem:[#allocation5 + $0xf54] sm:$0xf0] }
 0x255   :  { %v18750_v0 = vld [vmem:[#allocation5 + $0x1494] sm:$0xf]  ;;  %v14083_v9 = vor.u32 %v18622_v62, %v14080_v63  ;;  %6920 = vmatpush.bf16.msrb.mxu3 %v15683_v3  ;;  %v12294_v61 = vld [vmem:[#allocation5 + $0x298] sm:$0xf] }
 0x256   :  { %v14592_v4 = vld [vmem:[#allocation5 + $0x14d0] sm:$0xf0]  ;;  %v18183_v62 = vld [vmem:[#allocation5 + $0x2d4] sm:$0xf0] }
 0x257   :  { %v18878_v5 = vld [vmem:[#allocation5 + $0x1894] sm:$0xf]  ;;  %v14595_v12 = vor.u32 %v18750_v0, %v14592_v4  ;;  %6882 = vmatpush.bf16.msrb.mxu0 %v14083_v9  ;;  %v12806_v63 = vld [vmem:[#allocation5 + $0x698] sm:$0xf]  ;;  %v13895_v0 = vor.u32 %v18583_v56, %v13894_v55  ;;  %v6716_v56 = vpop.f32.mrf.mxu3 }
 0x258   :  { %v15104_v6 = vld [vmem:[#allocation5 + $0x18d0] sm:$0xf0]  ;;  %v13318_v3 = vld [vmem:[#allocation5 + $0xa98] sm:$0xf] }
 0x259   :  { %v19006_v7 = vld [vmem:[#allocation5 + $0x1c94] sm:$0xf]  ;;  %v15107_v13 = vor.u32 %v18878_v5, %v15104_v6  ;;  %6895 = vmatpush.bf16.msrb.mxu1 %v14595_v12  ;;  %v18439_v4 = vld [vmem:[#allocation5 + $0xad4] sm:$0xf0] }
 0x25a   :  { %v15616_v8 = vld [vmem:[#allocation5 + $0x1cd0] sm:$0xf0]  ;;  %v13830_v5 = vld [vmem:[#allocation5 + $0xe98] sm:$0xf]  ;;  %v13319_v9 = vor.u32 %v18439_v4, %v13318_v3 }
 0x25b   :  { %v18606_v10 = vld [vmem:[#allocation5 + $0x1014] sm:$0xf]  ;;  %v15619_v35 = vor.u32 %v19006_v7, %v15616_v8  ;;  %6908 = vmatpush.bf16.msrb.mxu2 %v15107_v13  ;;  %v18567_v6 = vld [vmem:[#allocation5 + $0xed4] sm:$0xf0]  ;;  %v12295_v7 = vor.u32 %v18183_v62, %v12294_v61  ;;  %v12807_v8 = vor.u32 %v18311_v2, %v12806_v63 }
 0x25c   :  { %v14016_v11 = vld [vmem:[#allocation5 + $0x1050] sm:$0xf0]  ;;  %v12742_v12 = vld [vmem:[#allocation5 + $0x618] sm:$0xf]  ;;  %v13831_v13 = vor.u32 %v18567_v6, %v13830_v5  ;;  %v6692_v5 = vpop.f32.mrf.mxu1 }
 0x25d   :  { %v18734_v14 = vld [vmem:[#allocation5 + $0x1414] sm:$0xf]  ;;  %v14019_v24 = vor.u32 %v18606_v10, %v14016_v11  ;;  %6921 = vmatpush.bf16.msrb.mxu3 %v15619_v35  ;;  %v12230_v10 = vld [vmem:[#allocation5 + $0x218] sm:$0xf] }
 0x25e   :  { %v14528_v15 = vld [vmem:[#allocation5 + $0x1450] sm:$0xf0]  ;;  %v18167_v11 = vld [vmem:[#allocation5 + $0x254] sm:$0xf0] }
 0x25f   :  { %v18862_v16 = vld [vmem:[#allocation5 + $0x1814] sm:$0xf]  ;;  %v14531_v28 = vor.u32 %v18734_v14, %v14528_v15  ;;  %6883 = vmatpush.bf16.msrb.mxu0 %v14019_v24  ;;  %v18295_v14 = vld [vmem:[#allocation5 + $0x654] sm:$0xf0] }
 0x260   :  { %v15040_v18 = vld [vmem:[#allocation5 + $0x1850] sm:$0xf0]  ;;  %v13254_v15 = vld [vmem:[#allocation5 + $0xa18] sm:$0xf] }
 0x261   :  { %v18990_v19 = vld [vmem:[#allocation5 + $0x1c14] sm:$0xf]  ;;  %v15043_v29 = vor.u32 %v18862_v16, %v15040_v18  ;;  %6896 = vmatpush.bf16.msrb.mxu1 %v14531_v28  ;;  %v18423_v16 = vld [vmem:[#allocation5 + $0xa54] sm:$0xf0]  ;;  %v12231_v18 = vor.u32 %v18167_v11, %v12230_v10 }
 0x262   :  { %v15552_v20 = vld [vmem:[#allocation5 + $0x1c50] sm:$0xf0]  ;;  %6884 = vmatmul.bf16.vlgmr.msrb.gmra.mxu0 %v19867_v37  ;;  %v18551_v35 = vld [vmem:[#allocation5 + $0xe54] sm:$0xf0]  ;;  %v13255_v21 = vor.u32 %v18423_v16, %v13254_v15 }
 0x263   :  { %v15555_v31 = vor.u32 %v18990_v19, %v15552_v20  ;;  %6909 = vmatpush.bf16.msrb.mxu2 %v15043_v29  ;;  %6928 = vmatpush.bf16.msra.mxu0 %v12423_v36  ;;  %v6677_v19 = vpop.f32.mrf.mxu0  ;;  %v12743_v20 = vor.u32 %v18295_v14, %v12742_v12  ;;  %v13767_v26 = vor.u32 %v18551_v35, %v13766_v17  ;;  %v18279_v27 = vld [vmem:[#allocation5 + $0x5d4] sm:$0xf0] }
 0x264   :  { %6897 = vmatmul.bf16.vlgmr.msrb.gmra.mxu1 %v19871_v40  ;;  %v6678_v24 = vadd.f32 %v6677_v19, %v19933_v58  ;;  %v13190_v28 = vld [vmem:[#allocation5 + $0x998] sm:$0xf]  ;;  %v12167_v36 = vor.u32 %v18151_v23, %v12166_v22 }
 0x265   :  { %6922 = vmatpush.bf16.msrb.mxu3 %v15555_v31  ;;  %6941 = vmatpush.bf16.msra.mxu1 %v12935_v51  ;;  %v18407_v29 = vld [vmem:[#allocation5 + $0x9d4] sm:$0xf0]  ;;  %v12679_v51 = vor.u32 %v18279_v27, %v12678_v1  ;;  %v6718_v1 = vpop.f32.mrf.mxu3 }
 0x266   :  { %6910 = vmatmul.bf16.vlgmr.msrb.gmra.mxu2 %v19865_v32  ;;  %v13702_v49 = vld [vmem:[#allocation5 + $0xd98] sm:$0xf]  ;;  %v6691_v31 = vadd.f32 %v6690_v25, %v6678_v24 }
 0x267   :  { %6954 = vmatpush.bf16.msra.mxu2 %v13447_v39  ;;  %6929 = vmatpush.bf16.msra.mxu0 %v12359_v57  ;;  %v18535_v30 = vld [vmem:[#allocation5 + $0xdd4] sm:$0xf0]  ;;  %v13191_v39 = vor.u32 %v18407_v29, %v13190_v28 }
 0x268   :  { %6923 = vmatmul.bf16.vlgmr.msrb.gmra.mxu3 %v19869_v38  ;;  %v12102_v43 = vld [vmem:[#allocation5 + $0x118] sm:$0xf]  ;;  %v13703_v58 = vor.u32 %v18535_v30, %v13702_v49 }
 0x269   :  { %6967 = vmatpush.bf16.msra.mxu3 %v13959_v46  ;;  %6942 = vmatpush.bf16.msra.mxu1 %v12871_v59  ;;  %v18135_v44 = vld [vmem:[#allocation5 + $0x154] sm:$0xf0]  ;;  %v6703_v46 = vpop.f32.mrf.mxu2 }
 0x26a   :  { %v12614_v45 = vld [vmem:[#allocation5 + $0x518] sm:$0xf]  ;;  %v6704_v55 = vadd.f32 %v6703_v46, %v6691_v31 }
 0x26b   :  { %6955 = vmatpush.bf16.msra.mxu2 %v13383_v60  ;;  %6930 = vmatpush.bf16.msra.mxu0 %v12295_v7  ;;  %v18263_v48 = vld [vmem:[#allocation5 + $0x554] sm:$0xf0]  ;;  %v12103_v60 = vor.u32 %v18135_v44, %v12102_v43  ;;  %v6679_v62 = vpop.f32.mrf.mxu0 }
 0x26c   :  { %v13126_v52 = vld [vmem:[#allocation5 + $0x918] sm:$0xf]  ;;  %v19940_v61 = vadd.f32 %v6716_v56, %v6704_v55  ;;  %v12615_v63 = vor.u32 %v18263_v48, %v12614_v45 }
 0x26d   :  { %6968 = vmatpush.bf16.msra.mxu3 %v13895_v0  ;;  %6943 = vmatpush.bf16.msra.mxu1 %v12807_v8  ;;  %v18391_v53 = vld [vmem:[#allocation5 + $0x954] sm:$0xf0] }
 0x26e   :  { %v13638_v57 = vld [vmem:[#allocation5 + $0xd18] sm:$0xf]  ;;  %v13127_v0 = vor.u32 %v18391_v53, %v13126_v52 }
 0x26f   :  { %6956 = vmatpush.bf16.msra.mxu2 %v13319_v9  ;;  %6931 = vmatpush.bf16.msra.mxu0 %v12231_v18  ;;  %v18519_v59 = vld [vmem:[#allocation5 + $0xd54] sm:$0xf0] }
 0x270   :  { %v12038_v2 = vld [vmem:[#allocation5 + $0x98] sm:$0xf]  ;;  %v13639_v6 = vor.u32 %v18519_v59, %v13638_v57 }
 0x271   :  { %6969 = vmatpush.bf16.msra.mxu3 %v13831_v13  ;;  %6944 = vmatpush.bf16.msra.mxu1 %v12743_v20  ;;  %v18119_v3 = vld [vmem:[#allocation5 + $0xd4] sm:$0xf0]  ;;  %v6705_v19 = vpop.f32.mrf.mxu2 }
 0x272   :  { %v12550_v4 = vld [vmem:[#allocation5 + $0x498] sm:$0xf]  ;;  %v12039_v12 = vor.u32 %v18119_v3, %v12038_v2 }
 0x273   :  { %6957 = vmatpush.bf16.msra.mxu2 %v13255_v21  ;;  %6932 = vmatpush.bf16.msra.mxu0 %v12167_v36  ;;  %v18247_v7 = vld [vmem:[#allocation5 + $0x4d4] sm:$0xf0]  ;;  %v6729_v1 = vpop.f32.mrf.mxu0 }
 0x274   :  { %v13062_v8 = vld [vmem:[#allocation5 + $0x898] sm:$0xf]  ;;  %v12551_v15 = vor.u32 %v18247_v7, %v12550_v4 }
 0x275   :  { %6970 = vmatpush.bf16.msra.mxu3 %v13767_v26  ;;  %6945 = vmatpush.bf16.msra.mxu1 %v12679_v51  ;;  %v18375_v9 = vld [vmem:[#allocation5 + $0x8d4] sm:$0xf0] }
 0x276   :  { %v13574_v10 = vld [vmem:[#allocation5 + $0xc98] sm:$0xf]  ;;  %v13063_v16 = vor.u32 %v18375_v9, %v13062_v8 }
 0x277   :  { %6958 = vmatpush.bf16.msra.mxu2 %v13191_v39  ;;  %v18503_v11 = vld [vmem:[#allocation5 + $0xcd4] sm:$0xf0]  ;;  %6933 = vmatpush.bf16.msra.mxu0 %v12103_v60 }
 0x278   :  { %v11974_v13 = vld [vmem:[#allocation5 + $0x18] sm:$0xf]  ;;  %v13575_v20 = vor.u32 %v18503_v11, %v13574_v10 }
 0x279   :  { %6971 = vmatpush.bf16.msra.mxu3 %v13703_v58  ;;  %v18103_v14 = vld [vmem:[#allocation5 + $0x54] sm:$0xf0]  ;;  %6946 = vmatpush.bf16.msra.mxu1 %v12615_v63 }
 0x27a   :  { %v12486_v17 = vld [vmem:[#allocation5 + $0x418] sm:$0xf]  ;;  %v11975_v27 = vor.u32 %v18103_v14, %v11974_v13 }
 0x27b   :  { %6959 = vmatpush.bf16.msra.mxu2 %v13127_v0  ;;  %v18231_v35 = vld [vmem:[#allocation5 + $0x454] sm:$0xf0]  ;;  %6934 = vmatpush.bf16.msra.mxu0 %v12039_v12 }
 0x27c   :  { %v12998_v18 = vld [vmem:[#allocation5 + $0x818] sm:$0xf]  ;;  %v12487_v30 = vor.u32 %v18231_v35, %v12486_v17 }
 0x27d   :  { %6972 = vmatpush.bf16.msra.mxu3 %v13639_v6  ;;  %v18359_v21 = vld [vmem:[#allocation5 + $0x854] sm:$0xf0]  ;;  %6947 = vmatpush.bf16.msra.mxu1 %v12551_v15 }
 0x27e   :  { %v13510_v22 = vld [vmem:[#allocation5 + $0xc18] sm:$0xf]  ;;  %v12999_v31 = vor.u32 %v18359_v21, %v12998_v18 }
 0x27f   :  { %v18487_v23 = vld [vmem:[#allocation5 + $0xc54] sm:$0xf0]  ;;  %6960 = vmatpush.bf16.msra.mxu2 %v13063_v16  ;;  %6935 = vmatpush.bf16.msra.mxu0 %v11975_v27  ;;  %v19946_v16 = vld [vmem:[#allocation7] sm:$0xff] }
 0x280   :  { %v14470_v24 = vld [vmem:[#allocation5 + $0x1398] sm:$0xf]  ;;  %v13511_v39 = vor.u32 %v18487_v23, %v13510_v22  ;;  %v1156_v17 = vperm.slane %v19946_v16, 4 }
 0x281   :  { %v18727_v25 = vld [vmem:[#allocation5 + $0x13d4] sm:$0xf0]  ;;  %6973 = vmatpush.bf16.msra.mxu3 %v13575_v20  ;;  %6948 = vmatpush.bf16.msra.mxu1 %v12487_v30 }
 0x282   :  { %v14982_v26 = vld [vmem:[#allocation5 + $0x1798] sm:$0xf]  ;;  %v14471_v43 = vor.u32 %v18727_v25, %v14470_v24  ;;  %6936 = vmatmul.bf16.vlgmr.msra.gmra.mxu0 %v19855_v34 }
 0x283   :  { %v18855_v28 = vld [vmem:[#allocation5 + $0x17d4] sm:$0xf0]  ;;  %6961 = vmatpush.bf16.msra.mxu2 %v12999_v31 }
 0x284   :  { %v15494_v29 = vld [vmem:[#allocation5 + $0x1b98] sm:$0xf]  ;;  %v14983_v44 = vor.u32 %v18855_v28, %v14982_v26  ;;  %6980 = vmatpush.bf16.msrb.mxu0 %v14471_v43  ;;  %6949 = vmatmul.bf16.vlgmr.msra.gmra.mxu1 %v19859_v42 }
 0x285   :  { %v18983_v49 = vld [vmem:[#allocation5 + $0x1bd4] sm:$0xf0]  ;;  %6974 = vmatpush.bf16.msra.mxu3 %v13511_v39 }
 0x286   :  { %v16006_v36 = vld [vmem:[#allocation5 + $0x1f98] sm:$0xf]  ;;  %v15495_v45 = vor.u32 %v18983_v49, %v15494_v29  ;;  %6993 = vmatpush.bf16.msrb.mxu1 %v14983_v44  ;;  %6962 = vmatmul.bf16.vlgmr.msra.gmra.mxu2 %v19853_v33  ;;  %v6730_v29 = vadd.f32 %v6729_v1, %v1156_v17  ;;  %v6742_v49 = vpop.f32.mrf.mxu1 }
 0x287   :  { %v19111_v51 = vld [vmem:[#allocation5 + $0x1fd4] sm:$0xf0] }
 0x288   :  { %v14406_v46 = vld [vmem:[#allocation5 + $0x1318] sm:$0xf]  ;;  %v16007_v52 = vor.u32 %v19111_v51, %v16006_v36  ;;  %7006 = vmatpush.bf16.msrb.mxu2 %v15495_v45  ;;  %6975 = vmatmul.bf16.vlgmr.msra.gmra.mxu3 %v19857_v41  ;;  %v6743_v44 = vadd.f32 %v6742_v49, %v6730_v29 }
 0x289   :  { %v18711_v58 = vld [vmem:[#allocation5 + $0x1354] sm:$0xf0] }
 0x28a   :  { %v14918_v48 = vld [vmem:[#allocation5 + $0x1718] sm:$0xf]  ;;  %v14407_v60 = vor.u32 %v18711_v58, %v14406_v46  ;;  %7019 = vmatpush.bf16.msrb.mxu3 %v16007_v52 }
 0x28b   :  { %v18839_v53 = vld [vmem:[#allocation5 + $0x1754] sm:$0xf0] }
 0x28c   :  { %v15430_v55 = vld [vmem:[#allocation5 + $0x1b18] sm:$0xf]  ;;  %v14919_v62 = vor.u32 %v18839_v53, %v14918_v48  ;;  %6981 = vmatpush.bf16.msrb.mxu0 %v14407_v60 }
 0x28d   :  { %v18967_v56 = vld [vmem:[#allocation5 + $0x1b54] sm:$0xf0] }
 0x28e   :  { %v15942_v57 = vld [vmem:[#allocation5 + $0x1f18] sm:$0xf]  ;;  %v15431_v63 = vor.u32 %v18967_v56, %v15430_v55  ;;  %6994 = vmatpush.bf16.msrb.mxu1 %v14919_v62  ;;  %v6755_v55 = vpop.f32.mrf.mxu2 }
 0x28f   :  { %v19095_v59 = vld [vmem:[#allocation5 + $0x1f54] sm:$0xf0]  ;;  %v6756_v62 = vadd.f32 %v6755_v55, %v6743_v44  ;;  %v13448_v44 = vld [vmem:[#allocation5 + $0xbd8] sm:$0xf0] }
 0x290   :  { %v14342_v0 = vld [vmem:[#allocation5 + $0x1298] sm:$0xf]  ;;  %v15943_v4 = vor.u32 %v19095_v59, %v15942_v57  ;;  %7007 = vmatpush.bf16.msrb.mxu2 %v15431_v63  ;;  %v6768_v63 = vpop.f32.mrf.mxu3 }
 0x291   :  { %v18695_v2 = vld [vmem:[#allocation5 + $0x12d4] sm:$0xf0] }
 0x292   :  { %v14854_v3 = vld [vmem:[#allocation5 + $0x1698] sm:$0xf]  ;;  %v14343_v10 = vor.u32 %v18695_v2, %v14342_v0  ;;  %7020 = vmatpush.bf16.msrb.mxu3 %v15943_v4  ;;  %v19949_v4 = vadd.f32 %v6768_v63, %v6756_v62  ;;  %v12872_v63 = vld [vmem:[#allocation5 + $0x758] sm:$0xf0] }
 0x293   :  { %v18823_v5 = vld [vmem:[#allocation5 + $0x16d4] sm:$0xf0] }
 0x294   :  { %v15366_v6 = vld [vmem:[#allocation5 + $0x1a98] sm:$0xf]  ;;  %v14855_v12 = vor.u32 %v18823_v5, %v14854_v3  ;;  %6982 = vmatpush.bf16.msrb.mxu0 %v14343_v10  ;;  %v6731_v5 = vpop.f32.mrf.mxu0 }
 0x295   :  { %v18951_v7 = vld [vmem:[#allocation5 + $0x1ad4] sm:$0xf0]  ;;  %v13896_v5 = vld [vmem:[#allocation5 + $0xf58] sm:$0xf0] }
 0x296   :  { %v15878_v8 = vld [vmem:[#allocation5 + $0x1e98] sm:$0xf]  ;;  %v15367_v13 = vor.u32 %v18951_v7, %v15366_v6  ;;  %6995 = vmatpush.bf16.msrb.mxu1 %v14855_v12 }
 0x297   :  { %v19079_v9 = vld [vmem:[#allocation5 + $0x1ed4] sm:$0xf0] }
 0x298   :  { %v14278_v11 = vld [vmem:[#allocation5 + $0x1218] sm:$0xf]  ;;  %v15879_v35 = vor.u32 %v19079_v9, %v15878_v8  ;;  %7008 = vmatpush.bf16.msrb.mxu2 %v15367_v13  ;;  %v6770_v49 = vpop.f32.mrf.mxu3 }
 0x299   :  { %v18679_v14 = vld [vmem:[#allocation5 + $0x1254] sm:$0xf0] }
 0x29a   :  { %v14790_v15 = vld [vmem:[#allocation5 + $0x1618] sm:$0xf]  ;;  %v14279_v23 = vor.u32 %v18679_v14, %v14278_v11  ;;  %7021 = vmatpush.bf16.msrb.mxu3 %v15879_v35  ;;  %v6744_v11 = vpop.f32.mrf.mxu1 }
 0x29b   :  { %v18807_v18 = vld [vmem:[#allocation5 + $0x1654] sm:$0xf0]  ;;  %v18303_v11 = vld [vmem:[#allocation5 + $0x69c] sm:$0xf] }
 0x29c   :  { %v15302_v19 = vld [vmem:[#allocation5 + $0x1a18] sm:$0xf]  ;;  %v14791_v24 = vor.u32 %v18807_v18, %v14790_v15  ;;  %6983 = vmatpush.bf16.msrb.mxu0 %v14279_v23  ;;  %v6781_v49 = vpop.f32.mrf.mxu0 }
 0x29d   :  { %v18935_v20 = vld [vmem:[#allocation5 + $0x1a54] sm:$0xf0] }
 0x29e   :  { %v15814_v21 = vld [vmem:[#allocation5 + $0x1e18] sm:$0xf]  ;;  %v15303_v25 = vor.u32 %v18935_v20, %v15302_v19  ;;  %6996 = vmatpush.bf16.msrb.mxu1 %v14791_v24 }
 0x29f   :  { %v19063_v22 = vld [vmem:[#allocation5 + $0x1e54] sm:$0xf0] }
 0x2a0   :  { %v14214_v26 = vld [vmem:[#allocation5 + $0x1198] sm:$0xf]  ;;  %v15815_v30 = vor.u32 %v19063_v22, %v15814_v21  ;;  %7009 = vmatpush.bf16.msrb.mxu2 %v15303_v25  ;;  %v6757_v25 = vpop.f32.mrf.mxu2 }
 0x2a1   :  { %v18663_v27 = vld [vmem:[#allocation5 + $0x11d4] sm:$0xf0]  ;;  %v18415_v25 = vld [vmem:[#allocation5 + $0xa1c] sm:$0xf] }
 0x2a2   :  { %v14726_v28 = vld [vmem:[#allocation5 + $0x1598] sm:$0xf]  ;;  %v14215_v45 = vor.u32 %v18663_v27, %v14214_v26  ;;  %7022 = vmatpush.bf16.msrb.mxu3 %v15815_v30  ;;  %v18207_v30 = vld [vmem:[#allocation5 + $0x39c] sm:$0xf] }
 0x2a3   :  { %v18791_v31 = vld [vmem:[#allocation5 + $0x15d4] sm:$0xf0] }
 0x2a4   :  { %v15238_v36 = vld [vmem:[#allocation5 + $0x1998] sm:$0xf]  ;;  %v14727_v46 = vor.u32 %v18791_v31, %v14726_v28  ;;  %6984 = vmatpush.bf16.msrb.mxu0 %v14215_v45  ;;  %v12424_v31 = vld [vmem:[#allocation5 + $0x3d8] sm:$0xf0] }
 0x2a5   :  { %v18919_v51 = vld [vmem:[#allocation5 + $0x19d4] sm:$0xf0] }
 0x2a6   :  { %v15750_v39 = vld [vmem:[#allocation5 + $0x1d98] sm:$0xf]  ;;  %v15239_v58 = vor.u32 %v18919_v51, %v15238_v36  ;;  %6997 = vmatpush.bf16.msrb.mxu1 %v14727_v46  ;;  %v18335_v36 = vld [vmem:[#allocation5 + $0x79c] sm:$0xf] }
 0x2a7   :  { %v19047_v43 = vld [vmem:[#allocation5 + $0x1dd4] sm:$0xf0] }
 0x2a8   :  { %v14150_v48 = vld [vmem:[#allocation5 + $0x1118] sm:$0xf]  ;;  %v15751_v56 = vor.u32 %v19047_v43, %v15750_v39  ;;  %7010 = vmatpush.bf16.msrb.mxu2 %v15239_v58  ;;  %v12936_v39 = vld [vmem:[#allocation5 + $0x7d8] sm:$0xf0] }
 0x2a9   :  { %v18647_v52 = vld [vmem:[#allocation5 + $0x1154] sm:$0xf0]  ;;  %v18463_v43 = vld [vmem:[#allocation5 + $0xb9c] sm:$0xf]  ;;  %v12939_v55 = vor.u32 %v18335_v36, %v12936_v39 }
 0x2aa   :  { %v14662_v53 = vld [vmem:[#allocation5 + $0x1518] sm:$0xf]  ;;  %v14151_v3 = vor.u32 %v18647_v52, %v14150_v48  ;;  %7023 = vmatpush.bf16.msrb.mxu3 %v15751_v56  ;;  %v18591_v58 = vld [vmem:[#allocation5 + $0xf9c] sm:$0xf]  ;;  %v13451_v56 = vor.u32 %v18463_v43, %v13448_v44  ;;  %v6782_v43 = vadd.f32 %v6781_v49, %v19949_v4  ;;  %v6794_v44 = vpop.f32.mrf.mxu1 }
 0x2ab   :  { %v18775_v57 = vld [vmem:[#allocation5 + $0x1554] sm:$0xf0]  ;;  %v13960_v48 = vld [vmem:[#allocation5 + $0xfd8] sm:$0xf0] }
 0x2ac   :  { %v15174_v59 = vld [vmem:[#allocation5 + $0x1918] sm:$0xf]  ;;  %v14663_v6 = vor.u32 %v18775_v57, %v14662_v53  ;;  %6985 = vmatpush.bf16.msrb.mxu0 %v14151_v3  ;;  %v12427_v53 = vor.u32 %v18207_v30, %v12424_v31  ;;  %v18191_v57 = vld [vmem:[#allocation5 + $0x31c] sm:$0xf]  ;;  %v13963_v62 = vor.u32 %v18591_v58, %v13960_v48 }
 0x2ad   :  { %v18903_v60 = vld [vmem:[#allocation5 + $0x1954] sm:$0xf0]  ;;  %v18575_v3 = vld [vmem:[#allocation5 + $0xf1c] sm:$0xf] }
 0x2ae   :  { %v15686_v0 = vld [vmem:[#allocation5 + $0x1d18] sm:$0xf]  ;;  %v15175_v7 = vor.u32 %v18903_v60, %v15174_v59  ;;  %6998 = vmatpush.bf16.msrb.mxu1 %v14663_v6  ;;  %v12360_v59 = vld [vmem:[#allocation5 + $0x358] sm:$0xf0] }
 0x2af   :  { %v19031_v2 = vld [vmem:[#allocation5 + $0x1d54] sm:$0xf0]  ;;  %v18319_v60 = vld [vmem:[#allocation5 + $0x71c] sm:$0xf]  ;;  %v12363_v6 = vor.u32 %v18191_v57, %v12360_v59 }
 0x2b0   :  { %v14086_v8 = vld [vmem:[#allocation5 + $0x1098] sm:$0xf]  ;;  %v15687_v12 = vor.u32 %v19031_v2, %v15686_v0  ;;  %7011 = vmatpush.bf16.msrb.mxu2 %v15175_v7  ;;  %v18447_v0 = vld [vmem:[#allocation5 + $0xb1c] sm:$0xf]  ;;  %v12875_v7 = vor.u32 %v18319_v60, %v12872_v63 }
 0x2b1   :  { %v18631_v9 = vld [vmem:[#allocation5 + $0x10d4] sm:$0xf0]  ;;  %v13384_v2 = vld [vmem:[#allocation5 + $0xb58] sm:$0xf0] }
 0x2b2   :  { %v14598_v10 = vld [vmem:[#allocation5 + $0x1498] sm:$0xf]  ;;  %v14087_v18 = vor.u32 %v18631_v9, %v14086_v8  ;;  %7024 = vmatpush.bf16.msrb.mxu3 %v15687_v12  ;;  %v13387_v8 = vor.u32 %v18447_v0, %v13384_v2  ;;  %v18175_v9 = vld [vmem:[#allocation5 + $0x29c] sm:$0xf]  ;;  %v13899_v12 = vor.u32 %v18575_v3, %v13896_v5  ;;  %v6807_v0 = vpop.f32.mrf.mxu2 }
 0x2b3   :  { %v18759_v13 = vld [vmem:[#allocation5 + $0x14d4] sm:$0xf0]  ;;  %v18143_v36 = vld [vmem:[#allocation5 + $0x19c] sm:$0xf] }
 0x2b4   :  { %v15110_v14 = vld [vmem:[#allocation5 + $0x1898] sm:$0xf]  ;;  %v14599_v21 = vor.u32 %v18759_v13, %v14598_v10  ;;  %6986 = vmatpush.bf16.msrb.mxu0 %v14087_v18  ;;  %v12296_v10 = vld [vmem:[#allocation5 + $0x2d8] sm:$0xf0] }
 0x2b5   :  { %v18887_v15 = vld [vmem:[#allocation5 + $0x18d4] sm:$0xf0]  ;;  %v12808_v13 = vld [vmem:[#allocation5 + $0x6d8] sm:$0xf0]  ;;  %v12299_v18 = vor.u32 %v18175_v9, %v12296_v10 }
 0x2b6   :  { %v15622_v17 = vld [vmem:[#allocation5 + $0x1c98] sm:$0xf]  ;;  %v15111_v22 = vor.u32 %v18887_v15, %v15110_v14  ;;  %6999 = vmatpush.bf16.msrb.mxu1 %v14599_v21  ;;  %v18431_v14 = vld [vmem:[#allocation5 + $0xa9c] sm:$0xf] }
 0x2b7   :  { %v19015_v35 = vld [vmem:[#allocation5 + $0x1cd4] sm:$0xf0]  ;;  %v13320_v15 = vld [vmem:[#allocation5 + $0xad8] sm:$0xf0] }
 0x2b8   :  { %v14022_v19 = vld [vmem:[#allocation5 + $0x1018] sm:$0xf]  ;;  %v15623_v26 = vor.u32 %v19015_v35, %v15622_v17  ;;  %7012 = vmatpush.bf16.msrb.mxu2 %v15111_v22  ;;  %v18559_v17 = vld [vmem:[#allocation5 + $0xe9c] sm:$0xf] }
 0x2b9   :  { %v18615_v20 = vld [vmem:[#allocation5 + $0x1054] sm:$0xf0]  ;;  %v13832_v35 = vld [vmem:[#allocation5 + $0xed8] sm:$0xf0] }
 0x2ba   :  { %v14534_v23 = vld [vmem:[#allocation5 + $0x1418] sm:$0xf]  ;;  %v14023_v51 = vor.u32 %v18615_v20, %v14022_v19  ;;  %7025 = vmatpush.bf16.msrb.mxu3 %v15623_v26  ;;  %v12811_v19 = vor.u32 %v18303_v11, %v12808_v13  ;;  %v13323_v20 = vor.u32 %v18431_v14, %v13320_v15  ;;  %v18159_v21 = vld [vmem:[#allocation5 + $0x21c] sm:$0xf] }
 0x2bb   :  { %v18743_v1 = vld [vmem:[#allocation5 + $0x1454] sm:$0xf0]  ;;  %v12232_v22 = vld [vmem:[#allocation5 + $0x258] sm:$0xf0] }
 0x2bc   :  { %v15046_v24 = vld [vmem:[#allocation5 + $0x1818] sm:$0xf]  ;;  %v14535_v45 = vor.u32 %v18743_v1, %v14534_v23  ;;  %6987 = vmatpush.bf16.msrb.mxu0 %v14023_v51  ;;  %v18287_v23 = vld [vmem:[#allocation5 + $0x61c] sm:$0xf]  ;;  %v13835_v1 = vor.u32 %v18559_v17, %v13832_v35 }
 0x2bd   :  { %v18871_v27 = vld [vmem:[#allocation5 + $0x1854] sm:$0xf0]  ;;  %v13256_v26 = vld [vmem:[#allocation5 + $0xa58] sm:$0xf0] }
 0x2be   :  { %v15558_v28 = vld [vmem:[#allocation5 + $0x1c18] sm:$0xf]  ;;  %v15047_v46 = vor.u32 %v18871_v27, %v15046_v24  ;;  %7000 = vmatpush.bf16.msrb.mxu1 %v14535_v45  ;;  %v12744_v24 = vld [vmem:[#allocation5 + $0x658] sm:$0xf0]  ;;  %v13259_v31 = vor.u32 %v18415_v25, %v13256_v26 }
 0x2bf   :  { %v18999_v29 = vld [vmem:[#allocation5 + $0x1c54] sm:$0xf0]  ;;  %6988 = vmatmul.bf16.vlgmr.msrb.gmra.mxu0 %v19867_v37  ;;  %v18543_v27 = vld [vmem:[#allocation5 + $0xe1c] sm:$0xf]  ;;  %v12747_v30 = vor.u32 %v18287_v23, %v12744_v24 }
 0x2c0   :  { %v15559_v52 = vor.u32 %v18999_v29, %v15558_v28  ;;  %7013 = vmatpush.bf16.msrb.mxu2 %v15047_v46  ;;  %7032 = vmatpush.bf16.msra.mxu0 %v12427_v53  ;;  %v13768_v28 = vld [vmem:[#allocation5 + $0xe58] sm:$0xf0]  ;;  %v12235_v29 = vor.u32 %v18159_v21, %v12232_v22 }
 0x2c1   :  { %7001 = vmatmul.bf16.vlgmr.msrb.gmra.mxu1 %v19871_v40  ;;  %v12168_v51 = vld [vmem:[#allocation5 + $0x1d8] sm:$0xf0]  ;;  %v13771_v45 = vor.u32 %v18543_v27, %v13768_v28 }
 0x2c2   :  { %7026 = vmatpush.bf16.msrb.mxu3 %v15559_v52  ;;  %7045 = vmatpush.bf16.msra.mxu1 %v12939_v55  ;;  %v18271_v39 = vld [vmem:[#allocation5 + $0x59c] sm:$0xf]  ;;  %v6795_v55 = vadd.f32 %v6794_v44, %v6782_v43 }
 0x2c3   :  { %7014 = vmatmul.bf16.vlgmr.msrb.gmra.mxu2 %v19865_v32  ;;  %v12680_v46 = vld [vmem:[#allocation5 + $0x5d8] sm:$0xf0] }
 0x2c4   :  { %7058 = vmatpush.bf16.msra.mxu2 %v13451_v56  ;;  %7033 = vmatpush.bf16.msra.mxu0 %v12363_v6  ;;  %v18399_v58 = vld [vmem:[#allocation5 + $0x99c] sm:$0xf]  ;;  %v12171_v56 = vor.u32 %v18143_v36, %v12168_v51  ;;  %v12683_v57 = vor.u32 %v18271_v39, %v12680_v46  ;;  %v6808_v6 = vadd.f32 %v6807_v0, %v6795_v55 }
 0x2c5   :  { %7027 = vmatmul.bf16.vlgmr.msrb.gmra.mxu3 %v19869_v38  ;;  %v13192_v48 = vld [vmem:[#allocation5 + $0x9d8] sm:$0xf0] }
 0x2c6   :  { %7071 = vmatpush.bf16.msra.mxu3 %v13963_v62  ;;  %7046 = vmatpush.bf16.msra.mxu1 %v12875_v7  ;;  %v18527_v52 = vld [vmem:[#allocation5 + $0xd9c] sm:$0xf]  ;;  %v13195_v59 = vor.u32 %v18399_v58, %v13192_v48  ;;  %v6820_v7 = vpop.f32.mrf.mxu3 }
 0x2c7   :  { %v13704_v53 = vld [vmem:[#allocation5 + $0xdd8] sm:$0xf0]  ;;  %v19956_v11 = vadd.f32 %v6820_v7, %v6808_v6 }
 0x2c8   :  { %7059 = vmatpush.bf16.msra.mxu2 %v13387_v8  ;;  %7034 = vmatpush.bf16.msra.mxu0 %v12299_v18  ;;  %v18127_v60 = vld [vmem:[#allocation5 + $0x11c] sm:$0xf]  ;;  %v13707_v4 = vor.u32 %v18527_v52, %v13704_v53  ;;  %v6796_v18 = vpop.f32.mrf.mxu1 }
 0x2c9   :  { %v12104_v62 = vld [vmem:[#allocation5 + $0x158] sm:$0xf0] }
 0x2ca   :  { %7072 = vmatpush.bf16.msra.mxu3 %v13899_v12  ;;  %7047 = vmatpush.bf16.msra.mxu1 %v12811_v19  ;;  %v18255_v63 = vld [vmem:[#allocation5 + $0x51c] sm:$0xf]  ;;  %v12107_v10 = vor.u32 %v18127_v60, %v12104_v62  ;;  %v6783_v12 = vpop.f32.mrf.mxu0 }
 0x2cb   :  { %v12616_v2 = vld [vmem:[#allocation5 + $0x558] sm:$0xf0] }
 0x2cc   :  { %7060 = vmatpush.bf16.msra.mxu2 %v13323_v20  ;;  %7035 = vmatpush.bf16.msra.mxu0 %v12235_v29  ;;  %v18383_v3 = vld [vmem:[#allocation5 + $0x91c] sm:$0xf]  ;;  %v12619_v13 = vor.u32 %v18255_v63, %v12616_v2 }
 0x2cd   :  { %v13128_v5 = vld [vmem:[#allocation5 + $0x958] sm:$0xf0] }
 0x2ce   :  { %7073 = vmatpush.bf16.msra.mxu3 %v13835_v1  ;;  %7048 = vmatpush.bf16.msra.mxu1 %v12747_v30  ;;  %v18511_v8 = vld [vmem:[#allocation5 + $0xd1c] sm:$0xf]  ;;  %v13131_v14 = vor.u32 %v18383_v3, %v13128_v5  ;;  %v6822_v44 = vpop.f32.mrf.mxu3 }
 0x2cf   :  { %v13640_v9 = vld [vmem:[#allocation5 + $0xd58] sm:$0xf0] }
 0x2d0   :  { %7061 = vmatpush.bf16.msra.mxu2 %v13259_v31  ;;  %7036 = vmatpush.bf16.msra.mxu0 %v12171_v56  ;;  %v18111_v15 = vld [vmem:[#allocation5 + $0x9c] sm:$0xf]  ;;  %v13643_v19 = vor.u32 %v18511_v8, %v13640_v9  ;;  %v6809_v31 = vpop.f32.mrf.mxu2 }
 0x2d1   :  { %v12040_v17 = vld [vmem:[#allocation5 + $0xd8] sm:$0xf0] }
 0x2d2   :  { %7074 = vmatpush.bf16.msra.mxu3 %v13771_v45  ;;  %7049 = vmatpush.bf16.msra.mxu1 %v12683_v57  ;;  %v18239_v35 = vld [vmem:[#allocation5 + $0x49c] sm:$0xf]  ;;  %v12043_v24 = vor.u32 %v18111_v15, %v12040_v17 }
 0x2d3   :  { %v12552_v20 = vld [vmem:[#allocation5 + $0x4d8] sm:$0xf0] }
 0x2d4   :  { %7062 = vmatpush.bf16.msra.mxu2 %v13195_v59  ;;  %v18367_v21 = vld [vmem:[#allocation5 + $0x89c] sm:$0xf]  ;;  %7037 = vmatpush.bf16.msra.mxu0 %v12107_v10  ;;  %v12555_v27 = vor.u32 %v18239_v35, %v12552_v20 }
 0x2d5   :  { %v13064_v22 = vld [vmem:[#allocation5 + $0x8d8] sm:$0xf0] }
 0x2d6   :  { %7075 = vmatpush.bf16.msra.mxu3 %v13707_v4  ;;  %v18495_v23 = vld [vmem:[#allocation5 + $0xc9c] sm:$0xf]  ;;  %7050 = vmatpush.bf16.msra.mxu1 %v12619_v13  ;;  %v13067_v28 = vor.u32 %v18367_v21, %v13064_v22 }
 0x2d7   :  { %v13576_v1 = vld [vmem:[#allocation5 + $0xcd8] sm:$0xf0] }
 0x2d8   :  { %v18095_v25 = vld [vmem:[#allocation5 + $0x1c] sm:$0xf]  ;;  %7063 = vmatpush.bf16.msra.mxu2 %v13131_v14  ;;  %v13579_v36 = vor.u32 %v18495_v23, %v13576_v1  ;;  %7038 = vmatpush.bf16.msra.mxu0 %v12043_v24 }
 0x2d9   :  { %v11976_v26 = vld [vmem:[#allocation5 + $0x58] sm:$0xf0] }
 0x2da   :  { %v18223_v29 = vld [vmem:[#allocation5 + $0x41c] sm:$0xf]  ;;  %7076 = vmatpush.bf16.msra.mxu3 %v13643_v19  ;;  %v11979_v48 = vor.u32 %v18095_v25, %v11976_v26  ;;  %7051 = vmatpush.bf16.msra.mxu1 %v12555_v27 }
 0x2db   :  { %v12488_v49 = vld [vmem:[#allocation5 + $0x458] sm:$0xf0] }
 0x2dc   :  { %v18351_v30 = vld [vmem:[#allocation5 + $0x81c] sm:$0xf]  ;;  %7064 = vmatpush.bf16.msra.mxu2 %v13067_v28  ;;  %v12491_v56 = vor.u32 %v18223_v29, %v12488_v49  ;;  %7039 = vmatpush.bf16.msra.mxu0 %v11979_v48  ;;  %v1157_v49 = vperm.slane %v19946_v16, 5 }
 0x2dd   :  { %v13000_v51 = vld [vmem:[#allocation5 + $0x858] sm:$0xf0] }
 0x2de   :  { %v18479_v39 = vld [vmem:[#allocation5 + $0xc1c] sm:$0xf]  ;;  %v13003_v57 = vor.u32 %v18351_v30, %v13000_v51  ;;  %7077 = vmatpush.bf16.msra.mxu3 %v13579_v36  ;;  %7052 = vmatpush.bf16.msra.mxu1 %v12491_v56  ;;  %v6846_v56 = vpop.f32.mrf.mxu1 }
 0x2df   :  { %v13512_v43 = vld [vmem:[#allocation5 + $0xc58] sm:$0xf0]  ;;  %7040 = vmatmul.bf16.vlgmr.msra.gmra.mxu0 %v19855_v34 }
 0x2e0   :  { %v18719_v45 = vld [vmem:[#allocation5 + $0x139c] sm:$0xf]  ;;  %v13515_v62 = vor.u32 %v18479_v39, %v13512_v43  ;;  %7065 = vmatpush.bf16.msra.mxu2 %v13003_v57 }
 0x2e1   :  { %v14472_v46 = vld [vmem:[#allocation5 + $0x13d8] sm:$0xf0]  ;;  %7053 = vmatmul.bf16.vlgmr.msra.gmra.mxu1 %v19859_v42 }
 0x2e2   :  { %v18847_v58 = vld [vmem:[#allocation5 + $0x179c] sm:$0xf]  ;;  %v14475_v63 = vor.u32 %v18719_v45, %v14472_v46  ;;  %7078 = vmatpush.bf16.msra.mxu3 %v13515_v62  ;;  %v6833_v45 = vpop.f32.mrf.mxu0 }
 0x2e3   :  { %v14984_v52 = vld [vmem:[#allocation5 + $0x17d8] sm:$0xf0]  ;;  %7066 = vmatmul.bf16.vlgmr.msra.gmra.mxu2 %v19853_v33 }
 0x2e4   :  { %v18975_v53 = vld [vmem:[#allocation5 + $0x1b9c] sm:$0xf]  ;;  %v14987_v0 = vor.u32 %v18847_v58, %v14984_v52  ;;  %7084 = vmatpush.bf16.msrb.mxu0 %v14475_v63 }
 0x2e5   :  { %v15496_v55 = vld [vmem:[#allocation5 + $0x1bd8] sm:$0xf0]  ;;  %7079 = vmatmul.bf16.vlgmr.msra.gmra.mxu3 %v19857_v41 }
 0x2e6   :  { %v19103_v59 = vld [vmem:[#allocation5 + $0x1f9c] sm:$0xf]  ;;  %v15499_v4 = vor.u32 %v18975_v53, %v15496_v55  ;;  %7097 = vmatpush.bf16.msrb.mxu1 %v14987_v0  ;;  %v6834_v55 = vadd.f32 %v6833_v45, %v1157_v49 }
 0x2e7   :  { %v16008_v60 = vld [vmem:[#allocation5 + $0x1fd8] sm:$0xf0] }
 0x2e8   :  { %v18703_v2 = vld [vmem:[#allocation5 + $0x131c] sm:$0xf]  ;;  %v16011_v6 = vor.u32 %v19103_v59, %v16008_v60  ;;  %7110 = vmatpush.bf16.msrb.mxu2 %v15499_v4  ;;  %v6847_v0 = vadd.f32 %v6846_v56, %v6834_v55 }
 0x2e9   :  { %v14408_v3 = vld [vmem:[#allocation5 + $0x1358] sm:$0xf0] }
 0x2ea   :  { %v18831_v5 = vld [vmem:[#allocation5 + $0x171c] sm:$0xf]  ;;  %v14411_v13 = vor.u32 %v18703_v2, %v14408_v3  ;;  %7123 = vmatpush.bf16.msrb.mxu3 %v16011_v6 }
 0x2eb   :  { %v14920_v7 = vld [vmem:[#allocation5 + $0x1758] sm:$0xf0] }
 0x2ec   :  { %v18959_v8 = vld [vmem:[#allocation5 + $0x1b1c] sm:$0xf]  ;;  %v14923_v14 = vor.u32 %v18831_v5, %v14920_v7  ;;  %7085 = vmatpush.bf16.msrb.mxu0 %v14411_v13 }
 0x2ed   :  { %v15432_v9 = vld [vmem:[#allocation5 + $0x1b58] sm:$0xf0] }
 0x2ee   :  { %v19087_v10 = vld [vmem:[#allocation5 + $0x1f1c] sm:$0xf]  ;;  %v15435_v15 = vor.u32 %v18959_v8, %v15432_v9  ;;  %7098 = vmatpush.bf16.msrb.mxu1 %v14923_v14  ;;  %v6859_v8 = vpop.f32.mrf.mxu2 }
 0x2ef   :  { %v15944_v12 = vld [vmem:[#allocation5 + $0x1f58] sm:$0xf0]  ;;  %v6860_v14 = vadd.f32 %v6859_v8, %v6847_v0  ;;  %v18472_v0 = vld [vmem:[#allocation5 + $0xbdc] sm:$0xf0] }
 0x2f0   :  { %v18687_v17 = vld [vmem:[#allocation5 + $0x129c] sm:$0xf]  ;;  %v15947_v19 = vor.u32 %v19087_v10, %v15944_v12  ;;  %7111 = vmatpush.bf16.msrb.mxu2 %v15435_v15  ;;  %v6872_v15 = vpop.f32.mrf.mxu3 }
 0x2f1   :  { %v14344_v35 = vld [vmem:[#allocation5 + $0x12d8] sm:$0xf0] }
 0x2f2   :  { %v18815_v18 = vld [vmem:[#allocation5 + $0x169c] sm:$0xf]  ;;  %v14347_v24 = vor.u32 %v18687_v17, %v14344_v35  ;;  %7124 = vmatpush.bf16.msrb.mxu3 %v15947_v19  ;;  %v19963_v19 = vadd.f32 %v6872_v15, %v6860_v14  ;;  %v18328_v15 = vld [vmem:[#allocation5 + $0x75c] sm:$0xf0] }
 0x2f3   :  { %v14856_v20 = vld [vmem:[#allocation5 + $0x16d8] sm:$0xf0] }
 0x2f4   :  { %v18943_v21 = vld [vmem:[#allocation5 + $0x1a9c] sm:$0xf]  ;;  %v14859_v26 = vor.u32 %v18815_v18, %v14856_v20  ;;  %7086 = vmatpush.bf16.msrb.mxu0 %v14347_v24  ;;  %v6835_v20 = vpop.f32.mrf.mxu0 }
 0x2f5   :  { %v15368_v22 = vld [vmem:[#allocation5 + $0x1ad8] sm:$0xf0]  ;;  %v18584_v20 = vld [vmem:[#allocation5 + $0xf5c] sm:$0xf0] }
 0x2f6   :  { %v19071_v23 = vld [vmem:[#allocation5 + $0x1e9c] sm:$0xf]  ;;  %v15371_v27 = vor.u32 %v18943_v21, %v15368_v22  ;;  %7099 = vmatpush.bf16.msrb.mxu1 %v14859_v26 }
 0x2f7   :  { %v15880_v1 = vld [vmem:[#allocation5 + $0x1ed8] sm:$0xf0] }
 0x2f8   :  { %v18671_v25 = vld [vmem:[#allocation5 + $0x121c] sm:$0xf]  ;;  %v15883_v30 = vor.u32 %v19071_v23, %v15880_v1  ;;  %7112 = vmatpush.bf16.msrb.mxu2 %v15371_v27  ;;  %v6874_v56 = vpop.f32.mrf.mxu3 }
 0x2f9   :  { %v14280_v28 = vld [vmem:[#allocation5 + $0x1258] sm:$0xf0] }
 0x2fa   :  { %v18799_v29 = vld [vmem:[#allocation5 + $0x161c] sm:$0xf]  ;;  %v14283_v44 = vor.u32 %v18671_v25, %v14280_v28  ;;  %7125 = vmatpush.bf16.msrb.mxu3 %v15883_v30  ;;  %v6848_v25 = vpop.f32.mrf.mxu1 }
 0x2fb   :  { %v14792_v31 = vld [vmem:[#allocation5 + $0x1658] sm:$0xf0]  ;;  %v12814_v25 = vld [vmem:[#allocation5 + $0x6a0] sm:$0xf] }
 0x2fc   :  { %v18927_v36 = vld [vmem:[#allocation5 + $0x1a1c] sm:$0xf]  ;;  %v14795_v46 = vor.u32 %v18799_v29, %v14792_v31  ;;  %7087 = vmatpush.bf16.msrb.mxu0 %v14283_v44  ;;  %v6885_v56 = vpop.f32.mrf.mxu0 }
 0x2fd   :  { %v15304_v51 = vld [vmem:[#allocation5 + $0x1a58] sm:$0xf0] }
 0x2fe   :  { %v19055_v39 = vld [vmem:[#allocation5 + $0x1e1c] sm:$0xf]  ;;  %v15307_v58 = vor.u32 %v18927_v36, %v15304_v51  ;;  %7100 = vmatpush.bf16.msrb.mxu1 %v14795_v46 }
 0x2ff   :  { %v15816_v43 = vld [vmem:[#allocation5 + $0x1e58] sm:$0xf0] }
 0x300   :  { %v18655_v48 = vld [vmem:[#allocation5 + $0x119c] sm:$0xf]  ;;  %v15819_v16 = vor.u32 %v19055_v39, %v15816_v43  ;;  %7113 = vmatpush.bf16.msrb.mxu2 %v15307_v58  ;;  %v6861_v58 = vpop.f32.mrf.mxu2 }
 0x301   :  { %v14216_v52 = vld [vmem:[#allocation5 + $0x11d8] sm:$0xf0]  ;;  %v13262_v58 = vld [vmem:[#allocation5 + $0xa20] sm:$0xf] }
 0x302   :  { %v18783_v53 = vld [vmem:[#allocation5 + $0x159c] sm:$0xf]  ;;  %v14219_v4 = vor.u32 %v18655_v48, %v14216_v52  ;;  %7126 = vmatpush.bf16.msrb.mxu3 %v15819_v16  ;;  %v12430_v16 = vld [vmem:[#allocation5 + $0x3a0] sm:$0xf] }
 0x303   :  { %v14728_v57 = vld [vmem:[#allocation5 + $0x15d8] sm:$0xf0] }
 0x304   :  { %v18911_v59 = vld [vmem:[#allocation5 + $0x199c] sm:$0xf]  ;;  %v14731_v2 = vor.u32 %v18783_v53, %v14728_v57  ;;  %7088 = vmatpush.bf16.msrb.mxu0 %v14219_v4  ;;  %v18216_v57 = vld [vmem:[#allocation5 + $0x3dc] sm:$0xf0] }
 0x305   :  { %v15240_v60 = vld [vmem:[#allocation5 + $0x19d8] sm:$0xf0] }
 0x306   :  { %v19039_v62 = vld [vmem:[#allocation5 + $0x1d9c] sm:$0xf]  ;;  %v15243_v3 = vor.u32 %v18911_v59, %v15240_v60  ;;  %7101 = vmatpush.bf16.msrb.mxu1 %v14731_v2  ;;  %v12942_v59 = vld [vmem:[#allocation5 + $0x7a0] sm:$0xf] }
 0x307   :  { %v15752_v63 = vld [vmem:[#allocation5 + $0x1dd8] sm:$0xf0] }
 0x308   :  { %v18639_v5 = vld [vmem:[#allocation5 + $0x111c] sm:$0xf]  ;;  %v15755_v9 = vor.u32 %v19039_v62, %v15752_v63  ;;  %7114 = vmatpush.bf16.msrb.mxu2 %v15243_v3  ;;  %v18344_v62 = vld [vmem:[#allocation5 + $0x7dc] sm:$0xf0] }
 0x309   :  { %v14152_v6 = vld [vmem:[#allocation5 + $0x1158] sm:$0xf0]  ;;  %v13454_v63 = vld [vmem:[#allocation5 + $0xba0] sm:$0xf]  ;;  %v12943_v8 = vor.u32 %v18344_v62, %v12942_v59 }
 0x30a   :  { %v18767_v7 = vld [vmem:[#allocation5 + $0x151c] sm:$0xf]  ;;  %v14155_v18 = vor.u32 %v18639_v5, %v14152_v6  ;;  %7127 = vmatpush.bf16.msrb.mxu3 %v15755_v9  ;;  %v13966_v3 = vld [vmem:[#allocation5 + $0xfa0] sm:$0xf]  ;;  %v13455_v9 = vor.u32 %v18472_v0, %v13454_v63  ;;  %v6886_v63 = vadd.f32 %v6885_v56, %v19963_v19  ;;  %v6898_v0 = vpop.f32.mrf.mxu1 }
 0x30b   :  { %v14664_v10 = vld [vmem:[#allocation5 + $0x1558] sm:$0xf0]  ;;  %v18600_v5 = vld [vmem:[#allocation5 + $0xfdc] sm:$0xf0] }
 0x30c   :  { %v18895_v12 = vld [vmem:[#allocation5 + $0x191c] sm:$0xf]  ;;  %v14667_v21 = vor.u32 %v18767_v7, %v14664_v10  ;;  %7089 = vmatpush.bf16.msrb.mxu0 %v14155_v18  ;;  %v12431_v7 = vor.u32 %v18216_v57, %v12430_v16  ;;  %v12366_v10 = vld [vmem:[#allocation5 + $0x320] sm:$0xf]  ;;  %v13967_v14 = vor.u32 %v18600_v5, %v13966_v3 }
 0x30d   :  { %v15176_v13 = vld [vmem:[#allocation5 + $0x1958] sm:$0xf0]  ;;  %v13902_v18 = vld [vmem:[#allocation5 + $0xf20] sm:$0xf] }
 0x30e   :  { %v19023_v17 = vld [vmem:[#allocation5 + $0x1d1c] sm:$0xf]  ;;  %v15179_v22 = vor.u32 %v18895_v12, %v15176_v13  ;;  %7102 = vmatpush.bf16.msrb.mxu1 %v14667_v21  ;;  %v18200_v12 = vld [vmem:[#allocation5 + $0x35c] sm:$0xf0] }
 0x30f   :  { %v15688_v35 = vld [vmem:[#allocation5 + $0x1d58] sm:$0xf0]  ;;  %v12878_v13 = vld [vmem:[#allocation5 + $0x720] sm:$0xf]  ;;  %v12367_v21 = vor.u32 %v18200_v12, %v12366_v10 }
 0x310   :  { %v18623_v23 = vld [vmem:[#allocation5 + $0x109c] sm:$0xf]  ;;  %v15691_v26 = vor.u32 %v19023_v17, %v15688_v35  ;;  %7115 = vmatpush.bf16.msrb.mxu2 %v15179_v22  ;;  %v13390_v17 = vld [vmem:[#allocation5 + $0xb20] sm:$0xf]  ;;  %v12879_v22 = vor.u32 %v18328_v15, %v12878_v13 }
 0x311   :  { %v14088_v1 = vld [vmem:[#allocation5 + $0x10d8] sm:$0xf0]  ;;  %v18456_v35 = vld [vmem:[#allocation5 + $0xb5c] sm:$0xf0] }
 0x312   :  { %v18751_v24 = vld [vmem:[#allocation5 + $0x149c] sm:$0xf]  ;;  %v14091_v31 = vor.u32 %v18623_v23, %v14088_v1  ;;  %7128 = vmatpush.bf16.msrb.mxu3 %v15691_v26  ;;  %v13391_v23 = vor.u32 %v18456_v35, %v13390_v17  ;;  %v12302_v1 = vld [vmem:[#allocation5 + $0x2a0] sm:$0xf]  ;;  %v13903_v26 = vor.u32 %v18584_v20, %v13902_v18  ;;  %v6911_v17 = vpop.f32.mrf.mxu2 }
 0x313   :  { %v14600_v27 = vld [vmem:[#allocation5 + $0x14d8] sm:$0xf0]  ;;  %v12174_v59 = vld [vmem:[#allocation5 + $0x1a0] sm:$0xf] }
 0x314   :  { %v18879_v28 = vld [vmem:[#allocation5 + $0x189c] sm:$0xf]  ;;  %v14603_v39 = vor.u32 %v18751_v24, %v14600_v27  ;;  %7090 = vmatpush.bf16.msrb.mxu0 %v14091_v31  ;;  %v18184_v24 = vld [vmem:[#allocation5 + $0x2dc] sm:$0xf0] }
 0x315   :  { %v15112_v29 = vld [vmem:[#allocation5 + $0x18d8] sm:$0xf0]  ;;  %v18312_v27 = vld [vmem:[#allocation5 + $0x6dc] sm:$0xf0]  ;;  %v12303_v31 = vor.u32 %v18184_v24, %v12302_v1 }
 0x316   :  { %v19007_v49 = vld [vmem:[#allocation5 + $0x1c9c] sm:$0xf]  ;;  %v15115_v43 = vor.u32 %v18879_v28, %v15112_v29  ;;  %7103 = vmatpush.bf16.msrb.mxu1 %v14603_v39  ;;  %v13326_v28 = vld [vmem:[#allocation5 + $0xaa0] sm:$0xf] }
 0x317   :  { %v15624_v30 = vld [vmem:[#allocation5 + $0x1cd8] sm:$0xf0]  ;;  %v18440_v29 = vld [vmem:[#allocation5 + $0xadc] sm:$0xf0] }
 0x318   :  { %v18607_v36 = vld [vmem:[#allocation5 + $0x101c] sm:$0xf]  ;;  %v15627_v48 = vor.u32 %v19007_v49, %v15624_v30  ;;  %7116 = vmatpush.bf16.msrb.mxu2 %v15115_v43  ;;  %v13838_v49 = vld [vmem:[#allocation5 + $0xea0] sm:$0xf] }
 0x319   :  { %v14024_v51 = vld [vmem:[#allocation5 + $0x1058] sm:$0xf0]  ;;  %v18568_v30 = vld [vmem:[#allocation5 + $0xedc] sm:$0xf0] }
 0x31a   :  { %v18735_v44 = vld [vmem:[#allocation5 + $0x141c] sm:$0xf]  ;;  %v14027_v60 = vor.u32 %v18607_v36, %v14024_v51  ;;  %7129 = vmatpush.bf16.msrb.mxu3 %v15627_v48  ;;  %v12815_v36 = vor.u32 %v18312_v27, %v12814_v25  ;;  %v13327_v51 = vor.u32 %v18440_v29, %v13326_v28  ;;  %v12238_v39 = vld [vmem:[#allocation5 + $0x220] sm:$0xf] }
 0x31b   :  { %v14536_v45 = vld [vmem:[#allocation5 + $0x1458] sm:$0xf0]  ;;  %v18168_v43 = vld [vmem:[#allocation5 + $0x25c] sm:$0xf0] }
 0x31c   :  { %v18863_v46 = vld [vmem:[#allocation5 + $0x181c] sm:$0xf]  ;;  %v14539_v4 = vor.u32 %v18735_v44, %v14536_v45  ;;  %7091 = vmatpush.bf16.msrb.mxu0 %v14027_v60  ;;  %v12750_v44 = vld [vmem:[#allocation5 + $0x620] sm:$0xf]  ;;  %v13839_v45 = vor.u32 %v18568_v30, %v13838_v49 }
 0x31d   :  { %v15048_v52 = vld [vmem:[#allocation5 + $0x1858] sm:$0xf0]  ;;  %v18424_v48 = vld [vmem:[#allocation5 + $0xa5c] sm:$0xf0] }
 0x31e   :  { %v18991_v53 = vld [vmem:[#allocation5 + $0x1c1c] sm:$0xf]  ;;  %v15051_v2 = vor.u32 %v18863_v46, %v15048_v52  ;;  %7104 = vmatpush.bf16.msrb.mxu1 %v14539_v4  ;;  %v18296_v46 = vld [vmem:[#allocation5 + $0x65c] sm:$0xf0]  ;;  %v13263_v57 = vor.u32 %v18424_v48, %v13262_v58 }
 0x31f   :  { %v15560_v55 = vld [vmem:[#allocation5 + $0x1c58] sm:$0xf0]  ;;  %7092 = vmatmul.bf16.vlgmr.msrb.gmra.mxu0 %v19867_v37  ;;  %v13774_v52 = vld [vmem:[#allocation5 + $0xe20] sm:$0xf]  ;;  %v12751_v16 = vor.u32 %v18296_v46, %v12750_v44 }
 0x320   :  { %v15563_v6 = vor.u32 %v18991_v53, %v15560_v55  ;;  %7117 = vmatpush.bf16.msrb.mxu2 %v15051_v2  ;;  %7136 = vmatpush.bf16.msra.mxu0 %v12431_v7  ;;  %v18552_v53 = vld [vmem:[#allocation5 + $0xe5c] sm:$0xf0]  ;;  %v12239_v55 = vor.u32 %v18168_v43, %v12238_v39 }
 0x321   :  { %7105 = vmatmul.bf16.vlgmr.msrb.gmra.mxu1 %v19871_v40  ;;  %v18152_v60 = vld [vmem:[#allocation5 + $0x1dc] sm:$0xf0]  ;;  %v13775_v4 = vor.u32 %v18552_v53, %v13774_v52 }
 0x322   :  { %7130 = vmatpush.bf16.msrb.mxu3 %v15563_v6  ;;  %7149 = vmatpush.bf16.msra.mxu1 %v12943_v8  ;;  %v12686_v62 = vld [vmem:[#allocation5 + $0x5a0] sm:$0xf]  ;;  %v6899_v8 = vadd.f32 %v6898_v0, %v6886_v63 }
 0x323   :  { %7118 = vmatmul.bf16.vlgmr.msrb.gmra.mxu2 %v19865_v32  ;;  %v18280_v2 = vld [vmem:[#allocation5 + $0x5dc] sm:$0xf0] }
 0x324   :  { %7162 = vmatpush.bf16.msra.mxu2 %v13455_v9  ;;  %7137 = vmatpush.bf16.msra.mxu0 %v12367_v21  ;;  %v13198_v3 = vld [vmem:[#allocation5 + $0x9a0] sm:$0xf]  ;;  %v12175_v9 = vor.u32 %v18152_v60, %v12174_v59  ;;  %v12687_v10 = vor.u32 %v18280_v2, %v12686_v62  ;;  %v6912_v21 = vadd.f32 %v6911_v17, %v6899_v8 }
 0x325   :  { %7131 = vmatmul.bf16.vlgmr.msrb.gmra.mxu3 %v19869_v38  ;;  %v18408_v5 = vld [vmem:[#allocation5 + $0x9dc] sm:$0xf0] }
 0x326   :  { %7175 = vmatpush.bf16.msra.mxu3 %v13967_v14  ;;  %7150 = vmatpush.bf16.msra.mxu1 %v12879_v22  ;;  %v13710_v6 = vld [vmem:[#allocation5 + $0xda0] sm:$0xf]  ;;  %v13199_v12 = vor.u32 %v18408_v5, %v13198_v3  ;;  %v6924_v22 = vpop.f32.mrf.mxu3 }
 0x327   :  { %v18536_v7 = vld [vmem:[#allocation5 + $0xddc] sm:$0xf0]  ;;  %v19970_v25 = vadd.f32 %v6924_v22, %v6912_v21 }
 0x328   :  { %7163 = vmatpush.bf16.msra.mxu2 %v13391_v23  ;;  %7138 = vmatpush.bf16.msra.mxu0 %v12303_v31  ;;  %v12110_v13 = vld [vmem:[#allocation5 + $0x120] sm:$0xf]  ;;  %v13711_v19 = vor.u32 %v18536_v7, %v13710_v6  ;;  %v6900_v31 = vpop.f32.mrf.mxu1 }
 0x329   :  { %v18136_v14 = vld [vmem:[#allocation5 + $0x15c] sm:$0xf0] }
 0x32a   :  { %7176 = vmatpush.bf16.msra.mxu3 %v13903_v26  ;;  %7151 = vmatpush.bf16.msra.mxu1 %v12815_v36  ;;  %v12622_v15 = vld [vmem:[#allocation5 + $0x520] sm:$0xf]  ;;  %v12111_v24 = vor.u32 %v18136_v14, %v12110_v13  ;;  %v6887_v26 = vpop.f32.mrf.mxu0 }
 0x32b   :  { %v18264_v35 = vld [vmem:[#allocation5 + $0x55c] sm:$0xf0] }
 0x32c   :  { %7164 = vmatpush.bf16.msra.mxu2 %v13327_v51  ;;  %7139 = vmatpush.bf16.msra.mxu0 %v12239_v55  ;;  %v13134_v18 = vld [vmem:[#allocation5 + $0x920] sm:$0xf]  ;;  %v12623_v27 = vor.u32 %v18264_v35, %v12622_v15 }
 0x32d   :  { %v18392_v20 = vld [vmem:[#allocation5 + $0x95c] sm:$0xf0] }
 0x32e   :  { %7177 = vmatpush.bf16.msra.mxu3 %v13839_v45  ;;  %7152 = vmatpush.bf16.msra.mxu1 %v12751_v16  ;;  %v13646_v23 = vld [vmem:[#allocation5 + $0xd20] sm:$0xf]  ;;  %v13135_v28 = vor.u32 %v18392_v20, %v13134_v18  ;;  %v6926_v0 = vpop.f32.mrf.mxu3 }
 0x32f   :  { %v18520_v1 = vld [vmem:[#allocation5 + $0xd5c] sm:$0xf0] }
 0x330   :  { %7165 = vmatpush.bf16.msra.mxu2 %v13263_v57  ;;  %7140 = vmatpush.bf16.msra.mxu0 %v12175_v9  ;;  %v12046_v29 = vld [vmem:[#allocation5 + $0xa0] sm:$0xf]  ;;  %v13647_v36 = vor.u32 %v18520_v1, %v13646_v23  ;;  %v6913_v57 = vpop.f32.mrf.mxu2 }
 0x331   :  { %v18120_v49 = vld [vmem:[#allocation5 + $0xdc] sm:$0xf0] }
 0x332   :  { %7178 = vmatpush.bf16.msra.mxu3 %v13775_v4  ;;  %7153 = vmatpush.bf16.msra.mxu1 %v12687_v10  ;;  %v12558_v30 = vld [vmem:[#allocation5 + $0x4a0] sm:$0xf]  ;;  %v12047_v46 = vor.u32 %v18120_v49, %v12046_v29 }
 0x333   :  { %v18248_v51 = vld [vmem:[#allocation5 + $0x4dc] sm:$0xf0] }
 0x334   :  { %7166 = vmatpush.bf16.msra.mxu2 %v13199_v12  ;;  %v13070_v39 = vld [vmem:[#allocation5 + $0x8a0] sm:$0xf]  ;;  %7141 = vmatpush.bf16.msra.mxu0 %v12111_v24  ;;  %v12559_v52 = vor.u32 %v18248_v51, %v12558_v30 }
 0x335   :  { %v18376_v43 = vld [vmem:[#allocation5 + $0x8dc] sm:$0xf0] }
 0x336   :  { %7179 = vmatpush.bf16.msra.mxu3 %v13711_v19  ;;  %v13582_v44 = vld [vmem:[#allocation5 + $0xca0] sm:$0xf]  ;;  %7154 = vmatpush.bf16.msra.mxu1 %v12623_v27  ;;  %v13071_v53 = vor.u32 %v18376_v43, %v13070_v39 }
 0x337   :  { %v18504_v45 = vld [vmem:[#allocation5 + $0xcdc] sm:$0xf0] }
 0x338   :  { %v11982_v58 = vld [vmem:[#allocation5 + $0x20] sm:$0xf]  ;;  %7167 = vmatpush.bf16.msra.mxu2 %v13135_v28  ;;  %v13583_v59 = vor.u32 %v18504_v45, %v13582_v44  ;;  %7142 = vmatpush.bf16.msra.mxu0 %v12047_v46 }
 0x339   :  { %v18104_v48 = vld [vmem:[#allocation5 + $0x5c] sm:$0xf0] }
 0x33a   :  { %v12494_v55 = vld [vmem:[#allocation5 + $0x420] sm:$0xf]  ;;  %7180 = vmatpush.bf16.msra.mxu3 %v13647_v36  ;;  %v11983_v5 = vor.u32 %v18104_v48, %v11982_v58  ;;  %7155 = vmatpush.bf16.msra.mxu1 %v12559_v52 }
 0x33b   :  { %v18232_v56 = vld [vmem:[#allocation5 + $0x45c] sm:$0xf0] }
 0x33c   :  { %v13006_v16 = vld [vmem:[#allocation5 + $0x820] sm:$0xf]  ;;  %7168 = vmatpush.bf16.msra.mxu2 %v13071_v53  ;;  %v12495_v9 = vor.u32 %v18232_v56, %v12494_v55  ;;  %7143 = vmatpush.bf16.msra.mxu0 %v11983_v5 }
 0x33d   :  { %v18360_v60 = vld [vmem:[#allocation5 + $0x85c] sm:$0xf0] }
 0x33e   :  { %v13518_v62 = vld [vmem:[#allocation5 + $0xc20] sm:$0xf]  ;;  %v13007_v10 = vor.u32 %v18360_v60, %v13006_v16  ;;  %7181 = vmatpush.bf16.msra.mxu3 %v13583_v59  ;;  %7156 = vmatpush.bf16.msra.mxu1 %v12495_v9 }
 0x33f   :  { %v18488_v63 = vld [vmem:[#allocation5 + $0xc5c] sm:$0xf0]  ;;  %7144 = vmatmul.bf16.vlgmr.msra.gmra.mxu0 %v19855_v34 }
 0x340   :  { %v14478_v4 = vld [vmem:[#allocation5 + $0x13a0] sm:$0xf]  ;;  %v13519_v14 = vor.u32 %v18488_v63, %v13518_v62  ;;  %7169 = vmatpush.bf16.msra.mxu2 %v13007_v10  ;;  %v6950_v10 = vpop.f32.mrf.mxu1 }
 0x341   :  { %v18728_v2 = vld [vmem:[#allocation5 + $0x13dc] sm:$0xf0]  ;;  %7157 = vmatmul.bf16.vlgmr.msra.gmra.mxu1 %v19859_v42 }
 0x342   :  { %v14990_v3 = vld [vmem:[#allocation5 + $0x17a0] sm:$0xf]  ;;  %v14479_v15 = vor.u32 %v18728_v2, %v14478_v4  ;;  %7182 = vmatpush.bf16.msra.mxu3 %v13519_v14  ;;  %v6937_v2 = vpop.f32.mrf.mxu0 }
 0x343   :  { %v18856_v6 = vld [vmem:[#allocation5 + $0x17dc] sm:$0xf0]  ;;  %7170 = vmatmul.bf16.vlgmr.msra.gmra.mxu2 %v19853_v33 }
 0x344   :  { %v15502_v7 = vld [vmem:[#allocation5 + $0x1ba0] sm:$0xf]  ;;  %v14991_v17 = vor.u32 %v18856_v6, %v14990_v3  ;;  %7188 = vmatpush.bf16.msrb.mxu0 %v14479_v15 }
 0x345   :  { %v18984_v8 = vld [vmem:[#allocation5 + $0x1bdc] sm:$0xf0]  ;;  %7183 = vmatmul.bf16.vlgmr.msra.gmra.mxu3 %v19857_v41 }
 0x346   :  { %v16014_v12 = vld [vmem:[#allocation5 + $0x1fa0] sm:$0xf]  ;;  %v15503_v19 = vor.u32 %v18984_v8, %v15502_v7  ;;  %7201 = vmatpush.bf16.msrb.mxu1 %v14991_v17 }
 0x347   :  { %v19112_v13 = vld [vmem:[#allocation5 + $0x1fdc] sm:$0xf0] }
 0x348   :  { %v14414_v35 = vld [vmem:[#allocation5 + $0x1320] sm:$0xf]  ;;  %v16015_v21 = vor.u32 %v19112_v13, %v16014_v12  ;;  %7214 = vmatpush.bf16.msrb.mxu2 %v15503_v19 }
 0x349   :  { %v18712_v18 = vld [vmem:[#allocation5 + $0x135c] sm:$0xf0] }
 0x34a   :  { %v14926_v20 = vld [vmem:[#allocation5 + $0x1720] sm:$0xf]  ;;  %v14415_v27 = vor.u32 %v18712_v18, %v14414_v35  ;;  %7227 = vmatpush.bf16.msrb.mxu3 %v16015_v21 }
 0x34b   :  { %v18840_v22 = vld [vmem:[#allocation5 + $0x175c] sm:$0xf0] }
 0x34c   :  { %v15438_v23 = vld [vmem:[#allocation5 + $0x1b20] sm:$0xf]  ;;  %v14927_v28 = vor.u32 %v18840_v22, %v14926_v20  ;;  %7189 = vmatpush.bf16.msrb.mxu0 %v14415_v27 }
 0x34d   :  { %v18968_v1 = vld [vmem:[#allocation5 + $0x1b5c] sm:$0xf0] }
 0x34e   :  { %v15950_v24 = vld [vmem:[#allocation5 + $0x1f20] sm:$0xf]  ;;  %v15439_v29 = vor.u32 %v18968_v1, %v15438_v23  ;;  %7202 = vmatpush.bf16.msrb.mxu1 %v14927_v28 }
 0x34f   :  { %v19096_v26 = vld [vmem:[#allocation5 + $0x1f5c] sm:$0xf0] }
 0x350   :  { %v14350_v49 = vld [vmem:[#allocation5 + $0x12a0] sm:$0xf]  ;;  %v15951_v36 = vor.u32 %v19096_v26, %v15950_v24  ;;  %7215 = vmatpush.bf16.msrb.mxu2 %v15439_v29  ;;  %v6963_v24 = vpop.f32.mrf.mxu2 }
 0x351   :  { %v18696_v30 = vld [vmem:[#allocation5 + $0x12dc] sm:$0xf0] }
 0x352   :  { %v14862_v31 = vld [vmem:[#allocation5 + $0x16a0] sm:$0xf]  ;;  %v14351_v46 = vor.u32 %v18696_v30, %v14350_v49  ;;  %7228 = vmatpush.bf16.msrb.mxu3 %v15951_v36  ;;  %v6976_v30 = vpop.f32.mrf.mxu3 }
 0x353   :  { %v18824_v51 = vld [vmem:[#allocation5 + $0x16dc] sm:$0xf0] }
 0x354   :  { %v15374_v39 = vld [vmem:[#allocation5 + $0x1aa0] sm:$0xf]  ;;  %v14863_v48 = vor.u32 %v18824_v51, %v14862_v31  ;;  %7190 = vmatpush.bf16.msrb.mxu0 %v14351_v46 }
 0x355   :  { %v18952_v43 = vld [vmem:[#allocation5 + $0x1adc] sm:$0xf0] }
 0x356   :  { %v15886_v44 = vld [vmem:[#allocation5 + $0x1ea0] sm:$0xf]  ;;  %v15375_v52 = vor.u32 %v18952_v43, %v15374_v39  ;;  %7203 = vmatpush.bf16.msrb.mxu1 %v14863_v48  ;;  %v6939_v43 = vpop.f32.mrf.mxu0 }
 0x357   :  { %v19080_v45 = vld [vmem:[#allocation5 + $0x1edc] sm:$0xf0]  ;;  %v13392_v43 = vld [vmem:[#allocation5 + $0xb60] sm:$0xf0] }
 0x358   :  { %v14286_v58 = vld [vmem:[#allocation5 + $0x1220] sm:$0xf]  ;;  %v15887_v57 = vor.u32 %v19080_v45, %v15886_v44  ;;  %7216 = vmatpush.bf16.msrb.mxu2 %v15375_v52  ;;  %v6952_v52 = vpop.f32.mrf.mxu1 }
 0x359   :  { %v18680_v53 = vld [vmem:[#allocation5 + $0x125c] sm:$0xf0]  ;;  %v18176_v52 = vld [vmem:[#allocation5 + $0x2a4] sm:$0xf] }
 0x35a   :  { %v14798_v55 = vld [vmem:[#allocation5 + $0x1620] sm:$0xf]  ;;  %v14287_v4 = vor.u32 %v18680_v53, %v14286_v58  ;;  %7229 = vmatpush.bf16.msrb.mxu3 %v15887_v57 }
 0x35b   :  { %v19976_v56 = vld [vmem:[#allocation7] sm:$0xff] }
 0x35c   :  { %v1158_v16 = vperm.slane %v19976_v56, 6  ;;  %v18808_v59 = vld [vmem:[#allocation5 + $0x165c] sm:$0xf0]  ;;  %7191 = vmatpush.bf16.msrb.mxu0 %v14287_v4 }
 0x35d   :  { %v15310_v60 = vld [vmem:[#allocation5 + $0x1a20] sm:$0xf]  ;;  %v14799_v3 = vor.u32 %v18808_v59, %v14798_v55 }
 0x35e   :  { %v18936_v62 = vld [vmem:[#allocation5 + $0x1a5c] sm:$0xf0]  ;;  %v6938_v9 = vadd.f32 %v6937_v2, %v1158_v16 }
 0x35f   :  { %v15822_v63 = vld [vmem:[#allocation5 + $0x1e20] sm:$0xf]  ;;  %v15311_v5 = vor.u32 %v18936_v62, %v15310_v60  ;;  %7204 = vmatpush.bf16.msrb.mxu1 %v14799_v3 }
 0x360   :  { %v19064_v0 = vld [vmem:[#allocation5 + $0x1e5c] sm:$0xf0]  ;;  %v6951_v35 = vadd.f32 %v6950_v10, %v6938_v9 }
 0x361   :  { %v14222_v6 = vld [vmem:[#allocation5 + $0x11a0] sm:$0xf]  ;;  %v15823_v12 = vor.u32 %v19064_v0, %v15822_v63  ;;  %7217 = vmatpush.bf16.msrb.mxu2 %v15311_v5 }
 0x362   :  { %v18664_v7 = vld [vmem:[#allocation5 + $0x11dc] sm:$0xf0]  ;;  %v6964_v49 = vadd.f32 %v6963_v24, %v6951_v35  ;;  %v12944_v35 = vld [vmem:[#allocation5 + $0x7e0] sm:$0xf0] }
 0x363   :  { %v14734_v8 = vld [vmem:[#allocation5 + $0x15a0] sm:$0xf]  ;;  %v14223_v18 = vor.u32 %v18664_v7, %v14222_v6  ;;  %7230 = vmatpush.bf16.msrb.mxu3 %v15823_v12  ;;  %v6965_v7 = vpop.f32.mrf.mxu2 }
 0x364   :  { %v18792_v13 = vld [vmem:[#allocation5 + $0x15dc] sm:$0xf0]  ;;  %v19979_v39 = vadd.f32 %v6976_v30, %v6964_v49  ;;  %v12368_v49 = vld [vmem:[#allocation5 + $0x360] sm:$0xf0] }
 0x365   :  { %v15246_v14 = vld [vmem:[#allocation5 + $0x19a0] sm:$0xf]  ;;  %v14735_v20 = vor.u32 %v18792_v13, %v14734_v8  ;;  %7192 = vmatpush.bf16.msrb.mxu0 %v14223_v18  ;;  %v6978_v13 = vpop.f32.mrf.mxu3  ;;  %v18464_v18 = vld [vmem:[#allocation5 + $0xba4] sm:$0xf] }
 0x366   :  { %v18920_v15 = vld [vmem:[#allocation5 + $0x19dc] sm:$0xf0]  ;;  %v18320_v30 = vld [vmem:[#allocation5 + $0x724] sm:$0xf] }
 0x367   :  { %v15758_v17 = vld [vmem:[#allocation5 + $0x1da0] sm:$0xf]  ;;  %v15247_v21 = vor.u32 %v18920_v15, %v15246_v14  ;;  %7205 = vmatpush.bf16.msrb.mxu1 %v14735_v20  ;;  %v18208_v14 = vld [vmem:[#allocation5 + $0x3a4] sm:$0xf] }
 0x368   :  { %v19048_v19 = vld [vmem:[#allocation5 + $0x1ddc] sm:$0xf0]  ;;  %v12432_v15 = vld [vmem:[#allocation5 + $0x3e0] sm:$0xf0] }
 0x369   :  { %v14158_v22 = vld [vmem:[#allocation5 + $0x1120] sm:$0xf]  ;;  %v15759_v26 = vor.u32 %v19048_v19, %v15758_v17  ;;  %7218 = vmatpush.bf16.msrb.mxu2 %v15247_v21  ;;  %v18336_v17 = vld [vmem:[#allocation5 + $0x7a4] sm:$0xf] }
 0x36a   :  { %v18648_v23 = vld [vmem:[#allocation5 + $0x115c] sm:$0xf0]  ;;  %v13456_v20 = vld [vmem:[#allocation5 + $0xbe0] sm:$0xf0] }
 0x36b   :  { %v14670_v1 = vld [vmem:[#allocation5 + $0x1520] sm:$0xf]  ;;  %v14159_v51 = vor.u32 %v18648_v23, %v14158_v22  ;;  %7231 = vmatpush.bf16.msrb.mxu3 %v15759_v26  ;;  %v18592_v23 = vld [vmem:[#allocation5 + $0xfa4] sm:$0xf]  ;;  %v12435_v26 = vor.u32 %v18208_v14, %v12432_v15  ;;  %v6989_v15 = vpop.f32.mrf.mxu0 }
 0x36c   :  { %v18776_v27 = vld [vmem:[#allocation5 + $0x155c] sm:$0xf0]  ;;  %v13776_v13 = vld [vmem:[#allocation5 + $0xe60] sm:$0xf0] }
 0x36d   :  { %v15182_v28 = vld [vmem:[#allocation5 + $0x1920] sm:$0xf]  ;;  %v14671_v44 = vor.u32 %v18776_v27, %v14670_v1  ;;  %7193 = vmatpush.bf16.msrb.mxu0 %v14159_v51  ;;  %v13968_v1 = vld [vmem:[#allocation5 + $0xfe0] sm:$0xf0]  ;;  %v12947_v27 = vor.u32 %v18336_v17, %v12944_v35 }
 0x36e   :  { %v18904_v29 = vld [vmem:[#allocation5 + $0x195c] sm:$0xf0]  ;;  %v18448_v51 = vld [vmem:[#allocation5 + $0xb24] sm:$0xf] }
 0x36f   :  { %v15694_v31 = vld [vmem:[#allocation5 + $0x1d20] sm:$0xf]  ;;  %v15183_v45 = vor.u32 %v18904_v29, %v15182_v28  ;;  %7206 = vmatpush.bf16.msrb.mxu1 %v14671_v44  ;;  %v13459_v28 = vor.u32 %v18464_v18, %v13456_v20  ;;  %v18192_v29 = vld [vmem:[#allocation5 + $0x324] sm:$0xf] }
 0x370   :  { %v19032_v36 = vld [vmem:[#allocation5 + $0x1d5c] sm:$0xf0]  ;;  %v18576_v44 = vld [vmem:[#allocation5 + $0xf24] sm:$0xf] }
 0x371   :  { %v14094_v46 = vld [vmem:[#allocation5 + $0x10a0] sm:$0xf]  ;;  %v15695_v53 = vor.u32 %v19032_v36, %v15694_v31  ;;  %7219 = vmatpush.bf16.msrb.mxu2 %v15183_v45  ;;  %v13971_v31 = vor.u32 %v18592_v23, %v13968_v1  ;;  %v12880_v36 = vld [vmem:[#allocation5 + $0x760] sm:$0xf0] }
 0x372   :  { %v18632_v58 = vld [vmem:[#allocation5 + $0x10dc] sm:$0xf0]  ;;  %v13904_v45 = vld [vmem:[#allocation5 + $0xf60] sm:$0xf0] }
 0x373   :  { %v14606_v48 = vld [vmem:[#allocation5 + $0x14a0] sm:$0xf]  ;;  %v14095_v62 = vor.u32 %v18632_v58, %v14094_v46  ;;  %7232 = vmatpush.bf16.msrb.mxu3 %v15695_v53  ;;  %v12371_v46 = vor.u32 %v18192_v29, %v12368_v49  ;;  %v12883_v58 = vor.u32 %v18320_v30, %v12880_v36  ;;  %v12304_v53 = vld [vmem:[#allocation5 + $0x2e0] sm:$0xf0] }
 0x374   :  { %v18760_v55 = vld [vmem:[#allocation5 + $0x14dc] sm:$0xf0]  ;;  %v18144_v35 = vld [vmem:[#allocation5 + $0x1a4] sm:$0xf] }
 0x375   :  { %v15118_v16 = vld [vmem:[#allocation5 + $0x18a0] sm:$0xf]  ;;  %v14607_v4 = vor.u32 %v18760_v55, %v14606_v48  ;;  %7194 = vmatpush.bf16.msrb.mxu0 %v14095_v62  ;;  %v13395_v48 = vor.u32 %v18448_v51, %v13392_v43  ;;  %v18304_v55 = vld [vmem:[#allocation5 + $0x6a4] sm:$0xf] }
 0x376   :  { %v18888_v57 = vld [vmem:[#allocation5 + $0x18dc] sm:$0xf0]  ;;  %v18560_v62 = vld [vmem:[#allocation5 + $0xea4] sm:$0xf] }
 0x377   :  { %v15630_v59 = vld [vmem:[#allocation5 + $0x1ca0] sm:$0xf]  ;;  %v15119_v2 = vor.u32 %v18888_v57, %v15118_v16  ;;  %7207 = vmatpush.bf16.msrb.mxu1 %v14607_v4  ;;  %v13907_v16 = vor.u32 %v18576_v44, %v13904_v45  ;;  %v12816_v57 = vld [vmem:[#allocation5 + $0x6e0] sm:$0xf0]  ;;  %v7015_v44 = vpop.f32.mrf.mxu2 }
 0x378   :  { %v19016_v60 = vld [vmem:[#allocation5 + $0x1cdc] sm:$0xf0]  ;;  %v12819_v4 = vor.u32 %v18304_v55, %v12816_v57  ;;  %v12176_v18 = vld [vmem:[#allocation5 + $0x1e0] sm:$0xf0] }
 0x379   :  { %v14030_v63 = vld [vmem:[#allocation5 + $0x1020] sm:$0xf]  ;;  %v15631_v8 = vor.u32 %v19016_v60, %v15630_v59  ;;  %7220 = vmatpush.bf16.msrb.mxu2 %v15119_v2  ;;  %v18432_v59 = vld [vmem:[#allocation5 + $0xaa4] sm:$0xf]  ;;  %v12179_v49 = vor.u32 %v18144_v35, %v12176_v18 }
 0x37a   :  { %v18616_v0 = vld [vmem:[#allocation5 + $0x105c] sm:$0xf0]  ;;  %v13328_v60 = vld [vmem:[#allocation5 + $0xae0] sm:$0xf0] }
 0x37b   :  { %v14542_v3 = vld [vmem:[#allocation5 + $0x1420] sm:$0xf]  ;;  %v14031_v19 = vor.u32 %v18616_v0, %v14030_v63  ;;  %7233 = vmatpush.bf16.msrb.mxu3 %v15631_v8  ;;  %v13840_v63 = vld [vmem:[#allocation5 + $0xee0] sm:$0xf0]  ;;  %v12307_v0 = vor.u32 %v18176_v52, %v12304_v53  ;;  %v13331_v2 = vor.u32 %v18432_v59, %v13328_v60  ;;  %v7028_v52 = vpop.f32.mrf.mxu3  ;;  %v6991_v59 = vpop.f32.mrf.mxu0 }
 0x37c   :  { %v18744_v5 = vld [vmem:[#allocation5 + $0x145c] sm:$0xf0]  ;;  %v13843_v7 = vor.u32 %v18560_v62, %v13840_v63  ;;  %v12752_v8 = vld [vmem:[#allocation5 + $0x660] sm:$0xf0] }
 0x37d   :  { %v15054_v6 = vld [vmem:[#allocation5 + $0x1820] sm:$0xf]  ;;  %v14543_v21 = vor.u32 %v18744_v5, %v14542_v3  ;;  %7195 = vmatpush.bf16.msrb.mxu0 %v14031_v19  ;;  %v18160_v3 = vld [vmem:[#allocation5 + $0x224] sm:$0xf] }
 0x37e   :  { %v18872_v9 = vld [vmem:[#allocation5 + $0x185c] sm:$0xf0]  ;;  %v12240_v5 = vld [vmem:[#allocation5 + $0x260] sm:$0xf0] }
 0x37f   :  { %v15566_v10 = vld [vmem:[#allocation5 + $0x1c20] sm:$0xf]  ;;  %v15055_v22 = vor.u32 %v18872_v9, %v15054_v6  ;;  %7208 = vmatpush.bf16.msrb.mxu1 %v14543_v21  ;;  %v18288_v6 = vld [vmem:[#allocation5 + $0x624] sm:$0xf]  ;;  %v12243_v14 = vor.u32 %v18160_v3, %v12240_v5  ;;  %v6990_v21 = vadd.f32 %v6989_v15, %v19979_v39  ;;  %v7017_v18 = vpop.f32.mrf.mxu2 }
 0x380   :  { %v19000_v12 = vld [vmem:[#allocation5 + $0x1c5c] sm:$0xf0]  ;;  %7196 = vmatmul.bf16.vlgmr.msrb.gmra.mxu0 %v19867_v37  ;;  %v18416_v9 = vld [vmem:[#allocation5 + $0xa24] sm:$0xf]  ;;  %v12755_v17 = vor.u32 %v18288_v6, %v12752_v8  ;;  %v1159_v18 = vperm.slane %v19976_v56, 7 }
 0x381   :  { %v15567_v24 = vor.u32 %v19000_v12, %v15566_v10  ;;  %7221 = vmatpush.bf16.msrb.mxu2 %v15055_v22  ;;  %7240 = vmatpush.bf16.msra.mxu0 %v12435_v26  ;;  %v13264_v10 = vld [vmem:[#allocation5 + $0xa60] sm:$0xf0]  ;;  %v7002_v22 = vpop.f32.mrf.mxu1 }
 0x382   :  { %7209 = vmatmul.bf16.vlgmr.msrb.gmra.mxu1 %v19871_v40  ;;  %v18544_v12 = vld [vmem:[#allocation5 + $0xe24] sm:$0xf]  ;;  %v13267_v19 = vor.u32 %v18416_v9, %v13264_v10  ;;  %v7003_v29 = vadd.f32 %v7002_v22, %v6990_v21 }
 0x383   :  { %7234 = vmatpush.bf16.msrb.mxu3 %v15567_v24  ;;  %7253 = vmatpush.bf16.msra.mxu1 %v12947_v27  ;;  %v18272_v20 = vld [vmem:[#allocation5 + $0x5a4] sm:$0xf]  ;;  %v13779_v23 = vor.u32 %v18544_v12, %v13776_v13 }
 0x384   :  { %7222 = vmatmul.bf16.vlgmr.msrb.gmra.mxu2 %v19865_v32  ;;  %v12688_v1 = vld [vmem:[#allocation5 + $0x5e0] sm:$0xf0] }
 0x385   :  { %7266 = vmatpush.bf16.msra.mxu2 %v13459_v28  ;;  %7241 = vmatpush.bf16.msra.mxu0 %v12371_v46  ;;  %v18400_v24 = vld [vmem:[#allocation5 + $0x9a4] sm:$0xf]  ;;  %v12691_v30 = vor.u32 %v18272_v20, %v12688_v1  ;;  %v7030_v1 = vpop.f32.mrf.mxu3 }
 0x386   :  { %7235 = vmatmul.bf16.vlgmr.msrb.gmra.mxu3 %v19869_v38  ;;  %v13200_v26 = vld [vmem:[#allocation5 + $0x9e0] sm:$0xf0] }
 0x387   :  { %7279 = vmatpush.bf16.msra.mxu3 %v13971_v31  ;;  %7254 = vmatpush.bf16.msra.mxu1 %v12883_v58  ;;  %v18528_v27 = vld [vmem:[#allocation5 + $0xda4] sm:$0xf]  ;;  %v13203_v31 = vor.u32 %v18400_v24, %v13200_v26 }
 0x388   :  { %v13712_v28 = vld [vmem:[#allocation5 + $0xde0] sm:$0xf0] }
 0x389   :  { %7267 = vmatpush.bf16.msra.mxu2 %v13395_v48  ;;  %7242 = vmatpush.bf16.msra.mxu0 %v12307_v0  ;;  %v18128_v36 = vld [vmem:[#allocation5 + $0x124] sm:$0xf]  ;;  %v13715_v39 = vor.u32 %v18528_v27, %v13712_v28  ;;  %v7016_v48 = vadd.f32 %v7015_v44, %v7003_v29 }
 0x38a   :  { %v12112_v51 = vld [vmem:[#allocation5 + $0x160] sm:$0xf0] }
 0x38b   :  { %7280 = vmatpush.bf16.msra.mxu3 %v13907_v16  ;;  %7255 = vmatpush.bf16.msra.mxu1 %v12819_v4  ;;  %v18256_v43 = vld [vmem:[#allocation5 + $0x524] sm:$0xf]  ;;  %v12115_v16 = vor.u32 %v18128_v36, %v12112_v51  ;;  %v19986_v57 = vadd.f32 %v7028_v52, %v7016_v48 }
 0x38c   :  { %v12624_v45 = vld [vmem:[#allocation5 + $0x560] sm:$0xf0] }
 0x38d   :  { %7268 = vmatpush.bf16.msra.mxu2 %v13331_v2  ;;  %7243 = vmatpush.bf16.msra.mxu0 %v12243_v14  ;;  %v18384_v46 = vld [vmem:[#allocation5 + $0x924] sm:$0xf]  ;;  %v12627_v60 = vor.u32 %v18256_v43, %v12624_v45  ;;  %v7004_v2 = vpop.f32.mrf.mxu1 }
 0x38e   :  { %v13136_v58 = vld [vmem:[#allocation5 + $0x960] sm:$0xf0] }
 0x38f   :  { %7281 = vmatpush.bf16.msra.mxu3 %v13843_v7  ;;  %7256 = vmatpush.bf16.msra.mxu1 %v12755_v17  ;;  %v18512_v53 = vld [vmem:[#allocation5 + $0xd24] sm:$0xf]  ;;  %v13139_v62 = vor.u32 %v18384_v46, %v13136_v58 }
 0x390   :  { %v13648_v55 = vld [vmem:[#allocation5 + $0xd60] sm:$0xf0] }
 0x391   :  { %7269 = vmatpush.bf16.msra.mxu2 %v13267_v19  ;;  %7244 = vmatpush.bf16.msra.mxu0 %v12179_v49  ;;  %v18112_v63 = vld [vmem:[#allocation5 + $0xa4] sm:$0xf]  ;;  %v13651_v3 = vor.u32 %v18512_v53, %v13648_v55 }
 0x392   :  { %v12048_v0 = vld [vmem:[#allocation5 + $0xe0] sm:$0xf0] }
 0x393   :  { %7282 = vmatpush.bf16.msra.mxu3 %v13779_v23  ;;  %7257 = vmatpush.bf16.msra.mxu1 %v12691_v30  ;;  %v18240_v4 = vld [vmem:[#allocation5 + $0x4a4] sm:$0xf]  ;;  %v12051_v10 = vor.u32 %v18112_v63, %v12048_v0 }
 0x394   :  { %v12560_v5 = vld [vmem:[#allocation5 + $0x4e0] sm:$0xf0] }
 0x395   :  { %7270 = vmatpush.bf16.msra.mxu2 %v13203_v31  ;;  %v18368_v6 = vld [vmem:[#allocation5 + $0x8a4] sm:$0xf]  ;;  %7245 = vmatpush.bf16.msra.mxu0 %v12115_v16  ;;  %v12563_v14 = vor.u32 %v18240_v4, %v12560_v5 }
 0x396   :  { %v13072_v7 = vld [vmem:[#allocation5 + $0x8e0] sm:$0xf0] }
 0x397   :  { %7283 = vmatpush.bf16.msra.mxu3 %v13715_v39  ;;  %v18496_v8 = vld [vmem:[#allocation5 + $0xca4] sm:$0xf]  ;;  %7258 = vmatpush.bf16.msra.mxu1 %v12627_v60  ;;  %v13075_v15 = vor.u32 %v18368_v6, %v13072_v7 }
 0x398   :  { %v13584_v9 = vld [vmem:[#allocation5 + $0xce0] sm:$0xf0] }
 0x399   :  { %v18096_v12 = vld [vmem:[#allocation5 + $0x24] sm:$0xf]  ;;  %7271 = vmatpush.bf16.msra.mxu2 %v13139_v62  ;;  %v13587_v20 = vor.u32 %v18496_v8, %v13584_v9  ;;  %7246 = vmatpush.bf16.msra.mxu0 %v12051_v10 }
 0x39a   :  { %v11984_v13 = vld [vmem:[#allocation5 + $0x60] sm:$0xf0] }
 0x39b   :  { %v18224_v17 = vld [vmem:[#allocation5 + $0x424] sm:$0xf]  ;;  %7284 = vmatpush.bf16.msra.mxu3 %v13651_v3  ;;  %v11987_v28 = vor.u32 %v18096_v12, %v11984_v13  ;;  %7259 = vmatpush.bf16.msra.mxu1 %v12563_v14 }
 0x39c   :  { %v12496_v19 = vld [vmem:[#allocation5 + $0x460] sm:$0xf0] }
 0x39d   :  { %v18352_v35 = vld [vmem:[#allocation5 + $0x824] sm:$0xf]  ;;  %7272 = vmatpush.bf16.msra.mxu2 %v13075_v15  ;;  %v12499_v31 = vor.u32 %v18224_v17, %v12496_v19  ;;  %7247 = vmatpush.bf16.msra.mxu0 %v11987_v28 }
 0x39e   :  { %v13008_v21 = vld [vmem:[#allocation5 + $0x860] sm:$0xf0] }
 0x39f   :  { %v18480_v22 = vld [vmem:[#allocation5 + $0xc24] sm:$0xf]  ;;  %v13011_v36 = vor.u32 %v18352_v35, %v13008_v21  ;;  %7285 = vmatpush.bf16.msra.mxu3 %v13587_v20  ;;  %7260 = vmatpush.bf16.msra.mxu1 %v12499_v31 }
 0x3a0   :  { %v13520_v23 = vld [vmem:[#allocation5 + $0xc60] sm:$0xf0]  ;;  %7248 = vmatmul.bf16.vlgmr.msra.gmra.mxu0 %v19855_v34 }
 0x3a1   :  { %v18720_v24 = vld [vmem:[#allocation5 + $0x13a4] sm:$0xf]  ;;  %v13523_v44 = vor.u32 %v18480_v22, %v13520_v23  ;;  %7273 = vmatpush.bf16.msra.mxu2 %v13011_v36 }
 0x3a2   :  { %v14480_v26 = vld [vmem:[#allocation5 + $0x13e0] sm:$0xf0]  ;;  %7261 = vmatmul.bf16.vlgmr.msra.gmra.mxu1 %v19859_v42 }
 0x3a3   :  { %v18848_v27 = vld [vmem:[#allocation5 + $0x17a4] sm:$0xf]  ;;  %v14483_v39 = vor.u32 %v18720_v24, %v14480_v26  ;;  %7286 = vmatpush.bf16.msra.mxu3 %v13523_v44 }
 0x3a4   :  { %v14992_v29 = vld [vmem:[#allocation5 + $0x17e0] sm:$0xf0]  ;;  %7274 = vmatmul.bf16.vlgmr.msra.gmra.mxu2 %v19853_v33 }
 0x3a5   :  { %v18976_v49 = vld [vmem:[#allocation5 + $0x1ba4] sm:$0xf]  ;;  %v14995_v45 = vor.u32 %v18848_v27, %v14992_v29  ;;  %7292 = vmatpush.bf16.msrb.mxu0 %v14483_v39  ;;  %v7041_v27 = vpop.f32.mrf.mxu0 }
 0x3a6   :  { %v15504_v30 = vld [vmem:[#allocation5 + $0x1be0] sm:$0xf0]  ;;  %7287 = vmatmul.bf16.vlgmr.msra.gmra.mxu3 %v19857_v41  ;;  %v7042_v36 = vadd.f32 %v7041_v27, %v1159_v18 }
 0x3a7   :  { %v19104_v51 = vld [vmem:[#allocation5 + $0x1fa4] sm:$0xf]  ;;  %v15507_v46 = vor.u32 %v18976_v49, %v15504_v30  ;;  %7305 = vmatpush.bf16.msrb.mxu1 %v14995_v45 }
 0x3a8   :  { %v16016_v43 = vld [vmem:[#allocation5 + $0x1fe0] sm:$0xf0] }
 0x3a9   :  { %v18704_v58 = vld [vmem:[#allocation5 + $0x1324] sm:$0xf]  ;;  %v16019_v53 = vor.u32 %v19104_v51, %v16016_v43  ;;  %7318 = vmatpush.bf16.msrb.mxu2 %v15507_v46  ;;  %v7054_v51 = vpop.f32.mrf.mxu1 }
 0x3aa   :  { %v14416_v48 = vld [vmem:[#allocation5 + $0x1360] sm:$0xf0] }
 0x3ab   :  { %v18832_v52 = vld [vmem:[#allocation5 + $0x1724] sm:$0xf]  ;;  %v14419_v63 = vor.u32 %v18704_v58, %v14416_v48  ;;  %7331 = vmatpush.bf16.msrb.mxu3 %v16019_v53  ;;  %v7055_v58 = vadd.f32 %v7054_v51, %v7042_v36 }
 0x3ac   :  { %v14928_v55 = vld [vmem:[#allocation5 + $0x1760] sm:$0xf0] }
 0x3ad   :  { %v18960_v16 = vld [vmem:[#allocation5 + $0x1b24] sm:$0xf]  ;;  %v14931_v0 = vor.u32 %v18832_v52, %v14928_v55  ;;  %7293 = vmatpush.bf16.msrb.mxu0 %v14419_v63 }
 0x3ae   :  { %v15440_v59 = vld [vmem:[#allocation5 + $0x1b60] sm:$0xf0] }
 0x3af   :  { %v19088_v60 = vld [vmem:[#allocation5 + $0x1f24] sm:$0xf]  ;;  %v15443_v4 = vor.u32 %v18960_v16, %v15440_v59  ;;  %7306 = vmatpush.bf16.msrb.mxu1 %v14931_v0 }
 0x3b0   :  { %v15952_v62 = vld [vmem:[#allocation5 + $0x1f60] sm:$0xf0] }
 0x3b1   :  { %v18688_v2 = vld [vmem:[#allocation5 + $0x12a4] sm:$0xf]  ;;  %v15955_v6 = vor.u32 %v19088_v60, %v15952_v62  ;;  %7319 = vmatpush.bf16.msrb.mxu2 %v15443_v4  ;;  %v7067_v60 = vpop.f32.mrf.mxu2 }
 0x3b2   :  { %v14352_v3 = vld [vmem:[#allocation5 + $0x12e0] sm:$0xf0] }
 0x3b3   :  { %v18816_v5 = vld [vmem:[#allocation5 + $0x16a4] sm:$0xf]  ;;  %v14355_v13 = vor.u32 %v18688_v2, %v14352_v3  ;;  %7332 = vmatpush.bf16.msrb.mxu3 %v15955_v6  ;;  %v7068_v2 = vadd.f32 %v7067_v60, %v7055_v58  ;;  %v7080_v3 = vpop.f32.mrf.mxu3  ;;  %v18345_v58 = vld [vmem:[#allocation5 + $0x7e4] sm:$0xf0] }
 0x3b4   :  { %v14864_v7 = vld [vmem:[#allocation5 + $0x16e0] sm:$0xf0] }
 0x3b5   :  { %v18944_v8 = vld [vmem:[#allocation5 + $0x1aa4] sm:$0xf]  ;;  %v14867_v15 = vor.u32 %v18816_v5, %v14864_v7  ;;  %7294 = vmatpush.bf16.msrb.mxu0 %v14355_v13 }
 0x3b6   :  { %v15376_v9 = vld [vmem:[#allocation5 + $0x1ae0] sm:$0xf0] }
 0x3b7   :  { %v19072_v10 = vld [vmem:[#allocation5 + $0x1ea4] sm:$0xf]  ;;  %v15379_v17 = vor.u32 %v18944_v8, %v15376_v9  ;;  %7307 = vmatpush.bf16.msrb.mxu1 %v14867_v15  ;;  %v19993_v8 = vadd.f32 %v7080_v3, %v7068_v2  ;;  %v7043_v9 = vpop.f32.mrf.mxu0  ;;  %v18201_v2 = vld [vmem:[#allocation5 + $0x364] sm:$0xf0] }
 0x3b8   :  { %v15888_v12 = vld [vmem:[#allocation5 + $0x1ee0] sm:$0xf0]  ;;  %v12886_v3 = vld [vmem:[#allocation5 + $0x728] sm:$0xf] }
 0x3b9   :  { %v18672_v14 = vld [vmem:[#allocation5 + $0x1224] sm:$0xf]  ;;  %v15891_v20 = vor.u32 %v19072_v10, %v15888_v12  ;;  %7320 = vmatpush.bf16.msrb.mxu2 %v15379_v17  ;;  %v7056_v17 = vpop.f32.mrf.mxu1  ;;  %v18457_v9 = vld [vmem:[#allocation5 + $0xb64] sm:$0xf0] }
 0x3ba   :  { %v14288_v19 = vld [vmem:[#allocation5 + $0x1260] sm:$0xf0]  ;;  %v12310_v17 = vld [vmem:[#allocation5 + $0x2a8] sm:$0xf] }
 0x3bb   :  { %v18800_v35 = vld [vmem:[#allocation5 + $0x1624] sm:$0xf]  ;;  %v14291_v26 = vor.u32 %v18672_v14, %v14288_v19  ;;  %7333 = vmatpush.bf16.msrb.mxu3 %v15891_v20 }
 0x3bc   :  { %v14800_v21 = vld [vmem:[#allocation5 + $0x1660] sm:$0xf0] }
 0x3bd   :  { %v18928_v22 = vld [vmem:[#allocation5 + $0x1a24] sm:$0xf]  ;;  %v14803_v28 = vor.u32 %v18800_v35, %v14800_v21  ;;  %7295 = vmatpush.bf16.msrb.mxu0 %v14291_v26 }
 0x3be   :  { %v15312_v23 = vld [vmem:[#allocation5 + $0x1a60] sm:$0xf0] }
 0x3bf   :  { %v19056_v1 = vld [vmem:[#allocation5 + $0x1e24] sm:$0xf]  ;;  %v15315_v29 = vor.u32 %v18928_v22, %v15312_v23  ;;  %7308 = vmatpush.bf16.msrb.mxu1 %v14803_v28 }
 0x3c0   :  { %v15824_v24 = vld [vmem:[#allocation5 + $0x1e60] sm:$0xf0] }
 0x3c1   :  { %v18656_v49 = vld [vmem:[#allocation5 + $0x11a4] sm:$0xf]  ;;  %v15827_v56 = vor.u32 %v19056_v1, %v15824_v24  ;;  %7321 = vmatpush.bf16.msrb.mxu2 %v15315_v29 }
 0x3c2   :  { %v14224_v30 = vld [vmem:[#allocation5 + $0x11e0] sm:$0xf0] }
 0x3c3   :  { %v18784_v31 = vld [vmem:[#allocation5 + $0x15a4] sm:$0xf]  ;;  %v14227_v48 = vor.u32 %v18656_v49, %v14224_v30  ;;  %7334 = vmatpush.bf16.msrb.mxu3 %v15827_v56  ;;  %v7069_v30 = vpop.f32.mrf.mxu2 }
 0x3c4   :  { %v14736_v43 = vld [vmem:[#allocation5 + $0x15e0] sm:$0xf0] }
 0x3c5   :  { %v18912_v44 = vld [vmem:[#allocation5 + $0x19a4] sm:$0xf]  ;;  %v14739_v52 = vor.u32 %v18784_v31, %v14736_v43  ;;  %7296 = vmatpush.bf16.msrb.mxu0 %v14227_v48  ;;  %v7082_v43 = vpop.f32.mrf.mxu3  ;;  %v13462_v48 = vld [vmem:[#allocation5 + $0xba8] sm:$0xf] }
 0x3c6   :  { %v15248_v39 = vld [vmem:[#allocation5 + $0x19e0] sm:$0xf0]  ;;  %v18553_v43 = vld [vmem:[#allocation5 + $0xe64] sm:$0xf0] }
 0x3c7   :  { %v19040_v45 = vld [vmem:[#allocation5 + $0x1da4] sm:$0xf]  ;;  %v15251_v53 = vor.u32 %v18912_v44, %v15248_v39  ;;  %7309 = vmatpush.bf16.msrb.mxu1 %v14739_v52  ;;  %v12438_v44 = vld [vmem:[#allocation5 + $0x3a8] sm:$0xf] }
 0x3c8   :  { %v15760_v46 = vld [vmem:[#allocation5 + $0x1de0] sm:$0xf0]  ;;  %v18217_v39 = vld [vmem:[#allocation5 + $0x3e4] sm:$0xf0] }
 0x3c9   :  { %v18640_v55 = vld [vmem:[#allocation5 + $0x1124] sm:$0xf]  ;;  %v15763_v62 = vor.u32 %v19040_v45, %v15760_v46  ;;  %7322 = vmatpush.bf16.msrb.mxu2 %v15251_v53  ;;  %v12950_v45 = vld [vmem:[#allocation5 + $0x7a8] sm:$0xf] }
 0x3ca   :  { %v14160_v16 = vld [vmem:[#allocation5 + $0x1160] sm:$0xf0]  ;;  %v18473_v52 = vld [vmem:[#allocation5 + $0xbe4] sm:$0xf0] }
 0x3cb   :  { %v18768_v59 = vld [vmem:[#allocation5 + $0x1524] sm:$0xf]  ;;  %v14163_v7 = vor.u32 %v18640_v55, %v14160_v16  ;;  %7335 = vmatpush.bf16.msrb.mxu3 %v15763_v62  ;;  %v13974_v16 = vld [vmem:[#allocation5 + $0xfa8] sm:$0xf]  ;;  %v12439_v62 = vor.u32 %v18217_v39, %v12438_v44  ;;  %v7093_v39 = vpop.f32.mrf.mxu0 }
 0x3cc   :  { %v14672_v63 = vld [vmem:[#allocation5 + $0x1560] sm:$0xf0] }
 0x3cd   :  { %v18896_v0 = vld [vmem:[#allocation5 + $0x1924] sm:$0xf]  ;;  %v14675_v10 = vor.u32 %v18768_v59, %v14672_v63  ;;  %7297 = vmatpush.bf16.msrb.mxu0 %v14163_v7  ;;  %v18601_v59 = vld [vmem:[#allocation5 + $0xfe4] sm:$0xf0]  ;;  %v12951_v63 = vor.u32 %v18345_v58, %v12950_v45 }
 0x3ce   :  { %v15184_v4 = vld [vmem:[#allocation5 + $0x1960] sm:$0xf0]  ;;  %v13398_v7 = vld [vmem:[#allocation5 + $0xb28] sm:$0xf] }
 0x3cf   :  { %v19024_v5 = vld [vmem:[#allocation5 + $0x1d24] sm:$0xf]  ;;  %v15187_v12 = vor.u32 %v18896_v0, %v15184_v4  ;;  %7310 = vmatpush.bf16.msrb.mxu1 %v14675_v10  ;;  %v13463_v0 = vor.u32 %v18473_v52, %v13462_v48  ;;  %v12374_v4 = vld [vmem:[#allocation5 + $0x328] sm:$0xf] }
 0x3d0   :  { %v15696_v6 = vld [vmem:[#allocation5 + $0x1d60] sm:$0xf0]  ;;  %v13910_v10 = vld [vmem:[#allocation5 + $0xf28] sm:$0xf] }
 0x3d1   :  { %v18624_v13 = vld [vmem:[#allocation5 + $0x10a4] sm:$0xf]  ;;  %v15699_v19 = vor.u32 %v19024_v5, %v15696_v6  ;;  %7323 = vmatpush.bf16.msrb.mxu2 %v15187_v12  ;;  %v13975_v5 = vor.u32 %v18601_v59, %v13974_v16  ;;  %v18329_v6 = vld [vmem:[#allocation5 + $0x764] sm:$0xf0] }
 0x3d2   :  { %v14096_v14 = vld [vmem:[#allocation5 + $0x10e0] sm:$0xf0]  ;;  %v18585_v12 = vld [vmem:[#allocation5 + $0xf64] sm:$0xf0] }
 0x3d3   :  { %v18752_v15 = vld [vmem:[#allocation5 + $0x14a4] sm:$0xf]  ;;  %v14099_v23 = vor.u32 %v18624_v13, %v14096_v14  ;;  %7336 = vmatpush.bf16.msrb.mxu3 %v15699_v19  ;;  %v12375_v13 = vor.u32 %v18201_v2, %v12374_v4  ;;  %v12887_v14 = vor.u32 %v18329_v6, %v12886_v3  ;;  %v18185_v19 = vld [vmem:[#allocation5 + $0x2e4] sm:$0xf0] }
 0x3d4   :  { %v14608_v35 = vld [vmem:[#allocation5 + $0x14e0] sm:$0xf0]  ;;  %v12182_v58 = vld [vmem:[#allocation5 + $0x1a8] sm:$0xf] }
 0x3d5   :  { %v18880_v18 = vld [vmem:[#allocation5 + $0x18a4] sm:$0xf]  ;;  %v14611_v26 = vor.u32 %v18752_v15, %v14608_v35  ;;  %7298 = vmatpush.bf16.msrb.mxu0 %v14099_v23  ;;  %v13399_v15 = vor.u32 %v18457_v9, %v13398_v7  ;;  %v12822_v35 = vld [vmem:[#allocation5 + $0x6a8] sm:$0xf] }
 0x3d6   :  { %v15120_v20 = vld [vmem:[#allocation5 + $0x18e0] sm:$0xf0]  ;;  %v13846_v23 = vld [vmem:[#allocation5 + $0xea8] sm:$0xf] }
 0x3d7   :  { %v19008_v21 = vld [vmem:[#allocation5 + $0x1ca4] sm:$0xf]  ;;  %v15123_v27 = vor.u32 %v18880_v18, %v15120_v20  ;;  %7311 = vmatpush.bf16.msrb.mxu1 %v14611_v26  ;;  %v13911_v18 = vor.u32 %v18585_v12, %v13910_v10  ;;  %v18313_v20 = vld [vmem:[#allocation5 + $0x6e4] sm:$0xf0]  ;;  %v7119_v10 = vpop.f32.mrf.mxu2 }
 0x3d8   :  { %v15632_v22 = vld [vmem:[#allocation5 + $0x1ce0] sm:$0xf0]  ;;  %v12823_v26 = vor.u32 %v18313_v20, %v12822_v35  ;;  %v18153_v48 = vld [vmem:[#allocation5 + $0x1e4] sm:$0xf0] }
 0x3d9   :  { %v18608_v1 = vld [vmem:[#allocation5 + $0x1024] sm:$0xf]  ;;  %v15635_v31 = vor.u32 %v19008_v21, %v15632_v22  ;;  %7324 = vmatpush.bf16.msrb.mxu2 %v15123_v27  ;;  %v13334_v21 = vld [vmem:[#allocation5 + $0xaa8] sm:$0xf]  ;;  %v12183_v2 = vor.u32 %v18153_v48, %v12182_v58 }
 0x3da   :  { %v14032_v24 = vld [vmem:[#allocation5 + $0x1060] sm:$0xf0]  ;;  %v18441_v22 = vld [vmem:[#allocation5 + $0xae4] sm:$0xf0] }
 0x3db   :  { %v18736_v28 = vld [vmem:[#allocation5 + $0x1424] sm:$0xf]  ;;  %v14035_v46 = vor.u32 %v18608_v1, %v14032_v24  ;;  %7337 = vmatpush.bf16.msrb.mxu3 %v15635_v31  ;;  %v18569_v1 = vld [vmem:[#allocation5 + $0xee4] sm:$0xf0]  ;;  %v12311_v24 = vor.u32 %v18185_v19, %v12310_v17  ;;  %v13335_v27 = vor.u32 %v18441_v22, %v13334_v21  ;;  %v7132_v17 = vpop.f32.mrf.mxu3  ;;  %v7095_v21 = vpop.f32.mrf.mxu0 }
 0x3dc   :  { %v14544_v29 = vld [vmem:[#allocation5 + $0x1460] sm:$0xf0]  ;;  %v13847_v30 = vor.u32 %v18569_v1, %v13846_v23  ;;  %v18297_v31 = vld [vmem:[#allocation5 + $0x664] sm:$0xf0] }
 0x3dd   :  { %v18864_v49 = vld [vmem:[#allocation5 + $0x1824] sm:$0xf]  ;;  %v14547_v53 = vor.u32 %v18736_v28, %v14544_v29  ;;  %7299 = vmatpush.bf16.msrb.mxu0 %v14035_v46  ;;  %v12246_v28 = vld [vmem:[#allocation5 + $0x228] sm:$0xf] }
 0x3de   :  { %v15056_v36 = vld [vmem:[#allocation5 + $0x1860] sm:$0xf0]  ;;  %v18169_v29 = vld [vmem:[#allocation5 + $0x264] sm:$0xf0] }
 0x3df   :  { %v18992_v51 = vld [vmem:[#allocation5 + $0x1c24] sm:$0xf]  ;;  %v15059_v55 = vor.u32 %v18864_v49, %v15056_v36  ;;  %7312 = vmatpush.bf16.msrb.mxu1 %v14547_v53  ;;  %v12758_v49 = vld [vmem:[#allocation5 + $0x628] sm:$0xf]  ;;  %v12247_v44 = vor.u32 %v18169_v29, %v12246_v28  ;;  %v7094_v53 = vadd.f32 %v7093_v39, %v19993_v8  ;;  %v7121_v48 = vpop.f32.mrf.mxu2 }
 0x3e0   :  { %v15568_v56 = vld [vmem:[#allocation5 + $0x1c60] sm:$0xf0]  ;;  %7300 = vmatmul.bf16.vlgmr.msrb.gmra.mxu0 %v19867_v37  ;;  %v13270_v36 = vld [vmem:[#allocation5 + $0xa28] sm:$0xf]  ;;  %v12759_v45 = vor.u32 %v18297_v31, %v12758_v49 }
 0x3e1   :  { %v15571_v60 = vor.u32 %v18992_v51, %v15568_v56  ;;  %7325 = vmatpush.bf16.msrb.mxu2 %v15059_v55  ;;  %7344 = vmatpush.bf16.msra.mxu0 %v12439_v62  ;;  %v18425_v51 = vld [vmem:[#allocation5 + $0xa64] sm:$0xf0]  ;;  %v7106_v55 = vpop.f32.mrf.mxu1 }
 0x3e2   :  { %7313 = vmatmul.bf16.vlgmr.msrb.gmra.mxu1 %v19871_v40  ;;  %v13782_v56 = vld [vmem:[#allocation5 + $0xe28] sm:$0xf]  ;;  %v13271_v46 = vor.u32 %v18425_v51, %v13270_v36  ;;  %v7107_v4 = vadd.f32 %v7106_v55, %v7094_v53 }
 0x3e3   :  { %7338 = vmatpush.bf16.msrb.mxu3 %v15571_v60  ;;  %7357 = vmatpush.bf16.msra.mxu1 %v12951_v63  ;;  %v12694_v52 = vld [vmem:[#allocation5 + $0x5a8] sm:$0xf]  ;;  %v13783_v16 = vor.u32 %v18553_v43, %v13782_v56 }
 0x3e4   :  { %7326 = vmatmul.bf16.vlgmr.msrb.gmra.mxu2 %v19865_v32  ;;  %v18281_v59 = vld [vmem:[#allocation5 + $0x5e4] sm:$0xf0] }
 0x3e5   :  { %7370 = vmatpush.bf16.msra.mxu2 %v13463_v0  ;;  %7345 = vmatpush.bf16.msra.mxu0 %v12375_v13  ;;  %v13206_v60 = vld [vmem:[#allocation5 + $0x9a8] sm:$0xf]  ;;  %v12695_v3 = vor.u32 %v18281_v59, %v12694_v52  ;;  %v7134_v59 = vpop.f32.mrf.mxu3 }
 0x3e6   :  { %7339 = vmatmul.bf16.vlgmr.msrb.gmra.mxu3 %v19869_v38  ;;  %v18409_v62 = vld [vmem:[#allocation5 + $0x9e4] sm:$0xf0] }
 0x3e7   :  { %7383 = vmatpush.bf16.msra.mxu3 %v13975_v5  ;;  %7358 = vmatpush.bf16.msra.mxu1 %v12887_v14  ;;  %v13718_v63 = vld [vmem:[#allocation5 + $0xda8] sm:$0xf]  ;;  %v13207_v5 = vor.u32 %v18409_v62, %v13206_v60 }
 0x3e8   :  { %v18537_v0 = vld [vmem:[#allocation5 + $0xde4] sm:$0xf0] }
 0x3e9   :  { %7371 = vmatpush.bf16.msra.mxu2 %v13399_v15  ;;  %7346 = vmatpush.bf16.msra.mxu0 %v12311_v24  ;;  %v12118_v6 = vld [vmem:[#allocation5 + $0x128] sm:$0xf]  ;;  %v13719_v8 = vor.u32 %v18537_v0, %v13718_v63  ;;  %v7120_v15 = vadd.f32 %v7119_v10, %v7107_v4 }
 0x3ea   :  { %v18137_v7 = vld [vmem:[#allocation5 + $0x164] sm:$0xf0] }
 0x3eb   :  { %7384 = vmatpush.bf16.msra.mxu3 %v13911_v18  ;;  %7359 = vmatpush.bf16.msra.mxu1 %v12823_v26  ;;  %v12630_v9 = vld [vmem:[#allocation5 + $0x528] sm:$0xf]  ;;  %v12119_v18 = vor.u32 %v18137_v7, %v12118_v6  ;;  %v20000_v20 = vadd.f32 %v7132_v17, %v7120_v15 }
 0x3ec   :  { %v18265_v12 = vld [vmem:[#allocation5 + $0x564] sm:$0xf0] }
 0x3ed   :  { %7372 = vmatpush.bf16.msra.mxu2 %v13335_v27  ;;  %7347 = vmatpush.bf16.msra.mxu0 %v12247_v44  ;;  %v13142_v13 = vld [vmem:[#allocation5 + $0x928] sm:$0xf]  ;;  %v12631_v22 = vor.u32 %v18265_v12, %v12630_v9  ;;  %v7108_v27 = vpop.f32.mrf.mxu1 }
 0x3ee   :  { %v18393_v14 = vld [vmem:[#allocation5 + $0x964] sm:$0xf0] }
 0x3ef   :  { %7385 = vmatpush.bf16.msra.mxu3 %v13847_v30  ;;  %7360 = vmatpush.bf16.msra.mxu1 %v12759_v45  ;;  %v13654_v19 = vld [vmem:[#allocation5 + $0xd28] sm:$0xf]  ;;  %v13143_v23 = vor.u32 %v18393_v14, %v13142_v13 }
 0x3f0   :  { %v18521_v35 = vld [vmem:[#allocation5 + $0xd64] sm:$0xf0] }
 0x3f1   :  { %7373 = vmatpush.bf16.msra.mxu2 %v13271_v46  ;;  %7348 = vmatpush.bf16.msra.mxu0 %v12183_v2  ;;  %v12054_v1 = vld [vmem:[#allocation5 + $0xa8] sm:$0xf]  ;;  %v13655_v28 = vor.u32 %v18521_v35, %v13654_v19 }
 0x3f2   :  { %v18121_v24 = vld [vmem:[#allocation5 + $0xe4] sm:$0xf0] }
 0x3f3   :  { %7386 = vmatpush.bf16.msra.mxu3 %v13783_v16  ;;  %7361 = vmatpush.bf16.msra.mxu1 %v12695_v3  ;;  %v12566_v26 = vld [vmem:[#allocation5 + $0x4a8] sm:$0xf]  ;;  %v12055_v51 = vor.u32 %v18121_v24, %v12054_v1 }
 0x3f4   :  { %v18249_v29 = vld [vmem:[#allocation5 + $0x4e4] sm:$0xf0] }
 0x3f5   :  { %7374 = vmatpush.bf16.msra.mxu2 %v13207_v5  ;;  %v13078_v49 = vld [vmem:[#allocation5 + $0x8a8] sm:$0xf]  ;;  %7349 = vmatpush.bf16.msra.mxu0 %v12119_v18  ;;  %v12567_v44 = vor.u32 %v18249_v29, %v12566_v26 }
 0x3f6   :  { %v18377_v30 = vld [vmem:[#allocation5 + $0x8e4] sm:$0xf0] }
 0x3f7   :  { %7387 = vmatpush.bf16.msra.mxu3 %v13719_v8  ;;  %v13590_v31 = vld [vmem:[#allocation5 + $0xca8] sm:$0xf]  ;;  %7362 = vmatpush.bf16.msra.mxu1 %v12631_v22  ;;  %v13079_v39 = vor.u32 %v18377_v30, %v13078_v49 }
 0x3f8   :  { %v18505_v36 = vld [vmem:[#allocation5 + $0xce4] sm:$0xf0] }
 0x3f9   :  { %v11990_v56 = vld [vmem:[#allocation5 + $0x28] sm:$0xf]  ;;  %7375 = vmatpush.bf16.msra.mxu2 %v13143_v23  ;;  %v13591_v52 = vor.u32 %v18505_v36, %v13590_v31  ;;  %7350 = vmatpush.bf16.msra.mxu0 %v12055_v51 }
 0x3fa   :  { %v18105_v43 = vld [vmem:[#allocation5 + $0x64] sm:$0xf0] }
 0x3fb   :  { %v12502_v45 = vld [vmem:[#allocation5 + $0x428] sm:$0xf]  ;;  %7388 = vmatpush.bf16.msra.mxu3 %v13655_v28  ;;  %v11991_v0 = vor.u32 %v18105_v43, %v11990_v56  ;;  %7363 = vmatpush.bf16.msra.mxu1 %v12567_v44 }
 0x3fc   :  { %v18233_v46 = vld [vmem:[#allocation5 + $0x464] sm:$0xf0] }
 0x3fd   :  { %v13014_v58 = vld [vmem:[#allocation5 + $0x828] sm:$0xf]  ;;  %7376 = vmatpush.bf16.msra.mxu2 %v13079_v39  ;;  %v12503_v5 = vor.u32 %v18233_v46, %v12502_v45  ;;  %7351 = vmatpush.bf16.msra.mxu0 %v11991_v0  ;;  %v7145_v0 = vpop.f32.mrf.mxu0 }
 0x3fe   :  { %v18361_v53 = vld [vmem:[#allocation5 + $0x864] sm:$0xf0] }
 0x3ff   :  { %v13526_v55 = vld [vmem:[#allocation5 + $0xc28] sm:$0xf]  ;;  %v13015_v6 = vor.u32 %v18361_v53, %v13014_v58  ;;  %7389 = vmatpush.bf16.msra.mxu3 %v13591_v52  ;;  %7364 = vmatpush.bf16.msra.mxu1 %v12503_v5 }
 0x400   :  { %v18489_v16 = vld [vmem:[#allocation5 + $0xc64] sm:$0xf0]  ;;  %7352 = vmatmul.bf16.vlgmr.msra.gmra.mxu0 %v19855_v34 }
 0x401   :  { %v14486_v60 = vld [vmem:[#allocation5 + $0x13a8] sm:$0xf]  ;;  %v13527_v10 = vor.u32 %v18489_v16, %v13526_v55  ;;  %7377 = vmatpush.bf16.msra.mxu2 %v13015_v6 }
 0x402   :  { %v18729_v62 = vld [vmem:[#allocation5 + $0x13e4] sm:$0xf0]  ;;  %7365 = vmatmul.bf16.vlgmr.msra.gmra.mxu1 %v19859_v42 }
 0x403   :  { %v14998_v63 = vld [vmem:[#allocation5 + $0x17a8] sm:$0xf]  ;;  %v14487_v8 = vor.u32 %v18729_v62, %v14486_v60  ;;  %7390 = vmatpush.bf16.msra.mxu3 %v13527_v10 }
 0x404   :  { %v18857_v4 = vld [vmem:[#allocation5 + $0x17e4] sm:$0xf0]  ;;  %7378 = vmatmul.bf16.vlgmr.msra.gmra.mxu2 %v19853_v33 }
 0x405   :  { %v15510_v2 = vld [vmem:[#allocation5 + $0x1ba8] sm:$0xf]  ;;  %v14999_v12 = vor.u32 %v18857_v4, %v14998_v63  ;;  %7396 = vmatpush.bf16.msrb.mxu0 %v14487_v8 }
 0x406   :  { %v18985_v3 = vld [vmem:[#allocation5 + $0x1be4] sm:$0xf0]  ;;  %7391 = vmatmul.bf16.vlgmr.msra.gmra.mxu3 %v19857_v41 }
 0x407   :  { %v16022_v7 = vld [vmem:[#allocation5 + $0x1fa8] sm:$0xf]  ;;  %v15511_v13 = vor.u32 %v18985_v3, %v15510_v2  ;;  %7409 = vmatpush.bf16.msrb.mxu1 %v14999_v12 }
 0x408   :  { %v19113_v9 = vld [vmem:[#allocation5 + $0x1fe4] sm:$0xf0] }
 0x409   :  { %v14422_v14 = vld [vmem:[#allocation5 + $0x1328] sm:$0xf]  ;;  %v16023_v19 = vor.u32 %v19113_v9, %v16022_v7  ;;  %7422 = vmatpush.bf16.msrb.mxu2 %v15511_v13  ;;  %v7158_v9 = vpop.f32.mrf.mxu1 }
 0x40a   :  { %v18713_v15 = vld [vmem:[#allocation5 + $0x1364] sm:$0xf0] }
 0x40b   :  { %v14934_v17 = vld [vmem:[#allocation5 + $0x1728] sm:$0xf]  ;;  %v14423_v1 = vor.u32 %v18713_v15, %v14422_v14  ;;  %7435 = vmatpush.bf16.msrb.mxu3 %v16023_v19 }
 0x40c   :  { %v18841_v35 = vld [vmem:[#allocation5 + $0x1764] sm:$0xf0] }
 0x40d   :  { %v15446_v18 = vld [vmem:[#allocation5 + $0x1b28] sm:$0xf]  ;;  %v14935_v26 = vor.u32 %v18841_v35, %v14934_v17  ;;  %7397 = vmatpush.bf16.msrb.mxu0 %v14423_v1  ;;  %v7171_v1 = vpop.f32.mrf.mxu2 }
 0x40e   :  { %v18969_v21 = vld [vmem:[#allocation5 + $0x1b64] sm:$0xf0] }
 0x40f   :  { %v15958_v22 = vld [vmem:[#allocation5 + $0x1f28] sm:$0xf]  ;;  %v15447_v27 = vor.u32 %v18969_v21, %v15446_v18  ;;  %7410 = vmatpush.bf16.msrb.mxu1 %v14935_v26 }
 0x410   :  { %v19097_v23 = vld [vmem:[#allocation5 + $0x1f64] sm:$0xf0] }
 0x411   :  { %v14358_v24 = vld [vmem:[#allocation5 + $0x12a8] sm:$0xf]  ;;  %v15959_v30 = vor.u32 %v19097_v23, %v15958_v22  ;;  %7423 = vmatpush.bf16.msrb.mxu2 %v15447_v27 }
 0x412   :  { %v18697_v28 = vld [vmem:[#allocation5 + $0x12e4] sm:$0xf0] }
 0x413   :  { %v14870_v29 = vld [vmem:[#allocation5 + $0x16a8] sm:$0xf]  ;;  %v14359_v44 = vor.u32 %v18697_v28, %v14358_v24  ;;  %7436 = vmatpush.bf16.msrb.mxu3 %v15959_v30 }
 0x414   :  { %v18825_v49 = vld [vmem:[#allocation5 + $0x16e4] sm:$0xf0] }
 0x415   :  { %v15382_v31 = vld [vmem:[#allocation5 + $0x1aa8] sm:$0xf]  ;;  %v14871_v45 = vor.u32 %v18825_v49, %v14870_v29  ;;  %7398 = vmatpush.bf16.msrb.mxu0 %v14359_v44  ;;  %v7184_v49 = vpop.f32.mrf.mxu3 }
 0x416   :  { %v18953_v36 = vld [vmem:[#allocation5 + $0x1ae4] sm:$0xf0] }
 0x417   :  { %v20003_v51 = vld [vmem:[#allocation7 + $0x8] sm:$0xff]  ;;  %v15383_v46 = vor.u32 %v18953_v36, %v15382_v31  ;;  %7411 = vmatpush.bf16.msrb.mxu1 %v14871_v45 }
 0x418   :  { %v15894_v56 = vld [vmem:[#allocation5 + $0x1ea8] sm:$0xf]  ;;  %v1160_v52 = vperm.slane %v20003_v51, 0 }
 0x419   :  { %v19081_v43 = vld [vmem:[#allocation5 + $0x1ee4] sm:$0xf0]  ;;  %7424 = vmatpush.bf16.msrb.mxu2 %v15383_v46 }
 0x41a   :  { %v14294_v39 = vld [vmem:[#allocation5 + $0x1228] sm:$0xf]  ;;  %v15895_v53 = vor.u32 %v19081_v43, %v15894_v56  ;;  %v7146_v7 = vadd.f32 %v7145_v0, %v1160_v52  ;;  %v7147_v43 = vpop.f32.mrf.mxu0 }
 0x41b   :  { %v18681_v58 = vld [vmem:[#allocation5 + $0x1264] sm:$0xf0]  ;;  %v12888_v43 = vld [vmem:[#allocation5 + $0x768] sm:$0xf0] }
 0x41c   :  { %v14806_v48 = vld [vmem:[#allocation5 + $0x1628] sm:$0xf]  ;;  %v14295_v63 = vor.u32 %v18681_v58, %v14294_v39  ;;  %7437 = vmatpush.bf16.msrb.mxu3 %v15895_v53  ;;  %v7159_v17 = vadd.f32 %v7158_v9, %v7146_v7  ;;  %v7173_v7 = vpop.f32.mrf.mxu2 }
 0x41d   :  { %v18809_v55 = vld [vmem:[#allocation5 + $0x1664] sm:$0xf0]  ;;  %v12248_v7 = vld [vmem:[#allocation5 + $0x268] sm:$0xf0] }
 0x41e   :  { %v15318_v16 = vld [vmem:[#allocation5 + $0x1a28] sm:$0xf]  ;;  %v14807_v4 = vor.u32 %v18809_v55, %v14806_v48  ;;  %7399 = vmatpush.bf16.msrb.mxu0 %v14295_v63  ;;  %v7172_v29 = vadd.f32 %v7171_v1, %v7159_v17  ;;  %v7160_v48 = vpop.f32.mrf.mxu1  ;;  %v18337_v17 = vld [vmem:[#allocation5 + $0x7ac] sm:$0xf] }
 0x41f   :  { %v18937_v59 = vld [vmem:[#allocation5 + $0x1a64] sm:$0xf0]  ;;  %v18593_v1 = vld [vmem:[#allocation5 + $0xfac] sm:$0xf] }
 0x420   :  { %v15830_v60 = vld [vmem:[#allocation5 + $0x1e28] sm:$0xf]  ;;  %v15319_v2 = vor.u32 %v18937_v59, %v15318_v16  ;;  %7412 = vmatpush.bf16.msrb.mxu1 %v14807_v4  ;;  %v20009_v56 = vadd.f32 %v7184_v49, %v7172_v29  ;;  %v18193_v49 = vld [vmem:[#allocation5 + $0x32c] sm:$0xf] }
 0x421   :  { %v19065_v62 = vld [vmem:[#allocation5 + $0x1e64] sm:$0xf0] }
 0x422   :  { %v14230_v3 = vld [vmem:[#allocation5 + $0x11a8] sm:$0xf]  ;;  %v15831_v10 = vor.u32 %v19065_v62, %v15830_v60  ;;  %7425 = vmatpush.bf16.msrb.mxu2 %v15319_v2 }
 0x423   :  { %v18665_v5 = vld [vmem:[#allocation5 + $0x11e4] sm:$0xf0] }
 0x424   :  { %v14742_v6 = vld [vmem:[#allocation5 + $0x15a8] sm:$0xf]  ;;  %v14231_v19 = vor.u32 %v18665_v5, %v14230_v3  ;;  %7438 = vmatpush.bf16.msrb.mxu3 %v15831_v10 }
 0x425   :  { %v18793_v8 = vld [vmem:[#allocation5 + $0x15e4] sm:$0xf0] }
 0x426   :  { %v15254_v12 = vld [vmem:[#allocation5 + $0x19a8] sm:$0xf]  ;;  %v14743_v35 = vor.u32 %v18793_v8, %v14742_v6  ;;  %7400 = vmatpush.bf16.msrb.mxu0 %v14231_v19 }
 0x427   :  { %v18921_v13 = vld [vmem:[#allocation5 + $0x19e4] sm:$0xf0] }
 0x428   :  { %v15766_v14 = vld [vmem:[#allocation5 + $0x1da8] sm:$0xf]  ;;  %v15255_v18 = vor.u32 %v18921_v13, %v15254_v12  ;;  %7413 = vmatpush.bf16.msrb.mxu1 %v14743_v35  ;;  %v7186_v13 = vpop.f32.mrf.mxu3  ;;  %v12952_v35 = vld [vmem:[#allocation5 + $0x7e8] sm:$0xf0] }
 0x429   :  { %v19049_v15 = vld [vmem:[#allocation5 + $0x1de4] sm:$0xf0]  ;;  %v13272_v13 = vld [vmem:[#allocation5 + $0xa68] sm:$0xf0] }
 0x42a   :  { %v14166_v21 = vld [vmem:[#allocation5 + $0x1128] sm:$0xf]  ;;  %v15767_v24 = vor.u32 %v19049_v15, %v15766_v14  ;;  %7426 = vmatpush.bf16.msrb.mxu2 %v15255_v18  ;;  %v18209_v14 = vld [vmem:[#allocation5 + $0x3ac] sm:$0xf] }
 0x42b   :  { %v18649_v22 = vld [vmem:[#allocation5 + $0x1164] sm:$0xf0]  ;;  %v12440_v15 = vld [vmem:[#allocation5 + $0x3e8] sm:$0xf0] }
 0x42c   :  { %v14678_v23 = vld [vmem:[#allocation5 + $0x1528] sm:$0xf]  ;;  %v14167_v36 = vor.u32 %v18649_v22, %v14166_v21  ;;  %7439 = vmatpush.bf16.msrb.mxu3 %v15767_v24  ;;  %v18465_v18 = vld [vmem:[#allocation5 + $0xbac] sm:$0xf] }
 0x42d   :  { %v18777_v26 = vld [vmem:[#allocation5 + $0x1564] sm:$0xf0]  ;;  %v13464_v21 = vld [vmem:[#allocation5 + $0xbe8] sm:$0xf0] }
 0x42e   :  { %v15190_v27 = vld [vmem:[#allocation5 + $0x1928] sm:$0xf]  ;;  %v14679_v44 = vor.u32 %v18777_v26, %v14678_v23  ;;  %7401 = vmatpush.bf16.msrb.mxu0 %v14167_v36  ;;  %v13976_v24 = vld [vmem:[#allocation5 + $0xfe8] sm:$0xf0]  ;;  %v13467_v29 = vor.u32 %v18465_v18, %v13464_v21 }
 0x42f   :  { %v18905_v28 = vld [vmem:[#allocation5 + $0x1964] sm:$0xf0]  ;;  %v13979_v36 = vor.u32 %v18593_v1, %v13976_v24  ;;  %v18145_v21 = vld [vmem:[#allocation5 + $0x1ac] sm:$0xf]  ;;  %v7210_v24 = vpop.f32.mrf.mxu1 }
 0x430   :  { %v15702_v30 = vld [vmem:[#allocation5 + $0x1d28] sm:$0xf]  ;;  %v15191_v39 = vor.u32 %v18905_v28, %v15190_v27  ;;  %7414 = vmatpush.bf16.msrb.mxu1 %v14679_v44  ;;  %v12443_v27 = vor.u32 %v18209_v14, %v12440_v15  ;;  %v12955_v28 = vor.u32 %v18337_v17, %v12952_v35  ;;  %v18449_v44 = vld [vmem:[#allocation5 + $0xb2c] sm:$0xf] }
 0x431   :  { %v19033_v31 = vld [vmem:[#allocation5 + $0x1d64] sm:$0xf0]  ;;  %v18545_v14 = vld [vmem:[#allocation5 + $0xe2c] sm:$0xf] }
 0x432   :  { %v14102_v45 = vld [vmem:[#allocation5 + $0x10a8] sm:$0xf]  ;;  %v15703_v52 = vor.u32 %v19033_v31, %v15702_v30  ;;  %7427 = vmatpush.bf16.msrb.mxu2 %v15191_v39  ;;  %v12376_v30 = vld [vmem:[#allocation5 + $0x368] sm:$0xf0] }
 0x433   :  { %v18633_v46 = vld [vmem:[#allocation5 + $0x10e4] sm:$0xf0]  ;;  %v18321_v31 = vld [vmem:[#allocation5 + $0x72c] sm:$0xf] }
 0x434   :  { %v14614_v58 = vld [vmem:[#allocation5 + $0x14a8] sm:$0xf]  ;;  %v14103_v62 = vor.u32 %v18633_v46, %v14102_v45  ;;  %7440 = vmatpush.bf16.msrb.mxu3 %v15703_v52  ;;  %v13400_v39 = vld [vmem:[#allocation5 + $0xb68] sm:$0xf0]  ;;  %v12891_v48 = vor.u32 %v18321_v31, %v12888_v43 }
 0x435   :  { %v18761_v53 = vld [vmem:[#allocation5 + $0x14e4] sm:$0xf0]  ;;  %v18577_v45 = vld [vmem:[#allocation5 + $0xf2c] sm:$0xf]  ;;  %v13403_v52 = vor.u32 %v18449_v44, %v13400_v39 }
 0x436   :  { %v15126_v55 = vld [vmem:[#allocation5 + $0x18a8] sm:$0xf]  ;;  %v14615_v4 = vor.u32 %v18761_v53, %v14614_v58  ;;  %7402 = vmatpush.bf16.msrb.mxu0 %v14103_v62  ;;  %v13912_v46 = vld [vmem:[#allocation5 + $0xf68] sm:$0xf0]  ;;  %v12379_v58 = vor.u32 %v18193_v49, %v12376_v30 }
 0x437   :  { %v18889_v16 = vld [vmem:[#allocation5 + $0x18e4] sm:$0xf0]  ;;  %v18177_v53 = vld [vmem:[#allocation5 + $0x2ac] sm:$0xf] }
 0x438   :  { %v15638_v59 = vld [vmem:[#allocation5 + $0x1ca8] sm:$0xf]  ;;  %v15127_v2 = vor.u32 %v18889_v16, %v15126_v55  ;;  %7415 = vmatpush.bf16.msrb.mxu1 %v14615_v4  ;;  %v12312_v55 = vld [vmem:[#allocation5 + $0x2e8] sm:$0xf0] }
 0x439   :  { %v19017_v60 = vld [vmem:[#allocation5 + $0x1ce4] sm:$0xf0]  ;;  %v18305_v16 = vld [vmem:[#allocation5 + $0x6ac] sm:$0xf] }
 0x43a   :  { %v14038_v63 = vld [vmem:[#allocation5 + $0x1028] sm:$0xf]  ;;  %v15639_v9 = vor.u32 %v19017_v60, %v15638_v59  ;;  %7428 = vmatpush.bf16.msrb.mxu2 %v15127_v2  ;;  %v13915_v59 = vor.u32 %v18577_v45, %v13912_v46  ;;  %v12824_v60 = vld [vmem:[#allocation5 + $0x6e8] sm:$0xf0]  ;;  %v12315_v2 = vor.u32 %v18177_v53, %v12312_v55 }
 0x43b   :  { %v18617_v0 = vld [vmem:[#allocation5 + $0x1064] sm:$0xf0]  ;;  %v18433_v62 = vld [vmem:[#allocation5 + $0xaac] sm:$0xf] }
 0x43c   :  { %v14550_v3 = vld [vmem:[#allocation5 + $0x1428] sm:$0xf]  ;;  %v14039_v19 = vor.u32 %v18617_v0, %v14038_v63  ;;  %7441 = vmatpush.bf16.msrb.mxu3 %v15639_v9  ;;  %v13336_v63 = vld [vmem:[#allocation5 + $0xae8] sm:$0xf0] }
 0x43d   :  { %v18745_v5 = vld [vmem:[#allocation5 + $0x1464] sm:$0xf0]  ;;  %v18561_v0 = vld [vmem:[#allocation5 + $0xeac] sm:$0xf] }
 0x43e   :  { %v15062_v6 = vld [vmem:[#allocation5 + $0x1828] sm:$0xf]  ;;  %v14551_v22 = vor.u32 %v18745_v5, %v14550_v3  ;;  %7403 = vmatpush.bf16.msrb.mxu0 %v14039_v19  ;;  %v13848_v4 = vld [vmem:[#allocation5 + $0xee8] sm:$0xf0]  ;;  %v12827_v3 = vor.u32 %v18305_v16, %v12824_v60  ;;  %v13339_v5 = vor.u32 %v18433_v62, %v13336_v63  ;;  %v7197_v19 = vpop.f32.mrf.mxu0  ;;  %v7236_v16 = vpop.f32.mrf.mxu3 }
 0x43f   :  { %v18873_v10 = vld [vmem:[#allocation5 + $0x1864] sm:$0xf0]  ;;  %v18289_v9 = vld [vmem:[#allocation5 + $0x62c] sm:$0xf]  ;;  %v7198_v1 = vadd.f32 %v7197_v19, %v20009_v56 }
 0x440   :  { %v15574_v8 = vld [vmem:[#allocation5 + $0x1c28] sm:$0xf]  ;;  %v15063_v23 = vor.u32 %v18873_v10, %v15062_v6  ;;  %7416 = vmatpush.bf16.msrb.mxu1 %v14551_v22  ;;  %v18161_v6 = vld [vmem:[#allocation5 + $0x22c] sm:$0xf]  ;;  %v13851_v10 = vor.u32 %v18561_v0, %v13848_v4 }
 0x441   :  { %v19001_v12 = vld [vmem:[#allocation5 + $0x1c64] sm:$0xf0]  ;;  %7404 = vmatmul.bf16.vlgmr.msrb.gmra.mxu0 %v19867_v37  ;;  %v13784_v15 = vld [vmem:[#allocation5 + $0xe68] sm:$0xf0]  ;;  %v12251_v17 = vor.u32 %v18161_v6, %v12248_v7  ;;  %v7211_v31 = vadd.f32 %v7210_v24, %v7198_v1  ;;  %v7212_v7 = vpop.f32.mrf.mxu1 }
 0x442   :  { %v15575_v26 = vor.u32 %v19001_v12, %v15574_v8  ;;  %7429 = vmatpush.bf16.msrb.mxu2 %v15063_v23  ;;  %7448 = vmatpush.bf16.msra.mxu0 %v12443_v27  ;;  %v12760_v8 = vld [vmem:[#allocation5 + $0x668] sm:$0xf0] }
 0x443   :  { %7417 = vmatmul.bf16.vlgmr.msrb.gmra.mxu1 %v19871_v40  ;;  %v18417_v12 = vld [vmem:[#allocation5 + $0xa2c] sm:$0xf]  ;;  %v12763_v35 = vor.u32 %v18289_v9, %v12760_v8 }
 0x444   :  { %7442 = vmatpush.bf16.msrb.mxu3 %v15575_v26  ;;  %7461 = vmatpush.bf16.msra.mxu1 %v12955_v28  ;;  %v13275_v18 = vor.u32 %v18417_v12, %v13272_v13  ;;  %v12184_v22 = vld [vmem:[#allocation5 + $0x1e8] sm:$0xf0]  ;;  %v13787_v26 = vor.u32 %v18545_v14, %v13784_v15 }
 0x445   :  { %7430 = vmatmul.bf16.vlgmr.msrb.gmra.mxu2 %v19865_v32  ;;  %v18273_v23 = vld [vmem:[#allocation5 + $0x5ac] sm:$0xf] }
 0x446   :  { %7474 = vmatpush.bf16.msra.mxu2 %v13467_v29  ;;  %7449 = vmatpush.bf16.msra.mxu0 %v12379_v58  ;;  %v12696_v27 = vld [vmem:[#allocation5 + $0x5e8] sm:$0xf0]  ;;  %v7223_v58 = vpop.f32.mrf.mxu2  ;;  %v7199_v0 = vpop.f32.mrf.mxu0 }
 0x447   :  { %7443 = vmatmul.bf16.vlgmr.msrb.gmra.mxu3 %v19869_v38  ;;  %v18401_v28 = vld [vmem:[#allocation5 + $0x9ac] sm:$0xf]  ;;  %v12699_v43 = vor.u32 %v18273_v23, %v12696_v27  ;;  %v7224_v55 = vadd.f32 %v7223_v58, %v7211_v31 }
 0x448   :  { %7487 = vmatpush.bf16.msra.mxu3 %v13979_v36  ;;  %7462 = vmatpush.bf16.msra.mxu1 %v12891_v48  ;;  %v13208_v29 = vld [vmem:[#allocation5 + $0x9e8] sm:$0xf0]  ;;  %v12187_v36 = vor.u32 %v18145_v21, %v12184_v22 }
 0x449   :  { %v18529_v49 = vld [vmem:[#allocation5 + $0xdac] sm:$0xf]  ;;  %v13211_v44 = vor.u32 %v18401_v28, %v13208_v29  ;;  %v20016_v63 = vadd.f32 %v7236_v16, %v7224_v55  ;;  %v7238_v29 = vpop.f32.mrf.mxu3 }
 0x44a   :  { %7475 = vmatpush.bf16.msra.mxu2 %v13403_v52  ;;  %7450 = vmatpush.bf16.msra.mxu0 %v12315_v2  ;;  %v13720_v30 = vld [vmem:[#allocation5 + $0xde8] sm:$0xf0] }
 0x44b   :  { %v18129_v39 = vld [vmem:[#allocation5 + $0x12c] sm:$0xf]  ;;  %v13723_v56 = vor.u32 %v18529_v49, %v13720_v30 }
 0x44c   :  { %7488 = vmatpush.bf16.msra.mxu3 %v13915_v59  ;;  %7463 = vmatpush.bf16.msra.mxu1 %v12827_v3  ;;  %v12120_v45 = vld [vmem:[#allocation5 + $0x168] sm:$0xf0] }
 0x44d   :  { %v18257_v46 = vld [vmem:[#allocation5 + $0x52c] sm:$0xf]  ;;  %v12123_v62 = vor.u32 %v18129_v39, %v12120_v45 }
 0x44e   :  { %7476 = vmatpush.bf16.msra.mxu2 %v13339_v5  ;;  %7451 = vmatpush.bf16.msra.mxu0 %v12251_v17  ;;  %v12632_v48 = vld [vmem:[#allocation5 + $0x568] sm:$0xf0]  ;;  %v7225_v1 = vpop.f32.mrf.mxu2 }
 0x44f   :  { %v18385_v52 = vld [vmem:[#allocation5 + $0x92c] sm:$0xf]  ;;  %v12635_v4 = vor.u32 %v18257_v46, %v12632_v48 }
 0x450   :  { %7489 = vmatpush.bf16.msra.mxu3 %v13851_v10  ;;  %7464 = vmatpush.bf16.msra.mxu1 %v12763_v35  ;;  %v13144_v53 = vld [vmem:[#allocation5 + $0x968] sm:$0xf0] }
 0x451   :  { %v18513_v59 = vld [vmem:[#allocation5 + $0xd2c] sm:$0xf]  ;;  %v13147_v2 = vor.u32 %v18385_v52, %v13144_v53 }
 0x452   :  { %7477 = vmatpush.bf16.msra.mxu2 %v13275_v18  ;;  %v13656_v60 = vld [vmem:[#allocation5 + $0xd68] sm:$0xf0]  ;;  %7452 = vmatpush.bf16.msra.mxu0 %v12187_v36 }
 0x453   :  { %v18113_v3 = vld [vmem:[#allocation5 + $0xac] sm:$0xf]  ;;  %v13659_v9 = vor.u32 %v18513_v59, %v13656_v60 }
 0x454   :  { %7490 = vmatpush.bf16.msra.mxu3 %v13787_v26  ;;  %7465 = vmatpush.bf16.msra.mxu1 %v12699_v43  ;;  %v12056_v5 = vld [vmem:[#allocation5 + $0xe8] sm:$0xf0] }
 0x455   :  { %v18241_v6 = vld [vmem:[#allocation5 + $0x4ac] sm:$0xf]  ;;  %v12059_v15 = vor.u32 %v18113_v3, %v12056_v5 }
 0x456   :  { %7478 = vmatpush.bf16.msra.mxu2 %v13211_v44  ;;  %v12568_v10 = vld [vmem:[#allocation5 + $0x4e8] sm:$0xf0]  ;;  %7453 = vmatpush.bf16.msra.mxu0 %v12123_v62 }
 0x457   :  { %v18369_v8 = vld [vmem:[#allocation5 + $0x8ac] sm:$0xf]  ;;  %v12571_v35 = vor.u32 %v18241_v6, %v12568_v10 }
 0x458   :  { %7491 = vmatpush.bf16.msra.mxu3 %v13723_v56  ;;  %v13080_v12 = vld [vmem:[#allocation5 + $0x8e8] sm:$0xf0]  ;;  %7466 = vmatpush.bf16.msra.mxu1 %v12635_v4 }
 0x459   :  { %v18497_v13 = vld [vmem:[#allocation5 + $0xcac] sm:$0xf]  ;;  %v13083_v18 = vor.u32 %v18369_v8, %v13080_v12 }
 0x45a   :  { %v13592_v14 = vld [vmem:[#allocation5 + $0xce8] sm:$0xf0]  ;;  %7479 = vmatpush.bf16.msra.mxu2 %v13147_v2  ;;  %7454 = vmatpush.bf16.msra.mxu0 %v12059_v15 }
 0x45b   :  { %v18097_v17 = vld [vmem:[#allocation5 + $0x2c] sm:$0xf]  ;;  %v13595_v24 = vor.u32 %v18497_v13, %v13592_v14 }
 0x45c   :  { %v11992_v19 = vld [vmem:[#allocation5 + $0x68] sm:$0xf0]  ;;  %7492 = vmatpush.bf16.msra.mxu3 %v13659_v9  ;;  %7467 = vmatpush.bf16.msra.mxu1 %v12571_v35 }
 0x45d   :  { %v18225_v21 = vld [vmem:[#allocation5 + $0x42c] sm:$0xf]  ;;  %v11995_v36 = vor.u32 %v18097_v17, %v11992_v19 }
 0x45e   :  { %v12504_v22 = vld [vmem:[#allocation5 + $0x468] sm:$0xf0]  ;;  %7480 = vmatpush.bf16.msra.mxu2 %v13083_v18 }
 0x45f   :  { %v18353_v23 = vld [vmem:[#allocation5 + $0x82c] sm:$0xf]  ;;  %v12507_v45 = vor.u32 %v18225_v21, %v12504_v22  ;;  %7455 = vmatpush.bf16.msra.mxu0 %v11995_v36 }
 0x460   :  { %v13016_v26 = vld [vmem:[#allocation5 + $0x868] sm:$0xf0]  ;;  %7493 = vmatpush.bf16.msra.mxu3 %v13595_v24 }
 0x461   :  { %v18481_v27 = vld [vmem:[#allocation5 + $0xc2c] sm:$0xf]  ;;  %v13019_v46 = vor.u32 %v18353_v23, %v13016_v26  ;;  %7468 = vmatpush.bf16.msra.mxu1 %v12507_v45  ;;  %v1161_v26 = vperm.slane %v20003_v51, 1 }
 0x462   :  { %v13528_v28 = vld [vmem:[#allocation5 + $0xc68] sm:$0xf0]  ;;  %7456 = vmatmul.bf16.vlgmr.msra.gmra.mxu0 %v19855_v34 }
 0x463   :  { %v18721_v49 = vld [vmem:[#allocation5 + $0x13ac] sm:$0xf]  ;;  %v13531_v48 = vor.u32 %v18481_v27, %v13528_v28  ;;  %7481 = vmatpush.bf16.msra.mxu2 %v13019_v46 }
 0x464   :  { %v14488_v30 = vld [vmem:[#allocation5 + $0x13e8] sm:$0xf0]  ;;  %7469 = vmatmul.bf16.vlgmr.msra.gmra.mxu1 %v19859_v42 }
 0x465   :  { %v18849_v31 = vld [vmem:[#allocation5 + $0x17ac] sm:$0xf]  ;;  %v14491_v52 = vor.u32 %v18721_v49, %v14488_v30  ;;  %7494 = vmatpush.bf16.msra.mxu3 %v13531_v48  ;;  %v7262_v48 = vpop.f32.mrf.mxu1 }
 0x466   :  { %v15000_v43 = vld [vmem:[#allocation5 + $0x17e8] sm:$0xf0]  ;;  %7482 = vmatmul.bf16.vlgmr.msra.gmra.mxu2 %v19853_v33 }
 0x467   :  { %v18977_v44 = vld [vmem:[#allocation5 + $0x1bac] sm:$0xf]  ;;  %v15003_v53 = vor.u32 %v18849_v31, %v15000_v43  ;;  %7500 = vmatpush.bf16.msrb.mxu0 %v14491_v52  ;;  %v7249_v43 = vpop.f32.mrf.mxu0 }
 0x468   :  { %v15512_v39 = vld [vmem:[#allocation5 + $0x1be8] sm:$0xf0]  ;;  %7495 = vmatmul.bf16.vlgmr.msra.gmra.mxu3 %v19857_v41 }
 0x469   :  { %v19105_v58 = vld [vmem:[#allocation5 + $0x1fac] sm:$0xf]  ;;  %v15515_v55 = vor.u32 %v18977_v44, %v15512_v39  ;;  %7513 = vmatpush.bf16.msrb.mxu1 %v15003_v53 }
 0x46a   :  { %v16024_v56 = vld [vmem:[#allocation5 + $0x1fe8] sm:$0xf0] }
 0x46b   :  { %v18705_v16 = vld [vmem:[#allocation5 + $0x132c] sm:$0xf]  ;;  %v16027_v62 = vor.u32 %v19105_v58, %v16024_v56  ;;  %7526 = vmatpush.bf16.msrb.mxu2 %v15515_v55  ;;  %v7250_v56 = vadd.f32 %v7249_v43, %v1161_v26 }
 0x46c   :  { %v14424_v59 = vld [vmem:[#allocation5 + $0x1368] sm:$0xf0] }
 0x46d   :  { %v18833_v60 = vld [vmem:[#allocation5 + $0x172c] sm:$0xf]  ;;  %v14427_v6 = vor.u32 %v18705_v16, %v14424_v59  ;;  %7539 = vmatpush.bf16.msrb.mxu3 %v16027_v62 }
 0x46e   :  { %v14936_v0 = vld [vmem:[#allocation5 + $0x1768] sm:$0xf0] }
 0x46f   :  { %v18961_v4 = vld [vmem:[#allocation5 + $0x1b2c] sm:$0xf]  ;;  %v14939_v7 = vor.u32 %v18833_v60, %v14936_v0  ;;  %7501 = vmatpush.bf16.msrb.mxu0 %v14427_v6  ;;  %v7263_v60 = vadd.f32 %v7262_v48, %v7250_v56  ;;  %v7275_v6 = vpop.f32.mrf.mxu2 }
 0x470   :  { %v15448_v2 = vld [vmem:[#allocation5 + $0x1b68] sm:$0xf0] }
 0x471   :  { %v19089_v3 = vld [vmem:[#allocation5 + $0x1f2c] sm:$0xf]  ;;  %v15451_v9 = vor.u32 %v18961_v4, %v15448_v2  ;;  %7514 = vmatpush.bf16.msrb.mxu1 %v14939_v7 }
 0x472   :  { %v15960_v5 = vld [vmem:[#allocation5 + $0x1f68] sm:$0xf0] }
 0x473   :  { %v18689_v10 = vld [vmem:[#allocation5 + $0x12ac] sm:$0xf]  ;;  %v15963_v13 = vor.u32 %v19089_v3, %v15960_v5  ;;  %7527 = vmatpush.bf16.msrb.mxu2 %v15451_v9 }
 0x474   :  { %v14360_v8 = vld [vmem:[#allocation5 + $0x12e8] sm:$0xf0] }
 0x475   :  { %v18817_v12 = vld [vmem:[#allocation5 + $0x16ac] sm:$0xf]  ;;  %v14363_v18 = vor.u32 %v18689_v10, %v14360_v8  ;;  %7540 = vmatpush.bf16.msrb.mxu3 %v15963_v13  ;;  %v7288_v13 = vpop.f32.mrf.mxu3 }
 0x476   :  { %v14872_v14 = vld [vmem:[#allocation5 + $0x16e8] sm:$0xf0] }
 0x477   :  { %v18945_v15 = vld [vmem:[#allocation5 + $0x1aac] sm:$0xf]  ;;  %v14875_v22 = vor.u32 %v18817_v12, %v14872_v14  ;;  %7502 = vmatpush.bf16.msrb.mxu0 %v14363_v18  ;;  %v7276_v12 = vadd.f32 %v7275_v6, %v7263_v60  ;;  %v7277_v56 = vpop.f32.mrf.mxu2  ;;  %v12958_v60 = vld [vmem:[#allocation5 + $0x7b0] sm:$0xf] }
 0x478   :  { %v15384_v17 = vld [vmem:[#allocation5 + $0x1ae8] sm:$0xf0]  ;;  %v13982_v6 = vld [vmem:[#allocation5 + $0xfb0] sm:$0xf] }
 0x479   :  { %v19073_v19 = vld [vmem:[#allocation5 + $0x1eac] sm:$0xf]  ;;  %v15387_v23 = vor.u32 %v18945_v15, %v15384_v17  ;;  %7515 = vmatpush.bf16.msrb.mxu1 %v14875_v22  ;;  %v18170_v56 = vld [vmem:[#allocation5 + $0x26c] sm:$0xf0] }
 0x47a   :  { %v15896_v35 = vld [vmem:[#allocation5 + $0x1ee8] sm:$0xf0] }
 0x47b   :  { %v18673_v21 = vld [vmem:[#allocation5 + $0x122c] sm:$0xf]  ;;  %v15899_v27 = vor.u32 %v19073_v19, %v15896_v35  ;;  %7528 = vmatpush.bf16.msrb.mxu2 %v15387_v23  ;;  %v20023_v19 = vadd.f32 %v7288_v13, %v7276_v12  ;;  %v7251_v35 = vpop.f32.mrf.mxu0  ;;  %v12382_v13 = vld [vmem:[#allocation5 + $0x330] sm:$0xf] }
 0x47c   :  { %v14296_v1 = vld [vmem:[#allocation5 + $0x1268] sm:$0xf0]  ;;  %v18330_v35 = vld [vmem:[#allocation5 + $0x76c] sm:$0xf0] }
 0x47d   :  { %v18801_v24 = vld [vmem:[#allocation5 + $0x162c] sm:$0xf]  ;;  %v14299_v36 = vor.u32 %v18673_v21, %v14296_v1  ;;  %7541 = vmatpush.bf16.msrb.mxu3 %v15899_v27 }
 0x47e   :  { %v14808_v28 = vld [vmem:[#allocation5 + $0x1668] sm:$0xf0] }
 0x47f   :  { %v18929_v29 = vld [vmem:[#allocation5 + $0x1a2c] sm:$0xf]  ;;  %v14811_v44 = vor.u32 %v18801_v24, %v14808_v28  ;;  %7503 = vmatpush.bf16.msrb.mxu0 %v14299_v36  ;;  %v7264_v24 = vpop.f32.mrf.mxu1 }
 0x480   :  { %v15320_v49 = vld [vmem:[#allocation5 + $0x1a68] sm:$0xf0] }
 0x481   :  { %v19057_v30 = vld [vmem:[#allocation5 + $0x1e2c] sm:$0xf]  ;;  %v15323_v39 = vor.u32 %v18929_v29, %v15320_v49  ;;  %7516 = vmatpush.bf16.msrb.mxu1 %v14811_v44 }
 0x482   :  { %v15832_v31 = vld [vmem:[#allocation5 + $0x1e68] sm:$0xf0] }
 0x483   :  { %v18657_v45 = vld [vmem:[#allocation5 + $0x11ac] sm:$0xf]  ;;  %v15835_v51 = vor.u32 %v19057_v30, %v15832_v31  ;;  %7529 = vmatpush.bf16.msrb.mxu2 %v15323_v39 }
 0x484   :  { %v14232_v46 = vld [vmem:[#allocation5 + $0x11e8] sm:$0xf0] }
 0x485   :  { %v18785_v58 = vld [vmem:[#allocation5 + $0x15ac] sm:$0xf]  ;;  %v14235_v62 = vor.u32 %v18657_v45, %v14232_v46  ;;  %7542 = vmatpush.bf16.msrb.mxu3 %v15835_v51 }
 0x486   :  { %v14744_v52 = vld [vmem:[#allocation5 + $0x15e8] sm:$0xf0] }
 0x487   :  { %v18913_v53 = vld [vmem:[#allocation5 + $0x19ac] sm:$0xf]  ;;  %v14747_v0 = vor.u32 %v18785_v58, %v14744_v52  ;;  %7504 = vmatpush.bf16.msrb.mxu0 %v14235_v62 }
 0x488   :  { %v15256_v55 = vld [vmem:[#allocation5 + $0x19e8] sm:$0xf0] }
 0x489   :  { %v19041_v16 = vld [vmem:[#allocation5 + $0x1dac] sm:$0xf]  ;;  %v15259_v4 = vor.u32 %v18913_v53, %v15256_v55  ;;  %7517 = vmatpush.bf16.msrb.mxu1 %v14747_v0  ;;  %v7290_v55 = vpop.f32.mrf.mxu3  ;;  %v18346_v0 = vld [vmem:[#allocation5 + $0x7ec] sm:$0xf0] }
 0x48a   :  { %v15768_v59 = vld [vmem:[#allocation5 + $0x1de8] sm:$0xf0]  ;;  %v18426_v55 = vld [vmem:[#allocation5 + $0xa6c] sm:$0xf0] }
 0x48b   :  { %v18641_v2 = vld [vmem:[#allocation5 + $0x112c] sm:$0xf]  ;;  %v15771_v7 = vor.u32 %v19041_v16, %v15768_v59  ;;  %7530 = vmatpush.bf16.msrb.mxu2 %v15259_v4  ;;  %v12446_v16 = vld [vmem:[#allocation5 + $0x3b0] sm:$0xf] }
 0x48c   :  { %v14168_v3 = vld [vmem:[#allocation5 + $0x1168] sm:$0xf0]  ;;  %v18218_v59 = vld [vmem:[#allocation5 + $0x3ec] sm:$0xf0] }
 0x48d   :  { %v18769_v5 = vld [vmem:[#allocation5 + $0x152c] sm:$0xf]  ;;  %v14171_v17 = vor.u32 %v18641_v2, %v14168_v3  ;;  %7543 = vmatpush.bf16.msrb.mxu3 %v15771_v7  ;;  %v13470_v4 = vld [vmem:[#allocation5 + $0xbb0] sm:$0xf] }
 0x48e   :  { %v14680_v9 = vld [vmem:[#allocation5 + $0x1568] sm:$0xf0]  ;;  %v18474_v2 = vld [vmem:[#allocation5 + $0xbec] sm:$0xf0] }
 0x48f   :  { %v18897_v10 = vld [vmem:[#allocation5 + $0x192c] sm:$0xf]  ;;  %v14683_v18 = vor.u32 %v18769_v5, %v14680_v9  ;;  %7505 = vmatpush.bf16.msrb.mxu0 %v14171_v17  ;;  %v18602_v7 = vld [vmem:[#allocation5 + $0xfec] sm:$0xf0]  ;;  %v13471_v12 = vor.u32 %v18474_v2, %v13470_v4 }
 0x490   :  { %v15192_v8 = vld [vmem:[#allocation5 + $0x1968] sm:$0xf0]  ;;  %v13983_v17 = vor.u32 %v18602_v7, %v13982_v6  ;;  %v12190_v2 = vld [vmem:[#allocation5 + $0x1b0] sm:$0xf]  ;;  %v7314_v7 = vpop.f32.mrf.mxu1 }
 0x491   :  { %v19025_v14 = vld [vmem:[#allocation5 + $0x1d2c] sm:$0xf]  ;;  %v15195_v21 = vor.u32 %v18897_v10, %v15192_v8  ;;  %7518 = vmatpush.bf16.msrb.mxu1 %v14683_v18  ;;  %v12447_v10 = vor.u32 %v18218_v59, %v12446_v16  ;;  %v12959_v8 = vor.u32 %v18346_v0, %v12958_v60  ;;  %v13406_v18 = vld [vmem:[#allocation5 + $0xb30] sm:$0xf] }
 0x492   :  { %v15704_v15 = vld [vmem:[#allocation5 + $0x1d68] sm:$0xf0]  ;;  %v13790_v16 = vld [vmem:[#allocation5 + $0xe30] sm:$0xf] }
 0x493   :  { %v18625_v22 = vld [vmem:[#allocation5 + $0x10ac] sm:$0xf]  ;;  %v15707_v26 = vor.u32 %v19025_v14, %v15704_v15  ;;  %7531 = vmatpush.bf16.msrb.mxu2 %v15195_v21  ;;  %v18202_v14 = vld [vmem:[#allocation5 + $0x36c] sm:$0xf0] }
 0x494   :  { %v14104_v23 = vld [vmem:[#allocation5 + $0x10e8] sm:$0xf0]  ;;  %v12894_v15 = vld [vmem:[#allocation5 + $0x730] sm:$0xf] }
 0x495   :  { %v18753_v1 = vld [vmem:[#allocation5 + $0x14ac] sm:$0xf]  ;;  %v14107_v31 = vor.u32 %v18625_v22, %v14104_v23  ;;  %7544 = vmatpush.bf16.msrb.mxu3 %v15707_v26  ;;  %v18458_v21 = vld [vmem:[#allocation5 + $0xb6c] sm:$0xf0]  ;;  %v12895_v24 = vor.u32 %v18330_v35, %v12894_v15 }
 0x496   :  { %v14616_v27 = vld [vmem:[#allocation5 + $0x14e8] sm:$0xf0]  ;;  %v13918_v22 = vld [vmem:[#allocation5 + $0xf30] sm:$0xf]  ;;  %v13407_v26 = vor.u32 %v18458_v21, %v13406_v18 }
 0x497   :  { %v18881_v28 = vld [vmem:[#allocation5 + $0x18ac] sm:$0xf]  ;;  %v14619_v44 = vor.u32 %v18753_v1, %v14616_v27  ;;  %7506 = vmatpush.bf16.msrb.mxu0 %v14107_v31  ;;  %v18586_v23 = vld [vmem:[#allocation5 + $0xf6c] sm:$0xf0]  ;;  %v12383_v1 = vor.u32 %v18202_v14, %v12382_v13 }
 0x498   :  { %v15128_v29 = vld [vmem:[#allocation5 + $0x18e8] sm:$0xf0]  ;;  %v12318_v27 = vld [vmem:[#allocation5 + $0x2b0] sm:$0xf] }
 0x499   :  { %v19009_v49 = vld [vmem:[#allocation5 + $0x1cac] sm:$0xf]  ;;  %v15131_v39 = vor.u32 %v18881_v28, %v15128_v29  ;;  %7519 = vmatpush.bf16.msrb.mxu1 %v14619_v44  ;;  %v18186_v28 = vld [vmem:[#allocation5 + $0x2ec] sm:$0xf0] }
 0x49a   :  { %v15640_v30 = vld [vmem:[#allocation5 + $0x1ce8] sm:$0xf0]  ;;  %v12830_v29 = vld [vmem:[#allocation5 + $0x6b0] sm:$0xf] }
 0x49b   :  { %v18609_v36 = vld [vmem:[#allocation5 + $0x102c] sm:$0xf]  ;;  %v15643_v48 = vor.u32 %v19009_v49, %v15640_v30  ;;  %7532 = vmatpush.bf16.msrb.mxu2 %v15131_v39  ;;  %v13919_v49 = vor.u32 %v18586_v23, %v13918_v22  ;;  %v18314_v30 = vld [vmem:[#allocation5 + $0x6ec] sm:$0xf0]  ;;  %v12319_v39 = vor.u32 %v18186_v28, %v12318_v27 }
 0x49c   :  { %v14040_v43 = vld [vmem:[#allocation5 + $0x1068] sm:$0xf0]  ;;  %v13342_v31 = vld [vmem:[#allocation5 + $0xab0] sm:$0xf] }
 0x49d   :  { %v18737_v45 = vld [vmem:[#allocation5 + $0x142c] sm:$0xf]  ;;  %v14043_v62 = vor.u32 %v18609_v36, %v14040_v43  ;;  %7545 = vmatpush.bf16.msrb.mxu3 %v15643_v48  ;;  %v18442_v36 = vld [vmem:[#allocation5 + $0xaec] sm:$0xf0] }
 0x49e   :  { %v14552_v46 = vld [vmem:[#allocation5 + $0x1468] sm:$0xf0]  ;;  %v13854_v43 = vld [vmem:[#allocation5 + $0xeb0] sm:$0xf] }
 0x49f   :  { %v18865_v58 = vld [vmem:[#allocation5 + $0x182c] sm:$0xf]  ;;  %v14555_v3 = vor.u32 %v18737_v45, %v14552_v46  ;;  %7507 = vmatpush.bf16.msrb.mxu0 %v14043_v62  ;;  %v18570_v44 = vld [vmem:[#allocation5 + $0xeec] sm:$0xf0]  ;;  %v12831_v45 = vor.u32 %v18314_v30, %v12830_v29  ;;  %v13343_v46 = vor.u32 %v18442_v36, %v13342_v31  ;;  %v7301_v62 = vpop.f32.mrf.mxu0  ;;  %v7340_v29 = vpop.f32.mrf.mxu3 }
 0x4a0   :  { %v15064_v51 = vld [vmem:[#allocation5 + $0x1868] sm:$0xf0]  ;;  %v12766_v48 = vld [vmem:[#allocation5 + $0x630] sm:$0xf]  ;;  %v7302_v6 = vadd.f32 %v7301_v62, %v20023_v19 }
 0x4a1   :  { %v18993_v52 = vld [vmem:[#allocation5 + $0x1c2c] sm:$0xf]  ;;  %v15067_v5 = vor.u32 %v18865_v58, %v15064_v51  ;;  %7520 = vmatpush.bf16.msrb.mxu1 %v14555_v3  ;;  %v12254_v58 = vld [vmem:[#allocation5 + $0x230] sm:$0xf]  ;;  %v13855_v51 = vor.u32 %v18570_v44, %v13854_v43 }
 0x4a2   :  { %v15576_v53 = vld [vmem:[#allocation5 + $0x1c68] sm:$0xf0]  ;;  %7508 = vmatmul.bf16.vlgmr.msrb.gmra.mxu0 %v19867_v37  ;;  %v18554_v59 = vld [vmem:[#allocation5 + $0xe6c] sm:$0xf0]  ;;  %v12255_v60 = vor.u32 %v18170_v56, %v12254_v58  ;;  %v7315_v15 = vadd.f32 %v7314_v7, %v7302_v6  ;;  %v7316_v56 = vpop.f32.mrf.mxu1 }
 0x4a3   :  { %v15579_v9 = vor.u32 %v18993_v52, %v15576_v53  ;;  %7533 = vmatpush.bf16.msrb.mxu2 %v15067_v5  ;;  %7552 = vmatpush.bf16.msra.mxu0 %v12447_v10  ;;  %v18298_v52 = vld [vmem:[#allocation5 + $0x66c] sm:$0xf0] }
 0x4a4   :  { %7521 = vmatmul.bf16.vlgmr.msrb.gmra.mxu1 %v19871_v40  ;;  %v13278_v53 = vld [vmem:[#allocation5 + $0xa30] sm:$0xf]  ;;  %v12767_v0 = vor.u32 %v18298_v52, %v12766_v48 }
 0x4a5   :  { %7546 = vmatpush.bf16.msrb.mxu3 %v15579_v9  ;;  %7565 = vmatpush.bf16.msra.mxu1 %v12959_v8  ;;  %v13279_v4 = vor.u32 %v18426_v55, %v13278_v53  ;;  %v18154_v3 = vld [vmem:[#allocation5 + $0x1ec] sm:$0xf0]  ;;  %v13791_v9 = vor.u32 %v18554_v59, %v13790_v16 }
 0x4a6   :  { %7534 = vmatmul.bf16.vlgmr.msrb.gmra.mxu2 %v19865_v32  ;;  %v12702_v5 = vld [vmem:[#allocation5 + $0x5b0] sm:$0xf] }
 0x4a7   :  { %7578 = vmatpush.bf16.msra.mxu2 %v13471_v12  ;;  %7553 = vmatpush.bf16.msra.mxu0 %v12383_v1  ;;  %v18282_v10 = vld [vmem:[#allocation5 + $0x5ec] sm:$0xf0]  ;;  %v7327_v1 = vpop.f32.mrf.mxu2  ;;  %v7303_v43 = vpop.f32.mrf.mxu0 }
 0x4a8   :  { %7547 = vmatmul.bf16.vlgmr.msrb.gmra.mxu3 %v19869_v38  ;;  %v13214_v8 = vld [vmem:[#allocation5 + $0x9b0] sm:$0xf]  ;;  %v12703_v35 = vor.u32 %v18282_v10, %v12702_v5  ;;  %v7328_v28 = vadd.f32 %v7327_v1, %v7315_v15 }
 0x4a9   :  { %7591 = vmatpush.bf16.msra.mxu3 %v13983_v17  ;;  %7566 = vmatpush.bf16.msra.mxu1 %v12895_v24  ;;  %v18410_v12 = vld [vmem:[#allocation5 + $0x9ec] sm:$0xf0]  ;;  %v12191_v17 = vor.u32 %v18154_v3, %v12190_v2 }
 0x4aa   :  { %v13726_v13 = vld [vmem:[#allocation5 + $0xdb0] sm:$0xf]  ;;  %v13215_v18 = vor.u32 %v18410_v12, %v13214_v8  ;;  %v20030_v36 = vadd.f32 %v7340_v29, %v7328_v28  ;;  %v7342_v12 = vpop.f32.mrf.mxu3 }
 0x4ab   :  { %7579 = vmatpush.bf16.msra.mxu2 %v13407_v26  ;;  %7554 = vmatpush.bf16.msra.mxu0 %v12319_v39  ;;  %v18538_v14 = vld [vmem:[#allocation5 + $0xdec] sm:$0xf0] }
 0x4ac   :  { %v12126_v21 = vld [vmem:[#allocation5 + $0x130] sm:$0xf]  ;;  %v13727_v19 = vor.u32 %v18538_v14, %v13726_v13 }
 0x4ad   :  { %7592 = vmatpush.bf16.msra.mxu3 %v13919_v49  ;;  %7567 = vmatpush.bf16.msra.mxu1 %v12831_v45  ;;  %v18138_v22 = vld [vmem:[#allocation5 + $0x16c] sm:$0xf0] }
 0x4ae   :  { %v12638_v23 = vld [vmem:[#allocation5 + $0x530] sm:$0xf]  ;;  %v12127_v31 = vor.u32 %v18138_v22, %v12126_v21 }
 0x4af   :  { %7580 = vmatpush.bf16.msra.mxu2 %v13343_v46  ;;  %7555 = vmatpush.bf16.msra.mxu0 %v12255_v60  ;;  %v18266_v24 = vld [vmem:[#allocation5 + $0x56c] sm:$0xf0]  ;;  %v7329_v6 = vpop.f32.mrf.mxu2 }
 0x4b0   :  { %v13150_v26 = vld [vmem:[#allocation5 + $0x930] sm:$0xf]  ;;  %v12639_v44 = vor.u32 %v18266_v24, %v12638_v23 }
 0x4b1   :  { %7593 = vmatpush.bf16.msra.mxu3 %v13855_v51  ;;  %7568 = vmatpush.bf16.msra.mxu1 %v12767_v0  ;;  %v18394_v27 = vld [vmem:[#allocation5 + $0x96c] sm:$0xf0] }
 0x4b2   :  { %v13662_v49 = vld [vmem:[#allocation5 + $0xd30] sm:$0xf]  ;;  %v13151_v39 = vor.u32 %v18394_v27, %v13150_v26 }
 0x4b3   :  { %7581 = vmatpush.bf16.msra.mxu2 %v13279_v4  ;;  %v18522_v30 = vld [vmem:[#allocation5 + $0xd6c] sm:$0xf0]  ;;  %7556 = vmatpush.bf16.msra.mxu0 %v12191_v17 }
 0x4b4   :  { %v12062_v45 = vld [vmem:[#allocation5 + $0xb0] sm:$0xf]  ;;  %v13663_v48 = vor.u32 %v18522_v30, %v13662_v49 }
 0x4b5   :  { %7594 = vmatpush.bf16.msra.mxu3 %v13791_v9  ;;  %7569 = vmatpush.bf16.msra.mxu1 %v12703_v35  ;;  %v18122_v46 = vld [vmem:[#allocation5 + $0xec] sm:$0xf0] }
 0x4b6   :  { %v12574_v58 = vld [vmem:[#allocation5 + $0x4b0] sm:$0xf]  ;;  %v12063_v59 = vor.u32 %v18122_v46, %v12062_v45 }
 0x4b7   :  { %7582 = vmatpush.bf16.msra.mxu2 %v13215_v18  ;;  %v18250_v51 = vld [vmem:[#allocation5 + $0x4ec] sm:$0xf0]  ;;  %7557 = vmatpush.bf16.msra.mxu0 %v12127_v31 }
 0x4b8   :  { %v13086_v52 = vld [vmem:[#allocation5 + $0x8b0] sm:$0xf]  ;;  %v12575_v0 = vor.u32 %v18250_v51, %v12574_v58 }
 0x4b9   :  { %7595 = vmatpush.bf16.msra.mxu3 %v13727_v19  ;;  %v18378_v53 = vld [vmem:[#allocation5 + $0x8ec] sm:$0xf0]  ;;  %7570 = vmatpush.bf16.msra.mxu1 %v12639_v44 }
 0x4ba   :  { %v13598_v55 = vld [vmem:[#allocation5 + $0xcb0] sm:$0xf]  ;;  %v13087_v4 = vor.u32 %v18378_v53, %v13086_v52 }
 0x4bb   :  { %v18506_v16 = vld [vmem:[#allocation5 + $0xcec] sm:$0xf0]  ;;  %7583 = vmatpush.bf16.msra.mxu2 %v13151_v39  ;;  %7558 = vmatpush.bf16.msra.mxu0 %v12063_v59 }
 0x4bc   :  { %v11998_v60 = vld [vmem:[#allocation5 + $0x30] sm:$0xf]  ;;  %v13599_v7 = vor.u32 %v18506_v16, %v13598_v55 }
 0x4bd   :  { %v18106_v62 = vld [vmem:[#allocation5 + $0x6c] sm:$0xf0]  ;;  %7596 = vmatpush.bf16.msra.mxu3 %v13663_v48  ;;  %7571 = vmatpush.bf16.msra.mxu1 %v12575_v0 }
 0x4be   :  { %v12510_v2 = vld [vmem:[#allocation5 + $0x430] sm:$0xf]  ;;  %v11999_v17 = vor.u32 %v18106_v62, %v11998_v60 }
 0x4bf   :  { %v18234_v3 = vld [vmem:[#allocation5 + $0x46c] sm:$0xf0]  ;;  %7584 = vmatpush.bf16.msra.mxu2 %v13087_v4 }
 0x4c0   :  { %v13022_v5 = vld [vmem:[#allocation5 + $0x830] sm:$0xf]  ;;  %v12511_v22 = vor.u32 %v18234_v3, %v12510_v2  ;;  %7559 = vmatpush.bf16.msra.mxu0 %v11999_v17 }
 0x4c1   :  { %v18362_v9 = vld [vmem:[#allocation5 + $0x86c] sm:$0xf0]  ;;  %7597 = vmatpush.bf16.msra.mxu3 %v13599_v7 }
 0x4c2   :  { %v13534_v10 = vld [vmem:[#allocation5 + $0xc30] sm:$0xf]  ;;  %v13023_v23 = vor.u32 %v18362_v9, %v13022_v5  ;;  %7572 = vmatpush.bf16.msra.mxu1 %v12511_v22  ;;  %v20036_v9 = vld [vmem:[#allocation7 + $0x8] sm:$0xff] }
 0x4c3   :  { %v18490_v8 = vld [vmem:[#allocation5 + $0xc6c] sm:$0xf0]  ;;  %7560 = vmatmul.bf16.vlgmr.msra.gmra.mxu0 %v19855_v34 }
 0x4c4   :  { %v14494_v13 = vld [vmem:[#allocation5 + $0x13b0] sm:$0xf]  ;;  %v13535_v24 = vor.u32 %v18490_v8, %v13534_v10  ;;  %7585 = vmatpush.bf16.msra.mxu2 %v13023_v23  ;;  %v1162_v10 = vperm.slane %v20036_v9, 2 }
 0x4c5   :  { %v18730_v14 = vld [vmem:[#allocation5 + $0x13ec] sm:$0xf0]  ;;  %7573 = vmatmul.bf16.vlgmr.msra.gmra.mxu1 %v19859_v42 }
 0x4c6   :  { %v15006_v15 = vld [vmem:[#allocation5 + $0x17b0] sm:$0xf]  ;;  %v14495_v26 = vor.u32 %v18730_v14, %v14494_v13  ;;  %7598 = vmatpush.bf16.msra.mxu3 %v13535_v24 }
 0x4c7   :  { %v18858_v35 = vld [vmem:[#allocation5 + $0x17ec] sm:$0xf0]  ;;  %7586 = vmatmul.bf16.vlgmr.msra.gmra.mxu2 %v19853_v33 }
 0x4c8   :  { %v15518_v18 = vld [vmem:[#allocation5 + $0x1bb0] sm:$0xf]  ;;  %v15007_v27 = vor.u32 %v18858_v35, %v15006_v15  ;;  %7604 = vmatpush.bf16.msrb.mxu0 %v14495_v26  ;;  %v7366_v26 = vpop.f32.mrf.mxu1 }
 0x4c9   :  { %v18986_v21 = vld [vmem:[#allocation5 + $0x1bec] sm:$0xf0]  ;;  %7599 = vmatmul.bf16.vlgmr.msra.gmra.mxu3 %v19857_v41 }
 0x4ca   :  { %v16030_v1 = vld [vmem:[#allocation5 + $0x1fb0] sm:$0xf]  ;;  %v15519_v28 = vor.u32 %v18986_v21, %v15518_v18  ;;  %7617 = vmatpush.bf16.msrb.mxu1 %v15007_v27  ;;  %v7353_v18 = vpop.f32.mrf.mxu0 }
 0x4cb   :  { %v19114_v19 = vld [vmem:[#allocation5 + $0x1fec] sm:$0xf0]  ;;  %v7354_v24 = vadd.f32 %v7353_v18, %v1162_v10 }
 0x4cc   :  { %v14430_v29 = vld [vmem:[#allocation5 + $0x1330] sm:$0xf]  ;;  %v16031_v31 = vor.u32 %v19114_v19, %v16030_v1  ;;  %7630 = vmatpush.bf16.msrb.mxu2 %v15519_v28 }
 0x4cd   :  { %v18714_v49 = vld [vmem:[#allocation5 + $0x136c] sm:$0xf0] }
 0x4ce   :  { %v14942_v30 = vld [vmem:[#allocation5 + $0x1730] sm:$0xf]  ;;  %v14431_v58 = vor.u32 %v18714_v49, %v14430_v29  ;;  %7643 = vmatpush.bf16.msrb.mxu3 %v16031_v31 }
 0x4cf   :  { %v18842_v43 = vld [vmem:[#allocation5 + $0x176c] sm:$0xf0] }
 0x4d0   :  { %v15454_v44 = vld [vmem:[#allocation5 + $0x1b30] sm:$0xf]  ;;  %v14943_v56 = vor.u32 %v18842_v43, %v14942_v30  ;;  %7605 = vmatpush.bf16.msrb.mxu0 %v14431_v58  ;;  %v7367_v43 = vadd.f32 %v7366_v26, %v7354_v24 }
 0x4d1   :  { %v18970_v39 = vld [vmem:[#allocation5 + $0x1b6c] sm:$0xf0] }
 0x4d2   :  { %v15966_v45 = vld [vmem:[#allocation5 + $0x1f30] sm:$0xf]  ;;  %v15455_v48 = vor.u32 %v18970_v39, %v15454_v44  ;;  %7618 = vmatpush.bf16.msrb.mxu1 %v14943_v56 }
 0x4d3   :  { %v19098_v46 = vld [vmem:[#allocation5 + $0x1f6c] sm:$0xf0] }
 0x4d4   :  { %v14366_v51 = vld [vmem:[#allocation5 + $0x12b0] sm:$0xf]  ;;  %v15967_v55 = vor.u32 %v19098_v46, %v15966_v45  ;;  %7631 = vmatpush.bf16.msrb.mxu2 %v15455_v48  ;;  %v7379_v48 = vpop.f32.mrf.mxu2 }
 0x4d5   :  { %v18698_v52 = vld [vmem:[#allocation5 + $0x12ec] sm:$0xf0] }
 0x4d6   :  { %v14878_v53 = vld [vmem:[#allocation5 + $0x16b0] sm:$0xf]  ;;  %v14367_v4 = vor.u32 %v18698_v52, %v14366_v51  ;;  %7644 = vmatpush.bf16.msrb.mxu3 %v15967_v55 }
 0x4d7   :  { %v18826_v16 = vld [vmem:[#allocation5 + $0x16ec] sm:$0xf0] }
 0x4d8   :  { %v15390_v59 = vld [vmem:[#allocation5 + $0x1ab0] sm:$0xf]  ;;  %v14879_v3 = vor.u32 %v18826_v16, %v14878_v53  ;;  %7606 = vmatpush.bf16.msrb.mxu0 %v14367_v4  ;;  %v7380_v16 = vadd.f32 %v7379_v48, %v7367_v43  ;;  %v18210_v43 = vld [vmem:[#allocation5 + $0x3b4] sm:$0xf] }
 0x4d9   :  { %v18954_v60 = vld [vmem:[#allocation5 + $0x1aec] sm:$0xf0] }
 0x4da   :  { %v15902_v62 = vld [vmem:[#allocation5 + $0x1eb0] sm:$0xf]  ;;  %v15391_v5 = vor.u32 %v18954_v60, %v15390_v59  ;;  %7619 = vmatpush.bf16.msrb.mxu1 %v14879_v3  ;;  %v7392_v59 = vpop.f32.mrf.mxu3 }
 0x4db   :  { %v19082_v0 = vld [vmem:[#allocation5 + $0x1eec] sm:$0xf0]  ;;  %v20039_v4 = vadd.f32 %v7392_v59, %v7380_v16 }
 0x4dc   :  { %v14302_v2 = vld [vmem:[#allocation5 + $0x1230] sm:$0xf]  ;;  %v15903_v8 = vor.u32 %v19082_v0, %v15902_v62  ;;  %7632 = vmatpush.bf16.msrb.mxu2 %v15391_v5 }
 0x4dd   :  { %v18682_v6 = vld [vmem:[#allocation5 + $0x126c] sm:$0xf0] }
 0x4de   :  { %v14814_v7 = vld [vmem:[#allocation5 + $0x1630] sm:$0xf]  ;;  %v14303_v35 = vor.u32 %v18682_v6, %v14302_v2  ;;  %7645 = vmatpush.bf16.msrb.mxu3 %v15903_v8  ;;  %v7355_v2 = vpop.f32.mrf.mxu0  ;;  %v7368_v8 = vpop.f32.mrf.mxu1 }
 0x4df   :  { %v18810_v12 = vld [vmem:[#allocation5 + $0x166c] sm:$0xf0]  ;;  %v18322_v2 = vld [vmem:[#allocation5 + $0x734] sm:$0xf] }
 0x4e0   :  { %v15326_v13 = vld [vmem:[#allocation5 + $0x1a30] sm:$0xf]  ;;  %v14815_v21 = vor.u32 %v18810_v12, %v14814_v7  ;;  %7607 = vmatpush.bf16.msrb.mxu0 %v14303_v35  ;;  %v13920_v8 = vld [vmem:[#allocation5 + $0xf70] sm:$0xf0] }
 0x4e1   :  { %v18938_v14 = vld [vmem:[#allocation5 + $0x1a6c] sm:$0xf0] }
 0x4e2   :  { %v15838_v15 = vld [vmem:[#allocation5 + $0x1e30] sm:$0xf]  ;;  %v15327_v22 = vor.u32 %v18938_v14, %v15326_v13  ;;  %7620 = vmatpush.bf16.msrb.mxu1 %v14815_v21 }
 0x4e3   :  { %v19066_v17 = vld [vmem:[#allocation5 + $0x1e6c] sm:$0xf0] }
 0x4e4   :  { %v14238_v23 = vld [vmem:[#allocation5 + $0x11b0] sm:$0xf]  ;;  %v15839_v27 = vor.u32 %v19066_v17, %v15838_v15  ;;  %7633 = vmatpush.bf16.msrb.mxu2 %v15327_v22 }
 0x4e5   :  { %v18666_v1 = vld [vmem:[#allocation5 + $0x11ec] sm:$0xf0] }
 0x4e6   :  { %v14750_v19 = vld [vmem:[#allocation5 + $0x15b0] sm:$0xf]  ;;  %v14239_v44 = vor.u32 %v18666_v1, %v14238_v23  ;;  %7646 = vmatpush.bf16.msrb.mxu3 %v15839_v27  ;;  %v7381_v27 = vpop.f32.mrf.mxu2 }
 0x4e7   :  { %v18794_v28 = vld [vmem:[#allocation5 + $0x15ec] sm:$0xf0] }
 0x4e8   :  { %v15262_v29 = vld [vmem:[#allocation5 + $0x19b0] sm:$0xf]  ;;  %v14751_v39 = vor.u32 %v18794_v28, %v14750_v19  ;;  %7608 = vmatpush.bf16.msrb.mxu0 %v14239_v44  ;;  %v12448_v44 = vld [vmem:[#allocation5 + $0x3f0] sm:$0xf0] }
 0x4e9   :  { %v18922_v49 = vld [vmem:[#allocation5 + $0x19ec] sm:$0xf0]  ;;  %v12451_v16 = vor.u32 %v18210_v43, %v12448_v44  ;;  %v18418_v43 = vld [vmem:[#allocation5 + $0xa34] sm:$0xf] }
 0x4ea   :  { %v15774_v30 = vld [vmem:[#allocation5 + $0x1db0] sm:$0xf]  ;;  %v15263_v45 = vor.u32 %v18922_v49, %v15262_v29  ;;  %7621 = vmatpush.bf16.msrb.mxu1 %v14751_v39  ;;  %v18338_v39 = vld [vmem:[#allocation5 + $0x7b4] sm:$0xf] }
 0x4eb   :  { %v19050_v31 = vld [vmem:[#allocation5 + $0x1dec] sm:$0xf0]  ;;  %v13280_v44 = vld [vmem:[#allocation5 + $0xa70] sm:$0xf0] }
 0x4ec   :  { %v14174_v46 = vld [vmem:[#allocation5 + $0x1130] sm:$0xf]  ;;  %v15775_v51 = vor.u32 %v19050_v31, %v15774_v30  ;;  %7634 = vmatpush.bf16.msrb.mxu2 %v15263_v45  ;;  %v7394_v31 = vpop.f32.mrf.mxu3 }
 0x4ed   :  { %v18650_v58 = vld [vmem:[#allocation5 + $0x116c] sm:$0xf0]  ;;  %v12768_v31 = vld [vmem:[#allocation5 + $0x670] sm:$0xf0] }
 0x4ee   :  { %v14686_v56 = vld [vmem:[#allocation5 + $0x1530] sm:$0xf]  ;;  %v14175_v0 = vor.u32 %v18650_v58, %v14174_v46  ;;  %7647 = vmatpush.bf16.msrb.mxu3 %v15775_v51  ;;  %v12960_v46 = vld [vmem:[#allocation5 + $0x7f0] sm:$0xf0] }
 0x4ef   :  { %v18778_v52 = vld [vmem:[#allocation5 + $0x156c] sm:$0xf0]  ;;  %v18466_v58 = vld [vmem:[#allocation5 + $0xbb4] sm:$0xf]  ;;  %v12963_v59 = vor.u32 %v18338_v39, %v12960_v46 }
 0x4f0   :  { %v15198_v53 = vld [vmem:[#allocation5 + $0x1930] sm:$0xf]  ;;  %v14687_v3 = vor.u32 %v18778_v52, %v14686_v56  ;;  %7609 = vmatpush.bf16.msrb.mxu0 %v14175_v0  ;;  %v13472_v56 = vld [vmem:[#allocation5 + $0xbf0] sm:$0xf0] }
 0x4f1   :  { %v18906_v55 = vld [vmem:[#allocation5 + $0x196c] sm:$0xf0]  ;;  %v18594_v52 = vld [vmem:[#allocation5 + $0xfb4] sm:$0xf] }
 0x4f2   :  { %v15710_v60 = vld [vmem:[#allocation5 + $0x1d30] sm:$0xf]  ;;  %v15199_v5 = vor.u32 %v18906_v55, %v15198_v53  ;;  %7622 = vmatpush.bf16.msrb.mxu1 %v14687_v3  ;;  %v13984_v53 = vld [vmem:[#allocation5 + $0xff0] sm:$0xf0] }
 0x4f3   :  { %v19034_v62 = vld [vmem:[#allocation5 + $0x1d6c] sm:$0xf0]  ;;  %v12384_v0 = vld [vmem:[#allocation5 + $0x370] sm:$0xf0]  ;;  %v13987_v3 = vor.u32 %v18594_v52, %v13984_v53 }
 0x4f4   :  { %v14110_v6 = vld [vmem:[#allocation5 + $0x10b0] sm:$0xf]  ;;  %v15711_v12 = vor.u32 %v19034_v62, %v15710_v60  ;;  %7635 = vmatpush.bf16.msrb.mxu2 %v15199_v5  ;;  %v13475_v60 = vor.u32 %v18466_v58, %v13472_v56  ;;  %v18194_v62 = vld [vmem:[#allocation5 + $0x334] sm:$0xf]  ;;  %v7405_v58 = vpop.f32.mrf.mxu0 }
 0x4f5   :  { %v18634_v7 = vld [vmem:[#allocation5 + $0x10ec] sm:$0xf0]  ;;  %v12896_v5 = vld [vmem:[#allocation5 + $0x770] sm:$0xf0] }
 0x4f6   :  { %v14622_v10 = vld [vmem:[#allocation5 + $0x14b0] sm:$0xf]  ;;  %v14111_v18 = vor.u32 %v18634_v7, %v14110_v6  ;;  %7648 = vmatpush.bf16.msrb.mxu3 %v15711_v12  ;;  %v18450_v6 = vld [vmem:[#allocation5 + $0xb34] sm:$0xf]  ;;  %v12387_v12 = vor.u32 %v18194_v62, %v12384_v0 }
 0x4f7   :  { %v18762_v13 = vld [vmem:[#allocation5 + $0x14ec] sm:$0xf0]  ;;  %v13408_v7 = vld [vmem:[#allocation5 + $0xb70] sm:$0xf0] }
 0x4f8   :  { %v15134_v14 = vld [vmem:[#allocation5 + $0x18b0] sm:$0xf]  ;;  %v14623_v23 = vor.u32 %v18762_v13, %v14622_v10  ;;  %7610 = vmatpush.bf16.msrb.mxu0 %v14111_v18  ;;  %v18578_v10 = vld [vmem:[#allocation5 + $0xf34] sm:$0xf]  ;;  %v12899_v13 = vor.u32 %v18322_v2, %v12896_v5 }
 0x4f9   :  { %v18890_v15 = vld [vmem:[#allocation5 + $0x18ec] sm:$0xf0]  ;;  %v13923_v18 = vor.u32 %v18578_v10, %v13920_v8  ;;  %v18546_v39 = vld [vmem:[#allocation5 + $0xe34] sm:$0xf] }
 0x4fa   :  { %v15646_v17 = vld [vmem:[#allocation5 + $0x1cb0] sm:$0xf]  ;;  %v15135_v1 = vor.u32 %v18890_v15, %v15134_v14  ;;  %7623 = vmatpush.bf16.msrb.mxu1 %v14623_v23  ;;  %v13411_v14 = vor.u32 %v18450_v6, %v13408_v7  ;;  %v18178_v15 = vld [vmem:[#allocation5 + $0x2b4] sm:$0xf] }
 0x4fb   :  { %v19018_v35 = vld [vmem:[#allocation5 + $0x1cec] sm:$0xf0]  ;;  %v13344_v23 = vld [vmem:[#allocation5 + $0xaf0] sm:$0xf0] }
 0x4fc   :  { %v14046_v21 = vld [vmem:[#allocation5 + $0x1030] sm:$0xf]  ;;  %v15647_v28 = vor.u32 %v19018_v35, %v15646_v17  ;;  %7636 = vmatpush.bf16.msrb.mxu2 %v15135_v1  ;;  %v12320_v17 = vld [vmem:[#allocation5 + $0x2f0] sm:$0xf0] }
 0x4fd   :  { %v18618_v22 = vld [vmem:[#allocation5 + $0x106c] sm:$0xf0]  ;;  %v18306_v35 = vld [vmem:[#allocation5 + $0x6b4] sm:$0xf] }
 0x4fe   :  { %v14558_v19 = vld [vmem:[#allocation5 + $0x1430] sm:$0xf]  ;;  %v14047_v45 = vor.u32 %v18618_v22, %v14046_v21  ;;  %7649 = vmatpush.bf16.msrb.mxu3 %v15647_v28  ;;  %v12832_v21 = vld [vmem:[#allocation5 + $0x6f0] sm:$0xf0] }
 0x4ff   :  { %v18746_v24 = vld [vmem:[#allocation5 + $0x146c] sm:$0xf0]  ;;  %v18434_v22 = vld [vmem:[#allocation5 + $0xab4] sm:$0xf] }
 0x500   :  { %v15070_v26 = vld [vmem:[#allocation5 + $0x1830] sm:$0xf]  ;;  %v14559_v48 = vor.u32 %v18746_v24, %v14558_v19  ;;  %7611 = vmatpush.bf16.msrb.mxu0 %v14047_v45  ;;  %v18562_v1 = vld [vmem:[#allocation5 + $0xeb4] sm:$0xf]  ;;  %v12323_v24 = vor.u32 %v18178_v15, %v12320_v17  ;;  %v13347_v27 = vor.u32 %v18434_v22, %v13344_v23 }
 0x501   :  { %v18874_v29 = vld [vmem:[#allocation5 + $0x186c] sm:$0xf0]  ;;  %v13856_v19 = vld [vmem:[#allocation5 + $0xef0] sm:$0xf0] }
 0x502   :  { %v15582_v49 = vld [vmem:[#allocation5 + $0x1c30] sm:$0xf]  ;;  %v15071_v51 = vor.u32 %v18874_v29, %v15070_v26  ;;  %7624 = vmatpush.bf16.msrb.mxu1 %v14559_v48  ;;  %v12835_v26 = vor.u32 %v18306_v35, %v12832_v21  ;;  %v18162_v28 = vld [vmem:[#allocation5 + $0x234] sm:$0xf]  ;;  %v13283_v48 = vor.u32 %v18418_v43, %v13280_v44  ;;  %v7444_v21 = vpop.f32.mrf.mxu3 }
 0x503   :  { %v19002_v30 = vld [vmem:[#allocation5 + $0x1c6c] sm:$0xf0]  ;;  %7612 = vmatmul.bf16.vlgmr.msrb.gmra.mxu0 %v19867_v37  ;;  %v12256_v29 = vld [vmem:[#allocation5 + $0x270] sm:$0xf0] }
 0x504   :  { %v15583_v55 = vor.u32 %v19002_v30, %v15582_v49  ;;  %7637 = vmatpush.bf16.msrb.mxu2 %v15071_v51  ;;  %7656 = vmatpush.bf16.msra.mxu0 %v12451_v16  ;;  %v18290_v49 = vld [vmem:[#allocation5 + $0x634] sm:$0xf]  ;;  %v13859_v30 = vor.u32 %v18562_v1, %v13856_v19  ;;  %v12259_v46 = vor.u32 %v18162_v28, %v12256_v29  ;;  %v7418_v16 = vpop.f32.mrf.mxu1 }
 0x505   :  { %7625 = vmatmul.bf16.vlgmr.msrb.gmra.mxu1 %v19871_v40  ;;  %v13792_v45 = vld [vmem:[#allocation5 + $0xe70] sm:$0xf0]  ;;  %v12771_v56 = vor.u32 %v18290_v49, %v12768_v31 }
 0x506   :  { %7650 = vmatpush.bf16.msrb.mxu3 %v15583_v55  ;;  %7669 = vmatpush.bf16.msra.mxu1 %v12963_v59  ;;  %v18146_v51 = vld [vmem:[#allocation5 + $0x1b4] sm:$0xf]  ;;  %v7406_v55 = vadd.f32 %v7405_v58, %v20039_v4  ;;  %v13795_v59 = vor.u32 %v18546_v39, %v13792_v45 }
 0x507   :  { %7638 = vmatmul.bf16.vlgmr.msrb.gmra.mxu2 %v19865_v32  ;;  %v12192_v52 = vld [vmem:[#allocation5 + $0x1f0] sm:$0xf0] }
 0x508   :  { %7682 = vmatpush.bf16.msra.mxu2 %v13475_v60  ;;  %7657 = vmatpush.bf16.msra.mxu0 %v12387_v12  ;;  %v18274_v53 = vld [vmem:[#allocation5 + $0x5b4] sm:$0xf]  ;;  %v7419_v5 = vadd.f32 %v7418_v16, %v7406_v55  ;;  %v12195_v6 = vor.u32 %v18146_v51, %v12192_v52 }
 0x509   :  { %7651 = vmatmul.bf16.vlgmr.msrb.gmra.mxu3 %v19869_v38  ;;  %v12704_v60 = vld [vmem:[#allocation5 + $0x5f0] sm:$0xf0] }
 0x50a   :  { %7695 = vmatpush.bf16.msra.mxu3 %v13987_v3  ;;  %7670 = vmatpush.bf16.msra.mxu1 %v12899_v13  ;;  %v18402_v62 = vld [vmem:[#allocation5 + $0x9b4] sm:$0xf]  ;;  %v12707_v7 = vor.u32 %v18274_v53, %v12704_v60 }
 0x50b   :  { %v13216_v0 = vld [vmem:[#allocation5 + $0x9f0] sm:$0xf0] }
 0x50c   :  { %7683 = vmatpush.bf16.msra.mxu2 %v13411_v14  ;;  %7658 = vmatpush.bf16.msra.mxu0 %v12323_v24  ;;  %v18530_v2 = vld [vmem:[#allocation5 + $0xdb4] sm:$0xf]  ;;  %v13219_v10 = vor.u32 %v18402_v62, %v13216_v0  ;;  %v7431_v14 = vpop.f32.mrf.mxu2  ;;  %v7407_v24 = vpop.f32.mrf.mxu0 }
 0x50d   :  { %v13728_v3 = vld [vmem:[#allocation5 + $0xdf0] sm:$0xf0] }
 0x50e   :  { %7696 = vmatpush.bf16.msra.mxu3 %v13923_v18  ;;  %7671 = vmatpush.bf16.msra.mxu1 %v12835_v26  ;;  %v18130_v8 = vld [vmem:[#allocation5 + $0x134] sm:$0xf]  ;;  %v13731_v4 = vor.u32 %v18530_v2, %v13728_v3  ;;  %v7432_v18 = vadd.f32 %v7431_v14, %v7419_v5  ;;  %v7446_v3 = vpop.f32.mrf.mxu3 }
 0x50f   :  { %v12128_v12 = vld [vmem:[#allocation5 + $0x170] sm:$0xf0] }
 0x510   :  { %7684 = vmatpush.bf16.msra.mxu2 %v13347_v27  ;;  %7659 = vmatpush.bf16.msra.mxu0 %v12259_v46  ;;  %v18258_v13 = vld [vmem:[#allocation5 + $0x534] sm:$0xf]  ;;  %v12131_v1 = vor.u32 %v18130_v8, %v12128_v12  ;;  %v20046_v19 = vadd.f32 %v7444_v21, %v7432_v18 }
 0x511   :  { %v12640_v15 = vld [vmem:[#allocation5 + $0x570] sm:$0xf0] }
 0x512   :  { %7697 = vmatpush.bf16.msra.mxu3 %v13859_v30  ;;  %7672 = vmatpush.bf16.msra.mxu1 %v12771_v56  ;;  %v18386_v17 = vld [vmem:[#allocation5 + $0x934] sm:$0xf]  ;;  %v12643_v26 = vor.u32 %v18258_v13, %v12640_v15  ;;  %v7420_v30 = vpop.f32.mrf.mxu1 }
 0x513   :  { %v13152_v35 = vld [vmem:[#allocation5 + $0x970] sm:$0xf0] }
 0x514   :  { %7685 = vmatpush.bf16.msra.mxu2 %v13283_v48  ;;  %v18514_v22 = vld [vmem:[#allocation5 + $0xd34] sm:$0xf]  ;;  %7660 = vmatpush.bf16.msra.mxu0 %v12195_v6  ;;  %v13155_v27 = vor.u32 %v18386_v17, %v13152_v35 }
 0x515   :  { %v13664_v23 = vld [vmem:[#allocation5 + $0xd70] sm:$0xf0] }
 0x516   :  { %7698 = vmatpush.bf16.msra.mxu3 %v13795_v59  ;;  %7673 = vmatpush.bf16.msra.mxu1 %v12707_v7  ;;  %v18114_v28 = vld [vmem:[#allocation5 + $0xb4] sm:$0xf]  ;;  %v13667_v31 = vor.u32 %v18514_v22, %v13664_v23  ;;  %v7433_v59 = vpop.f32.mrf.mxu2 }
 0x517   :  { %v12064_v29 = vld [vmem:[#allocation5 + $0xf0] sm:$0xf0] }
 0x518   :  { %7686 = vmatpush.bf16.msra.mxu2 %v13219_v10  ;;  %v18242_v49 = vld [vmem:[#allocation5 + $0x4b4] sm:$0xf]  ;;  %7661 = vmatpush.bf16.msra.mxu0 %v12131_v1  ;;  %v12067_v58 = vor.u32 %v18114_v28, %v12064_v29 }
 0x519   :  { %v12576_v43 = vld [vmem:[#allocation5 + $0x4f0] sm:$0xf0] }
 0x51a   :  { %7699 = vmatpush.bf16.msra.mxu3 %v13731_v4  ;;  %v18370_v44 = vld [vmem:[#allocation5 + $0x8b4] sm:$0xf]  ;;  %7674 = vmatpush.bf16.msra.mxu1 %v12643_v26  ;;  %v12579_v51 = vor.u32 %v18242_v49, %v12576_v43 }
 0x51b   :  { %v13088_v39 = vld [vmem:[#allocation5 + $0x8f0] sm:$0xf0] }
 0x51c   :  { %v18498_v45 = vld [vmem:[#allocation5 + $0xcb4] sm:$0xf]  ;;  %7687 = vmatpush.bf16.msra.mxu2 %v13155_v27  ;;  %v13091_v52 = vor.u32 %v18370_v44, %v13088_v39  ;;  %7662 = vmatpush.bf16.msra.mxu0 %v12067_v58 }
 0x51d   :  { %v13600_v46 = vld [vmem:[#allocation5 + $0xcf0] sm:$0xf0] }
 0x51e   :  { %v18098_v56 = vld [vmem:[#allocation5 + $0x34] sm:$0xf]  ;;  %7700 = vmatpush.bf16.msra.mxu3 %v13667_v31  ;;  %v13603_v60 = vor.u32 %v18498_v45, %v13600_v46  ;;  %7675 = vmatpush.bf16.msra.mxu1 %v12579_v51 }
 0x51f   :  { %v12000_v48 = vld [vmem:[#allocation5 + $0x70] sm:$0xf0] }
 0x520   :  { %v18226_v53 = vld [vmem:[#allocation5 + $0x434] sm:$0xf]  ;;  %v12003_v10 = vor.u32 %v18098_v56, %v12000_v48  ;;  %7688 = vmatpush.bf16.msra.mxu2 %v13091_v52 }
 0x521   :  { %v12512_v55 = vld [vmem:[#allocation5 + $0x470] sm:$0xf0] }
 0x522   :  { %v18354_v16 = vld [vmem:[#allocation5 + $0x834] sm:$0xf]  ;;  %v12515_v14 = vor.u32 %v18226_v53, %v12512_v55  ;;  %7701 = vmatpush.bf16.msra.mxu3 %v13603_v60  ;;  %7663 = vmatpush.bf16.msra.mxu0 %v12003_v10 }
 0x523   :  { %v13024_v62 = vld [vmem:[#allocation5 + $0x870] sm:$0xf0] }
 0x524   :  { %v18482_v0 = vld [vmem:[#allocation5 + $0xc34] sm:$0xf]  ;;  %v13027_v4 = vor.u32 %v18354_v16, %v13024_v62  ;;  %7676 = vmatpush.bf16.msra.mxu1 %v12515_v14 }
 0x525   :  { %v13536_v2 = vld [vmem:[#allocation5 + $0xc70] sm:$0xf0]  ;;  %7664 = vmatmul.bf16.vlgmr.msra.gmra.mxu0 %v19855_v34 }
 0x526   :  { %v18722_v5 = vld [vmem:[#allocation5 + $0x13b4] sm:$0xf]  ;;  %v13539_v35 = vor.u32 %v18482_v0, %v13536_v2  ;;  %7689 = vmatpush.bf16.msra.mxu2 %v13027_v4  ;;  %v1163_v2 = vperm.slane %v20036_v9, 3 }
 0x527   :  { %v14496_v6 = vld [vmem:[#allocation5 + $0x13f0] sm:$0xf0]  ;;  %7677 = vmatmul.bf16.vlgmr.msra.gmra.mxu1 %v19859_v42 }
 0x528   :  { %v18850_v7 = vld [vmem:[#allocation5 + $0x17b4] sm:$0xf]  ;;  %v14499_v18 = vor.u32 %v18722_v5, %v14496_v6  ;;  %7702 = vmatpush.bf16.msra.mxu3 %v13539_v35 }
 0x529   :  { %v15008_v8 = vld [vmem:[#allocation5 + $0x17f0] sm:$0xf0]  ;;  %7690 = vmatmul.bf16.vlgmr.msra.gmra.mxu2 %v19853_v33 }
 0x52a   :  { %v18978_v12 = vld [vmem:[#allocation5 + $0x1bb4] sm:$0xf]  ;;  %v15011_v21 = vor.u32 %v18850_v7, %v15008_v8  ;;  %7708 = vmatpush.bf16.msrb.mxu0 %v14499_v18 }
 0x52b   :  { %v15520_v13 = vld [vmem:[#allocation5 + $0x1bf0] sm:$0xf0]  ;;  %7703 = vmatmul.bf16.vlgmr.msra.gmra.mxu3 %v19857_v41 }
 0x52c   :  { %v19106_v15 = vld [vmem:[#allocation5 + $0x1fb4] sm:$0xf]  ;;  %v15523_v22 = vor.u32 %v18978_v12, %v15520_v13  ;;  %7721 = vmatpush.bf16.msrb.mxu1 %v15011_v21  ;;  %v7457_v13 = vpop.f32.mrf.mxu0  ;;  %v7470_v21 = vpop.f32.mrf.mxu1 }
 0x52d   :  { %v16032_v17 = vld [vmem:[#allocation5 + $0x1ff0] sm:$0xf0]  ;;  %v7458_v18 = vadd.f32 %v7457_v13, %v1163_v2 }
 0x52e   :  { %v18706_v23 = vld [vmem:[#allocation5 + $0x1334] sm:$0xf]  ;;  %v16035_v26 = vor.u32 %v19106_v15, %v16032_v17  ;;  %7734 = vmatpush.bf16.msrb.mxu2 %v15523_v22 }
 0x52f   :  { %v14432_v1 = vld [vmem:[#allocation5 + $0x1370] sm:$0xf0] }
 0x530   :  { %v18834_v24 = vld [vmem:[#allocation5 + $0x1734] sm:$0xf]  ;;  %v14435_v31 = vor.u32 %v18706_v23, %v14432_v1  ;;  %7747 = vmatpush.bf16.msrb.mxu3 %v16035_v26 }
 0x531   :  { %v14944_v27 = vld [vmem:[#allocation5 + $0x1770] sm:$0xf0] }
 0x532   :  { %v18962_v28 = vld [vmem:[#allocation5 + $0x1b34] sm:$0xf]  ;;  %v14947_v43 = vor.u32 %v18834_v24, %v14944_v27  ;;  %7709 = vmatpush.bf16.msrb.mxu0 %v14435_v31  ;;  %v7471_v27 = vadd.f32 %v7470_v21, %v7458_v18 }
 0x533   :  { %v15456_v29 = vld [vmem:[#allocation5 + $0x1b70] sm:$0xf0] }
 0x534   :  { %v19090_v49 = vld [vmem:[#allocation5 + $0x1f34] sm:$0xf]  ;;  %v15459_v44 = vor.u32 %v18962_v28, %v15456_v29  ;;  %7722 = vmatpush.bf16.msrb.mxu1 %v14947_v43 }
 0x535   :  { %v15968_v30 = vld [vmem:[#allocation5 + $0x1f70] sm:$0xf0] }
 0x536   :  { %v18690_v39 = vld [vmem:[#allocation5 + $0x12b4] sm:$0xf]  ;;  %v15971_v58 = vor.u32 %v19090_v49, %v15968_v30  ;;  %7735 = vmatpush.bf16.msrb.mxu2 %v15459_v44  ;;  %v7483_v44 = vpop.f32.mrf.mxu2 }
 0x537   :  { %v14368_v45 = vld [vmem:[#allocation5 + $0x12f0] sm:$0xf0] }
 0x538   :  { %v18818_v46 = vld [vmem:[#allocation5 + $0x16b4] sm:$0xf]  ;;  %v14371_v55 = vor.u32 %v18690_v39, %v14368_v45  ;;  %7748 = vmatpush.bf16.msrb.mxu3 %v15971_v58 }
 0x539   :  { %v14880_v56 = vld [vmem:[#allocation5 + $0x16f0] sm:$0xf0] }
 0x53a   :  { %v18946_v48 = vld [vmem:[#allocation5 + $0x1ab4] sm:$0xf]  ;;  %v14883_v59 = vor.u32 %v18818_v46, %v14880_v56  ;;  %7710 = vmatpush.bf16.msrb.mxu0 %v14371_v55  ;;  %v7484_v56 = vadd.f32 %v7483_v44, %v7471_v27  ;;  %v12454_v27 = vld [vmem:[#allocation5 + $0x3b8] sm:$0xf] }
 0x53b   :  { %v15392_v51 = vld [vmem:[#allocation5 + $0x1af0] sm:$0xf0] }
 0x53c   :  { %v19074_v52 = vld [vmem:[#allocation5 + $0x1eb4] sm:$0xf]  ;;  %v15395_v60 = vor.u32 %v18946_v48, %v15392_v51  ;;  %7723 = vmatpush.bf16.msrb.mxu1 %v14883_v59  ;;  %v7496_v48 = vpop.f32.mrf.mxu3 }
 0x53d   :  { %v15904_v53 = vld [vmem:[#allocation5 + $0x1ef0] sm:$0xf0]  ;;  %v20053_v55 = vadd.f32 %v7496_v48, %v7484_v56 }
 0x53e   :  { %v18674_v16 = vld [vmem:[#allocation5 + $0x1234] sm:$0xf]  ;;  %v15907_v3 = vor.u32 %v19074_v52, %v15904_v53  ;;  %7736 = vmatpush.bf16.msrb.mxu2 %v15395_v60 }
 0x53f   :  { %v14304_v62 = vld [vmem:[#allocation5 + $0x1270] sm:$0xf0] }
 0x540   :  { %v18802_v0 = vld [vmem:[#allocation5 + $0x1634] sm:$0xf]  ;;  %v14307_v12 = vor.u32 %v18674_v16, %v14304_v62  ;;  %7749 = vmatpush.bf16.msrb.mxu3 %v15907_v3  ;;  %v7459_v16 = vpop.f32.mrf.mxu0  ;;  %v7472_v3 = vpop.f32.mrf.mxu1 }
 0x541   :  { %v14816_v5 = vld [vmem:[#allocation5 + $0x1670] sm:$0xf0]  ;;  %v12902_v16 = vld [vmem:[#allocation5 + $0x738] sm:$0xf] }
 0x542   :  { %v18930_v6 = vld [vmem:[#allocation5 + $0x1a34] sm:$0xf]  ;;  %v14819_v14 = vor.u32 %v18802_v0, %v14816_v5  ;;  %7711 = vmatpush.bf16.msrb.mxu0 %v14307_v12  ;;  %v18587_v3 = vld [vmem:[#allocation5 + $0xf74] sm:$0xf0] }
 0x543   :  { %v15328_v7 = vld [vmem:[#allocation5 + $0x1a70] sm:$0xf0] }
 0x544   :  { %v19058_v10 = vld [vmem:[#allocation5 + $0x1e34] sm:$0xf]  ;;  %v15331_v4 = vor.u32 %v18930_v6, %v15328_v7  ;;  %7724 = vmatpush.bf16.msrb.mxu1 %v14819_v14 }
 0x545   :  { %v15840_v8 = vld [vmem:[#allocation5 + $0x1e70] sm:$0xf0] }
 0x546   :  { %v18658_v15 = vld [vmem:[#allocation5 + $0x11b4] sm:$0xf]  ;;  %v15843_v9 = vor.u32 %v19058_v10, %v15840_v8  ;;  %7737 = vmatpush.bf16.msrb.mxu2 %v15331_v4 }
 0x547   :  { %v14240_v17 = vld [vmem:[#allocation5 + $0x11f0] sm:$0xf0] }
 0x548   :  { %v18786_v35 = vld [vmem:[#allocation5 + $0x15b4] sm:$0xf]  ;;  %v14243_v28 = vor.u32 %v18658_v15, %v14240_v17  ;;  %7750 = vmatpush.bf16.msrb.mxu3 %v15843_v9  ;;  %v7485_v9 = vpop.f32.mrf.mxu2 }
 0x549   :  { %v14752_v22 = vld [vmem:[#allocation5 + $0x15f0] sm:$0xf0] }
 0x54a   :  { %v18914_v23 = vld [vmem:[#allocation5 + $0x19b4] sm:$0xf]  ;;  %v14755_v29 = vor.u32 %v18786_v35, %v14752_v22  ;;  %7712 = vmatpush.bf16.msrb.mxu0 %v14243_v28  ;;  %v18219_v28 = vld [vmem:[#allocation5 + $0x3f4] sm:$0xf0] }
 0x54b   :  { %v15264_v1 = vld [vmem:[#allocation5 + $0x19f0] sm:$0xf0]  ;;  %v12455_v56 = vor.u32 %v18219_v28, %v12454_v27  ;;  %v13286_v27 = vld [vmem:[#allocation5 + $0xa38] sm:$0xf] }
 0x54c   :  { %v19042_v24 = vld [vmem:[#allocation5 + $0x1db4] sm:$0xf]  ;;  %v15267_v49 = vor.u32 %v18914_v23, %v15264_v1  ;;  %7725 = vmatpush.bf16.msrb.mxu1 %v14755_v29  ;;  %v12966_v29 = vld [vmem:[#allocation5 + $0x7b8] sm:$0xf] }
 0x54d   :  { %v15776_v26 = vld [vmem:[#allocation5 + $0x1df0] sm:$0xf0]  ;;  %v18427_v28 = vld [vmem:[#allocation5 + $0xa74] sm:$0xf0] }
 0x54e   :  { %v18642_v30 = vld [vmem:[#allocation5 + $0x1134] sm:$0xf]  ;;  %v15779_v39 = vor.u32 %v19042_v24, %v15776_v26  ;;  %7738 = vmatpush.bf16.msrb.mxu2 %v15267_v49  ;;  %v7498_v26 = vpop.f32.mrf.mxu3 }
 0x54f   :  { %v14176_v31 = vld [vmem:[#allocation5 + $0x1170] sm:$0xf0]  ;;  %v18299_v26 = vld [vmem:[#allocation5 + $0x674] sm:$0xf0] }
 0x550   :  { %v18770_v43 = vld [vmem:[#allocation5 + $0x1534] sm:$0xf]  ;;  %v14179_v53 = vor.u32 %v18642_v30, %v14176_v31  ;;  %7751 = vmatpush.bf16.msrb.mxu3 %v15779_v39  ;;  %v18347_v30 = vld [vmem:[#allocation5 + $0x7f4] sm:$0xf0] }
 0x551   :  { %v14688_v45 = vld [vmem:[#allocation5 + $0x1570] sm:$0xf0]  ;;  %v13478_v31 = vld [vmem:[#allocation5 + $0xbb8] sm:$0xf]  ;;  %v12967_v48 = vor.u32 %v18347_v30, %v12966_v29 }
 0x552   :  { %v18898_v46 = vld [vmem:[#allocation5 + $0x1934] sm:$0xf]  ;;  %v14691_v59 = vor.u32 %v18770_v43, %v14688_v45  ;;  %7713 = vmatpush.bf16.msrb.mxu0 %v14179_v53  ;;  %v18475_v43 = vld [vmem:[#allocation5 + $0xbf4] sm:$0xf0] }
 0x553   :  { %v15200_v58 = vld [vmem:[#allocation5 + $0x1970] sm:$0xf0]  ;;  %v13990_v45 = vld [vmem:[#allocation5 + $0xfb8] sm:$0xf] }
 0x554   :  { %v19026_v51 = vld [vmem:[#allocation5 + $0x1d34] sm:$0xf]  ;;  %v15203_v60 = vor.u32 %v18898_v46, %v15200_v58  ;;  %7726 = vmatpush.bf16.msrb.mxu1 %v14691_v59  ;;  %v18603_v46 = vld [vmem:[#allocation5 + $0xff4] sm:$0xf0] }
 0x555   :  { %v15712_v52 = vld [vmem:[#allocation5 + $0x1d70] sm:$0xf0]  ;;  %v18203_v53 = vld [vmem:[#allocation5 + $0x374] sm:$0xf0]  ;;  %v13991_v59 = vor.u32 %v18603_v46, %v13990_v45 }
 0x556   :  { %v18626_v62 = vld [vmem:[#allocation5 + $0x10b4] sm:$0xf]  ;;  %v15715_v5 = vor.u32 %v19026_v51, %v15712_v52  ;;  %7739 = vmatpush.bf16.msrb.mxu2 %v15203_v60  ;;  %v13479_v51 = vor.u32 %v18475_v43, %v13478_v31  ;;  %v12390_v52 = vld [vmem:[#allocation5 + $0x338] sm:$0xf]  ;;  %v7509_v31 = vpop.f32.mrf.mxu0 }
 0x557   :  { %v14112_v0 = vld [vmem:[#allocation5 + $0x10f0] sm:$0xf0]  ;;  %v18331_v60 = vld [vmem:[#allocation5 + $0x774] sm:$0xf0] }
 0x558   :  { %v18754_v2 = vld [vmem:[#allocation5 + $0x14b4] sm:$0xf]  ;;  %v14115_v13 = vor.u32 %v18626_v62, %v14112_v0  ;;  %7752 = vmatpush.bf16.msrb.mxu3 %v15715_v5  ;;  %v13414_v62 = vld [vmem:[#allocation5 + $0xb38] sm:$0xf]  ;;  %v12391_v5 = vor.u32 %v18203_v53, %v12390_v52 }
 0x559   :  { %v14624_v6 = vld [vmem:[#allocation5 + $0x14f0] sm:$0xf0]  ;;  %v18459_v0 = vld [vmem:[#allocation5 + $0xb74] sm:$0xf0] }
 0x55a   :  { %v18882_v7 = vld [vmem:[#allocation5 + $0x18b4] sm:$0xf]  ;;  %v14627_v15 = vor.u32 %v18754_v2, %v14624_v6  ;;  %7714 = vmatpush.bf16.msrb.mxu0 %v14115_v13  ;;  %v13926_v2 = vld [vmem:[#allocation5 + $0xf38] sm:$0xf]  ;;  %v12903_v6 = vor.u32 %v18331_v60, %v12902_v16 }
 0x55b   :  { %v15136_v10 = vld [vmem:[#allocation5 + $0x18f0] sm:$0xf0]  ;;  %v13927_v13 = vor.u32 %v18587_v3, %v13926_v2  ;;  %v13798_v29 = vld [vmem:[#allocation5 + $0xe38] sm:$0xf] }
 0x55c   :  { %v19010_v8 = vld [vmem:[#allocation5 + $0x1cb4] sm:$0xf]  ;;  %v15139_v17 = vor.u32 %v18882_v7, %v15136_v10  ;;  %7727 = vmatpush.bf16.msrb.mxu1 %v14627_v15  ;;  %v13415_v7 = vor.u32 %v18459_v0, %v13414_v62  ;;  %v12326_v10 = vld [vmem:[#allocation5 + $0x2b8] sm:$0xf] }
 0x55d   :  { %v15648_v12 = vld [vmem:[#allocation5 + $0x1cf0] sm:$0xf0]  ;;  %v18443_v15 = vld [vmem:[#allocation5 + $0xaf4] sm:$0xf0] }
 0x55e   :  { %v18610_v14 = vld [vmem:[#allocation5 + $0x1034] sm:$0xf]  ;;  %v15651_v22 = vor.u32 %v19010_v8, %v15648_v12  ;;  %7740 = vmatpush.bf16.msrb.mxu2 %v15139_v17  ;;  %v18187_v8 = vld [vmem:[#allocation5 + $0x2f4] sm:$0xf0] }
 0x55f   :  { %v14048_v4 = vld [vmem:[#allocation5 + $0x1070] sm:$0xf0]  ;;  %v12838_v12 = vld [vmem:[#allocation5 + $0x6b8] sm:$0xf] }
 0x560   :  { %v18738_v35 = vld [vmem:[#allocation5 + $0x1434] sm:$0xf]  ;;  %v14051_v49 = vor.u32 %v18610_v14, %v14048_v4  ;;  %7753 = vmatpush.bf16.msrb.mxu3 %v15651_v22  ;;  %v18315_v14 = vld [vmem:[#allocation5 + $0x6f4] sm:$0xf0] }
 0x561   :  { %v14560_v18 = vld [vmem:[#allocation5 + $0x1470] sm:$0xf0]  ;;  %v13350_v4 = vld [vmem:[#allocation5 + $0xab8] sm:$0xf] }
 0x562   :  { %v18866_v21 = vld [vmem:[#allocation5 + $0x1834] sm:$0xf]  ;;  %v14563_v44 = vor.u32 %v18738_v35, %v14560_v18  ;;  %7715 = vmatpush.bf16.msrb.mxu0 %v14051_v49  ;;  %v13862_v17 = vld [vmem:[#allocation5 + $0xeb8] sm:$0xf]  ;;  %v12327_v18 = vor.u32 %v18187_v8, %v12326_v10  ;;  %v13351_v9 = vor.u32 %v18443_v15, %v13350_v4 }
 0x563   :  { %v15072_v23 = vld [vmem:[#allocation5 + $0x1870] sm:$0xf0]  ;;  %v18571_v35 = vld [vmem:[#allocation5 + $0xef4] sm:$0xf0] }
 0x564   :  { %v18994_v1 = vld [vmem:[#allocation5 + $0x1c34] sm:$0xf]  ;;  %v15075_v39 = vor.u32 %v18866_v21, %v15072_v23  ;;  %7728 = vmatpush.bf16.msrb.mxu1 %v14563_v44  ;;  %v12839_v21 = vor.u32 %v18315_v14, %v12838_v12  ;;  %v12262_v22 = vld [vmem:[#allocation5 + $0x238] sm:$0xf]  ;;  %v13287_v44 = vor.u32 %v18427_v28, %v13286_v27  ;;  %v7548_v14 = vpop.f32.mrf.mxu3 }
 0x565   :  { %v15584_v24 = vld [vmem:[#allocation5 + $0x1c70] sm:$0xf0]  ;;  %7716 = vmatmul.bf16.vlgmr.msrb.gmra.mxu0 %v19867_v37  ;;  %v18171_v23 = vld [vmem:[#allocation5 + $0x274] sm:$0xf0] }
 0x566   :  { %v15587_v58 = vor.u32 %v18994_v1, %v15584_v24  ;;  %7741 = vmatpush.bf16.msrb.mxu2 %v15075_v39  ;;  %7760 = vmatpush.bf16.msra.mxu0 %v12455_v56  ;;  %v12774_v1 = vld [vmem:[#allocation5 + $0x638] sm:$0xf]  ;;  %v13863_v24 = vor.u32 %v18571_v35, %v13862_v17  ;;  %v12263_v30 = vor.u32 %v18171_v23, %v12262_v22  ;;  %v7522_v56 = vpop.f32.mrf.mxu1 }
 0x567   :  { %7729 = vmatmul.bf16.vlgmr.msrb.gmra.mxu1 %v19871_v40  ;;  %v18555_v49 = vld [vmem:[#allocation5 + $0xe74] sm:$0xf0]  ;;  %v12775_v43 = vor.u32 %v18299_v26, %v12774_v1 }
 0x568   :  { %7754 = vmatpush.bf16.msrb.mxu3 %v15587_v58  ;;  %7773 = vmatpush.bf16.msra.mxu1 %v12967_v48  ;;  %v12198_v39 = vld [vmem:[#allocation5 + $0x1b8] sm:$0xf]  ;;  %v7510_v58 = vadd.f32 %v7509_v31, %v20053_v55  ;;  %v13799_v48 = vor.u32 %v18555_v49, %v13798_v29 }
 0x569   :  { %7742 = vmatmul.bf16.vlgmr.msrb.gmra.mxu2 %v19865_v32  ;;  %v18155_v45 = vld [vmem:[#allocation5 + $0x1f4] sm:$0xf0] }
 0x56a   :  { %7786 = vmatpush.bf16.msra.mxu2 %v13479_v51  ;;  %7761 = vmatpush.bf16.msra.mxu0 %v12391_v5  ;;  %v12710_v46 = vld [vmem:[#allocation5 + $0x5b8] sm:$0xf]  ;;  %v7523_v60 = vadd.f32 %v7522_v56, %v7510_v58  ;;  %v12199_v62 = vor.u32 %v18155_v45, %v12198_v39 }
 0x56b   :  { %7755 = vmatmul.bf16.vlgmr.msrb.gmra.mxu3 %v19869_v38  ;;  %v18283_v51 = vld [vmem:[#allocation5 + $0x5f4] sm:$0xf0] }
 0x56c   :  { %7799 = vmatpush.bf16.msra.mxu3 %v13991_v59  ;;  %7774 = vmatpush.bf16.msra.mxu1 %v12903_v6  ;;  %v13222_v52 = vld [vmem:[#allocation5 + $0x9b8] sm:$0xf]  ;;  %v12711_v0 = vor.u32 %v18283_v51, %v12710_v46 }
 0x56d   :  { %v18411_v53 = vld [vmem:[#allocation5 + $0x9f4] sm:$0xf0] }
 0x56e   :  { %7787 = vmatpush.bf16.msra.mxu2 %v13415_v7  ;;  %7762 = vmatpush.bf16.msra.mxu0 %v12327_v18  ;;  %v13734_v16 = vld [vmem:[#allocation5 + $0xdb8] sm:$0xf]  ;;  %v13223_v2 = vor.u32 %v18411_v53, %v13222_v52  ;;  %v7535_v7 = vpop.f32.mrf.mxu2  ;;  %v7511_v18 = vpop.f32.mrf.mxu0 }
 0x56f   :  { %v18539_v59 = vld [vmem:[#allocation5 + $0xdf4] sm:$0xf0] }
 0x570   :  { %7800 = vmatpush.bf16.msra.mxu3 %v13927_v13  ;;  %7775 = vmatpush.bf16.msra.mxu1 %v12839_v21  ;;  %v12134_v3 = vld [vmem:[#allocation5 + $0x138] sm:$0xf]  ;;  %v13735_v55 = vor.u32 %v18539_v59, %v13734_v16  ;;  %v7536_v13 = vadd.f32 %v7535_v7, %v7523_v60  ;;  %v7550_v59 = vpop.f32.mrf.mxu3 }
 0x571   :  { %v18139_v5 = vld [vmem:[#allocation5 + $0x174] sm:$0xf0] }
 0x572   :  { %7788 = vmatpush.bf16.msra.mxu2 %v13351_v9  ;;  %7763 = vmatpush.bf16.msra.mxu0 %v12263_v30  ;;  %v12646_v6 = vld [vmem:[#allocation5 + $0x538] sm:$0xf]  ;;  %v12135_v17 = vor.u32 %v18139_v5, %v12134_v3  ;;  %v20060_v35 = vadd.f32 %v7548_v14, %v7536_v13 }
 0x573   :  { %v18267_v10 = vld [vmem:[#allocation5 + $0x574] sm:$0xf0] }
 0x574   :  { %7801 = vmatpush.bf16.msra.mxu3 %v13863_v24  ;;  %7776 = vmatpush.bf16.msra.mxu1 %v12775_v43  ;;  %v13158_v8 = vld [vmem:[#allocation5 + $0x938] sm:$0xf]  ;;  %v12647_v21 = vor.u32 %v18267_v10, %v12646_v6  ;;  %v7524_v24 = vpop.f32.mrf.mxu1 }
 0x575   :  { %v18395_v12 = vld [vmem:[#allocation5 + $0x974] sm:$0xf0] }
 0x576   :  { %7789 = vmatpush.bf16.msra.mxu2 %v13287_v44  ;;  %v13670_v4 = vld [vmem:[#allocation5 + $0xd38] sm:$0xf]  ;;  %7764 = vmatpush.bf16.msra.mxu0 %v12199_v62  ;;  %v13159_v9 = vor.u32 %v18395_v12, %v13158_v8 }
 0x577   :  { %v18523_v15 = vld [vmem:[#allocation5 + $0xd74] sm:$0xf0] }
 0x578   :  { %7802 = vmatpush.bf16.msra.mxu3 %v13799_v48  ;;  %7777 = vmatpush.bf16.msra.mxu1 %v12711_v0  ;;  %v12070_v22 = vld [vmem:[#allocation5 + $0xb8] sm:$0xf]  ;;  %v13671_v26 = vor.u32 %v18523_v15, %v13670_v4  ;;  %v7537_v48 = vpop.f32.mrf.mxu2 }
 0x579   :  { %v18123_v23 = vld [vmem:[#allocation5 + $0xf4] sm:$0xf0] }
 0x57a   :  { %7790 = vmatpush.bf16.msra.mxu2 %v13223_v2  ;;  %v12582_v1 = vld [vmem:[#allocation5 + $0x4b8] sm:$0xf]  ;;  %7765 = vmatpush.bf16.msra.mxu0 %v12135_v17  ;;  %v12071_v31 = vor.u32 %v18123_v23, %v12070_v22 }
 0x57b   :  { %v18251_v27 = vld [vmem:[#allocation5 + $0x4f4] sm:$0xf0] }
 0x57c   :  { %7803 = vmatpush.bf16.msra.mxu3 %v13735_v55  ;;  %v13094_v28 = vld [vmem:[#allocation5 + $0x8b8] sm:$0xf]  ;;  %7778 = vmatpush.bf16.msra.mxu1 %v12647_v21  ;;  %v12583_v39 = vor.u32 %v18251_v27, %v12582_v1 }
 0x57d   :  { %v18379_v29 = vld [vmem:[#allocation5 + $0x8f4] sm:$0xf0] }
 0x57e   :  { %v13606_v49 = vld [vmem:[#allocation5 + $0xcb8] sm:$0xf]  ;;  %7791 = vmatpush.bf16.msra.mxu2 %v13159_v9  ;;  %v13095_v45 = vor.u32 %v18379_v29, %v13094_v28  ;;  %7766 = vmatpush.bf16.msra.mxu0 %v12071_v31 }
 0x57f   :  { %v18507_v30 = vld [vmem:[#allocation5 + $0xcf4] sm:$0xf0] }
 0x580   :  { %v12006_v43 = vld [vmem:[#allocation5 + $0x38] sm:$0xf]  ;;  %7804 = vmatpush.bf16.msra.mxu3 %v13671_v26  ;;  %v13607_v51 = vor.u32 %v18507_v30, %v13606_v49  ;;  %7779 = vmatpush.bf16.msra.mxu1 %v12583_v39 }
 0x581   :  { %v18107_v44 = vld [vmem:[#allocation5 + $0x74] sm:$0xf0] }
 0x582   :  { %v12518_v46 = vld [vmem:[#allocation5 + $0x438] sm:$0xf]  ;;  %v12007_v2 = vor.u32 %v18107_v44, %v12006_v43  ;;  %7792 = vmatpush.bf16.msra.mxu2 %v13095_v45 }
 0x583   :  { %v18235_v58 = vld [vmem:[#allocation5 + $0x474] sm:$0xf0] }
 0x584   :  { %v13030_v56 = vld [vmem:[#allocation5 + $0x838] sm:$0xf]  ;;  %v12519_v7 = vor.u32 %v18235_v58, %v12518_v46  ;;  %7805 = vmatpush.bf16.msra.mxu3 %v13607_v51  ;;  %7767 = vmatpush.bf16.msra.mxu0 %v12007_v2 }
 0x585   :  { %v18363_v52 = vld [vmem:[#allocation5 + $0x874] sm:$0xf0] }
 0x586   :  { %v13542_v53 = vld [vmem:[#allocation5 + $0xc38] sm:$0xf]  ;;  %v13031_v55 = vor.u32 %v18363_v52, %v13030_v56  ;;  %7780 = vmatpush.bf16.msra.mxu1 %v12519_v7  ;;  %v7561_v7 = vpop.f32.mrf.mxu0 }
 0x587   :  { %v18491_v16 = vld [vmem:[#allocation5 + $0xc74] sm:$0xf0]  ;;  %7768 = vmatmul.bf16.vlgmr.msra.gmra.mxu0 %v19855_v34 }
 0x588   :  { %v14502_v60 = vld [vmem:[#allocation5 + $0x13b8] sm:$0xf]  ;;  %v13543_v12 = vor.u32 %v18491_v16, %v13542_v53  ;;  %7793 = vmatpush.bf16.msra.mxu2 %v13031_v55  ;;  %v20066_v16 = vld [vmem:[#allocation7 + $0x8] sm:$0xff] }
 0x589   :  { %v18731_v62 = vld [vmem:[#allocation5 + $0x13f4] sm:$0xf0]  ;;  %7781 = vmatmul.bf16.vlgmr.msra.gmra.mxu1 %v19859_v42  ;;  %v1164_v59 = vperm.slane %v20066_v16, 4 }
 0x58a   :  { %v15014_v0 = vld [vmem:[#allocation5 + $0x17b8] sm:$0xf]  ;;  %v14503_v13 = vor.u32 %v18731_v62, %v14502_v60  ;;  %7806 = vmatpush.bf16.msra.mxu3 %v13543_v12 }
 0x58b   :  { %v18859_v3 = vld [vmem:[#allocation5 + $0x17f4] sm:$0xf0]  ;;  %7794 = vmatmul.bf16.vlgmr.msra.gmra.mxu2 %v19853_v33 }
 0x58c   :  { %v15526_v5 = vld [vmem:[#allocation5 + $0x1bb8] sm:$0xf]  ;;  %v15015_v14 = vor.u32 %v18859_v3, %v15014_v0  ;;  %7812 = vmatpush.bf16.msrb.mxu0 %v14503_v13 }
 0x58d   :  { %v18987_v6 = vld [vmem:[#allocation5 + $0x1bf4] sm:$0xf0]  ;;  %7807 = vmatmul.bf16.vlgmr.msra.gmra.mxu3 %v19857_v41 }
 0x58e   :  { %v16038_v10 = vld [vmem:[#allocation5 + $0x1fb8] sm:$0xf]  ;;  %v15527_v4 = vor.u32 %v18987_v6, %v15526_v5  ;;  %7825 = vmatpush.bf16.msrb.mxu1 %v15015_v14  ;;  %v7562_v14 = vadd.f32 %v7561_v7, %v1164_v59 }
 0x58f   :  { %v19115_v8 = vld [vmem:[#allocation5 + $0x1ff4] sm:$0xf0] }
 0x590   :  { %v14438_v15 = vld [vmem:[#allocation5 + $0x1338] sm:$0xf]  ;;  %v16039_v21 = vor.u32 %v19115_v8, %v16038_v10  ;;  %7838 = vmatpush.bf16.msrb.mxu2 %v15527_v4  ;;  %v7574_v4 = vpop.f32.mrf.mxu1 }
 0x591   :  { %v18715_v17 = vld [vmem:[#allocation5 + $0x1374] sm:$0xf0] }
 0x592   :  { %v14950_v18 = vld [vmem:[#allocation5 + $0x1738] sm:$0xf]  ;;  %v14439_v26 = vor.u32 %v18715_v17, %v14438_v15  ;;  %7851 = vmatpush.bf16.msrb.mxu3 %v16039_v21 }
 0x593   :  { %v18843_v9 = vld [vmem:[#allocation5 + $0x1774] sm:$0xf0] }
 0x594   :  { %v15462_v22 = vld [vmem:[#allocation5 + $0x1b38] sm:$0xf]  ;;  %v14951_v27 = vor.u32 %v18843_v9, %v14950_v18  ;;  %7813 = vmatpush.bf16.msrb.mxu0 %v14439_v26 }
 0x595   :  { %v18971_v23 = vld [vmem:[#allocation5 + $0x1b74] sm:$0xf0] }
 0x596   :  { %v15974_v1 = vld [vmem:[#allocation5 + $0x1f38] sm:$0xf]  ;;  %v15463_v28 = vor.u32 %v18971_v23, %v15462_v22  ;;  %7826 = vmatpush.bf16.msrb.mxu1 %v14951_v27  ;;  %v7575_v23 = vadd.f32 %v7574_v4, %v7562_v14 }
 0x597   :  { %v19099_v24 = vld [vmem:[#allocation5 + $0x1f74] sm:$0xf0] }
 0x598   :  { %v14374_v29 = vld [vmem:[#allocation5 + $0x12b8] sm:$0xf]  ;;  %v15975_v31 = vor.u32 %v19099_v24, %v15974_v1  ;;  %7839 = vmatpush.bf16.msrb.mxu2 %v15463_v28 }
 0x599   :  { %v18699_v49 = vld [vmem:[#allocation5 + $0x12f4] sm:$0xf0] }
 0x59a   :  { %v14886_v30 = vld [vmem:[#allocation5 + $0x16b8] sm:$0xf]  ;;  %v14375_v58 = vor.u32 %v18699_v49, %v14374_v29  ;;  %7852 = vmatpush.bf16.msrb.mxu3 %v15975_v31  ;;  %v7587_v49 = vpop.f32.mrf.mxu2 }
 0x59b   :  { %v18827_v43 = vld [vmem:[#allocation5 + $0x16f4] sm:$0xf0] }
 0x59c   :  { %v15398_v44 = vld [vmem:[#allocation5 + $0x1ab8] sm:$0xf]  ;;  %v14887_v48 = vor.u32 %v18827_v43, %v14886_v30  ;;  %7814 = vmatpush.bf16.msrb.mxu0 %v14375_v58 }
 0x59d   :  { %v18955_v39 = vld [vmem:[#allocation5 + $0x1af4] sm:$0xf0] }
 0x59e   :  { %v15910_v45 = vld [vmem:[#allocation5 + $0x1eb8] sm:$0xf]  ;;  %v15399_v51 = vor.u32 %v18955_v39, %v15398_v44  ;;  %7827 = vmatpush.bf16.msrb.mxu1 %v14887_v48  ;;  %v7588_v39 = vadd.f32 %v7587_v49, %v7575_v23  ;;  %v18467_v49 = vld [vmem:[#allocation5 + $0xbbc] sm:$0xf] }
 0x59f   :  { %v19083_v46 = vld [vmem:[#allocation5 + $0x1ef4] sm:$0xf0] }
 0x5a0   :  { %v14310_v56 = vld [vmem:[#allocation5 + $0x1238] sm:$0xf]  ;;  %v15911_v60 = vor.u32 %v19083_v46, %v15910_v45  ;;  %7840 = vmatpush.bf16.msrb.mxu2 %v15399_v51  ;;  %v7600_v45 = vpop.f32.mrf.mxu3  ;;  %v7563_v51 = vpop.f32.mrf.mxu0 }
 0x5a1   :  { %v18683_v52 = vld [vmem:[#allocation5 + $0x1274] sm:$0xf0]  ;;  %v20069_v48 = vadd.f32 %v7600_v45, %v7588_v39  ;;  %v13992_v39 = vld [vmem:[#allocation5 + $0xff8] sm:$0xf0] }
 0x5a2   :  { %v14822_v53 = vld [vmem:[#allocation5 + $0x1638] sm:$0xf]  ;;  %v14311_v6 = vor.u32 %v18683_v52, %v14310_v56  ;;  %7853 = vmatpush.bf16.msrb.mxu3 %v15911_v60  ;;  %v18195_v51 = vld [vmem:[#allocation5 + $0x33c] sm:$0xf] }
 0x5a3   :  { %v18811_v62 = vld [vmem:[#allocation5 + $0x1674] sm:$0xf0] }
 0x5a4   :  { %v15334_v0 = vld [vmem:[#allocation5 + $0x1a38] sm:$0xf]  ;;  %v14823_v55 = vor.u32 %v18811_v62, %v14822_v53  ;;  %7815 = vmatpush.bf16.msrb.mxu0 %v14311_v6 }
 0x5a5   :  { %v18939_v2 = vld [vmem:[#allocation5 + $0x1a74] sm:$0xf0] }
 0x5a6   :  { %v15846_v3 = vld [vmem:[#allocation5 + $0x1e38] sm:$0xf]  ;;  %v15335_v10 = vor.u32 %v18939_v2, %v15334_v0  ;;  %7828 = vmatpush.bf16.msrb.mxu1 %v14823_v55  ;;  %v7576_v0 = vpop.f32.mrf.mxu1 }
 0x5a7   :  { %v19067_v5 = vld [vmem:[#allocation5 + $0x1e74] sm:$0xf0]  ;;  %v13416_v0 = vld [vmem:[#allocation5 + $0xb78] sm:$0xf0] }
 0x5a8   :  { %v14246_v8 = vld [vmem:[#allocation5 + $0x11b8] sm:$0xf]  ;;  %v15847_v15 = vor.u32 %v19067_v5, %v15846_v3  ;;  %7841 = vmatpush.bf16.msrb.mxu2 %v15335_v10 }
 0x5a9   :  { %v18667_v12 = vld [vmem:[#allocation5 + $0x11f4] sm:$0xf0] }
 0x5aa   :  { %v14758_v13 = vld [vmem:[#allocation5 + $0x15b8] sm:$0xf]  ;;  %v14247_v1 = vor.u32 %v18667_v12, %v14246_v8  ;;  %7854 = vmatpush.bf16.msrb.mxu3 %v15847_v15 }
 0x5ab   :  { %v18795_v17 = vld [vmem:[#allocation5 + $0x15f4] sm:$0xf0] }
 0x5ac   :  { %v15270_v18 = vld [vmem:[#allocation5 + $0x19b8] sm:$0xf]  ;;  %v14759_v24 = vor.u32 %v18795_v17, %v14758_v13  ;;  %7816 = vmatpush.bf16.msrb.mxu0 %v14247_v1  ;;  %v7602_v1 = vpop.f32.mrf.mxu3 }
 0x5ad   :  { %v18923_v21 = vld [vmem:[#allocation5 + $0x19f4] sm:$0xf0]  ;;  %v18291_v1 = vld [vmem:[#allocation5 + $0x63c] sm:$0xf] }
 0x5ae   :  { %v15782_v9 = vld [vmem:[#allocation5 + $0x1db8] sm:$0xf]  ;;  %v15271_v26 = vor.u32 %v18923_v21, %v15270_v18  ;;  %7829 = vmatpush.bf16.msrb.mxu1 %v14759_v24  ;;  %v7589_v18 = vpop.f32.mrf.mxu2  ;;  %v18211_v24 = vld [vmem:[#allocation5 + $0x3bc] sm:$0xf] }
 0x5af   :  { %v19051_v22 = vld [vmem:[#allocation5 + $0x1df4] sm:$0xf0] }
 0x5b0   :  { %v14182_v27 = vld [vmem:[#allocation5 + $0x1138] sm:$0xf]  ;;  %v15783_v30 = vor.u32 %v19051_v22, %v15782_v9  ;;  %7842 = vmatpush.bf16.msrb.mxu2 %v15271_v26  ;;  %v12456_v26 = vld [vmem:[#allocation5 + $0x3f8] sm:$0xf0] }
 0x5b1   :  { %v18651_v28 = vld [vmem:[#allocation5 + $0x1174] sm:$0xf0] }
 0x5b2   :  { %v14694_v29 = vld [vmem:[#allocation5 + $0x1538] sm:$0xf]  ;;  %v14183_v56 = vor.u32 %v18651_v28, %v14182_v27  ;;  %7855 = vmatpush.bf16.msrb.mxu3 %v15783_v30  ;;  %v18339_v27 = vld [vmem:[#allocation5 + $0x7bc] sm:$0xf] }
 0x5b3   :  { %v18779_v31 = vld [vmem:[#allocation5 + $0x1574] sm:$0xf0]  ;;  %v13480_v30 = vld [vmem:[#allocation5 + $0xbf8] sm:$0xf0] }
 0x5b4   :  { %v15206_v43 = vld [vmem:[#allocation5 + $0x1938] sm:$0xf]  ;;  %v14695_v52 = vor.u32 %v18779_v31, %v14694_v29  ;;  %7817 = vmatpush.bf16.msrb.mxu0 %v14183_v56  ;;  %v12968_v29 = vld [vmem:[#allocation5 + $0x7f8] sm:$0xf0]  ;;  %v13483_v56 = vor.u32 %v18467_v49, %v13480_v30 }
 0x5b5   :  { %v18907_v44 = vld [vmem:[#allocation5 + $0x1974] sm:$0xf0]  ;;  %v13800_v49 = vld [vmem:[#allocation5 + $0xe78] sm:$0xf0] }
 0x5b6   :  { %v15718_v46 = vld [vmem:[#allocation5 + $0x1d38] sm:$0xf]  ;;  %v15207_v53 = vor.u32 %v18907_v44, %v15206_v43  ;;  %7830 = vmatpush.bf16.msrb.mxu1 %v14695_v52  ;;  %v18595_v44 = vld [vmem:[#allocation5 + $0xfbc] sm:$0xf] }
 0x5b7   :  { %v19035_v58 = vld [vmem:[#allocation5 + $0x1d74] sm:$0xf0]  ;;  %v12392_v52 = vld [vmem:[#allocation5 + $0x378] sm:$0xf0] }
 0x5b8   :  { %v14118_v59 = vld [vmem:[#allocation5 + $0x10b8] sm:$0xf]  ;;  %v15719_v2 = vor.u32 %v19035_v58, %v15718_v46  ;;  %7843 = vmatpush.bf16.msrb.mxu2 %v15207_v53  ;;  %v12459_v46 = vor.u32 %v18211_v24, %v12456_v26  ;;  %v12971_v58 = vor.u32 %v18339_v27, %v12968_v29  ;;  %v18323_v53 = vld [vmem:[#allocation5 + $0x73c] sm:$0xf] }
 0x5b9   :  { %v18635_v60 = vld [vmem:[#allocation5 + $0x10f4] sm:$0xf0]  ;;  %v12776_v26 = vld [vmem:[#allocation5 + $0x678] sm:$0xf0] }
 0x5ba   :  { %v14630_v62 = vld [vmem:[#allocation5 + $0x14b8] sm:$0xf]  ;;  %v14119_v10 = vor.u32 %v18635_v60, %v14118_v59  ;;  %7856 = vmatpush.bf16.msrb.mxu3 %v15719_v2  ;;  %v13995_v59 = vor.u32 %v18595_v44, %v13992_v39  ;;  %v12904_v60 = vld [vmem:[#allocation5 + $0x778] sm:$0xf0] }
 0x5bb   :  { %v18763_v3 = vld [vmem:[#allocation5 + $0x14f4] sm:$0xf0]  ;;  %v18579_v2 = vld [vmem:[#allocation5 + $0xf3c] sm:$0xf] }
 0x5bc   :  { %v15142_v5 = vld [vmem:[#allocation5 + $0x18b8] sm:$0xf]  ;;  %v14631_v13 = vor.u32 %v18763_v3, %v14630_v62  ;;  %7818 = vmatpush.bf16.msrb.mxu0 %v14119_v10  ;;  %v18451_v62 = vld [vmem:[#allocation5 + $0xb3c] sm:$0xf] }
 0x5bd   :  { %v18891_v6 = vld [vmem:[#allocation5 + $0x18f4] sm:$0xf0]  ;;  %v13928_v3 = vld [vmem:[#allocation5 + $0xf78] sm:$0xf0] }
 0x5be   :  { %v15654_v7 = vld [vmem:[#allocation5 + $0x1cb8] sm:$0xf]  ;;  %v15143_v14 = vor.u32 %v18891_v6, %v15142_v5  ;;  %7831 = vmatpush.bf16.msrb.mxu1 %v14631_v13  ;;  %v12395_v5 = vor.u32 %v18195_v51, %v12392_v52  ;;  %v12907_v6 = vor.u32 %v18323_v53, %v12904_v60  ;;  %v12328_v10 = vld [vmem:[#allocation5 + $0x2f8] sm:$0xf0] }
 0x5bf   :  { %v19019_v55 = vld [vmem:[#allocation5 + $0x1cf4] sm:$0xf0]  ;;  %v12840_v13 = vld [vmem:[#allocation5 + $0x6f8] sm:$0xf0] }
 0x5c0   :  { %v14054_v8 = vld [vmem:[#allocation5 + $0x1038] sm:$0xf]  ;;  %v15655_v21 = vor.u32 %v19019_v55, %v15654_v7  ;;  %7844 = vmatpush.bf16.msrb.mxu2 %v15143_v14  ;;  %v13419_v7 = vor.u32 %v18451_v62, %v13416_v0  ;;  %v18179_v55 = vld [vmem:[#allocation5 + $0x2bc] sm:$0xf] }
 0x5c1   :  { %v18619_v12 = vld [vmem:[#allocation5 + $0x1074] sm:$0xf0]  ;;  %v18435_v14 = vld [vmem:[#allocation5 + $0xabc] sm:$0xf]  ;;  %v12331_v18 = vor.u32 %v18179_v55, %v12328_v10  ;;  %v7639_v10 = vpop.f32.mrf.mxu2 }
 0x5c2   :  { %v14566_v4 = vld [vmem:[#allocation5 + $0x1438] sm:$0xf]  ;;  %v14055_v28 = vor.u32 %v18619_v12, %v14054_v8  ;;  %7857 = vmatpush.bf16.msrb.mxu3 %v15655_v21  ;;  %v18307_v8 = vld [vmem:[#allocation5 + $0x6bc] sm:$0xf]  ;;  %v13931_v12 = vor.u32 %v18579_v2, %v13928_v3 }
 0x5c3   :  { %v18747_v15 = vld [vmem:[#allocation5 + $0x1474] sm:$0xf0]  ;;  %v12843_v21 = vor.u32 %v18307_v8, %v12840_v13  ;;  %v18419_v27 = vld [vmem:[#allocation5 + $0xa3c] sm:$0xf] }
 0x5c4   :  { %v15078_v17 = vld [vmem:[#allocation5 + $0x1838] sm:$0xf]  ;;  %v14567_v31 = vor.u32 %v18747_v15, %v14566_v4  ;;  %7819 = vmatpush.bf16.msrb.mxu0 %v14055_v28  ;;  %v13352_v4 = vld [vmem:[#allocation5 + $0xaf8] sm:$0xf0] }
 0x5c5   :  { %v18875_v9 = vld [vmem:[#allocation5 + $0x1874] sm:$0xf0]  ;;  %v18563_v15 = vld [vmem:[#allocation5 + $0xebc] sm:$0xf] }
 0x5c6   :  { %v15590_v22 = vld [vmem:[#allocation5 + $0x1c38] sm:$0xf]  ;;  %v15079_v43 = vor.u32 %v18875_v9, %v15078_v17  ;;  %7832 = vmatpush.bf16.msrb.mxu1 %v14567_v31  ;;  %v13864_v17 = vld [vmem:[#allocation5 + $0xef8] sm:$0xf0]  ;;  %v13355_v9 = vor.u32 %v18435_v14, %v13352_v4  ;;  %v7613_v31 = vpop.f32.mrf.mxu0  ;;  %v7652_v4 = vpop.f32.mrf.mxu3 }
 0x5c7   :  { %v19003_v23 = vld [vmem:[#allocation5 + $0x1c74] sm:$0xf0]  ;;  %7820 = vmatmul.bf16.vlgmr.msrb.gmra.mxu0 %v19867_v37  ;;  %v13867_v24 = vor.u32 %v18563_v15, %v13864_v17  ;;  %v13288_v28 = vld [vmem:[#allocation5 + $0xa78] sm:$0xf0] }
 0x5c8   :  { %v15591_v45 = vor.u32 %v19003_v23, %v15590_v22  ;;  %7845 = vmatpush.bf16.msrb.mxu2 %v15079_v43  ;;  %7864 = vmatpush.bf16.msra.mxu0 %v12459_v46  ;;  %v18163_v22 = vld [vmem:[#allocation5 + $0x23c] sm:$0xf]  ;;  %v12779_v43 = vor.u32 %v18291_v1, %v12776_v26  ;;  %v13291_v44 = vor.u32 %v18419_v27, %v13288_v28 }
 0x5c9   :  { %7833 = vmatmul.bf16.vlgmr.msrb.gmra.mxu1 %v19871_v40  ;;  %v12264_v23 = vld [vmem:[#allocation5 + $0x278] sm:$0xf0] }
 0x5ca   :  { %7858 = vmatpush.bf16.msrb.mxu3 %v15591_v45  ;;  %7877 = vmatpush.bf16.msra.mxu1 %v12971_v58  ;;  %v18547_v29 = vld [vmem:[#allocation5 + $0xe3c] sm:$0xf]  ;;  %v12267_v30 = vor.u32 %v18163_v22, %v12264_v23  ;;  %v7614_v58 = vadd.f32 %v7613_v31, %v20069_v48 }
 0x5cb   :  { %7846 = vmatmul.bf16.vlgmr.msrb.gmra.mxu2 %v19865_v32  ;;  %v18147_v39 = vld [vmem:[#allocation5 + $0x1bc] sm:$0xf]  ;;  %v13803_v51 = vor.u32 %v18547_v29, %v13800_v49 }
 0x5cc   :  { %7890 = vmatpush.bf16.msra.mxu2 %v13483_v56  ;;  %7865 = vmatpush.bf16.msra.mxu0 %v12395_v5  ;;  %v12200_v45 = vld [vmem:[#allocation5 + $0x1f8] sm:$0xf0]  ;;  %v7626_v56 = vpop.f32.mrf.mxu1 }
 0x5cd   :  { %7859 = vmatmul.bf16.vlgmr.msrb.gmra.mxu3 %v19869_v38  ;;  %v18275_v46 = vld [vmem:[#allocation5 + $0x5bc] sm:$0xf]  ;;  %v7627_v0 = vadd.f32 %v7626_v56, %v7614_v58  ;;  %v12203_v2 = vor.u32 %v18147_v39, %v12200_v45 }
 0x5ce   :  { %7903 = vmatpush.bf16.msra.mxu3 %v13995_v59  ;;  %7878 = vmatpush.bf16.msra.mxu1 %v12907_v6  ;;  %v12712_v52 = vld [vmem:[#allocation5 + $0x5f8] sm:$0xf0] }
 0x5cf   :  { %v18403_v53 = vld [vmem:[#allocation5 + $0x9bc] sm:$0xf]  ;;  %v12715_v3 = vor.u32 %v18275_v46, %v12712_v52  ;;  %v7640_v14 = vadd.f32 %v7639_v10, %v7627_v0 }
 0x5d0   :  { %7891 = vmatpush.bf16.msra.mxu2 %v13419_v7  ;;  %7866 = vmatpush.bf16.msra.mxu0 %v12331_v18  ;;  %v13224_v59 = vld [vmem:[#allocation5 + $0x9f8] sm:$0xf0] }
 0x5d1   :  { %v18531_v60 = vld [vmem:[#allocation5 + $0xdbc] sm:$0xf]  ;;  %v13227_v5 = vor.u32 %v18403_v53, %v13224_v59  ;;  %v7641_v53 = vpop.f32.mrf.mxu2 }
 0x5d2   :  { %7904 = vmatpush.bf16.msra.mxu3 %v13931_v12  ;;  %7879 = vmatpush.bf16.msra.mxu1 %v12843_v21  ;;  %v13736_v62 = vld [vmem:[#allocation5 + $0xdf8] sm:$0xf0]  ;;  %v20076_v21 = vadd.f32 %v7652_v4, %v7640_v14 }
 0x5d3   :  { %v18131_v6 = vld [vmem:[#allocation5 + $0x13c] sm:$0xf]  ;;  %v13739_v48 = vor.u32 %v18531_v60, %v13736_v62 }
 0x5d4   :  { %7892 = vmatpush.bf16.msra.mxu2 %v13355_v9  ;;  %7867 = vmatpush.bf16.msra.mxu0 %v12267_v30  ;;  %v12136_v7 = vld [vmem:[#allocation5 + $0x178] sm:$0xf0]  ;;  %v7615_v9 = vpop.f32.mrf.mxu0  ;;  %v7628_v27 = vpop.f32.mrf.mxu1 }
 0x5d5   :  { %v18259_v55 = vld [vmem:[#allocation5 + $0x53c] sm:$0xf]  ;;  %v12139_v18 = vor.u32 %v18131_v6, %v12136_v7 }
 0x5d6   :  { %7905 = vmatpush.bf16.msra.mxu3 %v13867_v24  ;;  %7880 = vmatpush.bf16.msra.mxu1 %v12779_v43  ;;  %v12648_v8 = vld [vmem:[#allocation5 + $0x578] sm:$0xf0] }
 0x5d7   :  { %v18387_v12 = vld [vmem:[#allocation5 + $0x93c] sm:$0xf]  ;;  %v12651_v22 = vor.u32 %v18259_v55, %v12648_v8 }
 0x5d8   :  { %7893 = vmatpush.bf16.msra.mxu2 %v13291_v44  ;;  %v13160_v13 = vld [vmem:[#allocation5 + $0x978] sm:$0xf0]  ;;  %7868 = vmatpush.bf16.msra.mxu0 %v12203_v2  ;;  %v7654_v2 = vpop.f32.mrf.mxu3 }
 0x5d9   :  { %v18515_v15 = vld [vmem:[#allocation5 + $0xd3c] sm:$0xf]  ;;  %v13163_v23 = vor.u32 %v18387_v12, %v13160_v13 }
 0x5da   :  { %7906 = vmatpush.bf16.msra.mxu3 %v13803_v51  ;;  %v13672_v17 = vld [vmem:[#allocation5 + $0xd78] sm:$0xf0]  ;;  %7881 = vmatpush.bf16.msra.mxu1 %v12715_v3 }
 0x5db   :  { %v18115_v1 = vld [vmem:[#allocation5 + $0xbc] sm:$0xf]  ;;  %v13675_v28 = vor.u32 %v18515_v15, %v13672_v17 }
 0x5dc   :  { %7894 = vmatpush.bf16.msra.mxu2 %v13227_v5  ;;  %v12072_v24 = vld [vmem:[#allocation5 + $0xf8] sm:$0xf0]  ;;  %7869 = vmatpush.bf16.msra.mxu0 %v12139_v18 }
 0x5dd   :  { %v18243_v26 = vld [vmem:[#allocation5 + $0x4bc] sm:$0xf]  ;;  %v12075_v44 = vor.u32 %v18115_v1, %v12072_v24 }
 0x5de   :  { %7907 = vmatpush.bf16.msra.mxu3 %v13739_v48  ;;  %v12584_v29 = vld [vmem:[#allocation5 + $0x4f8] sm:$0xf0]  ;;  %7882 = vmatpush.bf16.msra.mxu1 %v12651_v22 }
 0x5df   :  { %v18371_v49 = vld [vmem:[#allocation5 + $0x8bc] sm:$0xf]  ;;  %v12587_v46 = vor.u32 %v18243_v26, %v12584_v29 }
 0x5e0   :  { %v13096_v30 = vld [vmem:[#allocation5 + $0x8f8] sm:$0xf0]  ;;  %7895 = vmatpush.bf16.msra.mxu2 %v13163_v23  ;;  %7870 = vmatpush.bf16.msra.mxu0 %v12075_v44 }
 0x5e1   :  { %v18499_v31 = vld [vmem:[#allocation5 + $0xcbc] sm:$0xf]  ;;  %v13099_v58 = vor.u32 %v18371_v49, %v13096_v30 }
 0x5e2   :  { %v13608_v43 = vld [vmem:[#allocation5 + $0xcf8] sm:$0xf0]  ;;  %7908 = vmatpush.bf16.msra.mxu3 %v13675_v28  ;;  %7883 = vmatpush.bf16.msra.mxu1 %v12587_v46 }
 0x5e3   :  { %v18099_v39 = vld [vmem:[#allocation5 + $0x3c] sm:$0xf]  ;;  %v13611_v59 = vor.u32 %v18499_v31, %v13608_v43 }
 0x5e4   :  { %v12008_v45 = vld [vmem:[#allocation5 + $0x78] sm:$0xf0]  ;;  %7896 = vmatpush.bf16.msra.mxu2 %v13099_v58 }
 0x5e5   :  { %v18227_v56 = vld [vmem:[#allocation5 + $0x43c] sm:$0xf]  ;;  %v12011_v7 = vor.u32 %v18099_v39, %v12008_v45 }
 0x5e6   :  { %v12520_v51 = vld [vmem:[#allocation5 + $0x478] sm:$0xf0]  ;;  %7909 = vmatpush.bf16.msra.mxu3 %v13611_v59 }
 0x5e7   :  { %v18355_v52 = vld [vmem:[#allocation5 + $0x83c] sm:$0xf]  ;;  %v12523_v8 = vor.u32 %v18227_v56, %v12520_v51  ;;  %7871 = vmatpush.bf16.msra.mxu0 %v12011_v7 }
 0x5e8   :  { %v13032_v60 = vld [vmem:[#allocation5 + $0x878] sm:$0xf0] }
 0x5e9   :  { %v18483_v62 = vld [vmem:[#allocation5 + $0xc3c] sm:$0xf]  ;;  %v13035_v12 = vor.u32 %v18355_v52, %v13032_v60  ;;  %7884 = vmatpush.bf16.msra.mxu1 %v12523_v8 }
 0x5ea   :  { %v13544_v0 = vld [vmem:[#allocation5 + $0xc78] sm:$0xf0]  ;;  %7872 = vmatmul.bf16.vlgmr.msra.gmra.mxu0 %v19855_v34 }
 0x5eb   :  { %v18723_v3 = vld [vmem:[#allocation5 + $0x13bc] sm:$0xf]  ;;  %v13547_v4 = vor.u32 %v18483_v62, %v13544_v0  ;;  %7897 = vmatpush.bf16.msra.mxu2 %v13035_v12 }
 0x5ec   :  { %v14504_v5 = vld [vmem:[#allocation5 + $0x13f8] sm:$0xf0]  ;;  %7885 = vmatmul.bf16.vlgmr.msra.gmra.mxu1 %v19859_v42 }
 0x5ed   :  { %v18851_v6 = vld [vmem:[#allocation5 + $0x17bc] sm:$0xf]  ;;  %v14507_v15 = vor.u32 %v18723_v3, %v14504_v5  ;;  %7910 = vmatpush.bf16.msra.mxu3 %v13547_v4  ;;  %v1165_v3 = vperm.slane %v20066_v16, 5  ;;  %v7678_v4 = vpop.f32.mrf.mxu1 }
 0x5ee   :  { %v15016_v55 = vld [vmem:[#allocation5 + $0x17f8] sm:$0xf0]  ;;  %7898 = vmatmul.bf16.vlgmr.msra.gmra.mxu2 %v19853_v33 }
 0x5ef   :  { %v18979_v10 = vld [vmem:[#allocation5 + $0x1bbc] sm:$0xf]  ;;  %v15019_v17 = vor.u32 %v18851_v6, %v15016_v55  ;;  %7916 = vmatpush.bf16.msrb.mxu0 %v14507_v15 }
 0x5f0   :  { %v15528_v48 = vld [vmem:[#allocation5 + $0x1bf8] sm:$0xf0]  ;;  %7911 = vmatmul.bf16.vlgmr.msra.gmra.mxu3 %v19857_v41 }
 0x5f1   :  { %v19107_v13 = vld [vmem:[#allocation5 + $0x1fbc] sm:$0xf]  ;;  %v15531_v18 = vor.u32 %v18979_v10, %v15528_v48  ;;  %7929 = vmatpush.bf16.msrb.mxu1 %v15019_v17  ;;  %v7665_v10 = vpop.f32.mrf.mxu0 }
 0x5f2   :  { %v16040_v14 = vld [vmem:[#allocation5 + $0x1ff8] sm:$0xf0] }
 0x5f3   :  { %v18707_v9 = vld [vmem:[#allocation5 + $0x133c] sm:$0xf]  ;;  %v16043_v1 = vor.u32 %v19107_v13, %v16040_v14  ;;  %7942 = vmatpush.bf16.msrb.mxu2 %v15531_v18  ;;  %v7666_v14 = vadd.f32 %v7665_v10, %v1165_v3 }
 0x5f4   :  { %v14440_v22 = vld [vmem:[#allocation5 + $0x1378] sm:$0xf0] }
 0x5f5   :  { %v18835_v23 = vld [vmem:[#allocation5 + $0x173c] sm:$0xf]  ;;  %v14443_v49 = vor.u32 %v18707_v9, %v14440_v22  ;;  %7955 = vmatpush.bf16.msrb.mxu3 %v16043_v1 }
 0x5f6   :  { %v14952_v24 = vld [vmem:[#allocation5 + $0x1778] sm:$0xf0] }
 0x5f7   :  { %v18963_v26 = vld [vmem:[#allocation5 + $0x1b3c] sm:$0xf]  ;;  %v14955_v30 = vor.u32 %v18835_v23, %v14952_v24  ;;  %7917 = vmatpush.bf16.msrb.mxu0 %v14443_v49  ;;  %v7679_v23 = vadd.f32 %v7678_v4, %v7666_v14  ;;  %v7691_v49 = vpop.f32.mrf.mxu2 }
 0x5f8   :  { %v15464_v27 = vld [vmem:[#allocation5 + $0x1b78] sm:$0xf0] }
 0x5f9   :  { %v19091_v28 = vld [vmem:[#allocation5 + $0x1f3c] sm:$0xf]  ;;  %v15467_v31 = vor.u32 %v18963_v26, %v15464_v27  ;;  %7930 = vmatpush.bf16.msrb.mxu1 %v14955_v30 }
 0x5fa   :  { %v15976_v29 = vld [vmem:[#allocation5 + $0x1f78] sm:$0xf0] }
 0x5fb   :  { %v18691_v43 = vld [vmem:[#allocation5 + $0x12bc] sm:$0xf]  ;;  %v15979_v45 = vor.u32 %v19091_v28, %v15976_v29  ;;  %7943 = vmatpush.bf16.msrb.mxu2 %v15467_v31 }
 0x5fc   :  { %v14376_v44 = vld [vmem:[#allocation5 + $0x12f8] sm:$0xf0] }
 0x5fd   :  { %v18819_v39 = vld [vmem:[#allocation5 + $0x16bc] sm:$0xf]  ;;  %v14379_v53 = vor.u32 %v18691_v43, %v14376_v44  ;;  %7956 = vmatpush.bf16.msrb.mxu3 %v15979_v45  ;;  %v7704_v45 = vpop.f32.mrf.mxu3 }
 0x5fe   :  { %v14888_v46 = vld [vmem:[#allocation5 + $0x16f8] sm:$0xf0] }
 0x5ff   :  { %v18947_v58 = vld [vmem:[#allocation5 + $0x1abc] sm:$0xf]  ;;  %v14891_v60 = vor.u32 %v18819_v39, %v14888_v46  ;;  %7918 = vmatpush.bf16.msrb.mxu0 %v14379_v53  ;;  %v7692_v39 = vadd.f32 %v7691_v49, %v7679_v23  ;;  %v7693_v14 = vpop.f32.mrf.mxu2  ;;  %v16286_v23 = vld [vmem:[#allocation8 + $0x1e0] sm:$0xf] }
 0x600   :  { %v15400_v56 = vld [vmem:[#allocation5 + $0x1af8] sm:$0xf0]  ;;  %v16542_v49 = vld [vmem:[#allocation8 + $0x3e0] sm:$0xf] }
 0x601   :  { %v19075_v51 = vld [vmem:[#allocation5 + $0x1ebc] sm:$0xf]  ;;  %v15403_v62 = vor.u32 %v18947_v58, %v15400_v56  ;;  %7931 = vmatpush.bf16.msrb.mxu1 %v14891_v60  ;;  %v16238_v14 = vld [vmem:[#allocation8 + $0x180] sm:$0xf] }
 0x602   :  { %v15912_v52 = vld [vmem:[#allocation5 + $0x1ef8] sm:$0xf0] }
 0x603   :  { %v18675_v59 = vld [vmem:[#allocation5 + $0x123c] sm:$0xf]  ;;  %v15915_v33 = vor.u32 %v19075_v51, %v15912_v52  ;;  %7944 = vmatpush.bf16.msrb.mxu2 %v15403_v62  ;;  %v20083_v51 = vadd.f32 %v7704_v45, %v7692_v39  ;;  %v7667_v52 = vpop.f32.mrf.mxu0  ;;  %v16142_v45 = vld [vmem:[#allocation8 + $0xc0] sm:$0xf] }
 0x604   :  { %v14312_v0 = vld [vmem:[#allocation5 + $0x1278] sm:$0xf0]  ;;  %v19174_v52 = vld [vmem:[#allocation8 + $0x1cc] sm:$0xf0] }
 0x605   :  { %v18803_v2 = vld [vmem:[#allocation5 + $0x163c] sm:$0xf]  ;;  %v14315_v55 = vor.u32 %v18675_v59, %v14312_v0  ;;  %7957 = vmatpush.bf16.msrb.mxu3 %v15915_v33 }
 0x606   :  { %v14824_v5 = vld [vmem:[#allocation5 + $0x1678] sm:$0xf0] }
 0x607   :  { %v18931_v6 = vld [vmem:[#allocation5 + $0x1a3c] sm:$0xf]  ;;  %v14827_v42 = vor.u32 %v18803_v2, %v14824_v5  ;;  %7919 = vmatpush.bf16.msrb.mxu0 %v14315_v55  ;;  %v7680_v2 = vpop.f32.mrf.mxu1 }
 0x608   :  { %v15336_v34 = vld [vmem:[#allocation5 + $0x1a78] sm:$0xf0] }
 0x609   :  { %v19059_v7 = vld [vmem:[#allocation5 + $0x1e3c] sm:$0xf]  ;;  %v15339_v48 = vor.u32 %v18931_v6, %v15336_v34  ;;  %7932 = vmatpush.bf16.msrb.mxu1 %v14827_v42 }
 0x60a   :  { %v15848_v41 = vld [vmem:[#allocation5 + $0x1e78] sm:$0xf0] }
 0x60b   :  { %v18659_v8 = vld [vmem:[#allocation5 + $0x11bc] sm:$0xf]  ;;  %v15851_v16 = vor.u32 %v19059_v7, %v15848_v41  ;;  %7945 = vmatpush.bf16.msrb.mxu2 %v15339_v48 }
 0x60c   :  { %v14248_v12 = vld [vmem:[#allocation5 + $0x11f8] sm:$0xf0] }
 0x60d   :  { %v18787_v13 = vld [vmem:[#allocation5 + $0x15bc] sm:$0xf]  ;;  %v14251_v1 = vor.u32 %v18659_v8, %v14248_v12  ;;  %7958 = vmatpush.bf16.msrb.mxu3 %v15851_v16 }
 0x60e   :  { %v14760_v15 = vld [vmem:[#allocation5 + $0x15f8] sm:$0xf0] }
 0x60f   :  { %v18915_v17 = vld [vmem:[#allocation5 + $0x19bc] sm:$0xf]  ;;  %v14763_v24 = vor.u32 %v18787_v13, %v14760_v15  ;;  %7920 = vmatpush.bf16.msrb.mxu0 %v14251_v1 }
 0x610   :  { %v15272_v18 = vld [vmem:[#allocation5 + $0x19f8] sm:$0xf0] }
 0x611   :  { %v19043_v9 = vld [vmem:[#allocation5 + $0x1dbc] sm:$0xf]  ;;  %v15275_v26 = vor.u32 %v18915_v17, %v15272_v18  ;;  %7933 = vmatpush.bf16.msrb.mxu1 %v14763_v24  ;;  %v7706_v18 = vpop.f32.mrf.mxu3  ;;  %v19178_v24 = vld [vmem:[#allocation8 + $0x1ec] sm:$0xf0] }
 0x612   :  { %v15784_v22 = vld [vmem:[#allocation5 + $0x1df8] sm:$0xf0] }
 0x613   :  { %v18643_v27 = vld [vmem:[#allocation5 + $0x113c] sm:$0xf]  ;;  %v15787_v30 = vor.u32 %v19043_v9, %v15784_v22  ;;  %7946 = vmatpush.bf16.msrb.mxu2 %v15275_v26  ;;  %v16158_v9 = vld [vmem:[#allocation8 + $0xe0] sm:$0xf]  ;;  %v19146_v22 = vld [vmem:[#allocation8 + $0xec] sm:$0xf0] }
 0x614   :  { %v14184_v28 = vld [vmem:[#allocation5 + $0x1178] sm:$0xf0]  ;;  %v16414_v26 = vld [vmem:[#allocation8 + $0x2e0] sm:$0xf] }
 0x615   :  { %v18771_v29 = vld [vmem:[#allocation5 + $0x153c] sm:$0xf]  ;;  %v14187_v56 = vor.u32 %v18643_v27, %v14184_v28  ;;  %7959 = vmatpush.bf16.msrb.mxu3 %v15787_v30  ;;  %v19210_v27 = vld [vmem:[#allocation8 + $0x2ec] sm:$0xf0] }
 0x616   :  { %v14696_v31 = vld [vmem:[#allocation5 + $0x1578] sm:$0xf0]  ;;  %v19242_v30 = vld [vmem:[#allocation8 + $0x3ec] sm:$0xf0]  ;;  %v16415_v39 = vor.u32 %v19210_v27, %v16414_v26  ;;  %v7730_v27 = vpop.f32.mrf.mxu1 }
 0x617   :  { %v18899_v43 = vld [vmem:[#allocation5 + $0x193c] sm:$0xf]  ;;  %v14699_v53 = vor.u32 %v18771_v29, %v14696_v31  ;;  %7921 = vmatpush.bf16.msrb.mxu0 %v14187_v56  ;;  %v16543_v56 = vor.u32 %v19242_v30, %v16542_v49  ;;  %v16350_v49 = vld [vmem:[#allocation8 + $0x260] sm:$0xf]  ;;  %v19194_v30 = vld [vmem:[#allocation8 + $0x26c] sm:$0xf0] }
 0x618   :  { %v15208_v44 = vld [vmem:[#allocation5 + $0x1978] sm:$0xf0] }
 0x619   :  { %v19027_v46 = vld [vmem:[#allocation5 + $0x1d3c] sm:$0xf]  ;;  %v15211_v59 = vor.u32 %v18899_v43, %v15208_v44  ;;  %7934 = vmatpush.bf16.msrb.mxu1 %v14699_v53  ;;  %v16159_v43 = vor.u32 %v19146_v22, %v16158_v9  ;;  %v16287_v44 = vor.u32 %v19178_v24, %v16286_v23  ;;  %v16398_v53 = vld [vmem:[#allocation8 + $0x2c0] sm:$0xf]  ;;  %v7717_v9 = vpop.f32.mrf.mxu0 }
 0x61a   :  { %v15720_v58 = vld [vmem:[#allocation5 + $0x1d78] sm:$0xf0]  ;;  %v16094_v23 = vld [vmem:[#allocation8 + $0x60] sm:$0xf]  ;;  %v7718_v26 = vadd.f32 %v7717_v9, %v20083_v51  ;;  %v19150_v9 = vld [vmem:[#allocation8 + $0x10c] sm:$0xf0] }
 0x61b   :  { %v18627_v60 = vld [vmem:[#allocation5 + $0x10bc] sm:$0xf]  ;;  %v15723_v3 = vor.u32 %v19027_v46, %v15720_v58  ;;  %7947 = vmatpush.bf16.msrb.mxu2 %v15211_v59  ;;  %v19142_v46 = vld [vmem:[#allocation8 + $0xcc] sm:$0xf0]  ;;  %v16270_v58 = vld [vmem:[#allocation8 + $0x1c0] sm:$0xf] }
 0x61c   :  { %v14120_v62 = vld [vmem:[#allocation5 + $0x10f8] sm:$0xf0]  ;;  %v19206_v59 = vld [vmem:[#allocation8 + $0x2cc] sm:$0xf0]  ;;  %v16271_v2 = vor.u32 %v19174_v52, %v16270_v58  ;;  %v16222_v24 = vld [vmem:[#allocation8 + $0x160] sm:$0xf] }
 0x61d   :  { %v18755_v0 = vld [vmem:[#allocation5 + $0x14bc] sm:$0xf]  ;;  %v14123_v41 = vor.u32 %v18627_v60, %v14120_v62  ;;  %7960 = vmatpush.bf16.msrb.mxu3 %v15723_v3  ;;  %v16526_v60 = vld [vmem:[#allocation8 + $0x3c0] sm:$0xf]  ;;  %v19238_v62 = vld [vmem:[#allocation8 + $0x3cc] sm:$0xf0]  ;;  %v16399_v3 = vor.u32 %v19206_v59, %v16398_v53  ;;  %v7743_v53 = vpop.f32.mrf.mxu2 }
 0x61e   :  { %v14632_v33 = vld [vmem:[#allocation5 + $0x14f8] sm:$0xf0]  ;;  %v16078_v58 = vld [vmem:[#allocation8 + $0x40] sm:$0xf]  ;;  %v19158_v59 = vld [vmem:[#allocation8 + $0x14c] sm:$0xf0] }
 0x61f   :  { %v18883_v5 = vld [vmem:[#allocation5 + $0x18bc] sm:$0xf]  ;;  %v14635_v42 = vor.u32 %v18755_v0, %v14632_v33  ;;  %7922 = vmatpush.bf16.msrb.mxu0 %v14123_v41  ;;  %v16143_v0 = vor.u32 %v19142_v46, %v16142_v45  ;;  %v16126_v33 = vld [vmem:[#allocation8 + $0xa0] sm:$0xf]  ;;  %v16351_v46 = vor.u32 %v19194_v30, %v16350_v49 }
 0x620   :  { %v15144_v6 = vld [vmem:[#allocation5 + $0x18f8] sm:$0xf0]  ;;  %v16382_v41 = vld [vmem:[#allocation8 + $0x2a0] sm:$0xf] }
 0x621   :  { %v19011_v34 = vld [vmem:[#allocation5 + $0x1cbc] sm:$0xf]  ;;  %v15147_v48 = vor.u32 %v18883_v5, %v15144_v6  ;;  %7935 = vmatpush.bf16.msrb.mxu1 %v14635_v42  ;;  %v19138_v5 = vld [vmem:[#allocation8 + $0xac] sm:$0xf0]  ;;  %v16254_v6 = vld [vmem:[#allocation8 + $0x1a0] sm:$0xf] }
 0x622   :  { %v15656_v7 = vld [vmem:[#allocation5 + $0x1cf8] sm:$0xf0]  ;;  %v19234_v42 = vld [vmem:[#allocation8 + $0x3ac] sm:$0xf0]  ;;  %v16206_v52 = vld [vmem:[#allocation8 + $0x140] sm:$0xf] }
 0x623   :  { %v18611_v55 = vld [vmem:[#allocation5 + $0x103c] sm:$0xf]  ;;  %v15659_v4 = vor.u32 %v19011_v34, %v15656_v7  ;;  %7948 = vmatpush.bf16.msrb.mxu2 %v15147_v48  ;;  %v16527_v34 = vor.u32 %v19238_v62, %v16526_v60  ;;  %v19170_v7 = vld [vmem:[#allocation8 + $0x1ac] sm:$0xf0]  ;;  %v16127_v48 = vor.u32 %v19138_v5, %v16126_v33  ;;  %v16334_v60 = vld [vmem:[#allocation8 + $0x240] sm:$0xf] }
 0x624   :  { %v14056_v10 = vld [vmem:[#allocation5 + $0x1078] sm:$0xf0]  ;;  %v19190_v62 = vld [vmem:[#allocation8 + $0x24c] sm:$0xf0]  ;;  %v16798_v49 = vld [vmem:[#allocation8 + $0x5e0] sm:$0xf] }
 0x625   :  { %v18739_v8 = vld [vmem:[#allocation5 + $0x143c] sm:$0xf]  ;;  %v14059_v1 = vor.u32 %v18611_v55, %v14056_v10  ;;  %7961 = vmatpush.bf16.msrb.mxu3 %v15659_v4  ;;  %v19202_v55 = vld [vmem:[#allocation8 + $0x2ac] sm:$0xf0]  ;;  %v16510_v10 = vld [vmem:[#allocation8 + $0x3a0] sm:$0xf] }
 0x626   :  { %v14568_v12 = vld [vmem:[#allocation5 + $0x1478] sm:$0xf0]  ;;  %v16511_v4 = vor.u32 %v19234_v42, %v16510_v10  ;;  %v19222_v33 = vld [vmem:[#allocation8 + $0x34c] sm:$0xf0]  ;;  %v16190_v42 = vld [vmem:[#allocation8 + $0x120] sm:$0xf] }
 0x627   :  { %v18867_v13 = vld [vmem:[#allocation5 + $0x183c] sm:$0xf]  ;;  %v14571_v28 = vor.u32 %v18739_v8, %v14568_v12  ;;  %7923 = vmatpush.bf16.msrb.mxu0 %v14059_v1  ;;  %v16255_v8 = vor.u32 %v19170_v7, %v16254_v6  ;;  %v16383_v12 = vor.u32 %v19202_v55, %v16382_v41  ;;  %v19130_v1 = vld [vmem:[#allocation8 + $0x6c] sm:$0xf0]  ;;  %v16207_v7 = vor.u32 %v19158_v59, %v16206_v52  ;;  %v16062_v55 = vld [vmem:[#allocation8 + $0x20] sm:$0xf] }
 0x628   :  { %v15080_v16 = vld [vmem:[#allocation5 + $0x1878] sm:$0xf0]  ;;  %v16335_v41 = vor.u32 %v19190_v62, %v16334_v60  ;;  %v19122_v10 = vld [vmem:[#allocation8 + $0x2c] sm:$0xf0] }
 0x629   :  { %v18995_v15 = vld [vmem:[#allocation5 + $0x1c3c] sm:$0xf]  ;;  %v15083_v29 = vor.u32 %v18867_v13, %v15080_v16  ;;  %7936 = vmatpush.bf16.msrb.mxu1 %v14571_v28  ;;  %v16110_v13 = vld [vmem:[#allocation8 + $0x80] sm:$0xf]  ;;  %v19166_v16 = vld [vmem:[#allocation8 + $0x18c] sm:$0xf0] }
 0x62a   :  { %v15592_v17 = vld [vmem:[#allocation5 + $0x1c78] sm:$0xf0]  ;;  %7924 = vmatmul.bf16.vlgmr.msrb.gmra.mxu0 %v19867_v37  ;;  %v19134_v37 = vld [vmem:[#allocation8 + $0x8c] sm:$0xf0] }
 0x62b   :  { %v15595_v31 = vor.u32 %v18995_v15, %v15592_v17  ;;  %7949 = vmatpush.bf16.msrb.mxu2 %v15083_v29  ;;  %11082 = vmatpush.bf16.msra.mxu0 %v16159_v43  ;;  %v16366_v15 = vld [vmem:[#allocation8 + $0x280] sm:$0xf]  ;;  %v16111_v18 = vor.u32 %v19134_v37, %v16110_v13  ;;  %v19162_v29 = vld [vmem:[#allocation8 + $0x16c] sm:$0xf0] }
 0x62c   :  { %7937 = vmatmul.bf16.vlgmr.msrb.gmra.mxu1 %v19871_v40  ;;  %v16494_v17 = vld [vmem:[#allocation8 + $0x380] sm:$0xf]  ;;  %v16239_v40 = vor.u32 %v19166_v16, %v16238_v14  ;;  %v19226_v43 = vld [vmem:[#allocation8 + $0x36c] sm:$0xf0]  ;;  %v16223_v45 = vor.u32 %v19162_v29, %v16222_v24  ;;  %v16063_v16 = vor.u32 %v19122_v10, %v16062_v55 }
 0x62d   :  { %7962 = vmatpush.bf16.msrb.mxu3 %v15595_v31  ;;  %11095 = vmatpush.bf16.msra.mxu1 %v16287_v44  ;;  %v16478_v31 = vld [vmem:[#allocation8 + $0x360] sm:$0xf]  ;;  %v7731_v44 = vadd.f32 %v7730_v27, %v7718_v26  ;;  %v19186_v37 = vld [vmem:[#allocation8 + $0x22c] sm:$0xf0] }
 0x62e   :  { %7950 = vmatmul.bf16.vlgmr.msrb.gmra.mxu2 %v19865_v32  ;;  %v19198_v32 = vld [vmem:[#allocation8 + $0x28c] sm:$0xf0]  ;;  %v16479_v51 = vor.u32 %v19226_v43, %v16478_v31  ;;  %v16318_v13 = vld [vmem:[#allocation8 + $0x220] sm:$0xf] }
 0x62f   :  { %11108 = vmatpush.bf16.msra.mxu2 %v16415_v39  ;;  %11083 = vmatpush.bf16.msra.mxu0 %v16143_v0  ;;  %v16367_v22 = vor.u32 %v19198_v32, %v16366_v15  ;;  %v16095_v39 = vor.u32 %v19130_v1, %v16094_v23  ;;  %v7744_v0 = vadd.f32 %v7743_v53, %v7731_v44  ;;  %v16446_v14 = vld [vmem:[#allocation8 + $0x320] sm:$0xf]  ;;  %v19118_v32 = vld [vmem:[#allocation8 + $0xc] sm:$0xf0]  ;;  %v7970_v53 = vmax.f32 %v19926_v54, 0.0 }
 0x630   :  { %7963 = vmatmul.bf16.vlgmr.msrb.gmra.mxu3 %v19869_v38  ;;  %v19230_v38 = vld [vmem:[#allocation8 + $0x38c] sm:$0xf0]  ;;  %v16046_v15 = vld [vmem:[#allocation8] sm:$0xf] }
 0x631   :  { %11121 = vmatpush.bf16.msra.mxu3 %v16543_v56  ;;  %11096 = vmatpush.bf16.msra.mxu1 %v16271_v2  ;;  %v16495_v28 = vor.u32 %v19230_v38, %v16494_v17  ;;  %v19126_v56 = vld [vmem:[#allocation8 + $0x4c] sm:$0xf0]  ;;  %v7756_v2 = vpop.f32.mrf.mxu3  ;;  %v16319_v38 = vor.u32 %v19186_v37, %v16318_v13  ;;  %v16430_v24 = vld [vmem:[#allocation8 + $0x300] sm:$0xf]  ;;  %v16047_v30 = vor.u32 %v19118_v32, %v16046_v15 }
 0x632   :  { %v16079_v5 = vor.u32 %v19126_v56, %v16078_v58  ;;  %v20090_v6 = vadd.f32 %v7756_v2, %v7744_v0  ;;  %v19182_v1 = vld [vmem:[#allocation8 + $0x20c] sm:$0xf0]  ;;  %v16926_v43 = vld [vmem:[#allocation8 + $0x6e0] sm:$0xf]  ;;  %v20100_v10 = vpack.c.bf16 %v7970_v53, %v7970_v53 }
 0x633   :  { %11109 = vmatpush.bf16.msra.mxu2 %v16399_v3  ;;  %11084 = vmatpush.bf16.msra.mxu0 %v16127_v48  ;;  %v16462_v3 = vld [vmem:[#allocation8 + $0x340] sm:$0xf]  ;;  %v7732_v48 = vpop.f32.mrf.mxu1  ;;  %v19214_v26 = vld [vmem:[#allocation8 + $0x30c] sm:$0xf0] }
 0x634   :  { %v19274_v29 = vld [vmem:[#allocation8 + $0x4ec] sm:$0xf0]  ;;  %v17054_v56 = vld [vmem:[#allocation8 + $0x7e0] sm:$0xf]  ;;  %v16431_v59 = vor.u32 %v19214_v26, %v16430_v24 }
 0x635   :  { %11122 = vmatpush.bf16.msra.mxu3 %v16527_v34  ;;  %11097 = vmatpush.bf16.msra.mxu1 %v16255_v8  ;;  %v7719_v34 = vpop.f32.mrf.mxu0  ;;  %v16463_v8 = vor.u32 %v19222_v33, %v16462_v3  ;;  %v19306_v31 = vld [vmem:[#allocation8 + $0x5ec] sm:$0xf0]  ;;  %v16654_v2 = vld [vmem:[#allocation8 + $0x4c0] sm:$0xf] }
 0x636   :  { %v19338_v44 = vld [vmem:[#allocation8 + $0x6ec] sm:$0xf0]  ;;  %v16799_v62 = vor.u32 %v19306_v31, %v16798_v49  ;;  %v16766_v13 = vld [vmem:[#allocation8 + $0x5a0] sm:$0xf] }
 0x637   :  { %11110 = vmatpush.bf16.msra.mxu2 %v16383_v12  ;;  %11085 = vmatpush.bf16.msra.mxu0 %v16111_v18  ;;  %v19154_v12 = vld [vmem:[#allocation8 + $0x12c] sm:$0xf0]  ;;  %v16174_v18 = vld [vmem:[#allocation8 + $0x100] sm:$0xf]  ;;  %v16927_v0 = vor.u32 %v19338_v44, %v16926_v43 }
 0x638   :  { %v16191_v17 = vor.u32 %v19154_v12, %v16190_v42  ;;  %v19370_v52 = vld [vmem:[#allocation8 + $0x7ec] sm:$0xf0]  ;;  %v17022_v32 = vld [vmem:[#allocation8 + $0x7a0] sm:$0xf] }
 0x639   :  { %11123 = vmatpush.bf16.msra.mxu3 %v16511_v4  ;;  %11098 = vmatpush.bf16.msra.mxu1 %v16239_v40  ;;  %v19218_v4 = vld [vmem:[#allocation8 + $0x32c] sm:$0xf0]  ;;  %v16302_v40 = vld [vmem:[#allocation8 + $0x200] sm:$0xf]  ;;  %v7758_v27 = vpop.f32.mrf.mxu3 }
 0x63a   :  { %v16447_v23 = vor.u32 %v19218_v4, %v16446_v14  ;;  %v16303_v58 = vor.u32 %v19182_v1, %v16302_v40  ;;  %v19270_v3 = vld [vmem:[#allocation8 + $0x4cc] sm:$0xf0]  ;;  %v20108_v1 = vld [vmem:[#allocation7 + $0x8] sm:$0xff]  ;;  %v17006_v49 = vld [vmem:[#allocation8 + $0x780] sm:$0xf] }
 0x63b   :  { %11111 = vmatpush.bf16.msra.mxu2 %v16367_v22  ;;  %11086 = vmatpush.bf16.msra.mxu0 %v16095_v39  ;;  %v7745_v22 = vpop.f32.mrf.mxu2  ;;  %v7968_v39 = vmax.f32 %v19896_v50, 0.0  ;;  %v16782_v50 = vld [vmem:[#allocation8 + $0x5c0] sm:$0xf]  ;;  %v19302_v33 = vld [vmem:[#allocation8 + $0x5cc] sm:$0xf0]  ;;  %v16655_v55 = vor.u32 %v19270_v3, %v16654_v2  ;;  %v1166_v24 = vperm.slane %v20108_v1, 6 }
 0x63c   :  { %v19334_v34 = vld [vmem:[#allocation8 + $0x6cc] sm:$0xf0]  ;;  %v16783_v42 = vor.u32 %v19302_v33, %v16782_v50  ;;  %v16590_v33 = vld [vmem:[#allocation8 + $0x440] sm:$0xf] }
 0x63d   :  { %11124 = vmatpush.bf16.msra.mxu3 %v16495_v28  ;;  %11099 = vmatpush.bf16.msra.mxu1 %v16223_v45  ;;  %v16670_v28 = vld [vmem:[#allocation8 + $0x4e0] sm:$0xf]  ;;  %v7969_v45 = vmax.f32 %v19910_v47, 0.0  ;;  %v17055_v47 = vor.u32 %v19370_v52, %v17054_v56  ;;  %v20096_v54 = vpack.c.bf16 %v7968_v39, %v7968_v39  ;;  %v19266_v12 = vld [vmem:[#allocation8 + $0x4ac] sm:$0xf0]  ;;  %v7769_v43 = vpop.f32.mrf.mxu0  ;;  %v7782_v52 = vpop.f32.mrf.mxu1 }
 0x63e   :  { %v16671_v60 = vor.u32 %v19274_v29, %v16670_v28  ;;  %v19298_v4 = vld [vmem:[#allocation8 + $0x5ac] sm:$0xf0]  ;;  %v16878_v28 = vld [vmem:[#allocation8 + $0x680] sm:$0xf]  ;;  %v7770_v56 = vadd.f32 %v7769_v43, %v1166_v24 }
 0x63f   :  { %11112 = vmatpush.bf16.msra.mxu2 %v16351_v46  ;;  %11087 = vmatpush.bf16.msra.mxu0 %v16079_v5  ;;  %v16175_v46 = vor.u32 %v19150_v9, %v16174_v18  ;;  %v16910_v5 = vld [vmem:[#allocation8 + $0x6c0] sm:$0xf]  ;;  %v19330_v15 = vld [vmem:[#allocation8 + $0x6ac] sm:$0xf0]  ;;  %v16767_v9 = vor.u32 %v19298_v4, %v16766_v13 }
 0x640   :  { %v16911_v48 = vor.u32 %v19334_v34, %v16910_v5  ;;  %v16622_v18 = vld [vmem:[#allocation8 + $0x480] sm:$0xf]  ;;  %v19262_v22 = vld [vmem:[#allocation8 + $0x48c] sm:$0xf0]  ;;  %v7783_v2 = vadd.f32 %v7782_v52, %v7770_v56 }
 0x641   :  { %11125 = vmatpush.bf16.msra.mxu3 %v16479_v51  ;;  %11100 = vmatpush.bf16.msra.mxu1 %v16207_v7  ;;  %v7971_v51 = vmax.f32 %v19940_v61, 0.0  ;;  %v17038_v7 = vld [vmem:[#allocation8 + $0x7c0] sm:$0xf]  ;;  %v20098_v61 = vpack.c.bf16 %v7969_v45, %v7969_v45  ;;  %v19294_v27 = vld [vmem:[#allocation8 + $0x58c] sm:$0xf0]  ;;  %v16623_v31 = vor.u32 %v19262_v22, %v16622_v18 }
 0x642   :  { %v19326_v29 = vld [vmem:[#allocation8 + $0x68c] sm:$0xf0]  ;;  %v16606_v45 = vld [vmem:[#allocation8 + $0x460] sm:$0xf] }
 0x643   :  { %11113 = vmatpush.bf16.msra.mxu2 %v16335_v41  ;;  %11088 = vmatpush.bf16.msra.mxu0 %v16063_v16  ;;  %v19366_v41 = vld [vmem:[#allocation8 + $0x7cc] sm:$0xf0]  ;;  %v20102_v37 = vpack.c.bf16 %v7971_v51, %v7971_v51  ;;  %v16894_v16 = vld [vmem:[#allocation8 + $0x6a0] sm:$0xf]  ;;  %v16879_v39 = vor.u32 %v19326_v29, %v16878_v28 }
 0x644   :  { %v17039_v14 = vor.u32 %v19366_v41, %v17038_v7  ;;  %v16895_v40 = vor.u32 %v19330_v15, %v16894_v16  ;;  %v19290_v51 = vld [vmem:[#allocation8 + $0x56c] sm:$0xf0]  ;;  %v16718_v34 = vld [vmem:[#allocation8 + $0x540] sm:$0xf]  ;;  %v7795_v7 = vpop.f32.mrf.mxu2 }
 0x645   :  { %11126 = vmatpush.bf16.msra.mxu3 %v16463_v8  ;;  %11101 = vmatpush.bf16.msra.mxu1 %v16191_v17  ;;  %v16638_v8 = vld [vmem:[#allocation8 + $0x4a0] sm:$0xf]  ;;  %v19362_v17 = vld [vmem:[#allocation8 + $0x7ac] sm:$0xf0]  ;;  %v7771_v15 = vpop.f32.mrf.mxu0 }
 0x646   :  { %v17023_v26 = vor.u32 %v19362_v17, %v17022_v32  ;;  %v19254_v5 = vld [vmem:[#allocation8 + $0x44c] sm:$0xf0]  ;;  %v16974_v13 = vld [vmem:[#allocation8 + $0x740] sm:$0xf] }
 0x647   :  { %11114 = vmatpush.bf16.msra.mxu2 %v16319_v38  ;;  %11089 = vmatpush.bf16.msra.mxu0 %v16047_v30  ;;  %v16639_v38 = vor.u32 %v19266_v12, %v16638_v8  ;;  %v19358_v30 = vld [vmem:[#allocation8 + $0x78c] sm:$0xf0]  ;;  %v7796_v8 = vadd.f32 %v7795_v7, %v7783_v2  ;;  %v7808_v12 = vpop.f32.mrf.mxu3  ;;  %v16591_v4 = vor.u32 %v19254_v5, %v16590_v33  ;;  %v16830_v24 = vld [vmem:[#allocation8 + $0x620] sm:$0xf]  ;;  %v7973_v33 = vmax.f32 %v19970_v25, 0.0 }
 0x648   :  { %v17007_v53 = vor.u32 %v19358_v30, %v17006_v49  ;;  %v19250_v18 = vld [vmem:[#allocation8 + $0x42c] sm:$0xf0]  ;;  %v16558_v49 = vld [vmem:[#allocation8 + $0x400] sm:$0xf] }
 0x649   :  { %11127 = vmatpush.bf16.msra.mxu3 %v16447_v23  ;;  %11102 = vmatpush.bf16.msra.mxu1 %v16175_v46  ;;  %v16750_v23 = vld [vmem:[#allocation8 + $0x580] sm:$0xf]  ;;  %v19258_v46 = vld [vmem:[#allocation8 + $0x46c] sm:$0xf0]  ;;  %v20111_v16 = vadd.f32 %v7808_v12, %v7796_v8 }
 0x64a   :  { %11090 = vmatmul.bf16.vlgmr.msra.gmra.mxu0 %v20096_v54  ;;  %v16751_v44 = vor.u32 %v19294_v27, %v16750_v23  ;;  %v16607_v3 = vor.u32 %v19258_v46, %v16606_v45  ;;  %v19282_v23 = vld [vmem:[#allocation8 + $0x52c] sm:$0xf0]  ;;  %v16958_v27 = vld [vmem:[#allocation8 + $0x720] sm:$0xf] }
 0x64b   :  { %11115 = vmatpush.bf16.msra.mxu2 %v16303_v58  ;;  %11134 = vmatpush.bf16.msrb.mxu0 %v16671_v60  ;;  %v16734_v58 = vld [vmem:[#allocation8 + $0x560] sm:$0xf]  ;;  %v19322_v60 = vld [vmem:[#allocation8 + $0x66c] sm:$0xf0] }
 0x64c   :  { %11103 = vmatmul.bf16.vlgmr.msra.gmra.mxu1 %v20098_v61  ;;  %v16735_v50 = vor.u32 %v19290_v51, %v16734_v58  ;;  %v19346_v28 = vld [vmem:[#allocation8 + $0x72c] sm:$0xf0]  ;;  %v16814_v45 = vld [vmem:[#allocation8 + $0x600] sm:$0xf]  ;;  %v7797_v46 = vpop.f32.mrf.mxu2 }
 0x64d   :  { %11128 = vmatpush.bf16.msra.mxu3 %v16431_v59  ;;  %11147 = vmatpush.bf16.msrb.mxu1 %v16799_v62  ;;  %v16862_v59 = vld [vmem:[#allocation8 + $0x660] sm:$0xf]  ;;  %v19246_v30 = vld [vmem:[#allocation8 + $0x40c] sm:$0xf0]  ;;  %v16959_v58 = vor.u32 %v19346_v28, %v16958_v27 }
 0x64e   :  { %11116 = vmatmul.bf16.vlgmr.msra.gmra.mxu2 %v20100_v10  ;;  %v16990_v62 = vld [vmem:[#allocation8 + $0x760] sm:$0xf]  ;;  %v19310_v56 = vld [vmem:[#allocation8 + $0x60c] sm:$0xf0] }
 0x64f   :  { %11160 = vmatpush.bf16.msrb.mxu2 %v16927_v0  ;;  %11135 = vmatpush.bf16.msrb.mxu0 %v16655_v55  ;;  %v19354_v0 = vld [vmem:[#allocation8 + $0x76c] sm:$0xf0]  ;;  %v16942_v52 = vld [vmem:[#allocation8 + $0x700] sm:$0xf]  ;;  %v7810_v51 = vpop.f32.mrf.mxu3 }
 0x650   :  { %11129 = vmatmul.bf16.vlgmr.msra.gmra.mxu3 %v20102_v37  ;;  %v16991_v41 = vor.u32 %v19354_v0, %v16990_v62  ;;  %v19286_v55 = vld [vmem:[#allocation8 + $0x54c] sm:$0xf0]  ;;  %v17310_v62 = vld [vmem:[#allocation8 + $0x9e0] sm:$0xf]  ;;  %v16559_v0 = vor.u32 %v19246_v30, %v16558_v49 }
 0x651   :  { %11173 = vmatpush.bf16.msrb.mxu3 %v17055_v47  ;;  %11148 = vmatpush.bf16.msrb.mxu1 %v16783_v42  ;;  %v16863_v47 = vor.u32 %v19322_v60, %v16862_v59  ;;  %v16846_v42 = vld [vmem:[#allocation8 + $0x640] sm:$0xf]  ;;  %v16719_v32 = vor.u32 %v19286_v55, %v16718_v34  ;;  %v19402_v60 = vld [vmem:[#allocation8 + $0x8ec] sm:$0xf0]  ;;  %v16815_v34 = vor.u32 %v19310_v56, %v16814_v45  ;;  %v7974_v55 = vmax.f32 %v19986_v57, 0.0 }
 0x652   :  { %v17182_v59 = vld [vmem:[#allocation8 + $0x8e0] sm:$0xf]  ;;  %v19434_v2 = vld [vmem:[#allocation8 + $0x9ec] sm:$0xf0] }
 0x653   :  { %11161 = vmatpush.bf16.msrb.mxu2 %v16911_v48  ;;  %11136 = vmatpush.bf16.msrb.mxu0 %v16639_v38  ;;  %v19318_v48 = vld [vmem:[#allocation8 + $0x64c] sm:$0xf0]  ;;  %v16574_v38 = vld [vmem:[#allocation8 + $0x420] sm:$0xf]  ;;  %v17183_v8 = vor.u32 %v19402_v60, %v17182_v59  ;;  %v17311_v12 = vor.u32 %v19434_v2, %v17310_v62 }
 0x654   :  { %v16847_v17 = vor.u32 %v19318_v48, %v16846_v42  ;;  %v16575_v29 = vor.u32 %v19250_v18, %v16574_v38  ;;  %v17566_v7 = vld [vmem:[#allocation8 + $0xbe0] sm:$0xf]  ;;  %v7975_v42 = vmax.f32 %v20000_v20, 0.0  ;;  %v19430_v15 = vld [vmem:[#allocation8 + $0x9cc] sm:$0xf0]  ;;  %v20119_v20 = vpack.c.bf16 %v7973_v33, %v7973_v33 }
 0x655   :  { %11174 = vmatpush.bf16.msrb.mxu3 %v17039_v14  ;;  %11149 = vmatpush.bf16.msrb.mxu1 %v16767_v9  ;;  %v19350_v14 = vld [vmem:[#allocation8 + $0x74c] sm:$0xf0]  ;;  %v16702_v9 = vld [vmem:[#allocation8 + $0x520] sm:$0xf] }
 0x656   :  { %v16975_v22 = vor.u32 %v19350_v14, %v16974_v13  ;;  %v17166_v14 = vld [vmem:[#allocation8 + $0x8c0] sm:$0xf]  ;;  %v19494_v18 = vld [vmem:[#allocation8 + $0xbcc] sm:$0xf0]  ;;  %v20123_v28 = vpack.c.bf16 %v7975_v42, %v7975_v42 }
 0x657   :  { %11162 = vmatpush.bf16.msrb.mxu2 %v16895_v40  ;;  %11137 = vmatpush.bf16.msrb.mxu0 %v16623_v31  ;;  %v7784_v40 = vpop.f32.mrf.mxu1  ;;  %v16703_v31 = vor.u32 %v19282_v23, %v16702_v9  ;;  %v17550_v38 = vld [vmem:[#allocation8 + $0xbc0] sm:$0xf]  ;;  %v19426_v49 = vld [vmem:[#allocation8 + $0x9ac] sm:$0xf0] }
 0x658   :  { %v20121_v40 = vpack.c.bf16 %v7974_v55, %v7974_v55  ;;  %v17278_v27 = vld [vmem:[#allocation8 + $0x9a0] sm:$0xf]  ;;  %v19390_v56 = vld [vmem:[#allocation8 + $0x88c] sm:$0xf0] }
 0x659   :  { %11175 = vmatpush.bf16.msrb.mxu3 %v17023_v26  ;;  %11150 = vmatpush.bf16.msrb.mxu1 %v16751_v44  ;;  %v19314_v26 = vld [vmem:[#allocation8 + $0x62c] sm:$0xf0]  ;;  %v16686_v44 = vld [vmem:[#allocation8 + $0x500] sm:$0xf]  ;;  %v17279_v45 = vor.u32 %v19426_v49, %v17278_v27 }
 0x65a   :  { %v16831_v43 = vor.u32 %v19314_v26, %v16830_v24  ;;  %v17150_v24 = vld [vmem:[#allocation8 + $0x8a0] sm:$0xf]  ;;  %v19394_v26 = vld [vmem:[#allocation8 + $0x8ac] sm:$0xf0] }
 0x65b   :  { %11163 = vmatpush.bf16.msrb.mxu2 %v16879_v39  ;;  %11138 = vmatpush.bf16.msrb.mxu0 %v16607_v3  ;;  %v19278_v39 = vld [vmem:[#allocation8 + $0x50c] sm:$0xf0]  ;;  %v17438_v3 = vld [vmem:[#allocation8 + $0xae0] sm:$0xf] }
 0x65c   :  { %v16687_v5 = vor.u32 %v19278_v39, %v16686_v44  ;;  %v17406_v30 = vld [vmem:[#allocation8 + $0xaa0] sm:$0xf]  ;;  %v19490_v44 = vld [vmem:[#allocation8 + $0xbac] sm:$0xf0]  ;;  %v17151_v39 = vor.u32 %v19394_v26, %v17150_v24 }
 0x65d   :  { %11176 = vmatpush.bf16.msrb.mxu3 %v17007_v53  ;;  %11151 = vmatpush.bf16.msrb.mxu1 %v16735_v50  ;;  %v19342_v53 = vld [vmem:[#allocation8 + $0x70c] sm:$0xf0]  ;;  %v17390_v59 = vld [vmem:[#allocation8 + $0xa80] sm:$0xf] }
 0x65e   :  { %v19466_v50 = vld [vmem:[#allocation8 + $0xaec] sm:$0xf0]  ;;  %v16943_v48 = vor.u32 %v19342_v53, %v16942_v52  ;;  %v17262_v52 = vld [vmem:[#allocation8 + $0x980] sm:$0xf] }
 0x65f   :  { %11164 = vmatpush.bf16.msrb.mxu2 %v16863_v47  ;;  %11139 = vmatpush.bf16.msrb.mxu0 %v16591_v4  ;;  %v7972_v47 = vmax.f32 %v19956_v11, 0.0  ;;  %v17439_v13 = vor.u32 %v19466_v50, %v17438_v3  ;;  %v19398_v4 = vld [vmem:[#allocation8 + $0x8cc] sm:$0xf0]  ;;  %v17294_v11 = vld [vmem:[#allocation8 + $0x9c0] sm:$0xf]  ;;  %v20129_v3 = vpop.f32.mrf.mxu0 }
 0x660   :  { %v17167_v9 = vor.u32 %v19398_v4, %v17166_v14  ;;  %v19422_v51 = vld [vmem:[#allocation8 + $0x98c] sm:$0xf0]  ;;  %v17518_v62 = vld [vmem:[#allocation8 + $0xb80] sm:$0xf] }
 0x661   :  { %11177 = vmatpush.bf16.msrb.mxu3 %v16991_v41  ;;  %11152 = vmatpush.bf16.msrb.mxu1 %v16719_v32  ;;  %v19498_v41 = vld [vmem:[#allocation8 + $0xbec] sm:$0xf0]  ;;  %v17422_v32 = vld [vmem:[#allocation8 + $0xac0] sm:$0xf]  ;;  %v20117_v57 = vpack.c.bf16 %v7972_v47, %v7972_v47  ;;  %v17263_v50 = vor.u32 %v19422_v51, %v17262_v52 }
 0x662   :  { %v17567_v25 = vor.u32 %v19498_v41, %v17566_v7  ;;  %v19454_v60 = vld [vmem:[#allocation8 + $0xa8c] sm:$0xf0]  ;;  %v17118_v33 = vld [vmem:[#allocation8 + $0x860] sm:$0xf]  ;;  %v20131_v7 = vpop.f32.mrf.mxu1 }
 0x663   :  { %11165 = vmatpush.bf16.msrb.mxu2 %v16847_v17  ;;  %11140 = vmatpush.bf16.msrb.mxu0 %v16575_v29  ;;  %v19462_v17 = vld [vmem:[#allocation8 + $0xacc] sm:$0xf0]  ;;  %v17551_v29 = vor.u32 %v19494_v18, %v17550_v38  ;;  %v17391_v47 = vor.u32 %v19454_v60, %v17390_v59  ;;  %v17374_v42 = vld [vmem:[#allocation8 + $0xa60] sm:$0xf] }
 0x664   :  { %v17423_v23 = vor.u32 %v19462_v17, %v17422_v32  ;;  %v19418_v55 = vld [vmem:[#allocation8 + $0x96c] sm:$0xf0]  ;;  %v20133_v32 = vpop.f32.mrf.mxu2  ;;  %v17358_v18 = vld [vmem:[#allocation8 + $0xa40] sm:$0xf] }
 0x665   :  { %11178 = vmatpush.bf16.msrb.mxu3 %v16975_v22  ;;  %11153 = vmatpush.bf16.msrb.mxu1 %v16703_v31  ;;  %v17295_v22 = vor.u32 %v19430_v15, %v17294_v11  ;;  %v19458_v31 = vld [vmem:[#allocation8 + $0xaac] sm:$0xf0]  ;;  %v17102_v11 = vld [vmem:[#allocation8 + $0x840] sm:$0xf] }
 0x666   :  { %v17407_v46 = vor.u32 %v19458_v31, %v17406_v30  ;;  %v17230_v15 = vld [vmem:[#allocation8 + $0x940] sm:$0xf]  ;;  %v19414_v38 = vld [vmem:[#allocation8 + $0x94c] sm:$0xf0] }
 0x667   :  { %11166 = vmatpush.bf16.msrb.mxu2 %v16831_v43  ;;  %11141 = vmatpush.bf16.msrb.mxu0 %v16559_v0  ;;  %v17534_v43 = vld [vmem:[#allocation8 + $0xba0] sm:$0xf]  ;;  %v19486_v0 = vld [vmem:[#allocation8 + $0xb8c] sm:$0xf0]  ;;  %v7823_v27 = vpop.f32.mrf.mxu0 }
 0x668   :  { %v17535_v53 = vor.u32 %v19490_v44, %v17534_v43  ;;  %v17519_v41 = vor.u32 %v19486_v0, %v17518_v62  ;;  %v19478_v24 = vld [vmem:[#allocation8 + $0xb4c] sm:$0xf0]  ;;  %v17086_v30 = vld [vmem:[#allocation8 + $0x820] sm:$0xf] }
 0x669   :  { %11179 = vmatpush.bf16.msrb.mxu3 %v16959_v58  ;;  %11154 = vmatpush.bf16.msrb.mxu1 %v16687_v5  ;;  %v17134_v58 = vld [vmem:[#allocation8 + $0x880] sm:$0xf]  ;;  %v19386_v5 = vld [vmem:[#allocation8 + $0x86c] sm:$0xf0] }
 0x66a   :  { %11142 = vmatmul.bf16.vlgmr.msrb.gmra.mxu0 %v20117_v57  ;;  %v17135_v2 = vor.u32 %v19390_v56, %v17134_v58  ;;  %v19378_v31 = vld [vmem:[#allocation8 + $0x82c] sm:$0xf0]  ;;  %v17214_v43 = vld [vmem:[#allocation8 + $0x920] sm:$0xf]  ;;  %v7836_v44 = vpop.f32.mrf.mxu1 }
 0x66b   :  { %11167 = vmatpush.bf16.msrb.mxu2 %v16815_v34  ;;  %11186 = vmatpush.bf16.msra.mxu0 %v17183_v8  ;;  %v17246_v34 = vld [vmem:[#allocation8 + $0x960] sm:$0xf]  ;;  %v19442_v58 = vld [vmem:[#allocation8 + $0xa2c] sm:$0xf0] }
 0x66c   :  { %11155 = vmatmul.bf16.vlgmr.msrb.gmra.mxu1 %v20119_v20  ;;  %v17502_v8 = vld [vmem:[#allocation8 + $0xb60] sm:$0xf]  ;;  %v17247_v14 = vor.u32 %v19418_v55, %v17246_v34  ;;  %v19474_v52 = vld [vmem:[#allocation8 + $0xb2c] sm:$0xf0] }
 0x66d   :  { %11180 = vmatpush.bf16.msrb.mxu3 %v16943_v48  ;;  %11199 = vmatpush.bf16.msra.mxu1 %v17311_v12  ;;  %v19450_v48 = vld [vmem:[#allocation8 + $0xa6c] sm:$0xf0]  ;;  %v17470_v56 = vld [vmem:[#allocation8 + $0xb20] sm:$0xf] }
 0x66e   :  { %11168 = vmatmul.bf16.vlgmr.msrb.gmra.mxu2 %v20121_v40  ;;  %v19482_v12 = vld [vmem:[#allocation8 + $0xb6c] sm:$0xf0]  ;;  %v17375_v4 = vor.u32 %v19450_v48, %v17374_v42  ;;  %v17070_v51 = vld [vmem:[#allocation8 + $0x800] sm:$0xf] }
 0x66f   :  { %11212 = vmatpush.bf16.msra.mxu2 %v17439_v13  ;;  %11187 = vmatpush.bf16.msra.mxu0 %v17167_v9  ;;  %v17119_v13 = vor.u32 %v19386_v5, %v17118_v33  ;;  %v17503_v17 = vor.u32 %v19482_v12, %v17502_v8  ;;  %v19446_v9 = vld [vmem:[#allocation8 + $0xa4c] sm:$0xf0]  ;;  %v17198_v0 = vld [vmem:[#allocation8 + $0x900] sm:$0xf]  ;;  %v17471_v33 = vor.u32 %v19474_v52, %v17470_v56 }
 0x670   :  { %11181 = vmatmul.bf16.vlgmr.msrb.gmra.mxu3 %v20123_v28  ;;  %v17359_v49 = vor.u32 %v19446_v9, %v17358_v18  ;;  %v19374_v59 = vld [vmem:[#allocation8 + $0x80c] sm:$0xf0]  ;;  %v17454_v34 = vld [vmem:[#allocation8 + $0xb00] sm:$0xf]  ;;  %v7978_v9 = vmax.f32 %v20046_v19, 0.0 }
 0x671   :  { %11225 = vmatpush.bf16.msra.mxu3 %v17567_v25  ;;  %11200 = vmatpush.bf16.msra.mxu1 %v17295_v22  ;;  %v19382_v25 = vld [vmem:[#allocation8 + $0x84c] sm:$0xf0]  ;;  %v20135_v22 = vpop.f32.mrf.mxu3  ;;  %v17694_v42 = vld [vmem:[#allocation8 + $0xce0] sm:$0xf]  ;;  %v17071_v12 = vor.u32 %v19374_v59, %v17070_v51 }
 0x672   :  { %v17103_v26 = vor.u32 %v19382_v25, %v17102_v11  ;;  %v19438_v5 = vld [vmem:[#allocation8 + $0xa0c] sm:$0xf0]  ;;  %v17822_v8 = vld [vmem:[#allocation8 + $0xde0] sm:$0xf]  ;;  %v7976_v11 = vmax.f32 %v20016_v63, 0.0  ;;  %v7977_v25 = vmax.f32 %v20030_v36, 0.0 }
 0x673   :  { %11213 = vmatpush.bf16.msra.mxu2 %v17423_v23  ;;  %11188 = vmatpush.bf16.msra.mxu0 %v17151_v39  ;;  %v17486_v23 = vld [vmem:[#allocation8 + $0xb40] sm:$0xf]  ;;  %v19530_v48 = vld [vmem:[#allocation8 + $0xcec] sm:$0xf0] }
 0x674   :  { %v17487_v39 = vor.u32 %v19478_v24, %v17486_v23  ;;  %v19626_v18 = vld [vmem:[#allocation8 + $0xfec] sm:$0xf0]  ;;  %v7979_v23 = vmax.f32 %v20060_v35, 0.0  ;;  %v17806_v63 = vld [vmem:[#allocation8 + $0xdc0] sm:$0xf]  ;;  %v20141_v19 = vpack.c.bf16 %v7976_v11, %v7976_v11  ;;  %v20143_v35 = vpack.c.bf16 %v7977_v25, %v7977_v25 }
 0x675   :  { %11226 = vmatpush.bf16.msra.mxu3 %v17551_v29  ;;  %11201 = vmatpush.bf16.msra.mxu1 %v17279_v45  ;;  %v17231_v29 = vor.u32 %v19414_v38, %v17230_v15  ;;  %v19410_v45 = vld [vmem:[#allocation8 + $0x92c] sm:$0xf0]  ;;  %v18078_v38 = vld [vmem:[#allocation8 + $0xfe0] sm:$0xf] }
 0x676   :  { %v17215_v60 = vor.u32 %v19410_v45, %v17214_v43  ;;  %v18079_v36 = vor.u32 %v19626_v18, %v18078_v38  ;;  %v17934_v43 = vld [vmem:[#allocation8 + $0xec0] sm:$0xf]  ;;  %v19590_v44 = vld [vmem:[#allocation8 + $0xecc] sm:$0xf0] }
 0x677   :  { %11214 = vmatpush.bf16.msra.mxu2 %v17407_v46  ;;  %11189 = vmatpush.bf16.msra.mxu0 %v17135_v2  ;;  %v17342_v46 = vld [vmem:[#allocation8 + $0xa20] sm:$0xf]  ;;  %v19406_v2 = vld [vmem:[#allocation8 + $0x90c] sm:$0xf0]  ;;  %v17935_v52 = vor.u32 %v19590_v44, %v17934_v43 }
 0x678   :  { %v17343_v62 = vor.u32 %v19442_v58, %v17342_v46  ;;  %v17199_v15 = vor.u32 %v19406_v2, %v17198_v0  ;;  %v19622_v45 = vld [vmem:[#allocation8 + $0xfcc] sm:$0xf0]  ;;  %v20145_v58 = vpack.c.bf16 %v7978_v9, %v7978_v9  ;;  %v17790_v59 = vld [vmem:[#allocation8 + $0xda0] sm:$0xf] }
 0x679   :  { %11227 = vmatpush.bf16.msra.mxu3 %v17535_v53  ;;  %11202 = vmatpush.bf16.msra.mxu1 %v17263_v50  ;;  %v17087_v53 = vor.u32 %v19378_v31, %v17086_v30  ;;  %v17326_v50 = vld [vmem:[#allocation8 + $0xa00] sm:$0xf]  ;;  %v7862_v55 = vpop.f32.mrf.mxu3  ;;  %v19526_v30 = vld [vmem:[#allocation8 + $0xccc] sm:$0xf0] }
 0x67a   :  { %v19558_v31 = vld [vmem:[#allocation8 + $0xdcc] sm:$0xf0]  ;;  %v17918_v2 = vld [vmem:[#allocation8 + $0xea0] sm:$0xf] }
 0x67b   :  { %11215 = vmatpush.bf16.msra.mxu2 %v17391_v47  ;;  %11190 = vmatpush.bf16.msra.mxu0 %v17119_v13  ;;  %v7849_v47 = vpop.f32.mrf.mxu2  ;;  %v19562_v13 = vld [vmem:[#allocation8 + $0xdec] sm:$0xf0]  ;;  %v17807_v56 = vor.u32 %v19558_v31, %v17806_v63  ;;  %v17646_v55 = vld [vmem:[#allocation8 + $0xc80] sm:$0xf] }
 0x67c   :  { %v17823_v27 = vor.u32 %v19562_v13, %v17822_v8  ;;  %v19522_v51 = vld [vmem:[#allocation8 + $0xcac] sm:$0xf0]  ;;  %v18046_v47 = vld [vmem:[#allocation8 + $0xfa0] sm:$0xf] }
 0x67d   :  { %11228 = vmatpush.bf16.msra.mxu3 %v17519_v41  ;;  %11203 = vmatpush.bf16.msra.mxu1 %v17247_v14  ;;  %v19470_v41 = vld [vmem:[#allocation8 + $0xb0c] sm:$0xf0]  ;;  %v17950_v14 = vld [vmem:[#allocation8 + $0xee0] sm:$0xf] }
 0x67e   :  { %v17455_v24 = vor.u32 %v19470_v41, %v17454_v34  ;;  %v19554_v0 = vld [vmem:[#allocation8 + $0xdac] sm:$0xf0]  ;;  %v17902_v13 = vld [vmem:[#allocation8 + $0xe80] sm:$0xf] }
 0x67f   :  { %11216 = vmatpush.bf16.msra.mxu2 %v17375_v4  ;;  %11191 = vmatpush.bf16.msra.mxu0 %v17103_v26  ;;  %v19594_v4 = vld [vmem:[#allocation8 + $0xeec] sm:$0xf0]  ;;  %v17695_v26 = vor.u32 %v19530_v48, %v17694_v42  ;;  %v17791_v34 = vor.u32 %v19554_v0, %v17790_v59  ;;  %v17774_v48 = vld [vmem:[#allocation8 + $0xd80] sm:$0xf] }
 0x680   :  { %v19518_v42 = vld [vmem:[#allocation8 + $0xc8c] sm:$0xf0]  ;;  %v17630_v18 = vld [vmem:[#allocation8 + $0xc60] sm:$0xf] }
 0x681   :  { %11229 = vmatpush.bf16.msra.mxu3 %v17503_v17  ;;  %11204 = vmatpush.bf16.msra.mxu1 %v17231_v29  ;;  %v17327_v17 = vor.u32 %v19438_v5, %v17326_v50  ;;  %v17951_v29 = vor.u32 %v19594_v4, %v17950_v14  ;;  %v19586_v50 = vld [vmem:[#allocation8 + $0xeac] sm:$0xf0]  ;;  %v18030_v4 = vld [vmem:[#allocation8 + $0xf80] sm:$0xf]  ;;  %v17647_v25 = vor.u32 %v19518_v42, %v17646_v55  ;;  %v20162_v59 = vpop.f32.mrf.mxu3 }
 0x682   :  { %v17919_v41 = vor.u32 %v19586_v50, %v17918_v2  ;;  %v19582_v14 = vld [vmem:[#allocation8 + $0xe8c] sm:$0xf0]  ;;  %v18014_v63 = vld [vmem:[#allocation8 + $0xf60] sm:$0xf] }
 0x683   :  { %11217 = vmatpush.bf16.msra.mxu2 %v17359_v49  ;;  %11192 = vmatpush.bf16.msra.mxu0 %v17087_v53  ;;  %v17678_v49 = vld [vmem:[#allocation8 + $0xcc0] sm:$0xf]  ;;  %v19614_v11 = vld [vmem:[#allocation8 + $0xf8c] sm:$0xf0]  ;;  %v17903_v38 = vor.u32 %v19582_v14, %v17902_v13  ;;  %v1167_v13 = vperm.slane %v20108_v1, 7 }
 0x684   :  { %v17679_v46 = vor.u32 %v19526_v30, %v17678_v49  ;;  %v17662_v53 = vld [vmem:[#allocation8 + $0xca0] sm:$0xf]  ;;  %v19514_v9 = vld [vmem:[#allocation8 + $0xc6c] sm:$0xf0] }
 0x685   :  { %11230 = vmatpush.bf16.msra.mxu3 %v17487_v39  ;;  %11205 = vmatpush.bf16.msra.mxu1 %v17215_v60  ;;  %v18062_v39 = vld [vmem:[#allocation8 + $0xfc0] sm:$0xf]  ;;  %v20147_v60 = vpack.c.bf16 %v7979_v23, %v7979_v23  ;;  %v17663_v5 = vor.u32 %v19522_v51, %v17662_v53  ;;  %v19578_v30 = vld [vmem:[#allocation8 + $0xe6c] sm:$0xf0]  ;;  %v17631_v31 = vor.u32 %v19514_v9, %v17630_v18 }
 0x686   :  { %v17758_v23 = vld [vmem:[#allocation8 + $0xd60] sm:$0xf]  ;;  %v19574_v51 = vld [vmem:[#allocation8 + $0xe4c] sm:$0xf0] }
 0x687   :  { %11218 = vmatpush.bf16.msra.mxu2 %v17343_v62  ;;  %11193 = vmatpush.bf16.msra.mxu0 %v17071_v12  ;;  %v18063_v62 = vor.u32 %v19622_v45, %v18062_v39  ;;  %v19550_v12 = vld [vmem:[#allocation8 + $0xd8c] sm:$0xf0]  ;;  %v17886_v49 = vld [vmem:[#allocation8 + $0xe60] sm:$0xf] }
 0x688   :  { %v17887_v44 = vor.u32 %v19578_v30, %v17886_v49  ;;  %v17614_v39 = vld [vmem:[#allocation8 + $0xc40] sm:$0xf]  ;;  %v19510_v45 = vld [vmem:[#allocation8 + $0xc4c] sm:$0xf0] }
 0x689   :  { %11231 = vmatpush.bf16.msra.mxu3 %v17471_v33  ;;  %11206 = vmatpush.bf16.msra.mxu1 %v17199_v15  ;;  %v19618_v33 = vld [vmem:[#allocation8 + $0xfac] sm:$0xf0]  ;;  %v20153_v15 = vpop.f32.mrf.mxu0  ;;  %v17870_v53 = vld [vmem:[#allocation8 + $0xe40] sm:$0xf]  ;;  %v17615_v2 = vor.u32 %v19510_v45, %v17614_v39  ;;  %v16288_v45 = vld [vmem:[#allocation8 + $0x1f0] sm:$0xf0] }
 0x68a   :  { %11194 = vmatmul.bf16.vlgmr.msra.gmra.mxu0 %v20141_v19  ;;  %v18047_v8 = vor.u32 %v19618_v33, %v18046_v47  ;;  %v19606_v0 = vld [vmem:[#allocation8 + $0xf4c] sm:$0xf0]  ;;  %v17871_v33 = vor.u32 %v19574_v51, %v17870_v53  ;;  %v17982_v14 = vld [vmem:[#allocation8 + $0xf20] sm:$0xf]  ;;  %v19240_v53 = vld [vmem:[#allocation8 + $0x3e4] sm:$0xf] }
 0x68b   :  { %11219 = vmatpush.bf16.msra.mxu2 %v17327_v17  ;;  %11238 = vmatpush.bf16.msrb.mxu0 %v17695_v26  ;;  %v17775_v17 = vor.u32 %v19550_v12, %v17774_v48  ;;  %v7822_v26 = vadd.f32 %v20129_v3, %v20111_v16  ;;  %v19538_v48 = vld [vmem:[#allocation8 + $0xd2c] sm:$0xf0]  ;;  %v17710_v9 = vld [vmem:[#allocation8 + $0xd00] sm:$0xf]  ;;  %v16544_v51 = vld [vmem:[#allocation8 + $0x3f0] sm:$0xf0] }
 0x68c   :  { %11207 = vmatmul.bf16.vlgmr.msra.gmra.mxu1 %v20143_v35  ;;  %v19570_v12 = vld [vmem:[#allocation8 + $0xe2c] sm:$0xf0]  ;;  %v17966_v1 = vld [vmem:[#allocation8 + $0xf00] sm:$0xf] }
 0x68d   :  { %11232 = vmatpush.bf16.msra.mxu3 %v17455_v24  ;;  %11251 = vmatpush.bf16.msrb.mxu1 %v17823_v27  ;;  %v20155_v24 = vpop.f32.mrf.mxu1  ;;  %v18031_v27 = vor.u32 %v19614_v11, %v18030_v4  ;;  %v7835_v16 = vadd.f32 %v20131_v7, %v7822_v26  ;;  %v19602_v4 = vld [vmem:[#allocation8 + $0xf2c] sm:$0xf0] }
 0x68e   :  { %11220 = vmatmul.bf16.vlgmr.msra.gmra.mxu2 %v20145_v58  ;;  %v19566_v49 = vld [vmem:[#allocation8 + $0xe0c] sm:$0xf0] }
 0x68f   :  { %11264 = vmatpush.bf16.msrb.mxu2 %v17951_v29  ;;  %11239 = vmatpush.bf16.msrb.mxu0 %v17679_v46  ;;  %v19546_v29 = vld [vmem:[#allocation8 + $0xd6c] sm:$0xf0]  ;;  %v17742_v46 = vld [vmem:[#allocation8 + $0xd40] sm:$0xf]  ;;  %v7848_v55 = vadd.f32 %v20133_v32, %v7835_v16  ;;  %v16416_v16 = vld [vmem:[#allocation8 + $0x2f0] sm:$0xf0] }
 0x690   :  { %11233 = vmatmul.bf16.vlgmr.msra.gmra.mxu3 %v20147_v60  ;;  %v17759_v43 = vor.u32 %v19546_v29, %v17758_v23  ;;  %v19534_v23 = vld [vmem:[#allocation8 + $0xd0c] sm:$0xf0]  ;;  %v17838_v32 = vld [vmem:[#allocation8 + $0xe00] sm:$0xf]  ;;  %v17983_v29 = vor.u32 %v19602_v4, %v17982_v14 }
 0x691   :  { %11277 = vmatpush.bf16.msrb.mxu3 %v18079_v36  ;;  %11252 = vmatpush.bf16.msrb.mxu1 %v17807_v56  ;;  %v19610_v36 = vld [vmem:[#allocation8 + $0xf6c] sm:$0xf0]  ;;  %v20159_v56 = vpop.f32.mrf.mxu2  ;;  %v7875_v50 = vpop.f32.mrf.mxu0 }
 0x692   :  { %v18015_v3 = vor.u32 %v19610_v36, %v18014_v63  ;;  %v19598_v30 = vld [vmem:[#allocation8 + $0xf0c] sm:$0xf0]  ;;  %v7914_v63 = vpop.f32.mrf.mxu3  ;;  %v7874_v36 = vadd.f32 %v20153_v15, %v1167_v13 }
 0x693   :  { %11265 = vmatpush.bf16.msrb.mxu2 %v17935_v52  ;;  %11240 = vmatpush.bf16.msrb.mxu0 %v17663_v5  ;;  %v19542_v52 = vld [vmem:[#allocation8 + $0xd4c] sm:$0xf0]  ;;  %v17598_v5 = vld [vmem:[#allocation8 + $0xc20] sm:$0xf]  ;;  %v17967_v15 = vor.u32 %v19598_v30, %v17966_v1  ;;  %v19132_v30 = vld [vmem:[#allocation8 + $0x84] sm:$0xf] }
 0x694   :  { %v17743_v47 = vor.u32 %v19542_v52, %v17742_v46  ;;  %v19208_v46 = vld [vmem:[#allocation8 + $0x2e4] sm:$0xf]  ;;  %v17839_v52 = vor.u32 %v19566_v49, %v17838_v32  ;;  %v7887_v50 = vadd.f32 %v20155_v24, %v7874_v36  ;;  %v16384_v32 = vld [vmem:[#allocation8 + $0x2b0] sm:$0xf0] }
 0x695   :  { %11278 = vmatpush.bf16.msrb.mxu3 %v18063_v62  ;;  %11253 = vmatpush.bf16.msrb.mxu1 %v17791_v34  ;;  %v17998_v62 = vld [vmem:[#allocation8 + $0xf40] sm:$0xf]  ;;  %v19506_v34 = vld [vmem:[#allocation8 + $0xc2c] sm:$0xf0]  ;;  %v7888_v7 = vpop.f32.mrf.mxu1  ;;  %v16112_v63 = vld [vmem:[#allocation8 + $0x90] sm:$0xf0] }
 0x696   :  { %v17999_v42 = vor.u32 %v19606_v0, %v17998_v62  ;;  %v17599_v11 = vor.u32 %v19506_v34, %v17598_v5  ;;  %v7981_v62 = vmax.f32 %v20090_v6, 0.0  ;;  %v19140_v5 = vld [vmem:[#allocation8 + $0xc4] sm:$0xf]  ;;  %v16144_v34 = vld [vmem:[#allocation8 + $0xd0] sm:$0xf0]  ;;  %v7900_v14 = vadd.f32 %v20159_v56, %v7887_v50 }
 0x697   :  { %11266 = vmatpush.bf16.msrb.mxu2 %v17919_v41  ;;  %11241 = vmatpush.bf16.msrb.mxu0 %v17647_v25  ;;  %v17726_v41 = vld [vmem:[#allocation8 + $0xd20] sm:$0xf]  ;;  %v16272_v7 = vld [vmem:[#allocation8 + $0x1d0] sm:$0xf0]  ;;  %v19236_v6 = vld [vmem:[#allocation8 + $0x3c4] sm:$0xf]  ;;  %v16147_v24 = vor.u32 %v19140_v5, %v16144_v34 }
 0x698   :  { %v17582_v25 = vld [vmem:[#allocation8 + $0xc00] sm:$0xf]  ;;  %v16512_v56 = vld [vmem:[#allocation8 + $0x3b0] sm:$0xf0]  ;;  %v19164_v36 = vld [vmem:[#allocation8 + $0x184] sm:$0xf] }
 0x699   :  { %11279 = vmatpush.bf16.msrb.mxu3 %v18047_v8  ;;  %11254 = vmatpush.bf16.msrb.mxu1 %v17775_v17  ;;  %v17854_v8 = vld [vmem:[#allocation8 + $0xe20] sm:$0xf]  ;;  %v19502_v17 = vld [vmem:[#allocation8 + $0xc0c] sm:$0xf0]  ;;  %v7901_v26 = vpop.f32.mrf.mxu2  ;;  %v19192_v50 = vld [vmem:[#allocation8 + $0x264] sm:$0xf] }
 0x69a   :  { %v17855_v18 = vor.u32 %v19570_v12, %v17854_v8  ;;  %v17583_v39 = vor.u32 %v19502_v17, %v17582_v25  ;;  %v16528_v8 = vld [vmem:[#allocation8 + $0x3d0] sm:$0xf0]  ;;  %v20173_v12 = vpack.c.bf16 %v7981_v62, %v7981_v62  ;;  %v19136_v25 = vld [vmem:[#allocation8 + $0xa4] sm:$0xf] }
 0x69b   :  { %11267 = vmatpush.bf16.msrb.mxu2 %v17903_v38  ;;  %11242 = vmatpush.bf16.msrb.mxu0 %v17631_v31  ;;  %v17727_v38 = vor.u32 %v19538_v48, %v17726_v41  ;;  %v19144_v31 = vld [vmem:[#allocation8 + $0xe4] sm:$0xf]  ;;  %v16128_v17 = vld [vmem:[#allocation8 + $0xb0] sm:$0xf0] }
 0x69c   :  { %v19172_v41 = vld [vmem:[#allocation8 + $0x1c4] sm:$0xf]  ;;  %v16096_v62 = vld [vmem:[#allocation8 + $0x70] sm:$0xf0] }
 0x69d   :  { %11280 = vmatpush.bf16.msrb.mxu3 %v18031_v27  ;;  %11255 = vmatpush.bf16.msrb.mxu1 %v17759_v43  ;;  %v7861_v27 = vadd.f32 %v20135_v22, %v7848_v55  ;;  %v16160_v43 = vld [vmem:[#allocation8 + $0xf0] sm:$0xf0]  ;;  %v17711_v22 = vor.u32 %v19534_v23, %v17710_v9  ;;  %v19204_v55 = vld [vmem:[#allocation8 + $0x2c4] sm:$0xf]  ;;  %v16275_v4 = vor.u32 %v19172_v41, %v16272_v7 }
 0x69e   :  { %v16256_v9 = vld [vmem:[#allocation8 + $0x1b0] sm:$0xf0]  ;;  %v19200_v23 = vld [vmem:[#allocation8 + $0x2a4] sm:$0xf] }
 0x69f   :  { %11268 = vmatpush.bf16.msrb.mxu2 %v17887_v44  ;;  %11243 = vmatpush.bf16.msrb.mxu0 %v17615_v2  ;;  %v19176_v44 = vld [vmem:[#allocation8 + $0x1e4] sm:$0xf]  ;;  %v7982_v0 = vmax.f32 %v7861_v27, 0.0  ;;  %v16163_v2 = vor.u32 %v19144_v31, %v16160_v43  ;;  %v16131_v27 = vor.u32 %v19136_v25, %v16128_v17  ;;  %v16387_v1 = vor.u32 %v19200_v23, %v16384_v32  ;;  %v16240_v43 = vld [vmem:[#allocation8 + $0x190] sm:$0xf0] }
 0x6a0   :  { %v19232_v26 = vld [vmem:[#allocation8 + $0x3a4] sm:$0xf]  ;;  %v16480_v5 = vld [vmem:[#allocation8 + $0x370] sm:$0xf0] }
 0x6a1   :  { %11281 = vmatpush.bf16.msrb.mxu3 %v18015_v3  ;;  %11256 = vmatpush.bf16.msrb.mxu1 %v17743_v47  ;;  %v7980_v3 = vmax.f32 %v20076_v21, 0.0  ;;  %v16291_v47 = vor.u32 %v19176_v44, %v16288_v45  ;;  %v16547_v21 = vor.u32 %v19240_v53, %v16544_v51  ;;  %v20175_v13 = vpack.c.bf16 %v7982_v0, %v7982_v0  ;;  %v19196_v44 = vld [vmem:[#allocation8 + $0x284] sm:$0xf]  ;;  %v16336_v25 = vld [vmem:[#allocation8 + $0x250] sm:$0xf0] }
 0x6a2   :  { %v16515_v31 = vor.u32 %v19232_v26, %v16512_v56  ;;  %v19128_v51 = vld [vmem:[#allocation8 + $0x64] sm:$0xf] }
 0x6a3   :  { %11269 = vmatpush.bf16.msrb.mxu2 %v17871_v33  ;;  %11244 = vmatpush.bf16.msrb.mxu0 %v17599_v11  ;;  %v16419_v33 = vor.u32 %v19208_v46, %v16416_v16  ;;  %v20171_v48 = vpack.c.bf16 %v7980_v3, %v7980_v3  ;;  %v19228_v46 = vld [vmem:[#allocation8 + $0x384] sm:$0xf]  ;;  %v16496_v16 = vld [vmem:[#allocation8 + $0x390] sm:$0xf0]  ;;  %v16115_v3 = vor.u32 %v19132_v30, %v16112_v63 }
 0x6a4   :  { %v19160_v0 = vld [vmem:[#allocation8 + $0x164] sm:$0xf]  ;;  %v16099_v34 = vor.u32 %v19128_v51, %v16096_v62  ;;  %v16192_v63 = vld [vmem:[#allocation8 + $0x130] sm:$0xf0] }
 0x6a5   :  { %11282 = vmatpush.bf16.msrb.mxu3 %v17999_v42  ;;  %11257 = vmatpush.bf16.msrb.mxu1 %v17727_v38  ;;  %v16400_v42 = vld [vmem:[#allocation8 + $0x2d0] sm:$0xf0]  ;;  %v19168_v38 = vld [vmem:[#allocation8 + $0x1a4] sm:$0xf] }
 0x6a6   :  { %v16403_v11 = vor.u32 %v19204_v55, %v16400_v42  ;;  %v16259_v49 = vor.u32 %v19168_v38, %v16256_v9  ;;  %v19124_v55 = vld [vmem:[#allocation8 + $0x44] sm:$0xf]  ;;  %v16080_v42 = vld [vmem:[#allocation8 + $0x50] sm:$0xf0] }
 0x6a7   :  { %11270 = vmatpush.bf16.msrb.mxu2 %v17855_v18  ;;  %11245 = vmatpush.bf16.msrb.mxu0 %v17583_v39  ;;  %v16531_v18 = vor.u32 %v19236_v6, %v16528_v8  ;;  %v16368_v39 = vld [vmem:[#allocation8 + $0x290] sm:$0xf0]  ;;  %v7925_v45 = vpop.f32.mrf.mxu0  ;;  %v19156_v6 = vld [vmem:[#allocation8 + $0x144] sm:$0xf]  ;;  %v16083_v23 = vor.u32 %v19124_v55, %v16080_v42 }
 0x6a8   :  { %v16371_v53 = vor.u32 %v19196_v44, %v16368_v39  ;;  %v16464_v9 = vld [vmem:[#allocation8 + $0x350] sm:$0xf0]  ;;  %v19216_v44 = vld [vmem:[#allocation8 + $0x324] sm:$0xf] }
 0x6a9   :  { %11283 = vmatpush.bf16.msrb.mxu3 %v17983_v29  ;;  %11258 = vmatpush.bf16.msrb.mxu1 %v17711_v22  ;;  %v7913_v29 = vadd.f32 %v20162_v59, %v7900_v14  ;;  %v7938_v22 = vpop.f32.mrf.mxu1  ;;  %v16448_v39 = vld [vmem:[#allocation8 + $0x330] sm:$0xf0]  ;;  %v19180_v51 = vld [vmem:[#allocation8 + $0x204] sm:$0xf] }
 0x6aa   :  { %11246 = vmatmul.bf16.vlgmr.msrb.gmra.mxu0 %v20171_v48  ;;  %v16451_v62 = vor.u32 %v19216_v44, %v16448_v39  ;;  %v16928_v55 = vld [vmem:[#allocation8 + $0x6f0] sm:$0xf0]  ;;  %v19328_v39 = vld [vmem:[#allocation8 + $0x6a4] sm:$0xf] }
 0x6ab   :  { %11271 = vmatpush.bf16.msrb.mxu2 %v17839_v52  ;;  %11290 = vmatpush.bf16.msra.mxu0 %v16163_v2  ;;  %v7926_v59 = vadd.f32 %v7925_v45, %v7913_v29  ;;  %v16243_v52 = vor.u32 %v19164_v36, %v16240_v43  ;;  %v16224_v2 = vld [vmem:[#allocation8 + $0x170] sm:$0xf0]  ;;  %v19120_v29 = vld [vmem:[#allocation8 + $0x24] sm:$0xf] }
 0x6ac   :  { %11259 = vmatmul.bf16.vlgmr.msrb.gmra.mxu1 %v20173_v12  ;;  %v19184_v36 = vld [vmem:[#allocation8 + $0x224] sm:$0xf]  ;;  %v16768_v44 = vld [vmem:[#allocation8 + $0x5b0] sm:$0xf0] }
 0x6ad   :  { %11284 = vmatpush.bf16.msrb.mxu3 %v17967_v15  ;;  %11303 = vmatpush.bf16.msra.mxu1 %v16291_v47  ;;  %v16499_v15 = vor.u32 %v19228_v46, %v16496_v16  ;;  %v16352_v47 = vld [vmem:[#allocation8 + $0x270] sm:$0xf0]  ;;  %v7939_v41 = vadd.f32 %v7938_v22, %v7926_v59  ;;  %v19116_v46 = vld [vmem:[#allocation8 + $0x4] sm:$0xf] }
 0x6ae   :  { %11272 = vmatmul.bf16.vlgmr.msrb.gmra.mxu2 %v20175_v13  ;;  %v16355_v7 = vor.u32 %v19192_v50, %v16352_v47  ;;  %v16048_v16 = vld [vmem:[#allocation8 + $0x10] sm:$0xf0]  ;;  %v19212_v50 = vld [vmem:[#allocation8 + $0x304] sm:$0xf] }
 0x6af   :  { %11316 = vmatpush.bf16.msra.mxu2 %v16419_v33  ;;  %11291 = vmatpush.bf16.msra.mxu0 %v16147_v24  ;;  %v19224_v33 = vld [vmem:[#allocation8 + $0x364] sm:$0xf]  ;;  %v7927_v38 = vpop.f32.mrf.mxu0  ;;  %v16432_v47 = vld [vmem:[#allocation8 + $0x310] sm:$0xf0] }
 0x6b0   :  { %v16483_v8 = vor.u32 %v19224_v33, %v16480_v5  ;;  %v19272_v33 = vld [vmem:[#allocation8 + $0x4e4] sm:$0xf]  ;;  %v16672_v5 = vld [vmem:[#allocation8 + $0x4f0] sm:$0xf0] }
 0x6b1   :  { %11329 = vmatpush.bf16.msra.mxu3 %v16547_v21  ;;  %11304 = vmatpush.bf16.msra.mxu1 %v16275_v4  ;;  %v16227_v21 = vor.u32 %v19160_v0, %v16224_v2  ;;  %v7951_v24 = vpop.f32.mrf.mxu2  ;;  %v16208_v4 = vld [vmem:[#allocation8 + $0x150] sm:$0xf0]  ;;  %v7940_v26 = vpop.f32.mrf.mxu1 }
 0x6b2   :  { %v7952_v17 = vadd.f32 %v7951_v24, %v7939_v41  ;;  %v16211_v56 = vor.u32 %v19156_v6, %v16208_v4  ;;  %v16304_v2 = vld [vmem:[#allocation8 + $0x210] sm:$0xf0]  ;;  %v16051_v41 = vor.u32 %v19116_v46, %v16048_v16  ;;  %v16675_v4 = vor.u32 %v19272_v33, %v16672_v5  ;;  %v19360_v46 = vld [vmem:[#allocation8 + $0x7a4] sm:$0xf] }
 0x6b3   :  { %11317 = vmatpush.bf16.msra.mxu2 %v16403_v11  ;;  %11292 = vmatpush.bf16.msra.mxu0 %v16131_v27  ;;  %v7964_v14 = vpop.f32.mrf.mxu3  ;;  %v19188_v11 = vld [vmem:[#allocation8 + $0x244] sm:$0xf]  ;;  %v16307_v6 = vor.u32 %v19180_v51, %v16304_v2  ;;  %v17056_v24 = vld [vmem:[#allocation8 + $0x7f0] sm:$0xf0] }
 0x6b4   :  { %v7965_v32 = vadd.f32 %v7964_v14, %v7952_v17  ;;  %v16339_v27 = vor.u32 %v19188_v11, %v16336_v25  ;;  %v16435_v14 = vor.u32 %v19212_v50, %v16432_v47  ;;  %v19268_v17 = vld [vmem:[#allocation8 + $0x4c4] sm:$0xf]  ;;  %v16656_v38 = vld [vmem:[#allocation8 + $0x4d0] sm:$0xf0] }
 0x6b5   :  { %11330 = vmatpush.bf16.msra.mxu3 %v16531_v18  ;;  %11305 = vmatpush.bf16.msra.mxu1 %v16259_v49  ;;  %v19220_v18 = vld [vmem:[#allocation8 + $0x344] sm:$0xf]  ;;  %v16064_v49 = vld [vmem:[#allocation8 + $0x30] sm:$0xf0] }
 0x6b6   :  { %v16467_v30 = vor.u32 %v19220_v18, %v16464_v9  ;;  %v7983_v43 = vmax.f32 %v7965_v32, 0.0  ;;  %v16067_v45 = vor.u32 %v19120_v29, %v16064_v49  ;;  %v19300_v18 = vld [vmem:[#allocation8 + $0x5c4] sm:$0xf]  ;;  %v16912_v26 = vld [vmem:[#allocation8 + $0x6d0] sm:$0xf0]  ;;  %v16659_v29 = vor.u32 %v19268_v17, %v16656_v38 }
 0x6b7   :  { %11318 = vmatpush.bf16.msra.mxu2 %v16387_v1  ;;  %11293 = vmatpush.bf16.msra.mxu0 %v16115_v3  ;;  %v19152_v1 = vld [vmem:[#allocation8 + $0x124] sm:$0xf]  ;;  %v17024_v16 = vld [vmem:[#allocation8 + $0x7b0] sm:$0xf0] }
 0x6b8   :  { %v20182_v3 = vpack.c.bf16 %v7983_v43, %v7983_v43  ;;  %v16195_v59 = vor.u32 %v19152_v1, %v16192_v63  ;;  %v19332_v32 = vld [vmem:[#allocation8 + $0x6c4] sm:$0xf]  ;;  %v16640_v63 = vld [vmem:[#allocation8 + $0x4b0] sm:$0xf0] }
 0x6b9   :  { %11331 = vmatpush.bf16.msra.mxu3 %v16515_v31  ;;  %11306 = vmatpush.bf16.msra.mxu1 %v16243_v52  ;;  %v16320_v31 = vld [vmem:[#allocation8 + $0x230] sm:$0xf0]  ;;  %v19148_v52 = vld [vmem:[#allocation8 + $0x104] sm:$0xf]  ;;  %v7953_v0 = vpop.f32.mrf.mxu2 }
 0x6ba   :  { %v16323_v22 = vor.u32 %v19184_v36, %v16320_v31  ;;  %11285 = vmatmul.bf16.vlgmr.msrb.gmra.mxu3 %v20182_v3  ;;  %v19264_v49 = vld [vmem:[#allocation8 + $0x4a4] sm:$0xf]  ;;  %v8512_v31 = vld [vmem:[#allocation10] sm:$0xf]  ;;  %v16752_v2 = vld [vmem:[#allocation8 + $0x590] sm:$0xf0] }
 0x6bb   :  { %11319 = vmatpush.bf16.msra.mxu2 %v16371_v53  ;;  %11294 = vmatpush.bf16.msra.mxu0 %v16099_v34  ;;  %v16176_v53 = vld [vmem:[#allocation8 + $0x110] sm:$0xf0]  ;;  %v19304_v34 = vld [vmem:[#allocation8 + $0x5e4] sm:$0xf] }
 0x6bc   :  { %v16179_v42 = vor.u32 %v19148_v52, %v16176_v53  ;;  %v19296_v36 = vld [vmem:[#allocation8 + $0x5a4] sm:$0xf]  ;;  %v16880_v47 = vld [vmem:[#allocation8 + $0x690] sm:$0xf0] }
 0x6bd   :  { %11332 = vmatpush.bf16.msra.mxu3 %v16499_v15  ;;  %11307 = vmatpush.bf16.msra.mxu1 %v16227_v21  ;;  %v7966_v15 = vpop.f32.mrf.mxu3  ;;  %v16800_v21 = vld [vmem:[#allocation8 + $0x5f0] sm:$0xf0]  ;;  %v16771_v52 = vor.u32 %v19296_v36, %v16768_v44  ;;  %v19260_v51 = vld [vmem:[#allocation8 + $0x484] sm:$0xf] }
 0x6be   :  { %v16803_v11 = vor.u32 %v19304_v34, %v16800_v21  ;;  %v19292_v0 = vld [vmem:[#allocation8 + $0x584] sm:$0xf]  ;;  %v17027_v15 = vor.u32 %v19360_v46, %v17024_v16  ;;  %v17008_v34 = vld [vmem:[#allocation8 + $0x790] sm:$0xf0] }
 0x6bf   :  { %11320 = vmatpush.bf16.msra.mxu2 %v16355_v7  ;;  %11295 = vmatpush.bf16.msra.mxu0 %v16083_v23  ;;  %v19336_v7 = vld [vmem:[#allocation8 + $0x6e4] sm:$0xf]  ;;  %v16784_v23 = vld [vmem:[#allocation8 + $0x5d0] sm:$0xf0] }
 0x6c0   :  { %v16931_v25 = vor.u32 %v19336_v7, %v16928_v55  ;;  %v16787_v1 = vor.u32 %v19300_v18, %v16784_v23  ;;  %v19324_v50 = vld [vmem:[#allocation8 + $0x684] sm:$0xf]  ;;  %v16755_v55 = vor.u32 %v19292_v0, %v16752_v2  ;;  %v16864_v17 = vld [vmem:[#allocation8 + $0x670] sm:$0xf0] }
 0x6c1   :  { %11333 = vmatpush.bf16.msra.mxu3 %v16483_v8  ;;  %11308 = vmatpush.bf16.msra.mxu1 %v16211_v56  ;;  %v19368_v8 = vld [vmem:[#allocation8 + $0x7e4] sm:$0xf]  ;;  %v16992_v18 = vld [vmem:[#allocation8 + $0x770] sm:$0xf0] }
 0x6c2   :  { %v17059_v9 = vor.u32 %v19368_v8, %v17056_v24  ;;  %v19364_v56 = vld [vmem:[#allocation8 + $0x7c4] sm:$0xf]  ;;  %v16608_v8 = vld [vmem:[#allocation8 + $0x470] sm:$0xf0] }
 0x6c3   :  { %11321 = vmatpush.bf16.msra.mxu2 %v16339_v27  ;;  %11296 = vmatpush.bf16.msra.mxu0 %v16067_v45  ;;  %v17040_v27 = vld [vmem:[#allocation8 + $0x7d0] sm:$0xf0]  ;;  %v19356_v5 = vld [vmem:[#allocation8 + $0x784] sm:$0xf] }
 0x6c4   :  { %v17043_v43 = vor.u32 %v19364_v56, %v17040_v27  ;;  %v16896_v45 = vld [vmem:[#allocation8 + $0x6b0] sm:$0xf0]  ;;  %v19288_v24 = vld [vmem:[#allocation8 + $0x564] sm:$0xf] }
 0x6c5   :  { %11334 = vmatpush.bf16.msra.mxu3 %v16467_v30  ;;  %11309 = vmatpush.bf16.msra.mxu1 %v16195_v59  ;;  %v16915_v30 = vor.u32 %v19332_v32, %v16912_v26  ;;  %v16643_v59 = vor.u32 %v19264_v49, %v16640_v63  ;;  %v16899_v53 = vor.u32 %v19328_v39, %v16896_v45  ;;  %v19352_v38 = vld [vmem:[#allocation8 + $0x764] sm:$0xf]  ;;  %v16592_v56 = vld [vmem:[#allocation8 + $0x450] sm:$0xf0] }
 0x6c6   :  { %v19252_v26 = vld [vmem:[#allocation8 + $0x444] sm:$0xf]  ;;  %v16848_v63 = vld [vmem:[#allocation8 + $0x650] sm:$0xf0] }
 0x6c7   :  { %11322 = vmatpush.bf16.msra.mxu2 %v16323_v22  ;;  %11297 = vmatpush.bf16.msra.mxu0 %v16051_v41  ;;  %v8514_v22 = vperm.slane %v8512_v31, 0  ;;  %v11091_v33 = vpop.f32.mrf.mxu0  ;;  %v19284_v27 = vld [vmem:[#allocation8 + $0x544] sm:$0xf]  ;;  %v16976_v39 = vld [vmem:[#allocation8 + $0x750] sm:$0xf0]  ;;  %v16595_v46 = vor.u32 %v19252_v26, %v16592_v56 }
 0x6c8   :  { %v19348_v44 = vld [vmem:[#allocation8 + $0x744] sm:$0xf]  ;;  %v16704_v0 = vld [vmem:[#allocation8 + $0x530] sm:$0xf0] }
 0x6c9   :  { %11335 = vmatpush.bf16.msra.mxu3 %v16451_v62  ;;  %11310 = vmatpush.bf16.msra.mxu1 %v16179_v42  ;;  %v16624_v62 = vld [vmem:[#allocation8 + $0x490] sm:$0xf0]  ;;  %v11092_v41 = vadd.f32 %v11091_v33, %v8514_v22  ;;  %v11104_v21 = vpop.f32.mrf.mxu1  ;;  %v16883_v42 = vor.u32 %v19324_v50, %v16880_v47  ;;  %v19344_v50 = vld [vmem:[#allocation8 + $0x724] sm:$0xf] }
 0x6ca   :  { %11298 = vmatmul.bf16.vlgmr.msra.gmra.mxu0 %v20096_v54  ;;  %v16627_v7 = vor.u32 %v19260_v51, %v16624_v62  ;;  %v19280_v51 = vld [vmem:[#allocation8 + $0x524] sm:$0xf]  ;;  %v16979_v62 = vor.u32 %v19348_v44, %v16976_v39  ;;  %v16832_v2 = vld [vmem:[#allocation8 + $0x630] sm:$0xf0] }
 0x6cb   :  { %11323 = vmatpush.bf16.msra.mxu2 %v16307_v6  ;;  %11342 = vmatpush.bf16.msrb.mxu0 %v16675_v4  ;;  %v19256_v6 = vld [vmem:[#allocation8 + $0x464] sm:$0xf]  ;;  %v17011_v4 = vor.u32 %v19356_v5, %v17008_v34  ;;  %v16960_v47 = vld [vmem:[#allocation8 + $0x730] sm:$0xf0] }
 0x6cc   :  { %11311 = vmatmul.bf16.vlgmr.msra.gmra.mxu1 %v20098_v61  ;;  %v19244_v5 = vld [vmem:[#allocation8 + $0x404] sm:$0xf]  ;;  %v16560_v34 = vld [vmem:[#allocation8 + $0x410] sm:$0xf0] }
 0x6cd   :  { %11336 = vmatpush.bf16.msra.mxu3 %v16435_v14  ;;  %11355 = vmatpush.bf16.msrb.mxu1 %v16803_v11  ;;  %v11105_v14 = vadd.f32 %v11104_v21, %v11092_v41  ;;  %v16736_v11 = vld [vmem:[#allocation8 + $0x570] sm:$0xf0]  ;;  %v16707_v41 = vor.u32 %v19280_v51, %v16704_v0 }
 0x6ce   :  { %11324 = vmatmul.bf16.vlgmr.msra.gmra.mxu2 %v20100_v10  ;;  %v16739_v23 = vor.u32 %v19288_v24, %v16736_v11  ;;  %v16816_v24 = vld [vmem:[#allocation8 + $0x610] sm:$0xf0] }
 0x6cf   :  { %11368 = vmatpush.bf16.msrb.mxu2 %v16931_v25  ;;  %11343 = vmatpush.bf16.msrb.mxu0 %v16659_v29  ;;  %v19320_v25 = vld [vmem:[#allocation8 + $0x664] sm:$0xf]  ;;  %v16995_v29 = vor.u32 %v19352_v38, %v16992_v18  ;;  %v16563_v18 = vor.u32 %v19244_v5, %v16560_v34  ;;  %v17296_v39 = vld [vmem:[#allocation8 + $0x9d0] sm:$0xf0] }
 0x6d0   :  { %11337 = vmatmul.bf16.vlgmr.msra.gmra.mxu3 %v20102_v37  ;;  %v16867_v32 = vor.u32 %v19320_v25, %v16864_v17  ;;  %v19400_v25 = vld [vmem:[#allocation8 + $0x8e4] sm:$0xf]  ;;  %v17184_v17 = vld [vmem:[#allocation8 + $0x8f0] sm:$0xf0] }
 0x6d1   :  { %11381 = vmatpush.bf16.msrb.mxu3 %v17059_v9  ;;  %11356 = vmatpush.bf16.msrb.mxu1 %v16787_v1  ;;  %v16611_v9 = vor.u32 %v19256_v6, %v16608_v8  ;;  %v11117_v49 = vpop.f32.mrf.mxu2  ;;  %v16720_v1 = vld [vmem:[#allocation8 + $0x550] sm:$0xf0]  ;;  %v11106_v45 = vpop.f32.mrf.mxu1  ;;  %v16963_v6 = vor.u32 %v19344_v50, %v16960_v47  ;;  %v19432_v38 = vld [vmem:[#allocation8 + $0x9e4] sm:$0xf] }
 0x6d2   :  { %v11118_v36 = vadd.f32 %v11117_v49, %v11105_v14  ;;  %v19340_v14 = vld [vmem:[#allocation8 + $0x704] sm:$0xf]  ;;  %v17152_v0 = vld [vmem:[#allocation8 + $0x8b0] sm:$0xf0] }
 0x6d3   :  { %11369 = vmatpush.bf16.msrb.mxu2 %v16915_v30  ;;  %11344 = vmatpush.bf16.msrb.mxu0 %v16643_v59  ;;  %v19316_v30 = vld [vmem:[#allocation8 + $0x644] sm:$0xf]  ;;  %v11130_v31 = vpop.f32.mrf.mxu3  ;;  %v16723_v59 = vor.u32 %v19284_v27, %v16720_v1  ;;  %v17187_v1 = vor.u32 %v19400_v25, %v17184_v17  ;;  %v17280_v50 = vld [vmem:[#allocation8 + $0x9b0] sm:$0xf0] }
 0x6d4   :  { %v20189_v16 = vadd.f32 %v11130_v31, %v11118_v36  ;;  %v16851_v22 = vor.u32 %v19316_v30, %v16848_v63  ;;  %v19496_v27 = vld [vmem:[#allocation8 + $0xbe4] sm:$0xf]  ;;  %v17168_v31 = vld [vmem:[#allocation8 + $0x8d0] sm:$0xf0] }
 0x6d5   :  { %11382 = vmatpush.bf16.msrb.mxu3 %v17043_v43  ;;  %11357 = vmatpush.bf16.msrb.mxu1 %v16771_v52  ;;  %v11093_v43 = vpop.f32.mrf.mxu0  ;;  %v19248_v52 = vld [vmem:[#allocation8 + $0x424] sm:$0xf]  ;;  %v17536_v34 = vld [vmem:[#allocation8 + $0xbb0] sm:$0xf0] }
 0x6d6   :  { %v19396_v36 = vld [vmem:[#allocation8 + $0x8c4] sm:$0xf]  ;;  %v17520_v17 = vld [vmem:[#allocation8 + $0xb90] sm:$0xf0] }
 0x6d7   :  { %11370 = vmatpush.bf16.msrb.mxu2 %v16899_v53  ;;  %11345 = vmatpush.bf16.msrb.mxu0 %v16627_v7  ;;  %v16576_v53 = vld [vmem:[#allocation8 + $0x430] sm:$0xf0]  ;;  %v19276_v7 = vld [vmem:[#allocation8 + $0x504] sm:$0xf] }
 0x6d8   :  { %v16579_v33 = vor.u32 %v19248_v52, %v16576_v53  ;;  %v19428_v43 = vld [vmem:[#allocation8 + $0x9c4] sm:$0xf]  ;;  %v17171_v52 = vor.u32 %v19396_v36, %v17168_v31  ;;  %v17504_v31 = vld [vmem:[#allocation8 + $0xb70] sm:$0xf0] }
 0x6d9   :  { %11383 = vmatpush.bf16.msrb.mxu3 %v17027_v15  ;;  %11358 = vmatpush.bf16.msrb.mxu1 %v16755_v55  ;;  %v19312_v15 = vld [vmem:[#allocation8 + $0x624] sm:$0xf]  ;;  %v16688_v55 = vld [vmem:[#allocation8 + $0x510] sm:$0xf0]  ;;  %v11119_v8 = vpop.f32.mrf.mxu2  ;;  %v17299_v53 = vor.u32 %v19428_v43, %v17296_v39 }
 0x6da   :  { %v16835_v21 = vor.u32 %v19312_v15, %v16832_v2  ;;  %v16691_v26 = vor.u32 %v19276_v7, %v16688_v55  ;;  %v19460_v45 = vld [vmem:[#allocation8 + $0xac4] sm:$0xf] }
 0x6db   :  { %11371 = vmatpush.bf16.msrb.mxu2 %v16883_v42  ;;  %11346 = vmatpush.bf16.msrb.mxu0 %v16611_v9  ;;  %v19308_v42 = vld [vmem:[#allocation8 + $0x604] sm:$0xf]  ;;  %v11132_v11 = vpop.f32.mrf.mxu3  ;;  %v17312_v9 = vld [vmem:[#allocation8 + $0x9f0] sm:$0xf0] }
 0x6dc   :  { %v16819_v56 = vor.u32 %v19308_v42, %v16816_v24  ;;  %v17315_v30 = vor.u32 %v19432_v38, %v17312_v9  ;;  %v19424_v15 = vld [vmem:[#allocation8 + $0x9a4] sm:$0xf]  ;;  %v17136_v42 = vld [vmem:[#allocation8 + $0x890] sm:$0xf0] }
 0x6dd   :  { %11384 = vmatpush.bf16.msrb.mxu3 %v17011_v4  ;;  %11359 = vmatpush.bf16.msrb.mxu1 %v16739_v23  ;;  %v16944_v4 = vld [vmem:[#allocation8 + $0x710] sm:$0xf0]  ;;  %v19464_v23 = vld [vmem:[#allocation8 + $0xae4] sm:$0xf] }
 0x6de   :  { %v16947_v49 = vor.u32 %v19340_v14, %v16944_v4  ;;  %v19456_v47 = vld [vmem:[#allocation8 + $0xaa4] sm:$0xf]  ;;  %v17264_v24 = vld [vmem:[#allocation8 + $0x990] sm:$0xf0] }
 0x6df   :  { %11372 = vmatpush.bf16.msrb.mxu2 %v16867_v32  ;;  %11347 = vmatpush.bf16.msrb.mxu0 %v16595_v46  ;;  %v17440_v32 = vld [vmem:[#allocation8 + $0xaf0] sm:$0xf0]  ;;  %v19488_v5 = vld [vmem:[#allocation8 + $0xba4] sm:$0xf] }
 0x6e0   :  { %v17443_v63 = vor.u32 %v19464_v23, %v17440_v32  ;;  %v17424_v46 = vld [vmem:[#allocation8 + $0xad0] sm:$0xf0]  ;;  %v19388_v55 = vld [vmem:[#allocation8 + $0x884] sm:$0xf]  ;;  %v17539_v8 = vor.u32 %v19488_v5, %v17536_v34 }
 0x6e1   :  { %11385 = vmatpush.bf16.msrb.mxu3 %v16995_v29  ;;  %11360 = vmatpush.bf16.msrb.mxu1 %v16723_v59  ;;  %v17568_v29 = vld [vmem:[#allocation8 + $0xbf0] sm:$0xf0]  ;;  %v19492_v59 = vld [vmem:[#allocation8 + $0xbc4] sm:$0xf]  ;;  %v17427_v51 = vor.u32 %v19460_v45, %v17424_v46  ;;  %v17139_v9 = vor.u32 %v19388_v55, %v17136_v42 }
 0x6e2   :  { %v17571_v44 = vor.u32 %v19496_v27, %v17568_v29  ;;  %v19452_v14 = vld [vmem:[#allocation8 + $0xa84] sm:$0xf]  ;;  %v17392_v4 = vld [vmem:[#allocation8 + $0xa90] sm:$0xf0] }
 0x6e3   :  { %11373 = vmatpush.bf16.msrb.mxu2 %v16851_v22  ;;  %11348 = vmatpush.bf16.msrb.mxu0 %v16579_v33  ;;  %v17552_v22 = vld [vmem:[#allocation8 + $0xbd0] sm:$0xf0]  ;;  %v19484_v25 = vld [vmem:[#allocation8 + $0xb84] sm:$0xf]  ;;  %v17395_v32 = vor.u32 %v19452_v14, %v17392_v4 }
 0x6e4   :  { %v17555_v2 = vor.u32 %v19492_v59, %v17552_v22  ;;  %v17408_v33 = vld [vmem:[#allocation8 + $0xab0] sm:$0xf0]  ;;  %v19416_v27 = vld [vmem:[#allocation8 + $0x964] sm:$0xf] }
 0x6e5   :  { %11386 = vmatpush.bf16.msrb.mxu3 %v16979_v62  ;;  %11361 = vmatpush.bf16.msrb.mxu1 %v16707_v41  ;;  %v19392_v62 = vld [vmem:[#allocation8 + $0x8a4] sm:$0xf]  ;;  %v17411_v7 = vor.u32 %v19456_v47, %v17408_v33  ;;  %v17104_v45 = vld [vmem:[#allocation8 + $0x850] sm:$0xf0] }
 0x6e6   :  { %v17155_v41 = vor.u32 %v19392_v62, %v17152_v0  ;;  %v19480_v36 = vld [vmem:[#allocation8 + $0xb64] sm:$0xf]  ;;  %v17472_v4 = vld [vmem:[#allocation8 + $0xb30] sm:$0xf0] }
 0x6e7   :  { %11374 = vmatpush.bf16.msrb.mxu2 %v16835_v21  ;;  %11349 = vmatpush.bf16.msrb.mxu0 %v16563_v18  ;;  %v17283_v21 = vor.u32 %v19424_v15, %v17280_v50  ;;  %v11143_v11 = vpop.f32.mrf.mxu0  ;;  %v19380_v39 = vld [vmem:[#allocation8 + $0x844] sm:$0xf]  ;;  %v17507_v59 = vor.u32 %v19480_v36, %v17504_v31  ;;  %v17488_v50 = vld [vmem:[#allocation8 + $0xb50] sm:$0xf0] }
 0x6e8   :  { %v11144_v38 = vadd.f32 %v11143_v11, %v20189_v16  ;;  %v19412_v46 = vld [vmem:[#allocation8 + $0x944] sm:$0xf]  ;;  %v17107_v33 = vor.u32 %v19380_v39, %v17104_v45 }
 0x6e9   :  { %11387 = vmatpush.bf16.msrb.mxu3 %v16963_v6  ;;  %11362 = vmatpush.bf16.msrb.mxu1 %v16691_v26  ;;  %v19420_v6 = vld [vmem:[#allocation8 + $0x984] sm:$0xf]  ;;  %v11156_v18 = vpop.f32.mrf.mxu1 }
 0x6ea   :  { %11350 = vmatmul.bf16.vlgmr.msrb.gmra.mxu0 %v20117_v57  ;;  %v17267_v23 = vor.u32 %v19420_v6, %v17264_v24  ;;  %v19384_v26 = vld [vmem:[#allocation8 + $0x864] sm:$0xf]  ;;  %v11157_v29 = vadd.f32 %v11156_v18, %v11144_v38  ;;  %v17216_v6 = vld [vmem:[#allocation8 + $0x930] sm:$0xf0] }
 0x6eb   :  { %11375 = vmatpush.bf16.msrb.mxu2 %v16819_v56  ;;  %11394 = vmatpush.bf16.msra.mxu0 %v17187_v1  ;;  %v17120_v56 = vld [vmem:[#allocation8 + $0x870] sm:$0xf0]  ;;  %v19408_v55 = vld [vmem:[#allocation8 + $0x924] sm:$0xf] }
 0x6ec   :  { %11363 = vmatmul.bf16.vlgmr.msrb.gmra.mxu1 %v20119_v20  ;;  %v17248_v1 = vld [vmem:[#allocation8 + $0x970] sm:$0xf0]  ;;  %v17123_v43 = vor.u32 %v19384_v26, %v17120_v56  ;;  %v19472_v14 = vld [vmem:[#allocation8 + $0xb24] sm:$0xf]  ;;  %v17219_v38 = vor.u32 %v19408_v55, %v17216_v6 }
 0x6ed   :  { %11388 = vmatpush.bf16.msrb.mxu3 %v16947_v49  ;;  %11407 = vmatpush.bf16.msra.mxu1 %v17315_v30  ;;  %v17523_v49 = vor.u32 %v19484_v25, %v17520_v17  ;;  %v19448_v30 = vld [vmem:[#allocation8 + $0xa64] sm:$0xf]  ;;  %v17251_v16 = vor.u32 %v19416_v27, %v17248_v1  ;;  %v17344_v24 = vld [vmem:[#allocation8 + $0xa30] sm:$0xf0]  ;;  %v17475_v26 = vor.u32 %v19472_v14, %v17472_v4 }
 0x6ee   :  { %11376 = vmatmul.bf16.vlgmr.msrb.gmra.mxu2 %v20121_v40  ;;  %v19372_v25 = vld [vmem:[#allocation8 + $0x804] sm:$0xf]  ;;  %v17072_v17 = vld [vmem:[#allocation8 + $0x810] sm:$0xf0] }
 0x6ef   :  { %11420 = vmatpush.bf16.msra.mxu2 %v17443_v63  ;;  %11395 = vmatpush.bf16.msra.mxu0 %v17171_v52  ;;  %v17376_v63 = vld [vmem:[#allocation8 + $0xa70] sm:$0xf0]  ;;  %v11145_v15 = vpop.f32.mrf.mxu0  ;;  %v19560_v36 = vld [vmem:[#allocation8 + $0xde4] sm:$0xf]  ;;  %v17075_v31 = vor.u32 %v19372_v25, %v17072_v17 }
 0x6f0   :  { %11389 = vmatmul.bf16.vlgmr.msrb.gmra.mxu3 %v20123_v28  ;;  %v17232_v52 = vld [vmem:[#allocation8 + $0x950] sm:$0xf0]  ;;  %v19556_v15 = vld [vmem:[#allocation8 + $0xdc4] sm:$0xf] }
 0x6f1   :  { %11433 = vmatpush.bf16.msra.mxu3 %v17571_v44  ;;  %11408 = vmatpush.bf16.msra.mxu1 %v17299_v53  ;;  %v17379_v44 = vor.u32 %v19448_v30, %v17376_v63  ;;  %v11169_v22 = vpop.f32.mrf.mxu2  ;;  %v19444_v53 = vld [vmem:[#allocation8 + $0xa44] sm:$0xf]  ;;  %v11158_v47 = vpop.f32.mrf.mxu1  ;;  %v17235_v34 = vor.u32 %v19412_v46, %v17232_v52  ;;  %v17328_v27 = vld [vmem:[#allocation8 + $0xa10] sm:$0xf0] }
 0x6f2   :  { %v11170_v62 = vadd.f32 %v11169_v22, %v11157_v29  ;;  %v19468_v29 = vld [vmem:[#allocation8 + $0xb04] sm:$0xf]  ;;  %v17696_v63 = vld [vmem:[#allocation8 + $0xcf0] sm:$0xf0] }
 0x6f3   :  { %11421 = vmatpush.bf16.msra.mxu2 %v17427_v51  ;;  %11396 = vmatpush.bf16.msra.mxu0 %v17155_v41  ;;  %v17360_v51 = vld [vmem:[#allocation8 + $0xa50] sm:$0xf0]  ;;  %v11182_v0 = vpop.f32.mrf.mxu3  ;;  %v19528_v30 = vld [vmem:[#allocation8 + $0xce4] sm:$0xf] }
 0x6f4   :  { %v20196_v5 = vadd.f32 %v11182_v0, %v11170_v62  ;;  %v17363_v41 = vor.u32 %v19444_v53, %v17360_v51  ;;  %v19624_v46 = vld [vmem:[#allocation8 + $0xfe4] sm:$0xf]  ;;  %v17699_v52 = vor.u32 %v19528_v30, %v17696_v63  ;;  %v17680_v0 = vld [vmem:[#allocation8 + $0xcd0] sm:$0xf0] }
 0x6f5   :  { %11434 = vmatpush.bf16.msra.mxu3 %v17555_v2  ;;  %11409 = vmatpush.bf16.msra.mxu1 %v17283_v21  ;;  %v19476_v2 = vld [vmem:[#allocation8 + $0xb44] sm:$0xf]  ;;  %v17664_v6 = vld [vmem:[#allocation8 + $0xcb0] sm:$0xf0] }
 0x6f6   :  { %v19376_v21 = vld [vmem:[#allocation8 + $0x824] sm:$0xf]  ;;  %v17491_v42 = vor.u32 %v19476_v2, %v17488_v50  ;;  %v17808_v50 = vld [vmem:[#allocation8 + $0xdd0] sm:$0xf0] }
 0x6f7   :  { %11422 = vmatpush.bf16.msra.mxu2 %v17411_v7  ;;  %11397 = vmatpush.bf16.msra.mxu0 %v17139_v9  ;;  %v17088_v7 = vld [vmem:[#allocation8 + $0x830] sm:$0xf0]  ;;  %v19404_v9 = vld [vmem:[#allocation8 + $0x904] sm:$0xf] }
 0x6f8   :  { %v17091_v11 = vor.u32 %v19376_v21, %v17088_v7  ;;  %v19524_v62 = vld [vmem:[#allocation8 + $0xcc4] sm:$0xf]  ;;  %v17811_v7 = vor.u32 %v19556_v15, %v17808_v50  ;;  %v17792_v14 = vld [vmem:[#allocation8 + $0xdb0] sm:$0xf0] }
 0x6f9   :  { %11435 = vmatpush.bf16.msra.mxu3 %v17539_v8  ;;  %11410 = vmatpush.bf16.msra.mxu1 %v17267_v23  ;;  %v19440_v8 = vld [vmem:[#allocation8 + $0xa24] sm:$0xf]  ;;  %v17200_v23 = vld [vmem:[#allocation8 + $0x910] sm:$0xf0]  ;;  %v11171_v56 = vpop.f32.mrf.mxu2  ;;  %v17683_v21 = vor.u32 %v19524_v62, %v17680_v0 }
 0x6fa   :  { %v17347_v18 = vor.u32 %v19440_v8, %v17344_v24  ;;  %v17203_v39 = vor.u32 %v19404_v9, %v17200_v23  ;;  %v19588_v47 = vld [vmem:[#allocation8 + $0xec4] sm:$0xf]  ;;  %v18048_v17 = vld [vmem:[#allocation8 + $0xfb0] sm:$0xf0] }
 0x6fb   :  { %11423 = vmatpush.bf16.msra.mxu2 %v17395_v32  ;;  %11398 = vmatpush.bf16.msra.mxu0 %v17123_v43  ;;  %v19436_v32 = vld [vmem:[#allocation8 + $0xa04] sm:$0xf]  ;;  %v11184_v1 = vpop.f32.mrf.mxu3  ;;  %v17824_v43 = vld [vmem:[#allocation8 + $0xdf0] sm:$0xf0] }
 0x6fc   :  { %v17331_v45 = vor.u32 %v19436_v32, %v17328_v27  ;;  %v17827_v53 = vor.u32 %v19560_v36, %v17824_v43  ;;  %v19552_v8 = vld [vmem:[#allocation8 + $0xda4] sm:$0xf]  ;;  %v17648_v32 = vld [vmem:[#allocation8 + $0xc90] sm:$0xf0] }
 0x6fd   :  { %11436 = vmatpush.bf16.msra.mxu3 %v17523_v49  ;;  %11411 = vmatpush.bf16.msra.mxu1 %v17251_v16  ;;  %v17456_v49 = vld [vmem:[#allocation8 + $0xb10] sm:$0xf0]  ;;  %v19592_v16 = vld [vmem:[#allocation8 + $0xee4] sm:$0xf] }
 0x6fe   :  { %v17459_v22 = vor.u32 %v19468_v29, %v17456_v49  ;;  %v19584_v4 = vld [vmem:[#allocation8 + $0xea4] sm:$0xf]  ;;  %v17776_v27 = vld [vmem:[#allocation8 + $0xd90] sm:$0xf0] }
 0x6ff   :  { %11424 = vmatpush.bf16.msra.mxu2 %v17379_v44  ;;  %11399 = vmatpush.bf16.msra.mxu0 %v17107_v33  ;;  %v17952_v44 = vld [vmem:[#allocation8 + $0xef0] sm:$0xf0]  ;;  %v19616_v25 = vld [vmem:[#allocation8 + $0xfa4] sm:$0xf] }
 0x700   :  { %v17955_v51 = vor.u32 %v19592_v16, %v17952_v44  ;;  %v17936_v33 = vld [vmem:[#allocation8 + $0xed0] sm:$0xf0]  ;;  %v19516_v23 = vld [vmem:[#allocation8 + $0xc84] sm:$0xf]  ;;  %v18051_v56 = vor.u32 %v19616_v25, %v18048_v17 }
 0x701   :  { %11437 = vmatpush.bf16.msra.mxu3 %v17507_v59  ;;  %11412 = vmatpush.bf16.msra.mxu1 %v17235_v34  ;;  %v18080_v59 = vld [vmem:[#allocation8 + $0xff0] sm:$0xf0]  ;;  %v19620_v34 = vld [vmem:[#allocation8 + $0xfc4] sm:$0xf]  ;;  %v17939_v55 = vor.u32 %v19588_v47, %v17936_v33  ;;  %v17651_v43 = vor.u32 %v19516_v23, %v17648_v32 }
 0x702   :  { %v18083_v2 = vor.u32 %v19624_v46, %v18080_v59  ;;  %v19580_v29 = vld [vmem:[#allocation8 + $0xe84] sm:$0xf]  ;;  %v17904_v49 = vld [vmem:[#allocation8 + $0xe90] sm:$0xf0] }
 0x703   :  { %11425 = vmatpush.bf16.msra.mxu2 %v17363_v41  ;;  %11400 = vmatpush.bf16.msra.mxu0 %v17091_v11  ;;  %v18064_v41 = vld [vmem:[#allocation8 + $0xfd0] sm:$0xf0]  ;;  %v19612_v30 = vld [vmem:[#allocation8 + $0xf84] sm:$0xf]  ;;  %v17907_v44 = vor.u32 %v19580_v29, %v17904_v49 }
 0x704   :  { %v18067_v24 = vor.u32 %v19620_v34, %v18064_v41  ;;  %v17920_v11 = vld [vmem:[#allocation8 + $0xeb0] sm:$0xf0]  ;;  %v19544_v46 = vld [vmem:[#allocation8 + $0xd64] sm:$0xf] }
 0x705   :  { %11438 = vmatpush.bf16.msra.mxu3 %v17491_v42  ;;  %11413 = vmatpush.bf16.msra.mxu1 %v17219_v38  ;;  %v19520_v42 = vld [vmem:[#allocation8 + $0xca4] sm:$0xf]  ;;  %v17923_v9 = vor.u32 %v19584_v4, %v17920_v11  ;;  %v18032_v63 = vld [vmem:[#allocation8 + $0xf90] sm:$0xf0] }
 0x706   :  { %v17667_v38 = vor.u32 %v19520_v42, %v17664_v6  ;;  %v19608_v62 = vld [vmem:[#allocation8 + $0xf64] sm:$0xf]  ;;  %v18016_v0 = vld [vmem:[#allocation8 + $0xf70] sm:$0xf0] }
 0x707   :  { %11426 = vmatpush.bf16.msra.mxu2 %v17347_v18  ;;  %11401 = vmatpush.bf16.msra.mxu0 %v17075_v31  ;;  %v17795_v18 = vor.u32 %v19552_v8, %v17792_v14  ;;  %v11195_v1 = vpop.f32.mrf.mxu0  ;;  %v19508_v50 = vld [vmem:[#allocation8 + $0xc44] sm:$0xf]  ;;  %v17616_v47 = vld [vmem:[#allocation8 + $0xc50] sm:$0xf0]  ;;  %v18019_v34 = vor.u32 %v19608_v62, %v18016_v0  ;;  %v16294_v62 = vld [vmem:[#allocation8 + $0x1e8] sm:$0xf] }
 0x708   :  { %v11196_v36 = vadd.f32 %v11195_v1, %v20196_v5  ;;  %v19540_v33 = vld [vmem:[#allocation8 + $0xd44] sm:$0xf]  ;;  %v18000_v14 = vld [vmem:[#allocation8 + $0xf50] sm:$0xf0]  ;;  %v17619_v11 = vor.u32 %v19508_v50, %v17616_v47 }
 0x709   :  { %11439 = vmatpush.bf16.msra.mxu3 %v17475_v26  ;;  %11414 = vmatpush.bf16.msra.mxu1 %v17203_v39  ;;  %v19548_v26 = vld [vmem:[#allocation8 + $0xd84] sm:$0xf]  ;;  %v11208_v31 = vpop.f32.mrf.mxu1  ;;  %v17984_v49 = vld [vmem:[#allocation8 + $0xf30] sm:$0xf0] }
 0x70a   :  { %11402 = vmatmul.bf16.vlgmr.msra.gmra.mxu0 %v20141_v19  ;;  %v17779_v16 = vor.u32 %v19548_v26, %v17776_v27  ;;  %v19512_v39 = vld [vmem:[#allocation8 + $0xc64] sm:$0xf]  ;;  %v11209_v59 = vadd.f32 %v11208_v31, %v11196_v36  ;;  %v17728_v26 = vld [vmem:[#allocation8 + $0xd30] sm:$0xf0] }
 0x70b   :  { %11427 = vmatpush.bf16.msra.mxu2 %v17331_v45  ;;  %11446 = vmatpush.bf16.msrb.mxu0 %v17699_v52  ;;  %v17632_v45 = vld [vmem:[#allocation8 + $0xc70] sm:$0xf0]  ;;  %v19536_v23 = vld [vmem:[#allocation8 + $0xd24] sm:$0xf] }
 0x70c   :  { %11415 = vmatmul.bf16.vlgmr.msra.gmra.mxu1 %v20143_v35  ;;  %v17760_v52 = vld [vmem:[#allocation8 + $0xd70] sm:$0xf0]  ;;  %v17635_v15 = vor.u32 %v19512_v39, %v17632_v45  ;;  %v19600_v29 = vld [vmem:[#allocation8 + $0xf24] sm:$0xf]  ;;  %v17731_v36 = vor.u32 %v19536_v23, %v17728_v26  ;;  %v19139_v26 = vld [vmem:[#allocation8 + $0xb4] sm:$0xf0] }
 0x70d   :  { %11440 = vmatpush.bf16.msra.mxu3 %v17459_v22  ;;  %11459 = vmatpush.bf16.msrb.mxu1 %v17827_v53  ;;  %v18035_v22 = vor.u32 %v19612_v30, %v18032_v63  ;;  %v19576_v53 = vld [vmem:[#allocation8 + $0xe64] sm:$0xf]  ;;  %v17763_v5 = vor.u32 %v19544_v46, %v17760_v52  ;;  %v17856_v27 = vld [vmem:[#allocation8 + $0xe30] sm:$0xf0]  ;;  %v17987_v39 = vor.u32 %v19600_v29, %v17984_v49  ;;  %v19171_v29 = vld [vmem:[#allocation8 + $0x1b4] sm:$0xf0] }
 0x70e   :  { %11428 = vmatmul.bf16.vlgmr.msra.gmra.mxu2 %v20145_v58  ;;  %v19500_v30 = vld [vmem:[#allocation8 + $0xc04] sm:$0xf]  ;;  %v17584_v63 = vld [vmem:[#allocation8 + $0xc10] sm:$0xf0]  ;;  %v16390_v49 = vld [vmem:[#allocation8 + $0x2a8] sm:$0xf] }
 0x70f   :  { %11472 = vmatpush.bf16.msrb.mxu2 %v17955_v51  ;;  %11447 = vmatpush.bf16.msrb.mxu0 %v17683_v21  ;;  %v17888_v51 = vld [vmem:[#allocation8 + $0xe70] sm:$0xf0]  ;;  %v11197_v8 = vpop.f32.mrf.mxu0  ;;  %v17587_v0 = vor.u32 %v19500_v30, %v17584_v63  ;;  %v16518_v30 = vld [vmem:[#allocation8 + $0x3a8] sm:$0xf]  ;;  %v19235_v63 = vld [vmem:[#allocation8 + $0x3b4] sm:$0xf0] }
 0x710   :  { %11441 = vmatmul.bf16.vlgmr.msra.gmra.mxu3 %v20147_v60  ;;  %v17744_v21 = vld [vmem:[#allocation8 + $0xd50] sm:$0xf0]  ;;  %v16278_v8 = vld [vmem:[#allocation8 + $0x1c8] sm:$0xf] }
 0x711   :  { %11485 = vmatpush.bf16.msrb.mxu3 %v18083_v2  ;;  %11460 = vmatpush.bf16.msrb.mxu1 %v17811_v7  ;;  %v17891_v2 = vor.u32 %v19576_v53, %v17888_v51  ;;  %v11221_v41 = vpop.f32.mrf.mxu2  ;;  %v19572_v7 = vld [vmem:[#allocation8 + $0xe44] sm:$0xf]  ;;  %v11210_v4 = vpop.f32.mrf.mxu1  ;;  %v17747_v17 = vor.u32 %v19540_v33, %v17744_v21  ;;  %v17840_v46 = vld [vmem:[#allocation8 + $0xe10] sm:$0xf0]  ;;  %v16166_v53 = vld [vmem:[#allocation8 + $0xe8] sm:$0xf] }
 0x712   :  { %v11222_v42 = vadd.f32 %v11221_v41, %v11209_v59  ;;  %v19596_v59 = vld [vmem:[#allocation8 + $0xf04] sm:$0xf]  ;;  %v19147_v51 = vld [vmem:[#allocation8 + $0xf4] sm:$0xf0]  ;;  %v16550_v33 = vld [vmem:[#allocation8 + $0x3e8] sm:$0xf] }
 0x713   :  { %11473 = vmatpush.bf16.msrb.mxu2 %v17939_v55  ;;  %11448 = vmatpush.bf16.msrb.mxu0 %v17667_v38  ;;  %v17872_v55 = vld [vmem:[#allocation8 + $0xe50] sm:$0xf0]  ;;  %v11234_v6 = vpop.f32.mrf.mxu3  ;;  %v16167_v21 = vor.u32 %v19147_v51, %v16166_v53  ;;  %v16406_v4 = vld [vmem:[#allocation8 + $0x2c8] sm:$0xf]  ;;  %v19231_v51 = vld [vmem:[#allocation8 + $0x394] sm:$0xf0] }
 0x714   :  { %v20203_v25 = vadd.f32 %v11234_v6, %v11222_v42  ;;  %v17875_v38 = vor.u32 %v19572_v7, %v17872_v55  ;;  %v16150_v42 = vld [vmem:[#allocation8 + $0xc8] sm:$0xf]  ;;  %v19143_v6 = vld [vmem:[#allocation8 + $0xd4] sm:$0xf0] }
 0x715   :  { %11486 = vmatpush.bf16.msrb.mxu3 %v18067_v24  ;;  %11461 = vmatpush.bf16.msrb.mxu1 %v17795_v18  ;;  %v19604_v24 = vld [vmem:[#allocation8 + $0xf44] sm:$0xf]  ;;  %v16502_v53 = vld [vmem:[#allocation8 + $0x388] sm:$0xf] }
 0x716   :  { %v19504_v18 = vld [vmem:[#allocation8 + $0xc24] sm:$0xf]  ;;  %v18003_v32 = vor.u32 %v19604_v24, %v18000_v14  ;;  %v19175_v14 = vld [vmem:[#allocation8 + $0x1d4] sm:$0xf0] }
 0x717   :  { %11474 = vmatpush.bf16.msrb.mxu2 %v17923_v9  ;;  %11449 = vmatpush.bf16.msrb.mxu0 %v17651_v43  ;;  %v17600_v9 = vld [vmem:[#allocation8 + $0xc30] sm:$0xf0]  ;;  %v19532_v43 = vld [vmem:[#allocation8 + $0xd04] sm:$0xf] }
 0x718   :  { %v17603_v1 = vor.u32 %v19504_v18, %v17600_v9  ;;  %v16151_v18 = vor.u32 %v19143_v6, %v16150_v42  ;;  %v16279_v9 = vor.u32 %v19175_v14, %v16278_v8  ;;  %v16486_v42 = vld [vmem:[#allocation8 + $0x368] sm:$0xf]  ;;  %v19227_v6 = vld [vmem:[#allocation8 + $0x374] sm:$0xf0] }
 0x719   :  { %11487 = vmatpush.bf16.msrb.mxu3 %v18051_v56  ;;  %11462 = vmatpush.bf16.msrb.mxu1 %v17779_v16  ;;  %v19568_v56 = vld [vmem:[#allocation8 + $0xe24] sm:$0xf]  ;;  %v17712_v16 = vld [vmem:[#allocation8 + $0xd10] sm:$0xf0]  ;;  %v11223_v45 = vpop.f32.mrf.mxu2  ;;  %v16086_v14 = vld [vmem:[#allocation8 + $0x48] sm:$0xf] }
 0x71a   :  { %v17859_v31 = vor.u32 %v19568_v56, %v17856_v27  ;;  %v17715_v50 = vor.u32 %v19532_v43, %v17712_v16  ;;  %v16262_v56 = vld [vmem:[#allocation8 + $0x1a8] sm:$0xf]  ;;  %v16519_v45 = vor.u32 %v19235_v63, %v16518_v30 }
 0x71b   :  { %11475 = vmatpush.bf16.msrb.mxu2 %v17907_v44  ;;  %11450 = vmatpush.bf16.msrb.mxu0 %v17635_v15  ;;  %v19564_v44 = vld [vmem:[#allocation8 + $0xe04] sm:$0xf]  ;;  %v11236_v52 = vpop.f32.mrf.mxu3  ;;  %v19179_v15 = vld [vmem:[#allocation8 + $0x1f4] sm:$0xf0]  ;;  %v16118_v16 = vld [vmem:[#allocation8 + $0x88] sm:$0xf] }
 0x71c   :  { %v17843_v47 = vor.u32 %v19564_v44, %v17840_v46  ;;  %v16295_v7 = vor.u32 %v19179_v15, %v16294_v62  ;;  %v19135_v44 = vld [vmem:[#allocation8 + $0x94] sm:$0xf0]  ;;  %v16070_v63 = vld [vmem:[#allocation8 + $0x28] sm:$0xf] }
 0x71d   :  { %11488 = vmatpush.bf16.msrb.mxu3 %v18035_v22  ;;  %11463 = vmatpush.bf16.msrb.mxu1 %v17763_v5  ;;  %v17968_v22 = vld [vmem:[#allocation8 + $0xf10] sm:$0xf0]  ;;  %v16422_v5 = vld [vmem:[#allocation8 + $0x2e8] sm:$0xf]  ;;  %v19167_v46 = vld [vmem:[#allocation8 + $0x194] sm:$0xf0]  ;;  %v16119_v15 = vor.u32 %v19135_v44, %v16118_v16 }
 0x71e   :  { %v17971_v41 = vor.u32 %v19596_v59, %v17968_v22  ;;  %v16374_v59 = vld [vmem:[#allocation8 + $0x288] sm:$0xf]  ;;  %v19199_v22 = vld [vmem:[#allocation8 + $0x294] sm:$0xf0] }
 0x71f   :  { %11476 = vmatpush.bf16.msrb.mxu2 %v17891_v2  ;;  %11451 = vmatpush.bf16.msrb.mxu0 %v17619_v11  ;;  %v19211_v2 = vld [vmem:[#allocation8 + $0x2f4] sm:$0xf0]  ;;  %v16326_v44 = vld [vmem:[#allocation8 + $0x228] sm:$0xf] }
 0x720   :  { %v16423_v55 = vor.u32 %v19211_v2, %v16422_v5  ;;  %v19207_v11 = vld [vmem:[#allocation8 + $0x2d4] sm:$0xf0]  ;;  %v16375_v2 = vor.u32 %v19199_v22, %v16374_v59  ;;  %v16054_v22 = vld [vmem:[#allocation8 + $0x8] sm:$0xf] }
 0x721   :  { %11489 = vmatpush.bf16.msrb.mxu3 %v18019_v34  ;;  %11464 = vmatpush.bf16.msrb.mxu1 %v17747_v17  ;;  %v19243_v34 = vld [vmem:[#allocation8 + $0x3f4] sm:$0xf0]  ;;  %v16534_v17 = vld [vmem:[#allocation8 + $0x3c8] sm:$0xf]  ;;  %v16407_v23 = vor.u32 %v19207_v11, %v16406_v4 }
 0x722   :  { %v16551_v24 = vor.u32 %v19243_v34, %v16550_v33  ;;  %v16230_v33 = vld [vmem:[#allocation8 + $0x168] sm:$0xf]  ;;  %v19127_v4 = vld [vmem:[#allocation8 + $0x54] sm:$0xf0] }
 0x723   :  { %11477 = vmatpush.bf16.msrb.mxu2 %v17875_v38  ;;  %11452 = vmatpush.bf16.msrb.mxu0 %v17603_v1  ;;  %v19239_v38 = vld [vmem:[#allocation8 + $0x3d4] sm:$0xf0]  ;;  %v16214_v11 = vld [vmem:[#allocation8 + $0x148] sm:$0xf] }
 0x724   :  { %v16535_v27 = vor.u32 %v19239_v38, %v16534_v17  ;;  %v19203_v1 = vld [vmem:[#allocation8 + $0x2b4] sm:$0xf0]  ;;  %v16487_v17 = vor.u32 %v19227_v6, %v16486_v42  ;;  %v16934_v42 = vld [vmem:[#allocation8 + $0x6e8] sm:$0xf] }
 0x725   :  { %11490 = vmatpush.bf16.msrb.mxu3 %v18003_v32  ;;  %11465 = vmatpush.bf16.msrb.mxu1 %v17731_v36  ;;  %v16134_v32 = vld [vmem:[#allocation8 + $0xa8] sm:$0xf]  ;;  %v16391_v43 = vor.u32 %v19203_v1, %v16390_v49  ;;  %v16087_v49 = vor.u32 %v19127_v4, %v16086_v14  ;;  %v19155_v16 = vld [vmem:[#allocation8 + $0x134] sm:$0xf0] }
 0x726   :  { %v16135_v36 = vor.u32 %v19139_v26, %v16134_v32  ;;  %v19339_v6 = vld [vmem:[#allocation8 + $0x6f4] sm:$0xf0] }
 0x727   :  { %11478 = vmatpush.bf16.msrb.mxu2 %v17859_v31  ;;  %11453 = vmatpush.bf16.msrb.mxu0 %v17587_v0  ;;  %v16263_v31 = vor.u32 %v19171_v29, %v16262_v56  ;;  %v11247_v52 = vpop.f32.mrf.mxu0  ;;  %v16470_v56 = vld [vmem:[#allocation8 + $0x348] sm:$0xf]  ;;  %v19371_v14 = vld [vmem:[#allocation8 + $0x7f4] sm:$0xf0] }
 0x728   :  { %v11248_v62 = vadd.f32 %v11247_v52, %v20203_v25  ;;  %v19119_v52 = vld [vmem:[#allocation8 + $0x14] sm:$0xf0] }
 0x729   :  { %11491 = vmatpush.bf16.msrb.mxu3 %v17987_v39  ;;  %11466 = vmatpush.bf16.msrb.mxu1 %v17715_v50  ;;  %v16246_v39 = vld [vmem:[#allocation8 + $0x188] sm:$0xf]  ;;  %v11260_v0 = vpop.f32.mrf.mxu1 }
 0x72a   :  { %11454 = vmatmul.bf16.vlgmr.msrb.gmra.mxu0 %v20171_v48  ;;  %v16247_v5 = vor.u32 %v19167_v46, %v16246_v39  ;;  %v16102_v50 = vld [vmem:[#allocation8 + $0x68] sm:$0xf]  ;;  %v11261_v34 = vadd.f32 %v11260_v0, %v11248_v62  ;;  %v19187_v39 = vld [vmem:[#allocation8 + $0x234] sm:$0xf0] }
 0x72b   :  { %11479 = vmatpush.bf16.msrb.mxu2 %v17843_v47  ;;  %11498 = vmatpush.bf16.msra.mxu0 %v16167_v21  ;;  %v19131_v47 = vld [vmem:[#allocation8 + $0x74] sm:$0xf0]  ;;  %v16182_v62 = vld [vmem:[#allocation8 + $0x108] sm:$0xf] }
 0x72c   :  { %11467 = vmatmul.bf16.vlgmr.msrb.gmra.mxu1 %v20173_v12  ;;  %v19163_v21 = vld [vmem:[#allocation8 + $0x174] sm:$0xf0]  ;;  %v16103_v8 = vor.u32 %v19131_v47, %v16102_v50  ;;  %v16438_v47 = vld [vmem:[#allocation8 + $0x308] sm:$0xf] }
 0x72d   :  { %11492 = vmatpush.bf16.msrb.mxu3 %v17971_v41  ;;  %11511 = vmatpush.bf16.msra.mxu1 %v16295_v7  ;;  %v16503_v41 = vor.u32 %v19231_v51, %v16502_v53  ;;  %v16358_v7 = vld [vmem:[#allocation8 + $0x268] sm:$0xf]  ;;  %v16231_v25 = vor.u32 %v19163_v21, %v16230_v33  ;;  %v19219_v46 = vld [vmem:[#allocation8 + $0x334] sm:$0xf0]  ;;  %v16327_v51 = vor.u32 %v19187_v39, %v16326_v44 }
 0x72e   :  { %11480 = vmatmul.bf16.vlgmr.msrb.gmra.mxu2 %v20175_v13  ;;  %v19151_v0 = vld [vmem:[#allocation8 + $0x114] sm:$0xf0]  ;;  %v16806_v21 = vld [vmem:[#allocation8 + $0x5e8] sm:$0xf] }
 0x72f   :  { %11524 = vmatpush.bf16.msra.mxu2 %v16423_v55  ;;  %11499 = vmatpush.bf16.msra.mxu0 %v16151_v18  ;;  %v19195_v55 = vld [vmem:[#allocation8 + $0x274] sm:$0xf0]  ;;  %v11249_v26 = vpop.f32.mrf.mxu0 }
 0x730   :  { %11493 = vmatmul.bf16.vlgmr.msrb.gmra.mxu3 %v20182_v3  ;;  %v19159_v18 = vld [vmem:[#allocation8 + $0x154] sm:$0xf0] }
 0x731   :  { %11537 = vmatpush.bf16.msra.mxu3 %v16551_v24  ;;  %11512 = vmatpush.bf16.msra.mxu1 %v16279_v9  ;;  %v16359_v24 = vor.u32 %v19195_v55, %v16358_v7  ;;  %v11273_v38 = vpop.f32.mrf.mxu2  ;;  %v16342_v9 = vld [vmem:[#allocation8 + $0x248] sm:$0xf]  ;;  %v11262_v29 = vpop.f32.mrf.mxu1  ;;  %v16215_v1 = vor.u32 %v19159_v18, %v16214_v11  ;;  %v19183_v50 = vld [vmem:[#allocation8 + $0x214] sm:$0xf0]  ;;  %v16055_v7 = vor.u32 %v19119_v52, %v16054_v22 }
 0x732   :  { %v20210_v32 = vadd.f32 %v11273_v38, %v11261_v34  ;;  %v19215_v33 = vld [vmem:[#allocation8 + $0x314] sm:$0xf0]  ;;  %v16678_v34 = vld [vmem:[#allocation8 + $0x4e8] sm:$0xf]  ;;  %v16935_v38 = vor.u32 %v19339_v6, %v16934_v42 }
 0x733   :  { %11525 = vmatpush.bf16.msra.mxu2 %v16407_v23  ;;  %11500 = vmatpush.bf16.msra.mxu0 %v16135_v36  ;;  %v19191_v23 = vld [vmem:[#allocation8 + $0x254] sm:$0xf0]  ;;  %v16439_v4 = vor.u32 %v19215_v33, %v16438_v47  ;;  %v16662_v18 = vld [vmem:[#allocation8 + $0x4c8] sm:$0xf] }
 0x734   :  { %v16343_v30 = vor.u32 %v19191_v23, %v16342_v9  ;;  %v19123_v36 = vld [vmem:[#allocation8 + $0x34] sm:$0xf0]  ;;  %v16790_v23 = vld [vmem:[#allocation8 + $0x5c8] sm:$0xf] }
 0x735   :  { %11538 = vmatpush.bf16.msra.mxu3 %v16535_v27  ;;  %11513 = vmatpush.bf16.msra.mxu1 %v16263_v31  ;;  %v19223_v27 = vld [vmem:[#allocation8 + $0x354] sm:$0xf0]  ;;  %v16198_v31 = vld [vmem:[#allocation8 + $0x128] sm:$0xf]  ;;  %v16071_v59 = vor.u32 %v19123_v36, %v16070_v63 }
 0x736   :  { %v16199_v53 = vor.u32 %v19155_v16, %v16198_v31  ;;  %v19307_v55 = vld [vmem:[#allocation8 + $0x5f4] sm:$0xf0]  ;;  %v16646_v31 = vld [vmem:[#allocation8 + $0x4a8] sm:$0xf] }
 0x737   :  { %11526 = vmatpush.bf16.msra.mxu2 %v16391_v43  ;;  %11501 = vmatpush.bf16.msra.mxu0 %v16119_v15  ;;  %v16471_v43 = vor.u32 %v19223_v27, %v16470_v56  ;;  %v16310_v15 = vld [vmem:[#allocation8 + $0x208] sm:$0xf]  ;;  %v19271_v9 = vld [vmem:[#allocation8 + $0x4d4] sm:$0xf0] }
 0x738   :  { %v19303_v56 = vld [vmem:[#allocation8 + $0x5d4] sm:$0xf0]  ;;  %v16918_v27 = vld [vmem:[#allocation8 + $0x6c8] sm:$0xf] }
 0x739   :  { %11539 = vmatpush.bf16.msra.mxu3 %v16519_v45  ;;  %11514 = vmatpush.bf16.msra.mxu1 %v16247_v5  ;;  %v16454_v45 = vld [vmem:[#allocation8 + $0x328] sm:$0xf]  ;;  %v19335_v29 = vld [vmem:[#allocation8 + $0x6d4] sm:$0xf0]  ;;  %v16791_v63 = vor.u32 %v19303_v56, %v16790_v23 }
 0x73a   :  { %v16455_v5 = vor.u32 %v19219_v46, %v16454_v45  ;;  %v16919_v36 = vor.u32 %v19335_v29, %v16918_v27  ;;  %v16774_v16 = vld [vmem:[#allocation8 + $0x5a8] sm:$0xf]  ;;  %v19299_v39 = vld [vmem:[#allocation8 + $0x5b4] sm:$0xf0] }
 0x73b   :  { %11527 = vmatpush.bf16.msra.mxu2 %v16375_v2  ;;  %11502 = vmatpush.bf16.msra.mxu0 %v16103_v8  ;;  %v11275_v2 = vpop.f32.mrf.mxu2  ;;  %v16183_v8 = vor.u32 %v19151_v0, %v16182_v62  ;;  %v16902_v45 = vld [vmem:[#allocation8 + $0x6a8] sm:$0xf]  ;;  %v19331_v46 = vld [vmem:[#allocation8 + $0x6b4] sm:$0xf0]  ;;  %v16775_v0 = vor.u32 %v19299_v39, %v16774_v16 }
 0x73c   :  { %v19363_v22 = vld [vmem:[#allocation8 + $0x7b4] sm:$0xf0]  ;;  %v16630_v2 = vld [vmem:[#allocation8 + $0x488] sm:$0xf] }
 0x73d   :  { %11540 = vmatpush.bf16.msra.mxu3 %v16503_v41  ;;  %11515 = vmatpush.bf16.msra.mxu1 %v16231_v25  ;;  %v19275_v41 = vld [vmem:[#allocation8 + $0x4f4] sm:$0xf0]  ;;  %v16311_v25 = vor.u32 %v19183_v50, %v16310_v15  ;;  %v11286_v62 = vpop.f32.mrf.mxu3  ;;  %v16903_v15 = vor.u32 %v19331_v46, %v16902_v45  ;;  %v16758_v47 = vld [vmem:[#allocation8 + $0x588] sm:$0xf] }
 0x73e   :  { %v16679_v11 = vor.u32 %v19275_v41, %v16678_v34  ;;  %v19263_v50 = vld [vmem:[#allocation8 + $0x494] sm:$0xf0]  ;;  %v16886_v41 = vld [vmem:[#allocation8 + $0x688] sm:$0xf] }
 0x73f   :  { %11528 = vmatpush.bf16.msra.mxu2 %v16359_v24  ;;  %11503 = vmatpush.bf16.msra.mxu0 %v16087_v49  ;;  %v17062_v24 = vld [vmem:[#allocation8 + $0x7e8] sm:$0xf]  ;;  %v19295_v34 = vld [vmem:[#allocation8 + $0x594] sm:$0xf0] }
 0x740   :  { %v17063_v26 = vor.u32 %v19371_v14, %v17062_v24  ;;  %v17046_v49 = vld [vmem:[#allocation8 + $0x7c8] sm:$0xf]  ;;  %v19359_v42 = vld [vmem:[#allocation8 + $0x794] sm:$0xf0]  ;;  %v16759_v24 = vor.u32 %v19295_v34, %v16758_v47 }
 0x741   :  { %11541 = vmatpush.bf16.msra.mxu3 %v16487_v17  ;;  %11516 = vmatpush.bf16.msra.mxu1 %v16215_v1  ;;  %v16807_v17 = vor.u32 %v19307_v55, %v16806_v21  ;;  %v19367_v1 = vld [vmem:[#allocation8 + $0x7d4] sm:$0xf0]  ;;  %v17014_v55 = vld [vmem:[#allocation8 + $0x788] sm:$0xf] }
 0x742   :  { %v17047_v44 = vor.u32 %v19367_v1, %v17046_v49  ;;  %v19327_v21 = vld [vmem:[#allocation8 + $0x694] sm:$0xf0]  ;;  %v16614_v14 = vld [vmem:[#allocation8 + $0x468] sm:$0xf] }
 0x743   :  { %11529 = vmatpush.bf16.msra.mxu2 %v16343_v30  ;;  %11504 = vmatpush.bf16.msra.mxu0 %v16071_v59  ;;  %v16663_v30 = vor.u32 %v19271_v9, %v16662_v18  ;;  %v17030_v59 = vld [vmem:[#allocation8 + $0x7a8] sm:$0xf]  ;;  %v19291_v18 = vld [vmem:[#allocation8 + $0x574] sm:$0xf0] }
 0x744   :  { %v17031_v33 = vor.u32 %v19363_v22, %v17030_v59  ;;  %v16870_v9 = vld [vmem:[#allocation8 + $0x668] sm:$0xf]  ;;  %v19323_v23 = vld [vmem:[#allocation8 + $0x674] sm:$0xf0] }
 0x745   :  { %11542 = vmatpush.bf16.msra.mxu3 %v16471_v43  ;;  %11517 = vmatpush.bf16.msra.mxu1 %v16199_v53  ;;  %v19267_v43 = vld [vmem:[#allocation8 + $0x4b4] sm:$0xf0]  ;;  %v19644_v53 = vld [vmem:[#allocation10] sm:$0xf]  ;;  %v11288_v29 = vpop.f32.mrf.mxu3  ;;  %v16871_v1 = vor.u32 %v19323_v23, %v16870_v9  ;;  %v16982_v59 = vld [vmem:[#allocation8 + $0x748] sm:$0xf] }
 0x746   :  { %v16647_v52 = vor.u32 %v19267_v43, %v16646_v31  ;;  %v19355_v56 = vld [vmem:[#allocation8 + $0x774] sm:$0xf0]  ;;  %v17190_v23 = vld [vmem:[#allocation8 + $0x8e8] sm:$0xf] }
 0x747   :  { %11530 = vmatpush.bf16.msra.mxu2 %v16327_v51  ;;  %11505 = vmatpush.bf16.msra.mxu0 %v16055_v7  ;;  %v8515_v51 = vperm.slane %v19644_v53, 1  ;;  %v11299_v7 = vpop.f32.mrf.mxu0  ;;  %v19287_v16 = vld [vmem:[#allocation8 + $0x554] sm:$0xf0] }
 0x748   :  { %v19319_v39 = vld [vmem:[#allocation8 + $0x654] sm:$0xf0] }
 0x749   :  { %11543 = vmatpush.bf16.msra.mxu3 %v16455_v5  ;;  %11518 = vmatpush.bf16.msra.mxu1 %v16183_v8  ;;  %v20217_v5 = vadd.f32 %v11286_v62, %v20210_v32  ;;  %v11300_v6 = vadd.f32 %v11299_v7, %v8515_v51  ;;  %v11312_v8 = vpop.f32.mrf.mxu1  ;;  %v16887_v32 = vor.u32 %v19327_v21, %v16886_v41  ;;  %v19351_v22 = vld [vmem:[#allocation8 + $0x754] sm:$0xf0]  ;;  %v16966_v41 = vld [vmem:[#allocation8 + $0x728] sm:$0xf] }
 0x74a   :  { %11506 = vmatmul.bf16.vlgmr.msra.gmra.mxu0 %v20096_v54  ;;  %v19283_v47 = vld [vmem:[#allocation8 + $0x534] sm:$0xf0] }
 0x74b   :  { %11531 = vmatpush.bf16.msra.mxu2 %v16311_v25  ;;  %11550 = vmatpush.bf16.msrb.mxu0 %v16679_v11  ;;  %v16631_v25 = vor.u32 %v19263_v50, %v16630_v2  ;;  %v16742_v11 = vld [vmem:[#allocation8 + $0x568] sm:$0xf]  ;;  %v16983_v50 = vor.u32 %v19351_v22, %v16982_v59  ;;  %v19315_v34 = vld [vmem:[#allocation8 + $0x634] sm:$0xf0] }
 0x74c   :  { %11519 = vmatmul.bf16.vlgmr.msra.gmra.mxu1 %v20098_v61  ;;  %v16743_v49 = vor.u32 %v19291_v18, %v16742_v11  ;;  %v16710_v2 = vld [vmem:[#allocation8 + $0x528] sm:$0xf]  ;;  %v19347_v21 = vld [vmem:[#allocation8 + $0x734] sm:$0xf0] }
 0x74d   :  { %11544 = vmatpush.bf16.msra.mxu3 %v16439_v4  ;;  %11563 = vmatpush.bf16.msrb.mxu1 %v16807_v17  ;;  %v19259_v4 = vld [vmem:[#allocation8 + $0x474] sm:$0xf0]  ;;  %v11313_v17 = vadd.f32 %v11312_v8, %v11300_v6  ;;  %v16711_v6 = vor.u32 %v19283_v47, %v16710_v2  ;;  %v17302_v59 = vld [vmem:[#allocation8 + $0x9c8] sm:$0xf] }
 0x74e   :  { %11532 = vmatmul.bf16.vlgmr.msra.gmra.mxu2 %v20100_v10  ;;  %v16615_v27 = vor.u32 %v19259_v4, %v16614_v14  ;;  %v16967_v14 = vor.u32 %v19347_v21, %v16966_v41  ;;  %v19343_v18 = vld [vmem:[#allocation8 + $0x714] sm:$0xf0]  ;;  %v17286_v41 = vld [vmem:[#allocation8 + $0x9a8] sm:$0xf] }
 0x74f   :  { %11576 = vmatpush.bf16.msrb.mxu2 %v16935_v38  ;;  %11551 = vmatpush.bf16.msrb.mxu0 %v16663_v30  ;;  %v17015_v38 = vor.u32 %v19359_v42, %v17014_v55  ;;  %v16598_v30 = vld [vmem:[#allocation8 + $0x448] sm:$0xf]  ;;  %v11301_v46 = vpop.f32.mrf.mxu0  ;;  %v19247_v42 = vld [vmem:[#allocation8 + $0x414] sm:$0xf0] }
 0x750   :  { %11545 = vmatmul.bf16.vlgmr.msra.gmra.mxu3 %v20102_v37  ;;  %v16566_v55 = vld [vmem:[#allocation8 + $0x408] sm:$0xf]  ;;  %v19435_v29 = vld [vmem:[#allocation8 + $0x9f4] sm:$0xf0] }
 0x751   :  { %11589 = vmatpush.bf16.msrb.mxu3 %v17063_v26  ;;  %11564 = vmatpush.bf16.msrb.mxu1 %v16791_v63  ;;  %v16998_v26 = vld [vmem:[#allocation8 + $0x768] sm:$0xf]  ;;  %v19255_v63 = vld [vmem:[#allocation8 + $0x454] sm:$0xf0]  ;;  %v11325_v43 = vpop.f32.mrf.mxu2 }
 0x752   :  { %v16999_v31 = vor.u32 %v19355_v56, %v16998_v26  ;;  %v11326_v45 = vadd.f32 %v11325_v43, %v11313_v17  ;;  %v16599_v53 = vor.u32 %v19255_v63, %v16598_v30  ;;  %v19311_v17 = vld [vmem:[#allocation8 + $0x614] sm:$0xf0]  ;;  %v17318_v56 = vld [vmem:[#allocation8 + $0x9e8] sm:$0xf] }
 0x753   :  { %11577 = vmatpush.bf16.msrb.mxu2 %v16919_v36  ;;  %11552 = vmatpush.bf16.msrb.mxu0 %v16647_v52  ;;  %v16726_v36 = vld [vmem:[#allocation8 + $0x548] sm:$0xf]  ;;  %v11314_v52 = vpop.f32.mrf.mxu1  ;;  %v11338_v11 = vpop.f32.mrf.mxu3  ;;  %v19403_v26 = vld [vmem:[#allocation8 + $0x8f4] sm:$0xf0] }
 0x754   :  { %v16727_v51 = vor.u32 %v19287_v16, %v16726_v36  ;;  %v20219_v9 = vadd.f32 %v11338_v11, %v11326_v45  ;;  %v17574_v36 = vld [vmem:[#allocation8 + $0xbe8] sm:$0xf]  ;;  %v17191_v16 = vor.u32 %v19403_v26, %v17190_v23  ;;  %v19399_v46 = vld [vmem:[#allocation8 + $0x8d4] sm:$0xf0] }
 0x755   :  { %11590 = vmatpush.bf16.msrb.mxu3 %v17047_v44  ;;  %11565 = vmatpush.bf16.msrb.mxu1 %v16775_v0  ;;  %v16854_v44 = vld [vmem:[#allocation8 + $0x648] sm:$0xf]  ;;  %v19431_v52 = vld [vmem:[#allocation8 + $0x9d4] sm:$0xf0] }
 0x756   :  { %v16855_v62 = vor.u32 %v19319_v39, %v16854_v44  ;;  %v16582_v0 = vld [vmem:[#allocation8 + $0x428] sm:$0xf]  ;;  %v17319_v44 = vor.u32 %v19435_v29, %v17318_v56  ;;  %v19455_v23 = vld [vmem:[#allocation8 + $0xa94] sm:$0xf0] }
 0x757   :  { %11578 = vmatpush.bf16.msrb.mxu2 %v16903_v15  ;;  %11553 = vmatpush.bf16.msrb.mxu0 %v16631_v25  ;;  %v19251_v15 = vld [vmem:[#allocation8 + $0x434] sm:$0xf0]  ;;  %v16694_v25 = vld [vmem:[#allocation8 + $0x508] sm:$0xf] }
 0x758   :  { %v16583_v7 = vor.u32 %v19251_v15, %v16582_v0  ;;  %v17174_v45 = vld [vmem:[#allocation8 + $0x8c8] sm:$0xf]  ;;  %v19495_v0 = vld [vmem:[#allocation8 + $0xbd4] sm:$0xf0] }
 0x759   :  { %11591 = vmatpush.bf16.msrb.mxu3 %v17031_v33  ;;  %11566 = vmatpush.bf16.msrb.mxu1 %v16759_v24  ;;  %v16838_v33 = vld [vmem:[#allocation8 + $0x628] sm:$0xf]  ;;  %v19279_v24 = vld [vmem:[#allocation8 + $0x514] sm:$0xf0]  ;;  %v11327_v4 = vpop.f32.mrf.mxu2  ;;  %v17175_v15 = vor.u32 %v19399_v46, %v17174_v45 }
 0x75a   :  { %v16839_v8 = vor.u32 %v19315_v34, %v16838_v33  ;;  %v16695_v30 = vor.u32 %v19279_v24, %v16694_v25  ;;  %v17158_v33 = vld [vmem:[#allocation8 + $0x8a8] sm:$0xf]  ;;  %v19395_v34 = vld [vmem:[#allocation8 + $0x8b4] sm:$0xf0] }
 0x75b   :  { %11579 = vmatpush.bf16.msrb.mxu2 %v16887_v32  ;;  %11554 = vmatpush.bf16.msrb.mxu0 %v16615_v27  ;;  %v16822_v32 = vld [vmem:[#allocation8 + $0x608] sm:$0xf]  ;;  %v16567_v27 = vor.u32 %v19247_v42, %v16566_v55  ;;  %v11340_v2 = vpop.f32.mrf.mxu3  ;;  %v19459_v42 = vld [vmem:[#allocation8 + $0xab4] sm:$0xf0]  ;;  %v17159_v25 = vor.u32 %v19395_v34, %v17158_v33 }
 0x75c   :  { %v16823_v63 = vor.u32 %v19311_v17, %v16822_v32  ;;  %v17414_v55 = vld [vmem:[#allocation8 + $0xaa8] sm:$0xf]  ;;  %v19391_v4 = vld [vmem:[#allocation8 + $0x894] sm:$0xf0] }
 0x75d   :  { %11592 = vmatpush.bf16.msrb.mxu3 %v17015_v38  ;;  %11567 = vmatpush.bf16.msrb.mxu1 %v16743_v49  ;;  %v16950_v38 = vld [vmem:[#allocation8 + $0x708] sm:$0xf]  ;;  %v17415_v32 = vor.u32 %v19459_v42, %v17414_v55  ;;  %v19451_v46 = vld [vmem:[#allocation8 + $0xa74] sm:$0xf0] }
 0x75e   :  { %v17446_v49 = vld [vmem:[#allocation8 + $0xae8] sm:$0xf]  ;;  %v16951_v43 = vor.u32 %v19343_v18, %v16950_v38  ;;  %v19423_v38 = vld [vmem:[#allocation8 + $0x994] sm:$0xf0] }
 0x75f   :  { %11580 = vmatpush.bf16.msrb.mxu2 %v16871_v1  ;;  %11555 = vmatpush.bf16.msrb.mxu0 %v16599_v53  ;;  %v19467_v1 = vld [vmem:[#allocation8 + $0xaf4] sm:$0xf0]  ;;  %v17430_v53 = vld [vmem:[#allocation8 + $0xac8] sm:$0xf] }
 0x760   :  { %v17447_v39 = vor.u32 %v19467_v1, %v17446_v49  ;;  %v17270_v11 = vld [vmem:[#allocation8 + $0x988] sm:$0xf]  ;;  %v19447_v33 = vld [vmem:[#allocation8 + $0xa54] sm:$0xf0] }
 0x761   :  { %11593 = vmatpush.bf16.msrb.mxu3 %v16999_v31  ;;  %11568 = vmatpush.bf16.msrb.mxu1 %v16727_v51  ;;  %v19499_v31 = vld [vmem:[#allocation8 + $0xbf4] sm:$0xf0]  ;;  %v17398_v18 = vld [vmem:[#allocation8 + $0xa88] sm:$0xf] }
 0x762   :  { %v17575_v22 = vor.u32 %v19499_v31, %v17574_v36  ;;  %v19463_v51 = vld [vmem:[#allocation8 + $0xad4] sm:$0xf0]  ;;  %v17526_v56 = vld [vmem:[#allocation8 + $0xb88] sm:$0xf] }
 0x763   :  { %11581 = vmatpush.bf16.msrb.mxu2 %v16855_v62  ;;  %11556 = vmatpush.bf16.msrb.mxu0 %v16583_v7  ;;  %v17558_v62 = vld [vmem:[#allocation8 + $0xbc8] sm:$0xf]  ;;  %v17431_v47 = vor.u32 %v19463_v51, %v17430_v53  ;;  %v19427_v7 = vld [vmem:[#allocation8 + $0x9b4] sm:$0xf0] }
 0x764   :  { %v17559_v21 = vor.u32 %v19495_v0, %v17558_v62  ;;  %v17287_v24 = vor.u32 %v19427_v7, %v17286_v41  ;;  %v17126_v36 = vld [vmem:[#allocation8 + $0x868] sm:$0xf]  ;;  %v19387_v31 = vld [vmem:[#allocation8 + $0x874] sm:$0xf0] }
 0x765   :  { %11594 = vmatpush.bf16.msrb.mxu3 %v16983_v50  ;;  %11569 = vmatpush.bf16.msrb.mxu1 %v16711_v6  ;;  %v17303_v50 = vor.u32 %v19431_v52, %v17302_v59  ;;  %v17542_v6 = vld [vmem:[#allocation8 + $0xba8] sm:$0xf]  ;;  %v17127_v52 = vor.u32 %v19387_v31, %v17126_v36  ;;  %v19383_v62 = vld [vmem:[#allocation8 + $0x854] sm:$0xf0] }
 0x766   :  { %v17382_v45 = vld [vmem:[#allocation8 + $0xa68] sm:$0xf]  ;;  %v19479_v55 = vld [vmem:[#allocation8 + $0xb54] sm:$0xf0] }
 0x767   :  { %11582 = vmatpush.bf16.msrb.mxu2 %v16839_v8  ;;  %11557 = vmatpush.bf16.msrb.mxu0 %v16567_v27  ;;  %v19491_v8 = vld [vmem:[#allocation8 + $0xbb4] sm:$0xf0]  ;;  %v11351_v26 = vpop.f32.mrf.mxu0  ;;  %v17510_v59 = vld [vmem:[#allocation8 + $0xb68] sm:$0xf]  ;;  %v17383_v53 = vor.u32 %v19451_v46, %v17382_v45 }
 0x768   :  { %v17543_v17 = vor.u32 %v19491_v8, %v17542_v6  ;;  %v19487_v27 = vld [vmem:[#allocation8 + $0xb94] sm:$0xf0]  ;;  %v11352_v29 = vadd.f32 %v11351_v26, %v20219_v9  ;;  %v17110_v51 = vld [vmem:[#allocation8 + $0x848] sm:$0xf] }
 0x769   :  { %11595 = vmatpush.bf16.msrb.mxu3 %v16967_v14  ;;  %11570 = vmatpush.bf16.msrb.mxu1 %v16695_v30  ;;  %v17142_v14 = vld [vmem:[#allocation8 + $0x888] sm:$0xf]  ;;  %v11364_v49 = vpop.f32.mrf.mxu1  ;;  %v17271_v30 = vor.u32 %v19423_v38, %v17270_v11  ;;  %v17111_v6 = vor.u32 %v19383_v62, %v17110_v51  ;;  %v19475_v26 = vld [vmem:[#allocation8 + $0xb34] sm:$0xf0] }
 0x76a   :  { %11558 = vmatmul.bf16.vlgmr.msrb.gmra.mxu0 %v20117_v57  ;;  %v17143_v1 = vor.u32 %v19391_v4, %v17142_v14  ;;  %v17238_v0 = vld [vmem:[#allocation8 + $0x948] sm:$0xf]  ;;  %v19379_v14 = vld [vmem:[#allocation8 + $0x834] sm:$0xf0] }
 0x76b   :  { %11583 = vmatpush.bf16.msrb.mxu2 %v16823_v63  ;;  %11602 = vmatpush.bf16.msra.mxu0 %v17191_v16  ;;  %v17399_v63 = vor.u32 %v19455_v23, %v17398_v18  ;;  %v11365_v16 = vadd.f32 %v11364_v49, %v11352_v29  ;;  %v17494_v7 = vld [vmem:[#allocation8 + $0xb48] sm:$0xf]  ;;  %v19443_v18 = vld [vmem:[#allocation8 + $0xa34] sm:$0xf0] }
 0x76c   :  { %11571 = vmatmul.bf16.vlgmr.msrb.gmra.mxu1 %v20119_v20  ;;  %v17222_v4 = vld [vmem:[#allocation8 + $0x928] sm:$0xf]  ;;  %v17495_v11 = vor.u32 %v19479_v55, %v17494_v7  ;;  %v19375_v29 = vld [vmem:[#allocation8 + $0x814] sm:$0xf0] }
 0x76d   :  { %11596 = vmatpush.bf16.msrb.mxu3 %v16951_v43  ;;  %11615 = vmatpush.bf16.msra.mxu1 %v17319_v44  ;;  %v17254_v43 = vld [vmem:[#allocation8 + $0x968] sm:$0xf]  ;;  %v17527_v44 = vor.u32 %v19487_v27, %v17526_v56  ;;  %v19595_v51 = vld [vmem:[#allocation8 + $0xef4] sm:$0xf0] }
 0x76e   :  { %11584 = vmatmul.bf16.vlgmr.msrb.gmra.mxu2 %v20121_v40  ;;  %v17350_v38 = vld [vmem:[#allocation8 + $0xa28] sm:$0xf] }
 0x76f   :  { %11628 = vmatpush.bf16.msra.mxu2 %v17447_v39  ;;  %11603 = vmatpush.bf16.msra.mxu0 %v17175_v15  ;;  %v19419_v39 = vld [vmem:[#allocation8 + $0x974] sm:$0xf0]  ;;  %v17478_v23 = vld [vmem:[#allocation8 + $0xb28] sm:$0xf] }
 0x770   :  { %11597 = vmatmul.bf16.vlgmr.msrb.gmra.mxu3 %v20123_v28  ;;  %v17255_v9 = vor.u32 %v19419_v39, %v17254_v43  ;;  %v17078_v27 = vld [vmem:[#allocation8 + $0x808] sm:$0xf]  ;;  %v17479_v31 = vor.u32 %v19475_v26, %v17478_v23  ;;  %v19471_v39 = vld [vmem:[#allocation8 + $0xb14] sm:$0xf0] }
 0x771   :  { %11641 = vmatpush.bf16.msra.mxu3 %v17575_v22  ;;  %11616 = vmatpush.bf16.msra.mxu1 %v17303_v50  ;;  %v19483_v22 = vld [vmem:[#allocation8 + $0xb74] sm:$0xf0]  ;;  %v11377_v2 = vpop.f32.mrf.mxu2  ;;  %v11366_v42 = vpop.f32.mrf.mxu1  ;;  %v17334_v36 = vld [vmem:[#allocation8 + $0xa08] sm:$0xf] }
 0x772   :  { %v17511_v15 = vor.u32 %v19483_v22, %v17510_v59  ;;  %v19415_v50 = vld [vmem:[#allocation8 + $0x954] sm:$0xf0]  ;;  %v11378_v34 = vadd.f32 %v11377_v2, %v11365_v16  ;;  %v17702_v46 = vld [vmem:[#allocation8 + $0xce8] sm:$0xf] }
 0x773   :  { %11629 = vmatpush.bf16.msra.mxu2 %v17431_v47  ;;  %11604 = vmatpush.bf16.msra.mxu0 %v17159_v25  ;;  %v17366_v47 = vld [vmem:[#allocation8 + $0xa48] sm:$0xf]  ;;  %v11390_v41 = vpop.f32.mrf.mxu3  ;;  %v17239_v25 = vor.u32 %v19415_v50, %v17238_v0  ;;  %v19439_v16 = vld [vmem:[#allocation8 + $0xa14] sm:$0xf0] }
 0x774   :  { %v20226_v8 = vadd.f32 %v11390_v41, %v11378_v34  ;;  %v19531_v59 = vld [vmem:[#allocation8 + $0xcf4] sm:$0xf0]  ;;  %v17830_v22 = vld [vmem:[#allocation8 + $0xde8] sm:$0xf]  ;;  %v17335_v0 = vor.u32 %v19439_v16, %v17334_v36 }
 0x775   :  { %11642 = vmatpush.bf16.msra.mxu3 %v17559_v21  ;;  %11617 = vmatpush.bf16.msra.mxu1 %v17287_v24  ;;  %v11353_v21 = vpop.f32.mrf.mxu0  ;;  %v17367_v24 = vor.u32 %v19447_v33, %v17366_v47  ;;  %v19627_v2 = vld [vmem:[#allocation8 + $0xff4] sm:$0xf0]  ;;  %v17703_v47 = vor.u32 %v19531_v59, %v17702_v46  ;;  %v17686_v41 = vld [vmem:[#allocation8 + $0xcc8] sm:$0xf] }
 0x776   :  { %v19527_v21 = vld [vmem:[#allocation8 + $0xcd4] sm:$0xf0]  ;;  %v17814_v7 = vld [vmem:[#allocation8 + $0xdc8] sm:$0xf] }
 0x777   :  { %11630 = vmatpush.bf16.msra.mxu2 %v17415_v32  ;;  %11605 = vmatpush.bf16.msra.mxu0 %v17143_v1  ;;  %v17094_v32 = vld [vmem:[#allocation8 + $0x828] sm:$0xf]  ;;  %v17351_v1 = vor.u32 %v19443_v18, %v17350_v38  ;;  %v19559_v42 = vld [vmem:[#allocation8 + $0xdd4] sm:$0xf0] }
 0x778   :  { %v17095_v56 = vor.u32 %v19379_v14, %v17094_v32  ;;  %v19623_v32 = vld [vmem:[#allocation8 + $0xfd4] sm:$0xf0]  ;;  %v17687_v14 = vor.u32 %v19527_v21, %v17686_v41  ;;  %v17798_v18 = vld [vmem:[#allocation8 + $0xda8] sm:$0xf] }
 0x779   :  { %11643 = vmatpush.bf16.msra.mxu3 %v17543_v17  ;;  %11618 = vmatpush.bf16.msra.mxu1 %v17271_v30  ;;  %v19411_v17 = vld [vmem:[#allocation8 + $0x934] sm:$0xf0]  ;;  %v17206_v30 = vld [vmem:[#allocation8 + $0x908] sm:$0xf]  ;;  %v11379_v43 = vpop.f32.mrf.mxu2 }
 0x77a   :  { %v17223_v49 = vor.u32 %v19411_v17, %v17222_v4  ;;  %v17815_v4 = vor.u32 %v19559_v42, %v17814_v7  ;;  %v17670_v17 = vld [vmem:[#allocation8 + $0xca8] sm:$0xf]  ;;  %v19523_v38 = vld [vmem:[#allocation8 + $0xcb4] sm:$0xf0] }
 0x77b   :  { %11631 = vmatpush.bf16.msra.mxu2 %v17399_v63  ;;  %11606 = vmatpush.bf16.msra.mxu0 %v17127_v52  ;;  %v19407_v63 = vld [vmem:[#allocation8 + $0x914] sm:$0xf0]  ;;  %v11392_v45 = vpop.f32.mrf.mxu3  ;;  %v17079_v52 = vor.u32 %v19375_v29, %v17078_v27  ;;  %v18054_v29 = vld [vmem:[#allocation8 + $0xfa8] sm:$0xf] }
 0x77c   :  { %v17207_v62 = vor.u32 %v19407_v63, %v17206_v30  ;;  %v19555_v26 = vld [vmem:[#allocation8 + $0xdb4] sm:$0xf0]  ;;  %v17654_v36 = vld [vmem:[#allocation8 + $0xc88] sm:$0xf] }
 0x77d   :  { %11644 = vmatpush.bf16.msra.mxu3 %v17527_v44  ;;  %11619 = vmatpush.bf16.msra.mxu1 %v17255_v9  ;;  %v17462_v44 = vld [vmem:[#allocation8 + $0xb08] sm:$0xf]  ;;  %v19563_v9 = vld [vmem:[#allocation8 + $0xdf4] sm:$0xf0]  ;;  %v17799_v30 = vor.u32 %v19555_v26, %v17798_v18 }
 0x77e   :  { %v17463_v50 = vor.u32 %v19471_v39, %v17462_v44  ;;  %v17831_v33 = vor.u32 %v19563_v9, %v17830_v22  ;;  %v19587_v27 = vld [vmem:[#allocation8 + $0xeb4] sm:$0xf0]  ;;  %v17782_v43 = vld [vmem:[#allocation8 + $0xd88] sm:$0xf] }
 0x77f   :  { %11632 = vmatpush.bf16.msra.mxu2 %v17383_v53  ;;  %11607 = vmatpush.bf16.msra.mxu0 %v17111_v6  ;;  %v17958_v53 = vld [vmem:[#allocation8 + $0xee8] sm:$0xf]  ;;  %v19551_v44 = vld [vmem:[#allocation8 + $0xd94] sm:$0xf0] }
 0x780   :  { %v17959_v34 = vor.u32 %v19595_v51, %v17958_v53  ;;  %v17942_v6 = vld [vmem:[#allocation8 + $0xec8] sm:$0xf]  ;;  %v19583_v45 = vld [vmem:[#allocation8 + $0xe94] sm:$0xf0]  ;;  %v17783_v51 = vor.u32 %v19551_v44, %v17782_v43 }
 0x781   :  { %11645 = vmatpush.bf16.msra.mxu3 %v17511_v15  ;;  %11620 = vmatpush.bf16.msra.mxu1 %v17239_v25  ;;  %v18086_v15 = vld [vmem:[#allocation8 + $0xfe8] sm:$0xf]  ;;  %v19591_v25 = vld [vmem:[#allocation8 + $0xed4] sm:$0xf0] }
 0x782   :  { %v18087_v55 = vor.u32 %v19627_v2, %v18086_v15  ;;  %v17910_v39 = vld [vmem:[#allocation8 + $0xe88] sm:$0xf]  ;;  %v19615_v22 = vld [vmem:[#allocation8 + $0xf94] sm:$0xf0] }
 0x783   :  { %11633 = vmatpush.bf16.msra.mxu2 %v17367_v24  ;;  %11608 = vmatpush.bf16.msra.mxu0 %v17095_v56  ;;  %v18070_v24 = vld [vmem:[#allocation8 + $0xfc8] sm:$0xf]  ;;  %v19515_v15 = vld [vmem:[#allocation8 + $0xc74] sm:$0xf0] }
 0x784   :  { %v18071_v23 = vor.u32 %v19623_v32, %v18070_v24  ;;  %v17926_v56 = vld [vmem:[#allocation8 + $0xea8] sm:$0xf]  ;;  %v19579_v41 = vld [vmem:[#allocation8 + $0xe74] sm:$0xf0] }
 0x785   :  { %11646 = vmatpush.bf16.msra.mxu3 %v17495_v11  ;;  %11621 = vmatpush.bf16.msra.mxu1 %v17223_v49  ;;  %v17943_v11 = vor.u32 %v19591_v25, %v17942_v6  ;;  %v19619_v49 = vld [vmem:[#allocation8 + $0xfb4] sm:$0xf0]  ;;  %v17927_v63 = vor.u32 %v19587_v27, %v17926_v56  ;;  %v18038_v59 = vld [vmem:[#allocation8 + $0xf88] sm:$0xf] }
 0x786   :  { %v18055_v16 = vor.u32 %v19619_v49, %v18054_v29  ;;  %v17766_v2 = vld [vmem:[#allocation8 + $0xd68] sm:$0xf]  ;;  %v19611_v7 = vld [vmem:[#allocation8 + $0xf74] sm:$0xf0] }
 0x787   :  { %11634 = vmatpush.bf16.msra.mxu2 %v17351_v1  ;;  %11609 = vmatpush.bf16.msra.mxu0 %v17079_v52  ;;  %v17671_v1 = vor.u32 %v19523_v38, %v17670_v17  ;;  %v11403_v46 = vpop.f32.mrf.mxu0  ;;  %v18022_v21 = vld [vmem:[#allocation8 + $0xf68] sm:$0xf]  ;;  %v19511_v25 = vld [vmem:[#allocation8 + $0xc54] sm:$0xf0] }
 0x788   :  { %v11404_v52 = vadd.f32 %v11403_v46, %v20226_v8  ;;  %v17622_v6 = vld [vmem:[#allocation8 + $0xc48] sm:$0xf]  ;;  %v18023_v32 = vor.u32 %v19611_v7, %v18022_v21  ;;  %v19575_v17 = vld [vmem:[#allocation8 + $0xe54] sm:$0xf0]  ;;  %v16168_v21 = vld [vmem:[#allocation8 + $0xf8] sm:$0xf0] }
 0x789   :  { %11647 = vmatpush.bf16.msra.mxu3 %v17479_v31  ;;  %11622 = vmatpush.bf16.msra.mxu1 %v17207_v62  ;;  %v19519_v31 = vld [vmem:[#allocation8 + $0xc94] sm:$0xf0]  ;;  %v11416_v9 = vpop.f32.mrf.mxu1  ;;  %v17911_v62 = vor.u32 %v19583_v45, %v17910_v39  ;;  %v17750_v24 = vld [vmem:[#allocation8 + $0xd48] sm:$0xf]  ;;  %v17623_v29 = vor.u32 %v19511_v25, %v17622_v6  ;;  %v19177_v7 = vld [vmem:[#allocation8 + $0x1ec] sm:$0xf] }
 0x78a   :  { %11610 = vmatmul.bf16.vlgmr.msra.gmra.mxu0 %v20141_v19  ;;  %v17655_v53 = vor.u32 %v19519_v31, %v17654_v36  ;;  %v18006_v26 = vld [vmem:[#allocation8 + $0xf48] sm:$0xf]  ;;  %v19607_v56 = vld [vmem:[#allocation8 + $0xf54] sm:$0xf0]  ;;  %v16424_v6 = vld [vmem:[#allocation8 + $0x2f8] sm:$0xf0] }
 0x78b   :  { %11635 = vmatpush.bf16.msra.mxu2 %v17335_v0  ;;  %11654 = vmatpush.bf16.msrb.mxu0 %v17703_v47  ;;  %v17638_v0 = vld [vmem:[#allocation8 + $0xc68] sm:$0xf]  ;;  %v18039_v47 = vor.u32 %v19615_v22, %v18038_v59  ;;  %v19507_v36 = vld [vmem:[#allocation8 + $0xc34] sm:$0xf0]  ;;  %v18007_v43 = vor.u32 %v19607_v56, %v18006_v26  ;;  %v19173_v26 = vld [vmem:[#allocation8 + $0x1cc] sm:$0xf] }
 0x78c   :  { %11623 = vmatmul.bf16.vlgmr.msra.gmra.mxu1 %v20143_v35  ;;  %v17734_v31 = vld [vmem:[#allocation8 + $0xd28] sm:$0xf]  ;;  %v19571_v39 = vld [vmem:[#allocation8 + $0xe34] sm:$0xf0] }
 0x78d   :  { %11648 = vmatpush.bf16.msra.mxu3 %v17463_v50  ;;  %11667 = vmatpush.bf16.msrb.mxu1 %v17831_v33  ;;  %v11417_v50 = vadd.f32 %v11416_v9, %v11404_v52  ;;  %v19547_v33 = vld [vmem:[#allocation8 + $0xd74] sm:$0xf0]  ;;  %v17862_v44 = vld [vmem:[#allocation8 + $0xe28] sm:$0xf] }
 0x78e   :  { %11636 = vmatmul.bf16.vlgmr.msra.gmra.mxu2 %v20145_v58  ;;  %v17767_v8 = vor.u32 %v19547_v33, %v17766_v2  ;;  %v17990_v45 = vld [vmem:[#allocation8 + $0xf28] sm:$0xf]  ;;  %v19603_v46 = vld [vmem:[#allocation8 + $0xf34] sm:$0xf0] }
 0x78f   :  { %11680 = vmatpush.bf16.msrb.mxu2 %v17959_v34  ;;  %11655 = vmatpush.bf16.msrb.mxu0 %v17687_v14  ;;  %v17894_v34 = vld [vmem:[#allocation8 + $0xe68] sm:$0xf]  ;;  %v19503_v52 = vld [vmem:[#allocation8 + $0xc14] sm:$0xf0] }
 0x790   :  { %11649 = vmatmul.bf16.vlgmr.msra.gmra.mxu3 %v20147_v60  ;;  %v17895_v42 = vor.u32 %v19579_v41, %v17894_v34  ;;  %v17590_v22 = vld [vmem:[#allocation8 + $0xc08] sm:$0xf]  ;;  %v19599_v33 = vld [vmem:[#allocation8 + $0xf14] sm:$0xf0]  ;;  %v19145_v41 = vld [vmem:[#allocation8 + $0xec] sm:$0xf] }
 0x791   :  { %11693 = vmatpush.bf16.msrb.mxu3 %v18087_v55  ;;  %11668 = vmatpush.bf16.msrb.mxu1 %v17815_v4  ;;  %v17639_v55 = vor.u32 %v19515_v15, %v17638_v0  ;;  %v11429_v14 = vpop.f32.mrf.mxu2  ;;  %v19543_v4 = vld [vmem:[#allocation8 + $0xd54] sm:$0xf0]  ;;  %v11418_v27 = vpop.f32.mrf.mxu1  ;;  %v17846_v0 = vld [vmem:[#allocation8 + $0xe08] sm:$0xf]  ;;  %v17991_v15 = vor.u32 %v19603_v46, %v17990_v45  ;;  %v16264_v46 = vld [vmem:[#allocation8 + $0x1b8] sm:$0xf0] }
 0x792   :  { %v11430_v38 = vadd.f32 %v11429_v14, %v11417_v50  ;;  %v19567_v50 = vld [vmem:[#allocation8 + $0xe14] sm:$0xf0]  ;;  %v16552_v14 = vld [vmem:[#allocation8 + $0x3f8] sm:$0xf0] }
 0x793   :  { %11681 = vmatpush.bf16.msrb.mxu2 %v17943_v11  ;;  %11656 = vmatpush.bf16.msrb.mxu0 %v17671_v1  ;;  %v17878_v11 = vld [vmem:[#allocation8 + $0xe48] sm:$0xf]  ;;  %v11442_v18 = vpop.f32.mrf.mxu3  ;;  %v17751_v1 = vor.u32 %v19543_v4, %v17750_v24  ;;  %v17847_v24 = vor.u32 %v19567_v50, %v17846_v0  ;;  %v16280_v27 = vld [vmem:[#allocation8 + $0x1d8] sm:$0xf0]  ;;  %v19133_v0 = vld [vmem:[#allocation8 + $0x8c] sm:$0xf] }
 0x794   :  { %v20233_v49 = vadd.f32 %v11442_v18, %v11430_v38  ;;  %v19141_v18 = vld [vmem:[#allocation8 + $0xcc] sm:$0xf] }
 0x795   :  { %11694 = vmatpush.bf16.msrb.mxu3 %v18071_v23  ;;  %11669 = vmatpush.bf16.msrb.mxu1 %v17799_v30  ;;  %v11405_v23 = vpop.f32.mrf.mxu0  ;;  %v17879_v30 = vor.u32 %v19575_v17, %v17878_v11  ;;  %v16171_v11 = vor.u32 %v19145_v41, %v16168_v21  ;;  %v19229_v21 = vld [vmem:[#allocation8 + $0x38c] sm:$0xf] }
 0x796   :  { %v16152_v23 = vld [vmem:[#allocation8 + $0xd8] sm:$0xf0] }
 0x797   :  { %11682 = vmatpush.bf16.msrb.mxu2 %v17927_v63  ;;  %11657 = vmatpush.bf16.msrb.mxu0 %v17655_v53  ;;  %v17606_v63 = vld [vmem:[#allocation8 + $0xc28] sm:$0xf]  ;;  %v17863_v53 = vor.u32 %v19571_v39, %v17862_v44  ;;  %v16136_v44 = vld [vmem:[#allocation8 + $0xb8] sm:$0xf0]  ;;  %v19169_v39 = vld [vmem:[#allocation8 + $0x1ac] sm:$0xf] }
 0x798   :  { %v17607_v59 = vor.u32 %v19507_v36, %v17606_v63  ;;  %v16536_v63 = vld [vmem:[#allocation8 + $0x3d8] sm:$0xf0]  ;;  %v16155_v36 = vor.u32 %v19141_v18, %v16152_v23  ;;  %v19225_v23 = vld [vmem:[#allocation8 + $0x36c] sm:$0xf] }
 0x799   :  { %11695 = vmatpush.bf16.msrb.mxu3 %v18055_v16  ;;  %11670 = vmatpush.bf16.msrb.mxu1 %v17783_v51  ;;  %v19539_v16 = vld [vmem:[#allocation8 + $0xd34] sm:$0xf0]  ;;  %v17718_v51 = vld [vmem:[#allocation8 + $0xd08] sm:$0xf]  ;;  %v11431_v2 = vpop.f32.mrf.mxu2  ;;  %v16360_v18 = vld [vmem:[#allocation8 + $0x278] sm:$0xf0] }
 0x79a   :  { %v17735_v9 = vor.u32 %v19539_v16, %v17734_v31  ;;  %v16283_v31 = vor.u32 %v19173_v26, %v16280_v27  ;;  %v19137_v16 = vld [vmem:[#allocation8 + $0xac] sm:$0xf]  ;;  %v16488_v26 = vld [vmem:[#allocation8 + $0x378] sm:$0xf0] }
 0x79b   :  { %11683 = vmatpush.bf16.msrb.mxu2 %v17911_v62  ;;  %11658 = vmatpush.bf16.msrb.mxu0 %v17639_v55  ;;  %v19535_v62 = vld [vmem:[#allocation8 + $0xd14] sm:$0xf0]  ;;  %v11444_v34 = vpop.f32.mrf.mxu3  ;;  %v17591_v55 = vor.u32 %v19503_v52, %v17590_v22  ;;  %v16392_v22 = vld [vmem:[#allocation8 + $0x2b8] sm:$0xf0]  ;;  %v19233_v52 = vld [vmem:[#allocation8 + $0x3ac] sm:$0xf] }
 0x79c   :  { %v17719_v25 = vor.u32 %v19535_v62, %v17718_v51  ;;  %v16267_v51 = vor.u32 %v19169_v39, %v16264_v46  ;;  %v19165_v2 = vld [vmem:[#allocation8 + $0x18c] sm:$0xf]  ;;  %v16376_v34 = vld [vmem:[#allocation8 + $0x298] sm:$0xf0] }
 0x79d   :  { %11696 = vmatpush.bf16.msrb.mxu3 %v18039_v47  ;;  %11671 = vmatpush.bf16.msrb.mxu1 %v17767_v8  ;;  %v17974_v47 = vld [vmem:[#allocation8 + $0xf08] sm:$0xf]  ;;  %v16296_v8 = vld [vmem:[#allocation8 + $0x1f8] sm:$0xf0]  ;;  %v19221_v46 = vld [vmem:[#allocation8 + $0x34c] sm:$0xf] }
 0x79e   :  { %v17975_v4 = vor.u32 %v19599_v33, %v17974_v47  ;;  %v16299_v17 = vor.u32 %v19177_v7, %v16296_v8  ;;  %v16248_v47 = vld [vmem:[#allocation8 + $0x198] sm:$0xf0]  ;;  %v19197_v33 = vld [vmem:[#allocation8 + $0x28c] sm:$0xf] }
 0x79f   :  { %11684 = vmatpush.bf16.msrb.mxu2 %v17895_v42  ;;  %11659 = vmatpush.bf16.msrb.mxu0 %v17623_v29  ;;  %v19209_v42 = vld [vmem:[#allocation8 + $0x2ec] sm:$0xf]  ;;  %v16504_v7 = vld [vmem:[#allocation8 + $0x398] sm:$0xf0] }
 0x7a0   :  { %v16427_v38 = vor.u32 %v19209_v42, %v16424_v6  ;;  %v19205_v29 = vld [vmem:[#allocation8 + $0x2cc] sm:$0xf]  ;;  %v16251_v6 = vor.u32 %v19165_v2, %v16248_v47 }
 0x7a1   :  { %11697 = vmatpush.bf16.msrb.mxu3 %v18023_v32  ;;  %11672 = vmatpush.bf16.msrb.mxu1 %v17751_v1  ;;  %v19241_v32 = vld [vmem:[#allocation8 + $0x3ec] sm:$0xf]  ;;  %v16408_v1 = vld [vmem:[#allocation8 + $0x2d8] sm:$0xf0] }
 0x7a2   :  { %v16555_v56 = vor.u32 %v19241_v32, %v16552_v14  ;;  %v16104_v32 = vld [vmem:[#allocation8 + $0x78] sm:$0xf0]  ;;  %v19161_v14 = vld [vmem:[#allocation8 + $0x16c] sm:$0xf] }
 0x7a3   :  { %11685 = vmatpush.bf16.msrb.mxu2 %v17879_v30  ;;  %11660 = vmatpush.bf16.msrb.mxu0 %v17607_v59  ;;  %v19237_v30 = vld [vmem:[#allocation8 + $0x3cc] sm:$0xf] }
 0x7a4   :  { %v16539_v45 = vor.u32 %v19237_v30, %v16536_v63  ;;  %v19201_v59 = vld [vmem:[#allocation8 + $0x2ac] sm:$0xf]  ;;  %v16491_v63 = vor.u32 %v19225_v23, %v16488_v26 }
 0x7a5   :  { %11698 = vmatpush.bf16.msrb.mxu3 %v18007_v43  ;;  %11673 = vmatpush.bf16.msrb.mxu1 %v17735_v9  ;;  %v16411_v43 = vor.u32 %v19205_v29, %v16408_v1  ;;  %v16520_v9 = vld [vmem:[#allocation8 + $0x3b8] sm:$0xf0]  ;;  %v16395_v62 = vor.u32 %v19201_v59, %v16392_v22  ;;  %v19125_v29 = vld [vmem:[#allocation8 + $0x4c] sm:$0xf] }
 0x7a6   :  { %v16523_v50 = vor.u32 %v19233_v52, %v16520_v9  ;;  %v16088_v1 = vld [vmem:[#allocation8 + $0x58] sm:$0xf0]  ;;  %v19157_v30 = vld [vmem:[#allocation8 + $0x14c] sm:$0xf] }
 0x7a7   :  { %11686 = vmatpush.bf16.msrb.mxu2 %v17863_v53  ;;  %11661 = vmatpush.bf16.msrb.mxu0 %v17591_v55  ;;  %v16139_v53 = vor.u32 %v19137_v16, %v16136_v44  ;;  %v11455_v41 = vpop.f32.mrf.mxu0  ;;  %v16344_v16 = vld [vmem:[#allocation8 + $0x258] sm:$0xf0]  ;;  %v16091_v52 = vor.u32 %v19125_v29, %v16088_v1  ;;  %v19185_v47 = vld [vmem:[#allocation8 + $0x22c] sm:$0xf] }
 0x7a8   :  { %v11456_v55 = vadd.f32 %v11455_v41, %v20233_v49  ;;  %v16472_v59 = vld [vmem:[#allocation8 + $0x358] sm:$0xf0]  ;;  %v19217_v41 = vld [vmem:[#allocation8 + $0x32c] sm:$0xf] }
 0x7a9   :  { %11699 = vmatpush.bf16.msrb.mxu3 %v17991_v15  ;;  %11674 = vmatpush.bf16.msrb.mxu1 %v17719_v25  ;;  %v16120_v15 = vld [vmem:[#allocation8 + $0x98] sm:$0xf0]  ;;  %v11468_v8 = vpop.f32.mrf.mxu1  ;;  %v16379_v25 = vor.u32 %v19197_v33, %v16376_v34  ;;  %v16475_v2 = vor.u32 %v19221_v46, %v16472_v59  ;;  %v19273_v26 = vld [vmem:[#allocation8 + $0x4ec] sm:$0xf] }
 0x7aa   :  { %11662 = vmatmul.bf16.vlgmr.msrb.gmra.mxu0 %v20171_v48  ;;  %v16123_v42 = vor.u32 %v19133_v0, %v16120_v15  ;;  %v16072_v0 = vld [vmem:[#allocation8 + $0x38] sm:$0xf0]  ;;  %v19153_v15 = vld [vmem:[#allocation8 + $0x12c] sm:$0xf] }
 0x7ab   :  { %11687 = vmatpush.bf16.msrb.mxu2 %v17847_v24  ;;  %11706 = vmatpush.bf16.msra.mxu0 %v16171_v11  ;;  %v19129_v24 = vld [vmem:[#allocation8 + $0x6c] sm:$0xf]  ;;  %v16507_v11 = vor.u32 %v19229_v21, %v16504_v7  ;;  %v16328_v33 = vld [vmem:[#allocation8 + $0x238] sm:$0xf0] }
 0x7ac   :  { %11675 = vmatmul.bf16.vlgmr.msrb.gmra.mxu1 %v20173_v12  ;;  %v16456_v21 = vld [vmem:[#allocation8 + $0x338] sm:$0xf0]  ;;  %v19337_v29 = vld [vmem:[#allocation8 + $0x6ec] sm:$0xf] }
 0x7ad   :  { %11700 = vmatpush.bf16.msrb.mxu3 %v17975_v4  ;;  %11719 = vmatpush.bf16.msra.mxu1 %v16299_v17  ;;  %v11469_v4 = vadd.f32 %v11468_v8, %v11456_v55  ;;  %v16232_v17 = vld [vmem:[#allocation8 + $0x178] sm:$0xf0]  ;;  %v19117_v55 = vld [vmem:[#allocation8 + $0xc] sm:$0xf] }
 0x7ae   :  { %11688 = vmatmul.bf16.vlgmr.msrb.gmra.mxu2 %v20175_v13  ;;  %v16235_v49 = vor.u32 %v19161_v14, %v16232_v17  ;;  %v16056_v8 = vld [vmem:[#allocation8 + $0x18] sm:$0xf0]  ;;  %v19181_v14 = vld [vmem:[#allocation8 + $0x20c] sm:$0xf] }
 0x7af   :  { %11732 = vmatpush.bf16.msra.mxu2 %v16427_v38  ;;  %11707 = vmatpush.bf16.msra.mxu0 %v16155_v36  ;;  %v19193_v38 = vld [vmem:[#allocation8 + $0x26c] sm:$0xf]  ;;  %v16312_v17 = vld [vmem:[#allocation8 + $0x218] sm:$0xf0] }
 0x7b0   :  { %11701 = vmatmul.bf16.vlgmr.msrb.gmra.mxu3 %v20182_v3  ;;  %v16363_v27 = vor.u32 %v19193_v38, %v16360_v18  ;;  %v19213_v38 = vld [vmem:[#allocation8 + $0x30c] sm:$0xf]  ;;  %v16440_v18 = vld [vmem:[#allocation8 + $0x318] sm:$0xf0] }
 0x7b1   :  { %11745 = vmatpush.bf16.msra.mxu3 %v16555_v56  ;;  %11720 = vmatpush.bf16.msra.mxu1 %v16283_v31  ;;  %v16107_v56 = vor.u32 %v19129_v24, %v16104_v32  ;;  %v11481_v36 = vpop.f32.mrf.mxu2  ;;  %v16216_v31 = vld [vmem:[#allocation8 + $0x158] sm:$0xf0]  ;;  %v11470_v22 = vpop.f32.mrf.mxu1  ;;  %v19149_v24 = vld [vmem:[#allocation8 + $0x10c] sm:$0xf] }
 0x7b2   :  { %v11482_v44 = vadd.f32 %v11481_v36, %v11469_v4  ;;  %v16184_v32 = vld [vmem:[#allocation8 + $0x118] sm:$0xf0]  ;;  %v16459_v4 = vor.u32 %v19217_v41, %v16456_v21  ;;  %v19369_v36 = vld [vmem:[#allocation8 + $0x7ec] sm:$0xf] }
 0x7b3   :  { %11733 = vmatpush.bf16.msra.mxu2 %v16411_v43  ;;  %11708 = vmatpush.bf16.msra.mxu0 %v16139_v53  ;;  %v19189_v43 = vld [vmem:[#allocation8 + $0x24c] sm:$0xf]  ;;  %v11494_v39 = vpop.f32.mrf.mxu3  ;;  %v16219_v53 = vor.u32 %v19157_v30, %v16216_v31  ;;  %v16936_v1 = vld [vmem:[#allocation8 + $0x6f8] sm:$0xf0]  ;;  %v16187_v30 = vor.u32 %v19149_v24, %v16184_v32 }
 0x7b4   :  { %v11495_v9 = vadd.f32 %v11494_v39, %v11482_v44  ;;  %v17064_v31 = vld [vmem:[#allocation8 + $0x7f8] sm:$0xf0]  ;;  %v16939_v39 = vor.u32 %v19337_v29, %v16936_v1  ;;  %v19301_v59 = vld [vmem:[#allocation8 + $0x5cc] sm:$0xf] }
 0x7b5   :  { %11746 = vmatpush.bf16.msra.mxu3 %v16539_v45  ;;  %11721 = vmatpush.bf16.msra.mxu1 %v16267_v51  ;;  %v11457_v45 = vpop.f32.mrf.mxu0  ;;  %v16347_v51 = vor.u32 %v19189_v43, %v16344_v16  ;;  %v16443_v43 = vor.u32 %v19213_v38, %v16440_v18  ;;  %v16664_v46 = vld [vmem:[#allocation8 + $0x4d8] sm:$0xf0]  ;;  %v17067_v22 = vor.u32 %v19369_v36, %v17064_v31  ;;  %v19329_v21 = vld [vmem:[#allocation8 + $0x6ac] sm:$0xf] }
 0x7b6   :  { %v11918_v34 = vrot.slane %v11495_v9, 6  ;;  %v19269_v45 = vld [vmem:[#allocation8 + $0x4cc] sm:$0xf]  ;;  %v16776_v41 = vld [vmem:[#allocation8 + $0x5b8] sm:$0xf0] }
 0x7b7   :  { %11734 = vmatpush.bf16.msra.mxu2 %v16395_v62  ;;  %11709 = vmatpush.bf16.msra.mxu0 %v16123_v42  ;;  %v19121_v62 = vld [vmem:[#allocation8 + $0x2c] sm:$0xf]  ;;  %v16888_v38 = vld [vmem:[#allocation8 + $0x698] sm:$0xf0] }
 0x7b8   :  { %v16075_v7 = vor.u32 %v19121_v62, %v16072_v0  ;;  %v20242_v42 = vsel %vm11921_vm0, %v20217_v5, %v11918_v34  ;;  %v16059_v5 = vor.u32 %v19117_v55, %v16056_v8  ;;  %v19333_v9 = vld [vmem:[#allocation8 + $0x6cc] sm:$0xf]  ;;  %v17048_v62 = vld [vmem:[#allocation8 + $0x7d8] sm:$0xf0]  ;;  %v16667_v0 = vor.u32 %v19269_v45, %v16664_v46 }
 0x7b9   :  { %11747 = vmatpush.bf16.msra.mxu3 %v16523_v50  ;;  %11722 = vmatpush.bf16.msra.mxu1 %v16251_v6  ;;  %v16200_v50 = vld [vmem:[#allocation8 + $0x138] sm:$0xf0]  ;;  %v19361_v55 = vld [vmem:[#allocation8 + $0x7ac] sm:$0xf] }
 0x7ba   :  { %v16203_v6 = vor.u32 %v19153_v15, %v16200_v50  ;;  %v19265_v50 = vld [vmem:[#allocation8 + $0x4ac] sm:$0xf]  ;;  %v17032_v8 = vld [vmem:[#allocation8 + $0x7b8] sm:$0xf0] }
 0x7bb   :  { %11735 = vmatpush.bf16.msra.mxu2 %v16379_v25  ;;  %11710 = vmatpush.bf16.msra.mxu0 %v16107_v56  ;;  %v16331_v25 = vor.u32 %v19185_v47, %v16328_v33  ;;  %v11496_v23 = vpop.f32.mrf.mxu3  ;;  %v16680_v56 = vld [vmem:[#allocation8 + $0x4f8] sm:$0xf0]  ;;  %v19297_v33 = vld [vmem:[#allocation8 + $0x5ac] sm:$0xf] }
 0x7bc   :  { %v16683_v16 = vor.u32 %v19273_v26, %v16680_v56  ;;  %v16648_v47 = vld [vmem:[#allocation8 + $0x4b8] sm:$0xf0]  ;;  %v19257_v29 = vld [vmem:[#allocation8 + $0x46c] sm:$0xf] }
 0x7bd   :  { %11748 = vmatpush.bf16.msra.mxu3 %v16507_v11  ;;  %11723 = vmatpush.bf16.msra.mxu1 %v16235_v49  ;;  %v11483_v11 = vpop.f32.mrf.mxu2  ;;  %v19305_v49 = vld [vmem:[#allocation8 + $0x5ec] sm:$0xf]  ;;  %v17016_v23 = vld [vmem:[#allocation8 + $0x798] sm:$0xf0] }
 0x7be   :  { %v19293_v11 = vld [vmem:[#allocation8 + $0x58c] sm:$0xf]  ;;  %v16616_v1 = vld [vmem:[#allocation8 + $0x478] sm:$0xf0] }
 0x7bf   :  { %11736 = vmatpush.bf16.msra.mxu2 %v16363_v27  ;;  %11711 = vmatpush.bf16.msra.mxu0 %v16091_v52  ;;  %v16808_v27 = vld [vmem:[#allocation8 + $0x5f8] sm:$0xf0]  ;;  %v16619_v45 = vor.u32 %v19257_v29, %v16616_v1  ;;  %v19341_v1 = vld [vmem:[#allocation8 + $0x70c] sm:$0xf] }
 0x7c0   :  { %v16811_v44 = vor.u32 %v19305_v49, %v16808_v27  ;;  %v16792_v52 = vld [vmem:[#allocation8 + $0x5d8] sm:$0xf0] }
 0x7c1   :  { %11749 = vmatpush.bf16.msra.mxu3 %v16491_v63  ;;  %11724 = vmatpush.bf16.msra.mxu1 %v16219_v53  ;;  %v16315_v63 = vor.u32 %v19181_v14, %v16312_v17  ;;  %v16920_v53 = vld [vmem:[#allocation8 + $0x6d8] sm:$0xf0]  ;;  %v16795_v15 = vor.u32 %v19301_v59, %v16792_v52  ;;  %v19261_v14 = vld [vmem:[#allocation8 + $0x48c] sm:$0xf] }
 0x7c2   :  { %v19325_v17 = vld [vmem:[#allocation8 + $0x68c] sm:$0xf]  ;;  %v16744_v31 = vld [vmem:[#allocation8 + $0x578] sm:$0xf0] }
 0x7c3   :  { %11737 = vmatpush.bf16.msra.mxu2 %v16347_v51  ;;  %11712 = vmatpush.bf16.msra.mxu0 %v16075_v7  ;;  %v19365_v51 = vld [vmem:[#allocation8 + $0x7cc] sm:$0xf]  ;;  %v16904_v7 = vld [vmem:[#allocation8 + $0x6b8] sm:$0xf0]  ;;  %v16891_v27 = vor.u32 %v19325_v17, %v16888_v38 }
 0x7c4   :  { %v17051_v34 = vor.u32 %v19365_v51, %v17048_v62  ;;  %v16907_v32 = vor.u32 %v19329_v21, %v16904_v7  ;;  %v16600_v52 = vld [vmem:[#allocation8 + $0x458] sm:$0xf0]  ;;  %v19245_v38 = vld [vmem:[#allocation8 + $0x40c] sm:$0xf] }
 0x7c5   :  { %11750 = vmatpush.bf16.msra.mxu3 %v16475_v2  ;;  %11725 = vmatpush.bf16.msra.mxu1 %v16203_v6  ;;  %v16923_v2 = vor.u32 %v19333_v9, %v16920_v53  ;;  %v16651_v6 = vor.u32 %v19265_v50, %v16648_v47  ;;  %v19285_v9 = vld [vmem:[#allocation8 + $0x54c] sm:$0xf]  ;;  %v16728_v62 = vld [vmem:[#allocation8 + $0x558] sm:$0xf0] }
 0x7c6   :  { %v16824_v29 = vld [vmem:[#allocation8 + $0x618] sm:$0xf0] }
 0x7c7   :  { %11738 = vmatpush.bf16.msra.mxu2 %v16331_v25  ;;  %11713 = vmatpush.bf16.msra.mxu0 %v16059_v5  ;;  %v20248_v25 = vld [vmem:[#allocation10] sm:$0xf]  ;;  %v11507_v18 = vpop.f32.mrf.mxu0 }
 0x7c8   :  { %v8516_v24 = vperm.slane %v20248_v25, 2 }
 0x7c9   :  { %11751 = vmatpush.bf16.msra.mxu3 %v16459_v4  ;;  %11726 = vmatpush.bf16.msra.mxu1 %v16187_v30  ;;  %v16632_v4 = vld [vmem:[#allocation8 + $0x498] sm:$0xf0]  ;;  %v11520_v56 = vpop.f32.mrf.mxu1  ;;  %v19289_v30 = vld [vmem:[#allocation8 + $0x56c] sm:$0xf] }
 0x7ca   :  { %11714 = vmatmul.bf16.vlgmr.msra.gmra.mxu0 %v20096_v54  ;;  %v16779_v54 = vor.u32 %v19297_v33, %v16776_v41  ;;  %v11508_v26 = vadd.f32 %v11507_v18, %v8516_v24  ;;  %v16635_v49 = vor.u32 %v19261_v14, %v16632_v4  ;;  %v16747_v46 = vor.u32 %v19289_v30, %v16744_v31  ;;  %v19349_v33 = vld [vmem:[#allocation8 + $0x74c] sm:$0xf]  ;;  %v16584_v24 = vld [vmem:[#allocation8 + $0x438] sm:$0xf0] }
 0x7cb   :  { %11739 = vmatpush.bf16.msra.mxu2 %v16315_v63  ;;  %11758 = vmatpush.bf16.msrb.mxu0 %v16683_v16  ;;  %v16872_v16 = vld [vmem:[#allocation8 + $0x678] sm:$0xf0]  ;;  %v19313_v4 = vld [vmem:[#allocation8 + $0x62c] sm:$0xf] }
 0x7cc   :  { %11727 = vmatmul.bf16.vlgmr.msra.gmra.mxu1 %v20098_v61  ;;  %v17035_v61 = vor.u32 %v19361_v55, %v17032_v8  ;;  %v11521_v63 = vadd.f32 %v11520_v56, %v11508_v26  ;;  %v16731_v55 = vor.u32 %v19285_v9, %v16728_v62  ;;  %v16712_v14 = vld [vmem:[#allocation8 + $0x538] sm:$0xf0]  ;;  %v19277_v26 = vld [vmem:[#allocation8 + $0x50c] sm:$0xf] }
 0x7cd   :  { %11752 = vmatpush.bf16.msra.mxu3 %v16443_v43  ;;  %11771 = vmatpush.bf16.msrb.mxu1 %v16811_v44  ;;  %v19321_v43 = vld [vmem:[#allocation8 + $0x66c] sm:$0xf]  ;;  %v16568_v18 = vld [vmem:[#allocation8 + $0x418] sm:$0xf0] }
 0x7ce   :  { %11740 = vmatmul.bf16.vlgmr.msra.gmra.mxu2 %v20100_v10  ;;  %v16760_v10 = vld [vmem:[#allocation8 + $0x598] sm:$0xf0]  ;;  %v19353_v44 = vld [vmem:[#allocation8 + $0x76c] sm:$0xf]  ;;  %v16875_v59 = vor.u32 %v19321_v43, %v16872_v16  ;;  %v16571_v16 = vor.u32 %v19245_v38, %v16568_v18 }
 0x7cf   :  { %11784 = vmatpush.bf16.msrb.mxu2 %v16939_v39  ;;  %11759 = vmatpush.bf16.msrb.mxu0 %v16667_v0  ;;  %v16763_v5 = vor.u32 %v19293_v11, %v16760_v10  ;;  %v17000_v39 = vld [vmem:[#allocation8 + $0x778] sm:$0xf0]  ;;  %v19317_v0 = vld [vmem:[#allocation8 + $0x64c] sm:$0xf]  ;;  %v11509_v47 = vpop.f32.mrf.mxu0 }
 0x7d0   :  { %11753 = vmatmul.bf16.vlgmr.msra.gmra.mxu3 %v20102_v37  ;;  %v19357_v37 = vld [vmem:[#allocation8 + $0x78c] sm:$0xf]  ;;  %v17003_v53 = vor.u32 %v19353_v44, %v17000_v39  ;;  %v16840_v11 = vld [vmem:[#allocation8 + $0x638] sm:$0xf0] }
 0x7d1   :  { %11797 = vmatpush.bf16.msrb.mxu3 %v17067_v22  ;;  %11772 = vmatpush.bf16.msrb.mxu1 %v16795_v15  ;;  %v17019_v36 = vor.u32 %v19357_v37, %v17016_v23  ;;  %v19253_v22 = vld [vmem:[#allocation8 + $0x44c] sm:$0xf]  ;;  %v11533_v51 = vpop.f32.mrf.mxu2  ;;  %v16856_v15 = vld [vmem:[#allocation8 + $0x658] sm:$0xf0]  ;;  %v11522_v41 = vpop.f32.mrf.mxu1  ;;  %v16843_v23 = vor.u32 %v19313_v4, %v16840_v11 }
 0x7d2   :  { %v16603_v21 = vor.u32 %v19253_v22, %v16600_v52  ;;  %v16859_v8 = vor.u32 %v19317_v0, %v16856_v15  ;;  %v16968_v10 = vld [vmem:[#allocation8 + $0x738] sm:$0xf0]  ;;  %v19433_v43 = vld [vmem:[#allocation8 + $0x9ec] sm:$0xf] }
 0x7d3   :  { %11785 = vmatpush.bf16.msrb.mxu2 %v16923_v2  ;;  %11760 = vmatpush.bf16.msrb.mxu0 %v16651_v6  ;;  %v11534_v2 = vadd.f32 %v11533_v51, %v11521_v63  ;;  %v11546_v50 = vpop.f32.mrf.mxu3  ;;  %v19249_v6 = vld [vmem:[#allocation8 + $0x42c] sm:$0xf]  ;;  %v16696_v56 = vld [vmem:[#allocation8 + $0x518] sm:$0xf0] }
 0x7d4   :  { %v16587_v17 = vor.u32 %v19249_v6, %v16584_v24  ;;  %v16952_v30 = vld [vmem:[#allocation8 + $0x718] sm:$0xf0]  ;;  %v19465_v39 = vld [vmem:[#allocation8 + $0xaec] sm:$0xf] }
 0x7d5   :  { %11798 = vmatpush.bf16.msrb.mxu3 %v17051_v34  ;;  %11773 = vmatpush.bf16.msrb.mxu1 %v16779_v54  ;;  %v16984_v34 = vld [vmem:[#allocation8 + $0x758] sm:$0xf0]  ;;  %v20251_v7 = vadd.f32 %v11546_v50, %v11534_v2  ;;  %v19281_v54 = vld [vmem:[#allocation8 + $0x52c] sm:$0xf]  ;;  %v16955_v9 = vor.u32 %v19341_v1, %v16952_v30 }
 0x7d6   :  { %v16715_v37 = vor.u32 %v19281_v54, %v16712_v14  ;;  %v17192_v31 = vld [vmem:[#allocation8 + $0x8f8] sm:$0xf0]  ;;  %v19497_v22 = vld [vmem:[#allocation8 + $0xbec] sm:$0xf] }
 0x7d7   :  { %11786 = vmatpush.bf16.msrb.mxu2 %v16907_v32  ;;  %11761 = vmatpush.bf16.msrb.mxu0 %v16635_v49  ;;  %v16987_v32 = vor.u32 %v19349_v33, %v16984_v34  ;;  %v19309_v49 = vld [vmem:[#allocation8 + $0x60c] sm:$0xf]  ;;  %v17320_v44 = vld [vmem:[#allocation8 + $0x9f8] sm:$0xf0] }
 0x7d8   :  { %v17576_v52 = vld [vmem:[#allocation8 + $0xbf8] sm:$0xf0]  ;;  %v17323_v51 = vor.u32 %v19433_v43, %v17320_v44  ;;  %v19397_v0 = vld [vmem:[#allocation8 + $0x8cc] sm:$0xf] }
 0x7d9   :  { %11799 = vmatpush.bf16.msrb.mxu3 %v17035_v61  ;;  %11774 = vmatpush.bf16.msrb.mxu1 %v16763_v5  ;;  %v19345_v61 = vld [vmem:[#allocation8 + $0x72c] sm:$0xf]  ;;  %v17176_v15 = vld [vmem:[#allocation8 + $0x8d8] sm:$0xf0]  ;;  %v17579_v50 = vor.u32 %v19497_v22, %v17576_v52 }
 0x7da   :  { %v16971_v5 = vor.u32 %v19345_v61, %v16968_v10  ;;  %v19429_v2 = vld [vmem:[#allocation8 + $0x9cc] sm:$0xf]  ;;  %v17304_v47 = vld [vmem:[#allocation8 + $0x9d8] sm:$0xf0] }
 0x7db   :  { %11787 = vmatpush.bf16.msrb.mxu2 %v16891_v27  ;;  %11762 = vmatpush.bf16.msrb.mxu0 %v16619_v45  ;;  %v11535_v27 = vpop.f32.mrf.mxu2  ;;  %v11548_v63 = vpop.f32.mrf.mxu3  ;;  %v17448_v45 = vld [vmem:[#allocation8 + $0xaf8] sm:$0xf0]  ;;  %v19461_v33 = vld [vmem:[#allocation8 + $0xacc] sm:$0xf] }
 0x7dc   :  { %v17451_v62 = vor.u32 %v19465_v39, %v17448_v45  ;;  %v17432_v34 = vld [vmem:[#allocation8 + $0xad8] sm:$0xf0]  ;;  %v19493_v41 = vld [vmem:[#allocation8 + $0xbcc] sm:$0xf] }
 0x7dd   :  { %11800 = vmatpush.bf16.msrb.mxu3 %v17019_v36  ;;  %11775 = vmatpush.bf16.msrb.mxu1 %v16747_v46  ;;  %v19401_v36 = vld [vmem:[#allocation8 + $0x8ec] sm:$0xf]  ;;  %v16699_v46 = vor.u32 %v19277_v26, %v16696_v56  ;;  %v17435_v6 = vor.u32 %v19461_v33, %v17432_v34  ;;  %v17160_v54 = vld [vmem:[#allocation8 + $0x8b8] sm:$0xf0] }
 0x7de   :  { %v19393_v24 = vld [vmem:[#allocation8 + $0x8ac] sm:$0xf]  ;;  %v17288_v4 = vld [vmem:[#allocation8 + $0x9b8] sm:$0xf0] }
 0x7df   :  { %11788 = vmatpush.bf16.msrb.mxu2 %v16875_v59  ;;  %11763 = vmatpush.bf16.msrb.mxu0 %v16603_v21  ;;  %v16827_v59 = vor.u32 %v19309_v49, %v16824_v29  ;;  %v17560_v21 = vld [vmem:[#allocation8 + $0xbd8] sm:$0xf0]  ;;  %v19457_v11 = vld [vmem:[#allocation8 + $0xaac] sm:$0xf]  ;;  %v17163_v38 = vor.u32 %v19393_v24, %v17160_v54 }
 0x7e0   :  { %v17563_v14 = vor.u32 %v19493_v41, %v17560_v21  ;;  %v17416_v61 = vld [vmem:[#allocation8 + $0xab8] sm:$0xf0]  ;;  %v19489_v10 = vld [vmem:[#allocation8 + $0xbac] sm:$0xf] }
 0x7e1   :  { %11801 = vmatpush.bf16.msrb.mxu3 %v17003_v53  ;;  %11776 = vmatpush.bf16.msrb.mxu1 %v16731_v55  ;;  %v17195_v53 = vor.u32 %v19401_v36, %v17192_v31  ;;  %v17179_v55 = vor.u32 %v19397_v0, %v17176_v15  ;;  %v19421_v26 = vld [vmem:[#allocation8 + $0x98c] sm:$0xf]  ;;  %v17272_v49 = vld [vmem:[#allocation8 + $0x998] sm:$0xf0] }
 0x7e2   :  { %v17528_v29 = vld [vmem:[#allocation8 + $0xb98] sm:$0xf0]  ;;  %v17275_v63 = vor.u32 %v19421_v26, %v17272_v49  ;;  %v19385_v31 = vld [vmem:[#allocation8 + $0x86c] sm:$0xf] }
 0x7e3   :  { %11789 = vmatpush.bf16.msrb.mxu2 %v16859_v8  ;;  %11764 = vmatpush.bf16.msrb.mxu0 %v16587_v17  ;;  %v17307_v8 = vor.u32 %v19429_v2, %v17304_v47  ;;  %v17544_v17 = vld [vmem:[#allocation8 + $0xbb8] sm:$0xf0]  ;;  %v19481_v22 = vld [vmem:[#allocation8 + $0xb6c] sm:$0xf] }
 0x7e4   :  { %v17547_v56 = vor.u32 %v19489_v10, %v17544_v17  ;;  %v17128_v43 = vld [vmem:[#allocation8 + $0x878] sm:$0xf0]  ;;  %v19413_v0 = vld [vmem:[#allocation8 + $0x94c] sm:$0xf] }
 0x7e5   :  { %11802 = vmatpush.bf16.msrb.mxu3 %v16987_v32  ;;  %11777 = vmatpush.bf16.msrb.mxu1 %v16715_v37  ;;  %v19425_v32 = vld [vmem:[#allocation8 + $0x9ac] sm:$0xf]  ;;  %v17419_v37 = vor.u32 %v19457_v11, %v17416_v61  ;;  %v17256_v45 = vld [vmem:[#allocation8 + $0x978] sm:$0xf0] }
 0x7e6   :  { %v17291_v18 = vor.u32 %v19425_v32, %v17288_v4  ;;  %v17512_v52 = vld [vmem:[#allocation8 + $0xb78] sm:$0xf0]  ;;  %v19445_v47 = vld [vmem:[#allocation8 + $0xa4c] sm:$0xf] }
 0x7e7   :  { %11790 = vmatpush.bf16.msrb.mxu2 %v16843_v23  ;;  %11765 = vmatpush.bf16.msrb.mxu0 %v16571_v16  ;;  %v19389_v23 = vld [vmem:[#allocation8 + $0x88c] sm:$0xf]  ;;  %v11559_v27 = vpop.f32.mrf.mxu0  ;;  %v17515_v15 = vor.u32 %v19481_v22, %v17512_v52  ;;  %v17368_v33 = vld [vmem:[#allocation8 + $0xa58] sm:$0xf0] }
 0x7e8   :  { %v19417_v16 = vld [vmem:[#allocation8 + $0x96c] sm:$0xf]  ;;  %v17096_v11 = vld [vmem:[#allocation8 + $0x838] sm:$0xf0] }
 0x7e9   :  { %11803 = vmatpush.bf16.msrb.mxu3 %v16971_v5  ;;  %11778 = vmatpush.bf16.msrb.mxu1 %v16699_v46  ;;  %v19453_v5 = vld [vmem:[#allocation8 + $0xa8c] sm:$0xf]  ;;  %v11572_v1 = vpop.f32.mrf.mxu1  ;;  %v17224_v17 = vld [vmem:[#allocation8 + $0x938] sm:$0xf0] }
 0x7ea   :  { %11766 = vmatmul.bf16.vlgmr.msrb.gmra.mxu0 %v20117_v57  ;;  %v17144_v57 = vld [vmem:[#allocation8 + $0x898] sm:$0xf0]  ;;  %v19449_v46 = vld [vmem:[#allocation8 + $0xa6c] sm:$0xf] }
 0x7eb   :  { %11791 = vmatpush.bf16.msrb.mxu2 %v16827_v59  ;;  %11810 = vmatpush.bf16.msra.mxu0 %v17195_v53  ;;  %v17147_v30 = vor.u32 %v19389_v23, %v17144_v57  ;;  %v17384_v59 = vld [vmem:[#allocation8 + $0xa78] sm:$0xf0]  ;;  %v19377_v4 = vld [vmem:[#allocation8 + $0x82c] sm:$0xf] }
 0x7ec   :  { %11779 = vmatmul.bf16.vlgmr.msrb.gmra.mxu1 %v20119_v20  ;;  %v17400_v20 = vld [vmem:[#allocation8 + $0xa98] sm:$0xf0]  ;;  %v17387_v53 = vor.u32 %v19449_v46, %v17384_v59  ;;  %v19409_v61 = vld [vmem:[#allocation8 + $0x92c] sm:$0xf]  ;;  %v17099_v57 = vor.u32 %v19377_v4, %v17096_v11 }
 0x7ed   :  { %11804 = vmatpush.bf16.msrb.mxu3 %v16955_v9  ;;  %11823 = vmatpush.bf16.msra.mxu1 %v17323_v51  ;;  %v17403_v36 = vor.u32 %v19453_v5, %v17400_v20  ;;  %v17131_v9 = vor.u32 %v19385_v31, %v17128_v43  ;;  %v19381_v51 = vld [vmem:[#allocation8 + $0x84c] sm:$0xf]  ;;  %v17480_v23 = vld [vmem:[#allocation8 + $0xb38] sm:$0xf0]  ;;  %v17227_v49 = vor.u32 %v19409_v61, %v17224_v17 }
 0x7ee   :  { %11792 = vmatmul.bf16.vlgmr.msrb.gmra.mxu2 %v20121_v40  ;;  %v19485_v40 = vld [vmem:[#allocation8 + $0xb8c] sm:$0xf]  ;;  %v17704_v43 = vld [vmem:[#allocation8 + $0xcf8] sm:$0xf0] }
 0x7ef   :  { %11836 = vmatpush.bf16.msra.mxu2 %v17451_v62  ;;  %11811 = vmatpush.bf16.msra.mxu0 %v17179_v55  ;;  %v17531_v39 = vor.u32 %v19485_v40, %v17528_v29  ;;  %v17112_v62 = vld [vmem:[#allocation8 + $0x858] sm:$0xf0]  ;;  %v11561_v21 = vpop.f32.mrf.mxu0  ;;  %v19477_v55 = vld [vmem:[#allocation8 + $0xb4c] sm:$0xf] }
 0x7f0   :  { %11805 = vmatmul.bf16.vlgmr.msrb.gmra.mxu3 %v20123_v28  ;;  %v11560_v28 = vadd.f32 %v11559_v27, %v20251_v7  ;;  %v17259_v7 = vor.u32 %v19417_v16, %v17256_v45  ;;  %v17115_v24 = vor.u32 %v19381_v51, %v17112_v62  ;;  %v19373_v26 = vld [vmem:[#allocation8 + $0x80c] sm:$0xf]  ;;  %v17208_v27 = vld [vmem:[#allocation8 + $0x918] sm:$0xf0] }
 0x7f1   :  { %11849 = vmatpush.bf16.msra.mxu3 %v17579_v50  ;;  %11824 = vmatpush.bf16.msra.mxu1 %v17307_v8  ;;  %v11585_v2 = vpop.f32.mrf.mxu2  ;;  %v17240_v50 = vld [vmem:[#allocation8 + $0x958] sm:$0xf0]  ;;  %v19405_v20 = vld [vmem:[#allocation8 + $0x90c] sm:$0xf] }
 0x7f2   :  { %v11573_v44 = vadd.f32 %v11572_v1, %v11560_v28  ;;  %v17496_v8 = vld [vmem:[#allocation8 + $0xb58] sm:$0xf0]  ;;  %v17243_v32 = vor.u32 %v19413_v0, %v17240_v50  ;;  %v19437_v40 = vld [vmem:[#allocation8 + $0xa0c] sm:$0xf]  ;;  %v17211_v59 = vor.u32 %v19405_v20, %v17208_v27 }
 0x7f3   :  { %11837 = vmatpush.bf16.msra.mxu2 %v17435_v6  ;;  %11812 = vmatpush.bf16.msra.mxu0 %v17163_v38  ;;  %v11598_v41 = vpop.f32.mrf.mxu3  ;;  %v11574_v6 = vpop.f32.mrf.mxu1  ;;  %v17499_v10 = vor.u32 %v19477_v55, %v17496_v8  ;;  %v19441_v38 = vld [vmem:[#allocation8 + $0xa2c] sm:$0xf]  ;;  %v17336_v1 = vld [vmem:[#allocation8 + $0xa18] sm:$0xf0] }
 0x7f4   :  { %v11586_v34 = vadd.f32 %v11585_v2, %v11573_v44  ;;  %v19529_v31 = vld [vmem:[#allocation8 + $0xcec] sm:$0xf]  ;;  %v17960_v46 = vld [vmem:[#allocation8 + $0xef8] sm:$0xf0]  ;;  %v17339_v22 = vor.u32 %v19437_v40, %v17336_v1 }
 0x7f5   :  { %11850 = vmatpush.bf16.msra.mxu3 %v17563_v14  ;;  %11825 = vmatpush.bf16.msra.mxu1 %v17291_v18  ;;  %v17371_v14 = vor.u32 %v19445_v47, %v17368_v33  ;;  %v17352_v18 = vld [vmem:[#allocation8 + $0xa38] sm:$0xf0]  ;;  %v19561_v16 = vld [vmem:[#allocation8 + $0xdec] sm:$0xf] }
 0x7f6   :  { %v20258_v54 = vadd.f32 %v11598_v41, %v11586_v34  ;;  %v17355_v5 = vor.u32 %v19441_v38, %v17352_v18  ;;  %v19593_v45 = vld [vmem:[#allocation8 + $0xeec] sm:$0xf]  ;;  %v17816_v47 = vld [vmem:[#allocation8 + $0xdd8] sm:$0xf0] }
 0x7f7   :  { %11838 = vmatpush.bf16.msra.mxu2 %v17419_v37  ;;  %11813 = vmatpush.bf16.msra.mxu0 %v17147_v30  ;;  %v19473_v37 = vld [vmem:[#allocation8 + $0xb2c] sm:$0xf]  ;;  %v17963_v62 = vor.u32 %v19593_v45, %v17960_v46  ;;  %v17944_v34 = vld [vmem:[#allocation8 + $0xed8] sm:$0xf0] }
 0x7f8   :  { %v17483_v29 = vor.u32 %v19473_v37, %v17480_v23  ;;  %v19469_v30 = vld [vmem:[#allocation8 + $0xb0c] sm:$0xf]  ;;  %v18072_v21 = vld [vmem:[#allocation8 + $0xfd8] sm:$0xf0] }
 0x7f9   :  { %11851 = vmatpush.bf16.msra.mxu3 %v17547_v56  ;;  %11826 = vmatpush.bf16.msra.mxu1 %v17275_v63  ;;  %v17080_v56 = vld [vmem:[#allocation8 + $0x818] sm:$0xf0]  ;;  %v11587_v28 = vpop.f32.mrf.mxu2  ;;  %v19625_v52 = vld [vmem:[#allocation8 + $0xfec] sm:$0xf] }
 0x7fa   :  { %v17464_v63 = vld [vmem:[#allocation8 + $0xb18] sm:$0xf0]  ;;  %v17083_v44 = vor.u32 %v19373_v26, %v17080_v56  ;;  %v19525_v0 = vld [vmem:[#allocation8 + $0xccc] sm:$0xf] }
 0x7fb   :  { %11839 = vmatpush.bf16.msra.mxu2 %v17403_v36  ;;  %11814 = vmatpush.bf16.msra.mxu0 %v17131_v9  ;;  %v11600_v36 = vpop.f32.mrf.mxu3  ;;  %v18088_v9 = vld [vmem:[#allocation8 + $0xff8] sm:$0xf0]  ;;  %v19557_v2 = vld [vmem:[#allocation8 + $0xdcc] sm:$0xf] }
 0x7fc   :  { %v18091_v50 = vor.u32 %v19625_v52, %v18088_v9  ;;  %v19589_v33 = vld [vmem:[#allocation8 + $0xecc] sm:$0xf]  ;;  %v17819_v8 = vor.u32 %v19557_v2, %v17816_v47  ;;  %v17800_v11 = vld [vmem:[#allocation8 + $0xdb8] sm:$0xf0] }
 0x7fd   :  { %11852 = vmatpush.bf16.msra.mxu3 %v17531_v39  ;;  %11827 = vmatpush.bf16.msra.mxu1 %v17259_v7  ;;  %v17832_v39 = vld [vmem:[#allocation8 + $0xdf8] sm:$0xf0]  ;;  %v17467_v7 = vor.u32 %v19469_v30, %v17464_v63  ;;  %v19621_v41 = vld [vmem:[#allocation8 + $0xfcc] sm:$0xf]  ;;  %v17947_v6 = vor.u32 %v19589_v33, %v17944_v34 }
 0x7fe   :  { %v17835_v51 = vor.u32 %v19561_v16, %v17832_v39  ;;  %v18075_v4 = vor.u32 %v19621_v41, %v18072_v21  ;;  %v19585_v61 = vld [vmem:[#allocation8 + $0xeac] sm:$0xf]  ;;  %v18056_v38 = vld [vmem:[#allocation8 + $0xfb8] sm:$0xf0] }
 0x7ff   :  { %11840 = vmatpush.bf16.msra.mxu2 %v17387_v53  ;;  %11815 = vmatpush.bf16.msra.mxu0 %v17115_v24  ;;  %v17707_v53 = vor.u32 %v19529_v31, %v17704_v43  ;;  %v19521_v24 = vld [vmem:[#allocation8 + $0xcac] sm:$0xf]  ;;  %v18040_v27 = vld [vmem:[#allocation8 + $0xf98] sm:$0xf0] }
 0x800   :  { %v19617_v17 = vld [vmem:[#allocation8 + $0xfac] sm:$0xf]  ;;  %v17640_v63 = vld [vmem:[#allocation8 + $0xc78] sm:$0xf0] }
 0x801   :  { %11853 = vmatpush.bf16.msra.mxu3 %v17515_v15  ;;  %11828 = vmatpush.bf16.msra.mxu1 %v17243_v32  ;;  %v17688_v15 = vld [vmem:[#allocation8 + $0xcd8] sm:$0xf0]  ;;  %v19549_v26 = vld [vmem:[#allocation8 + $0xd8c] sm:$0xf]  ;;  %v18059_v56 = vor.u32 %v19617_v17, %v18056_v38 }
 0x802   :  { %v17691_v55 = vor.u32 %v19525_v0, %v17688_v15  ;;  %v17672_v32 = vld [vmem:[#allocation8 + $0xcb8] sm:$0xf0]  ;;  %v19513_v30 = vld [vmem:[#allocation8 + $0xc6c] sm:$0xf] }
 0x803   :  { %11841 = vmatpush.bf16.msra.mxu2 %v17371_v14  ;;  %11816 = vmatpush.bf16.msra.mxu0 %v17099_v57  ;;  %v19553_v14 = vld [vmem:[#allocation8 + $0xdac] sm:$0xf]  ;;  %v17675_v18 = vor.u32 %v19521_v24, %v17672_v32  ;;  %v17768_v16 = vld [vmem:[#allocation8 + $0xd78] sm:$0xf0] }
 0x804   :  { %v17803_v37 = vor.u32 %v19553_v14, %v17800_v11  ;;  %v19517_v57 = vld [vmem:[#allocation8 + $0xc8c] sm:$0xf]  ;;  %v17896_v39 = vld [vmem:[#allocation8 + $0xe78] sm:$0xf0] }
 0x805   :  { %11854 = vmatpush.bf16.msra.mxu3 %v17499_v10  ;;  %11829 = vmatpush.bf16.msra.mxu1 %v17227_v49  ;;  %v17928_v10 = vld [vmem:[#allocation8 + $0xeb8] sm:$0xf0]  ;;  %v19545_v36 = vld [vmem:[#allocation8 + $0xd6c] sm:$0xf] }
 0x806   :  { %v17931_v23 = vor.u32 %v19585_v61, %v17928_v10  ;;  %v17784_v49 = vld [vmem:[#allocation8 + $0xd98] sm:$0xf0]  ;;  %v19609_v45 = vld [vmem:[#allocation8 + $0xf6c] sm:$0xf] }
 0x807   :  { %11842 = vmatpush.bf16.msra.mxu2 %v17355_v5  ;;  %11817 = vmatpush.bf16.msra.mxu0 %v17083_v44  ;;  %v19581_v5 = vld [vmem:[#allocation8 + $0xe8c] sm:$0xf]  ;;  %v11611_v20 = vpop.f32.mrf.mxu0  ;;  %v17787_v28 = vor.u32 %v19549_v26, %v17784_v49  ;;  %v18024_v46 = vld [vmem:[#allocation8 + $0xf78] sm:$0xf0] }
 0x808   :  { %v19577_v44 = vld [vmem:[#allocation8 + $0xe6c] sm:$0xf]  ;;  %v17624_v9 = vld [vmem:[#allocation8 + $0xc58] sm:$0xf0] }
 0x809   :  { %11855 = vmatpush.bf16.msra.mxu3 %v17483_v29  ;;  %11830 = vmatpush.bf16.msra.mxu1 %v17211_v59  ;;  %v11624_v40 = vpop.f32.mrf.mxu1  ;;  %v17643_v59 = vor.u32 %v19513_v30, %v17640_v63  ;;  %v19509_v52 = vld [vmem:[#allocation8 + $0xc4c] sm:$0xf]  ;;  %v17880_v15 = vld [vmem:[#allocation8 + $0xe58] sm:$0xf0] }
 0x80a   :  { %11818 = vmatmul.bf16.vlgmr.msra.gmra.mxu0 %v20141_v19  ;;  %v17656_v19 = vld [vmem:[#allocation8 + $0xc98] sm:$0xf0]  ;;  %v19573_v0 = vld [vmem:[#allocation8 + $0xe4c] sm:$0xf]  ;;  %v17627_v21 = vor.u32 %v19509_v52, %v17624_v9 }
 0x80b   :  { %11843 = vmatpush.bf16.msra.mxu2 %v17339_v22  ;;  %11862 = vmatpush.bf16.msrb.mxu0 %v17707_v53  ;;  %v17659_v29 = vor.u32 %v19517_v57, %v17656_v19  ;;  %v17899_v22 = vor.u32 %v19577_v44, %v17896_v39  ;;  %v18027_v53 = vor.u32 %v19609_v45, %v18024_v46  ;;  %v19605_v33 = vld [vmem:[#allocation8 + $0xf4c] sm:$0xf]  ;;  %v18008_v34 = vld [vmem:[#allocation8 + $0xf58] sm:$0xf0] }
 0x80c   :  { %11831 = vmatmul.bf16.vlgmr.msra.gmra.mxu1 %v20143_v35  ;;  %v17912_v35 = vld [vmem:[#allocation8 + $0xe98] sm:$0xf0]  ;;  %v19505_v24 = vld [vmem:[#allocation8 + $0xc2c] sm:$0xf] }
 0x80d   :  { %11856 = vmatpush.bf16.msra.mxu3 %v17467_v7  ;;  %11875 = vmatpush.bf16.msrb.mxu1 %v17835_v51  ;;  %v17915_v1 = vor.u32 %v19581_v5, %v17912_v35  ;;  %v19541_v7 = vld [vmem:[#allocation8 + $0xd4c] sm:$0xf]  ;;  %v17608_v32 = vld [vmem:[#allocation8 + $0xc38] sm:$0xf0] }
 0x80e   :  { %11844 = vmatmul.bf16.vlgmr.msra.gmra.mxu2 %v20145_v58  ;;  %v19613_v58 = vld [vmem:[#allocation8 + $0xf8c] sm:$0xf]  ;;  %v17736_v11 = vld [vmem:[#allocation8 + $0xd38] sm:$0xf0] }
 0x80f   :  { %11888 = vmatpush.bf16.msrb.mxu2 %v17963_v62  ;;  %11863 = vmatpush.bf16.msrb.mxu0 %v17691_v55  ;;  %v18043_v43 = vor.u32 %v19613_v58, %v18040_v27  ;;  %v17752_v62 = vld [vmem:[#allocation8 + $0xd58] sm:$0xf0]  ;;  %v11613_v47 = vpop.f32.mrf.mxu0  ;;  %v19537_v14 = vld [vmem:[#allocation8 + $0xd2c] sm:$0xf] }
 0x810   :  { %11857 = vmatmul.bf16.vlgmr.msra.gmra.mxu3 %v20147_v60  ;;  %v11612_v60 = vadd.f32 %v11611_v20, %v20258_v54  ;;  %v17771_v54 = vor.u32 %v19545_v36, %v17768_v16  ;;  %v19569_v61 = vld [vmem:[#allocation8 + $0xe2c] sm:$0xf]  ;;  %v17864_v10 = vld [vmem:[#allocation8 + $0xe38] sm:$0xf0] }
 0x811   :  { %11901 = vmatpush.bf16.msrb.mxu3 %v18091_v50  ;;  %11876 = vmatpush.bf16.msrb.mxu1 %v17819_v8  ;;  %v11637_v51 = vpop.f32.mrf.mxu2  ;;  %v11626_v41 = vpop.f32.mrf.mxu1  ;;  %v17755_v8 = vor.u32 %v19541_v7, %v17752_v62  ;;  %v19601_v17 = vld [vmem:[#allocation8 + $0xf2c] sm:$0xf]  ;;  %v17992_v38 = vld [vmem:[#allocation8 + $0xf38] sm:$0xf0] }
 0x812   :  { %v11625_v31 = vadd.f32 %v11624_v40, %v11612_v60  ;;  %v19501_v57 = vld [vmem:[#allocation8 + $0xc0c] sm:$0xf]  ;;  %v17592_v19 = vld [vmem:[#allocation8 + $0xc18] sm:$0xf0] }
 0x813   :  { %11889 = vmatpush.bf16.msrb.mxu2 %v17947_v6  ;;  %11864 = vmatpush.bf16.msrb.mxu0 %v17675_v18  ;;  %v11650_v50 = vpop.f32.mrf.mxu3  ;;  %v17883_v6 = vor.u32 %v19573_v0, %v17880_v15  ;;  %v17611_v18 = vor.u32 %v19505_v24, %v17608_v32  ;;  %v19533_v26 = vld [vmem:[#allocation8 + $0xd0c] sm:$0xf]  ;;  %v17720_v5 = vld [vmem:[#allocation8 + $0xd18] sm:$0xf0]  ;;  %v17595_v40 = vor.u32 %v19501_v57, %v17592_v19 }
 0x814   :  { %v11638_v2 = vadd.f32 %v11637_v51, %v11625_v31  ;;  %v19565_v35 = vld [vmem:[#allocation8 + $0xe0c] sm:$0xf]  ;;  %v17848_v20 = vld [vmem:[#allocation8 + $0xe18] sm:$0xf0] }
 0x815   :  { %11902 = vmatpush.bf16.msrb.mxu3 %v18075_v4  ;;  %11877 = vmatpush.bf16.msrb.mxu1 %v17803_v37  ;;  %v18011_v4 = vor.u32 %v19605_v33, %v18008_v34  ;;  %v17739_v37 = vor.u32 %v19537_v14, %v17736_v11  ;;  %v19597_v27 = vld [vmem:[#allocation8 + $0xf0c] sm:$0xf]  ;;  %v17976_v60 = vld [vmem:[#allocation8 + $0xf18] sm:$0xf0] }
 0x816   :  { %v11651_v55 = vadd.f32 %v11650_v50, %v11638_v2 }
 0x817   :  { %11890 = vmatpush.bf16.msrb.mxu2 %v17931_v23  ;;  %11865 = vmatpush.bf16.msrb.mxu0 %v17659_v29  ;;  %v17867_v23 = vor.u32 %v19569_v61, %v17864_v10  ;;  %v17723_v29 = vor.u32 %v19533_v26, %v17720_v5 }
 0x819   :  { %11903 = vmatpush.bf16.msrb.mxu3 %v18059_v56  ;;  %11878 = vmatpush.bf16.msrb.mxu1 %v17787_v28  ;;  %v17995_v56 = vor.u32 %v19601_v17, %v17992_v38  ;;  %v11639_v49 = vpop.f32.mrf.mxu2  ;;  %v17851_v28 = vor.u32 %v19565_v35, %v17848_v20 }
 0x81b   :  { %11891 = vmatpush.bf16.msrb.mxu2 %v17915_v1  ;;  %11866 = vmatpush.bf16.msrb.mxu0 %v17643_v59  ;;  %v11652_v58 = vpop.f32.mrf.mxu3  ;;  %v17979_v1 = vor.u32 %v19597_v27, %v17976_v60 }
 0x81d   :  { %11904 = vmatpush.bf16.msrb.mxu3 %v18043_v43  ;;  %11879 = vmatpush.bf16.msrb.mxu1 %v17771_v54 }
 0x81f   :  { %11892 = vmatpush.bf16.msrb.mxu2 %v17899_v22  ;;  %11867 = vmatpush.bf16.msrb.mxu0 %v17627_v21 }
 0x821   :  { %11905 = vmatpush.bf16.msrb.mxu3 %v18027_v53  ;;  %11880 = vmatpush.bf16.msrb.mxu1 %v17755_v8 }
 0x823   :  { %11893 = vmatpush.bf16.msrb.mxu2 %v17883_v6  ;;  %11868 = vmatpush.bf16.msrb.mxu0 %v17611_v18 }
 0x825   :  { %11906 = vmatpush.bf16.msrb.mxu3 %v18011_v4  ;;  %11881 = vmatpush.bf16.msrb.mxu1 %v17739_v37 }
 0x827   :  { %11894 = vmatpush.bf16.msrb.mxu2 %v17867_v23  ;;  %11869 = vmatpush.bf16.msrb.mxu0 %v17595_v40  ;;  %v11663_v30 = vpop.f32.mrf.mxu0 }
 0x828   :  { %v11664_v63 = vadd.f32 %v11663_v30, %v11651_v55 }
 0x829   :  { %11907 = vmatpush.bf16.msrb.mxu3 %v17995_v56  ;;  %11882 = vmatpush.bf16.msrb.mxu1 %v17723_v29  ;;  %v11676_v36 = vpop.f32.mrf.mxu1 }
 0x82a   :  { %11870 = vmatmul.bf16.vlgmr.msrb.gmra.mxu0 %v20171_v48  ;;  %v11677_v31 = vadd.f32 %v11676_v36, %v11664_v63  ;;  %v8517_v48 = vperm.slane %v20248_v25, 3 }
 0x82b   :  { %11895 = vmatpush.bf16.msrb.mxu2 %v17851_v28 }
 0x82c   :  { %11883 = vmatmul.bf16.vlgmr.msrb.gmra.mxu1 %v20173_v12 }
 0x82d   :  { %11908 = vmatpush.bf16.msrb.mxu3 %v17979_v1 }
 0x82e   :  { %11896 = vmatmul.bf16.vlgmr.msrb.gmra.mxu2 %v20175_v13 }
 0x82f   :  { %v11665_v39 = vpop.f32.mrf.mxu0 }
 0x830   :  { %11909 = vmatmul.bf16.vlgmr.msrb.gmra.mxu3 %v20182_v3 }
 0x831   :  { %v11689_v43 = vpop.f32.mrf.mxu2  ;;  %v11678_v45 = vpop.f32.mrf.mxu1 }
 0x832   :  { %v11690_v16 = vadd.f32 %v11689_v43, %v11677_v31 }
 0x833   :  { %v11702_v44 = vpop.f32.mrf.mxu3 }
 0x834   :  { %v11703_v46 = vadd.f32 %v11702_v44, %v11690_v16 }
 0x836   :  { %v11919_v40 = vrot.slane %v11703_v46, 4 }
 0x839   :  { %v11691_v59 = vpop.f32.mrf.mxu2 }
 0x83b   :  { %v11704_v54 = vpop.f32.mrf.mxu3 }
 0x847   :  { %v11715_v22 = vpop.f32.mrf.mxu0 }
 0x848   :  { %v11716_v12 = vadd.f32 %v11715_v22, %v8517_v48 }
 0x849   :  { %v11728_v52 = vpop.f32.mrf.mxu1 }
 0x84a   :  { %v11729_v13 = vadd.f32 %v11728_v52, %v11716_v12 }
 0x84f   :  { %v11717_v53 = vpop.f32.mrf.mxu0 }
 0x851   :  { %v11741_v9 = vpop.f32.mrf.mxu2  ;;  %v11730_v51 = vpop.f32.mrf.mxu1 }
 0x852   :  { %v11742_v3 = vadd.f32 %v11741_v9, %v11729_v13 }
 0x853   :  { %v11754_v7 = vpop.f32.mrf.mxu3 }
 0x854   :  { %v11755_v62 = vadd.f32 %v11754_v7, %v11742_v3 }
 0x859   :  { %v11743_v0 = vpop.f32.mrf.mxu2 }
 0x85b   :  { %v11756_v15 = vpop.f32.mrf.mxu3 }
 0x867   :  { %v11767_v2 = vpop.f32.mrf.mxu0 }
 0x868   :  { %v11768_v6 = vadd.f32 %v11767_v2, %v11755_v62 }
 0x869   :  { %v11780_v50 = vpop.f32.mrf.mxu1 }
 0x86a   :  { %v11781_v11 = vadd.f32 %v11780_v50, %v11768_v6 }
 0x86f   :  { %v11769_v34 = vpop.f32.mrf.mxu0 }
 0x871   :  { %v11793_v47 = vpop.f32.mrf.mxu2  ;;  %v11782_v41 = vpop.f32.mrf.mxu1 }
 0x872   :  { %v11794_v61 = vadd.f32 %v11793_v47, %v11781_v11 }
 0x873   :  { %v11806_v33 = vpop.f32.mrf.mxu3 }
 0x874   :  { %v11807_v38 = vadd.f32 %v11806_v33, %v11794_v61 }
 0x879   :  { %v11795_v21 = vpop.f32.mrf.mxu2 }
 0x87b   :  { %v11808_v25 = vpop.f32.mrf.mxu3 }
 0x887   :  { %v11819_v55 = vpop.f32.mrf.mxu0 }
 0x888   :  { %v11820_v18 = vadd.f32 %v11819_v55, %v11807_v38 }
 0x889   :  { %v11832_v8 = vpop.f32.mrf.mxu1 }
 0x88a   :  { %v11833_v37 = vadd.f32 %v11832_v8, %v11820_v18 }
 0x88f   :  { %v11821_v14 = vpop.f32.mrf.mxu0 }
 0x891   :  { %v11845_v24 = vpop.f32.mrf.mxu2  ;;  %v11834_v4 = vpop.f32.mrf.mxu1 }
 0x892   :  { %v11846_v23 = vadd.f32 %v11845_v24, %v11833_v37 }
 0x893   :  { %v11858_v32 = vpop.f32.mrf.mxu3 }
 0x894   :  { %v11859_v57 = vadd.f32 %v11858_v32, %v11846_v23 }
 0x899   :  { %v11847_v10 = vpop.f32.mrf.mxu2 }
 0x89b   :  { %v11860_v17 = vpop.f32.mrf.mxu3 }
 0x8a7   :  { %v11871_v19 = vpop.f32.mrf.mxu0 }
 0x8a8   :  { %v11872_v56 = vadd.f32 %v11871_v19, %v11859_v57 }
 0x8a9   :  { %v11884_v26 = vpop.f32.mrf.mxu1 }
 0x8aa   :  { %v11885_v49 = vadd.f32 %v11884_v26, %v11872_v56 }
 0x8af   :  { %v11873_v58 = vpop.f32.mrf.mxu0 }
 0x8b1   :  { %v11897_v5 = vpop.f32.mrf.mxu2  ;;  %v11886_v27 = vpop.f32.mrf.mxu1 }
 0x8b2   :  { %v11898_v35 = vadd.f32 %v11897_v5, %v11885_v49 }
 0x8b3   :  { %v11910_v20 = vpop.f32.mrf.mxu3 }
 0x8b4   :  { %v11911_v60 = vadd.f32 %v11910_v20, %v11898_v35 }
 0x8b6   :  { %v11920_v29 = vrot.slane %v11911_v60, 2 }
 0x8b8   :  { %v11924_v28 = vsel %vm11923_vm1, %v11919_v40, %v11920_v29 }
 0x8b9   :  { %v11899_v1 = vpop.f32.mrf.mxu2  ;;  %v11926_v30 = vsel %vm11925_vm2, %v20242_v42, %v11924_v28 }
 0x8ba   :  { %11928 = vst [vmem:[#allocation11] sm:$0xff] %v11926_v30 }
 0x8bb   :  { %v11912_v63 = vpop.f32.mrf.mxu3  ;;  %11939 = dma.vmem_to_hbm [thread:$0]  %s11935_s4, 128, %s11937_s21, [#allocation4]  }
 0x8bc   :  { %19796 = dma.done.wait [#allocation4], 128  }
 0x8bd   :  { %19797 = vsyncadd [#allocation4], 4294967168 }
 0x8be   :  { %11944 = vsyncpa [#allocation3], 1 }
 0x8bf   :  { %11945 = vsyncpa [#allocation6], 1 }
 0x8c0   :  { %11946 = vsyncpa [#allocation9], 1 }
 0x8c1   :  { %11947 = vsyncpa [#allocation4], 1 }

</bundles_post_ra>
